<compile_context>
chip_gen: v6e
topology: v6e:2x2x1
jax: 0.10.0
libtpu: 0.0.40
codegen_flags: <defaults>
</compile_context>

<pallas_src>
import functools

import jax
import jax.numpy as jnp
import numpy as np
from jax.experimental import pallas as pl
from jax.experimental.pallas import tpu as pltpu


def double_conv1_kernel(xp_ref, rhs_ref, g_ref, be_ref, w4bd_ref, b4_ref,
                        out_ref, p_scr, *, N, D, H, W, Cout, KC, combos):
    """Whole-problem kernel (everything resident in VMEM).

    xp_ref   : (N, D+4, H+4, KC)      bf16  padded input, (W_pad*Cin) fused minor
    rhs_ref  : (18*KC, W*3*Cout)      bf16  banded/block-diag conv1|2|3 weights
    g_ref    : (1, 3*Cout)            f32   BN gamma  (conv1|conv2|conv3 order)
    be_ref   : (1, 3*Cout)            f32   BN beta
    w4bd_ref : (W*3*Cout, W*Cout)     bf16  per-w block-diagonal 1x1x1 conv weight
    b4_ref   : (1, Cout)              f32
    out_ref  : (N*D*H, W*Cout)        f32
    p_scr    : (N*D*H, 18*KC)         bf16  staged LHS of the fused conv matmul
    """
    C3 = 3 * Cout
    M3 = N * D * H
    inv_m = 1.0 / (M3 * W)
    eps = 1e-5

    # ---- stage the 18 (kd, kh, dilation) input slabs into the K scratch ------
    # Each slab is the full lane-dense minor (KC = 128 lanes) of a (D, H)
    # window of the padded input; the destination lane offset is a multiple of
    # KC (=128), so every store is a full, unmasked tile write.
    for c, (d0, h0) in enumerate(combos):
        slab = xp_ref[:, d0:d0 + D, h0:h0 + H, :]            # (N, D, H, KC) bf16
        p_scr[:, c * KC:(c + 1) * KC] = slab.reshape(M3, KC)

    # ---- conv1 | conv2 | conv3 as ONE banded / block-diagonal MXU matmul -----
    y = jnp.dot(p_scr[...], rhs_ref[...],
                preferred_element_type=jnp.float32)           # (M3, W*C3) f32

    # ---- lane-packed BatchNorm (training-mode batch stats) + ReLU ------------
    # y columns are ordered (w, channel); per-channel statistics need a W-way
    # fold across the lane dimension. Two-pass mean/variance for robustness.
    def fold_w(row):                                          # (1, W*C3) -> (1, C3)
        acc = row[:, 0:C3]
        for w in range(1, W):
            acc = acc + row[:, w * C3:(w + 1) * C3]
        return acc

    mean = fold_w(jnp.sum(y, axis=0, keepdims=True)) * inv_m            # (1, C3)
    yc = y - jnp.tile(mean, (1, W))                                      # (M3, W*C3)
    var = fold_w(jnp.sum(yc * yc, axis=0, keepdims=True)) * inv_m        # (1, C3)
    scale = g_ref[...] * jax.lax.rsqrt(var + eps)                        # (1, C3)
    r = jnp.maximum(
        yc * jnp.tile(scale, (1, W)) + jnp.tile(be_ref[...], (1, W)), 0.0)

    # ---- conv4 (1x1x1) as one per-w block-diagonal matmul --------------------
    out = jnp.dot(r.astype(jnp.bfloat16), w4bd_ref[...],
                  preferred_element_type=jnp.float32)                    # (M3, W*Cout)
    # Kept f32 for semantic parity with the PyTorch module; emit bf16 here if
    # the downstream consumer tolerates it (halves output traffic).
    out_ref[...] = out + jnp.tile(b4_ref[...], (1, W))


def _taps(w):
    """(Cout, Cin, 3, 3, 3) -> (kd, kh, kw, cin, cout)."""
    return jnp.transpose(w, (2, 3, 4, 1, 0))


@jax.jit
def double_conv_1(x_ncdhw, params):
    """Forward of DoubleConv_1 (x2=None). Input/output are NCDHW like PyTorch."""
    x = jnp.transpose(x_ncdhw, (0, 2, 3, 4, 1)).astype(jnp.float32)   # -> NDHWC
    N, D, H, W, Cin = x.shape
    Cout = params["w4"].shape[0]
    C3 = 3 * Cout

    # ---- input: pad spatially by 2 and fold (W_pad, Cin) into a lane-dense
    # minor dim, zero-padding the W axis so the minor is a multiple of 128.
    if 128 % Cin == 0:
        KC = max(128, ((W + 4) * Cin + 127) // 128 * 128)
        WP = KC // Cin
    else:  # TODO(synk): lane-unaligned minor when Cin does not divide 128
        WP = W + 4
        KC = WP * Cin
    xp = jnp.pad(x, ((0, 0), (2, 2), (2, 2), (2, WP - (W + 2)), (0, 0)))
    xp = xp.reshape(N, D + 4, H + 4, KC).astype(jnp.bfloat16)
    # TODO(synk): at production sizes, drop this wrapper-side jnp.pad and express
    # the 2-voxel halo via overlapping BlockSpec index_map blocks.

    # ---- fused conv1|conv2|conv3 weight: banded over the W window (Toeplitz),
    # block-diagonal over the three convs' output channels.
    taps12 = jnp.concatenate([_taps(params["w1"]), _taps(params["w2"])], axis=-1)
    taps3 = _taps(params["w3"])
    taps12p = jnp.concatenate(
        [taps12, jnp.zeros(taps12.shape[:-1] + (Cout,), jnp.float32)], axis=-1)
    taps3p = jnp.concatenate(
        [jnp.zeros(taps3.shape[:-1] + (2 * Cout,), jnp.float32), taps3], axis=-1)

    # Selection tensors: S[kw, w_in, w_out] = 1 iff tap kw maps output column
    # w_out to padded-input column w_in (pad=1/dil=1 and pad=2/dil=2 patterns).
    s1 = np.zeros((3, WP, W), np.float32)
    s2 = np.zeros((3, WP, W), np.float32)
    for kw in range(3):
        for wo in range(W):
            s1[kw, wo + kw + 1, wo] = 1.0
            s2[kw, wo + 2 * kw, wo] = 1.0

    def toeplitz(sel, taps):  # -> (9, KC, W*C3), block index = kd*3 + kh
        t = jnp.einsum("kpw,dekco->depcwo", jnp.asarray(sel), taps)
        return t.reshape(9, KC, W * C3)

    rhs = jnp.concatenate([toeplitz(s1, taps12p), toeplitz(s2, taps3p)], axis=0)
    rhs = rhs.reshape(18 * KC, W * C3).astype(jnp.bfloat16)

    # ---- conv4 weight as a per-w block-diagonal matrix (one matmul, no concat).
    w4_t = jnp.transpose(params["w4"][:, :, 0, 0, 0], (1, 0))          # (3C, C)
    w4bd = jnp.einsum("wv,co->wcvo", jnp.eye(W, dtype=jnp.float32), w4_t)
    w4bd = w4bd.reshape(W * C3, W * Cout).astype(jnp.bfloat16)

    row = lambda v: v.reshape(1, -1).astype(jnp.float32)
    g_all = jnp.concatenate([params["g1"], params["g2"], params["g3"]]).reshape(1, C3)
    be_all = jnp.concatenate([params["be1"], params["be2"], params["be3"]]).reshape(1, C3)
    # Note: conv biases b1/b2/b3 are intentionally dropped (cancel under BN).

    # Slab (kd, kh) offsets: first 9 = pad1/dil1 combos, next 9 = pad2/dil2,
    # matching the row-block order of `rhs`.
    combos = tuple((kd + 1, kh + 1) for kd in range(3) for kh in range(3)) + \
             tuple((2 * kd, 2 * kh) for kd in range(3) for kh in range(3))

    M3 = N * D * H
    vmem = pl.BlockSpec(memory_space=pltpu.MemorySpace.VMEM)
    kernel = functools.partial(double_conv1_kernel, N=N, D=D, H=H, W=W,
                               Cout=Cout, KC=KC, combos=combos)

    out_slab = pl.pallas_call(
        kernel,
        out_shape=jax.ShapeDtypeStruct((M3, W * Cout), jnp.float32),
        in_specs=[vmem] * 6,
        out_specs=vmem,
        scratch_shapes=[pltpu.VMEM((M3, 18 * KC), jnp.bfloat16)],
        # Resident footprint (incl. tiling padding) is ~2 MB, far under the
        # default scoped VMEM limit on v5e/v6e/v7x, so no vmem_limit override.
    )(xp, rhs, g_all.astype(jnp.float32), be_all.astype(jnp.float32),
      w4bd, row(params["b4"]))

    out = out_slab.reshape(N, D, H, W, Cout)
    return jnp.transpose(out, (0, 4, 1, 2, 3))  # back to NCDHW


# ----------------------------- pure-JAX reference ----------------------------
def ref_double_conv_1(x, p):
    def cbr(x, w, b, g, be, pad, dil):
        y = jax.lax.conv_general_dilated(
            x, w, window_strides=(1, 1, 1), padding=[(pad, pad)] * 3,
            rhs_dilation=(dil, dil, dil),
            dimension_numbers=("NCDHW", "OIDHW", "NCDHW"))
        y = y + b[None, :, None, None, None]
        mean = jnp.mean(y, axis=(0, 2, 3, 4), keepdims=True)
        var = jnp.mean((y - mean) ** 2, axis=(0, 2, 3, 4), keepdims=True)
        yn = (y - mean) / jnp.sqrt(var + 1e-5)
        yn = yn * g[None, :, None, None, None] + be[None, :, None, None, None]
        return jnp.maximum(yn, 0.0)

    y1 = cbr(x, p["w1"], p["b1"], p["g1"], p["be1"], 1, 1)
    y2 = cbr(x, p["w2"], p["b2"], p["g2"], p["be2"], 1, 1)
    y3 = cbr(x, p["w3"], p["b3"], p["g3"], p["be3"], 2, 2)
    cat = jnp.concatenate([y1, y2, y3], axis=1)
    out = jax.lax.conv_general_dilated(
        cat, p["w4"], window_strides=(1, 1, 1), padding=[(0, 0)] * 3,
        dimension_numbers=("NCDHW", "OIDHW", "NCDHW"))
    return out + p["b4"][None, :, None, None, None]


# --------------------------------- main --------------------------------------
if __name__ == "__main__":
    N, Cin, Cout, D, H, W = 2, 4, 8, 8, 8, 8

    key = jax.random.PRNGKey(0)
    ks = jax.random.split(key, 16)

    def nrm(k, shape, std=0.1):
        return (std * jax.random.normal(k, shape)).astype(jnp.float32)

    params = {
        "w1": nrm(ks[0], (Cout, Cin, 3, 3, 3)), "b1": nrm(ks[1], (Cout,)),
        "g1": jnp.ones((Cout,), jnp.float32),   "be1": jnp.zeros((Cout,), jnp.float32),
        "w2": nrm(ks[2], (Cout, Cin, 3, 3, 3)), "b2": nrm(ks[3], (Cout,)),
        "g2": jnp.ones((Cout,), jnp.float32),   "be2": jnp.zeros((Cout,), jnp.float32),
        "w3": nrm(ks[4], (Cout, Cin, 3, 3, 3)), "b3": nrm(ks[5], (Cout,)),
        "g3": jnp.ones((Cout,), jnp.float32),   "be3": jnp.zeros((Cout,), jnp.float32),
        "w4": nrm(ks[6], (Cout, 3 * Cout, 1, 1, 1)), "b4": nrm(ks[7], (Cout,)),
    }

    x = jax.random.normal(ks[8], (N, Cin, D, H, W), jnp.float32)  # NCDHW like PyTorch

    out = double_conv_1(x, params)
    out = jax.block_until_ready(out)

    ref = jax.block_until_ready(ref_double_conv_1(x, params))
    assert out.shape == (N, Cout, D, H, W), out.shape
    np.testing.assert_allclose(np.asarray(out), np.asarray(ref), rtol=2e-2, atol=2e-2)

    print("KERNEL_OK")
</pallas_src>

<mosaic_0001>
module attributes {stable_mosaic.version = 11 : i64} {
  func.func @double_conv1_kernel(%arg0: memref<2x12x12x128xbf16, #tpu.memory_space<vmem>>, %arg1: memref<2304x192xbf16, #tpu.memory_space<vmem>>, %arg2: memref<1x24xf32, #tpu.memory_space<vmem>>, %arg3: memref<1x24xf32, #tpu.memory_space<vmem>>, %arg4: memref<192x64xbf16, #tpu.memory_space<vmem>>, %arg5: memref<1x8xf32, #tpu.memory_space<vmem>>, %arg6: memref<128x64xf32, #tpu.memory_space<vmem>>, %arg7: memref<128x2304xbf16, #tpu.memory_space<vmem>>) attributes {dimension_semantics = [], scalar_prefetch = 0 : i64, scratch_operands = 1 : i64, tpu.core_type = #tpu.core_type<tc>} {
    %c0 = arith.constant 0 : index
    %c1 = arith.constant 1 : index
    %c1_0 = arith.constant 1 : index
    %c0_1 = arith.constant 0 : index
    %0 = vector.load %arg0[%c0, %c1, %c1_0, %c0_1] : memref<2x12x12x128xbf16, #tpu.memory_space<vmem>>, vector<2x8x8x128xbf16>
    %1 = vector.shape_cast %0 : vector<2x8x8x128xbf16> to vector<128x128xbf16>
    %c0_2 = arith.constant 0 : index
    %c0_3 = arith.constant 0 : index
    %2 = vector.load %arg7[%c0_2, %c0_3] : memref<128x2304xbf16, #tpu.memory_space<vmem>>, vector<128x128xbf16>
    tpu.vector_store %arg7[%c0_2, %c0_3], %1 {strides = array<i32>} : memref<128x2304xbf16, #tpu.memory_space<vmem>>, vector<128x128xbf16>,
    %c0_4 = arith.constant 0 : index
    %c1_5 = arith.constant 1 : index
    %c2 = arith.constant 2 : index
    %c0_6 = arith.constant 0 : index
    %3 = vector.load %arg0[%c0_4, %c1_5, %c2, %c0_6] : memref<2x12x12x128xbf16, #tpu.memory_space<vmem>>, vector<2x8x8x128xbf16>
    %4 = vector.shape_cast %3 : vector<2x8x8x128xbf16> to vector<128x128xbf16>
    %c0_7 = arith.constant 0 : index
    %c128 = arith.constant 128 : index
    %5 = vector.load %arg7[%c0_7, %c128] : memref<128x2304xbf16, #tpu.memory_space<vmem>>, vector<128x128xbf16>
    tpu.vector_store %arg7[%c0_7, %c128], %4 {strides = array<i32>} : memref<128x2304xbf16, #tpu.memory_space<vmem>>, vector<128x128xbf16>,
    %c0_8 = arith.constant 0 : index
    %c1_9 = arith.constant 1 : index
    %c3 = arith.constant 3 : index
    %c0_10 = arith.constant 0 : index
    %6 = vector.load %arg0[%c0_8, %c1_9, %c3, %c0_10] : memref<2x12x12x128xbf16, #tpu.memory_space<vmem>>, vector<2x8x8x128xbf16>
    %7 = vector.shape_cast %6 : vector<2x8x8x128xbf16> to vector<128x128xbf16>
    %c0_11 = arith.constant 0 : index
    %c256 = arith.constant 256 : index
    %8 = vector.load %arg7[%c0_11, %c256] : memref<128x2304xbf16, #tpu.memory_space<vmem>>, vector<128x128xbf16>
    tpu.vector_store %arg7[%c0_11, %c256], %7 {strides = array<i32>} : memref<128x2304xbf16, #tpu.memory_space<vmem>>, vector<128x128xbf16>,
    %c0_12 = arith.constant 0 : index
    %c2_13 = arith.constant 2 : index
    %c1_14 = arith.constant 1 : index
    %c0_15 = arith.constant 0 : index
    %9 = vector.load %arg0[%c0_12, %c2_13, %c1_14, %c0_15] : memref<2x12x12x128xbf16, #tpu.memory_space<vmem>>, vector<2x8x8x128xbf16>
    %10 = vector.shape_cast %9 : vector<2x8x8x128xbf16> to vector<128x128xbf16>
    %c0_16 = arith.constant 0 : index
    %c384 = arith.constant 384 : index
    %11 = vector.load %arg7[%c0_16, %c384] : memref<128x2304xbf16, #tpu.memory_space<vmem>>, vector<128x128xbf16>
    tpu.vector_store %arg7[%c0_16, %c384], %10 {strides = array<i32>} : memref<128x2304xbf16, #tpu.memory_space<vmem>>, vector<128x128xbf16>,
    %c0_17 = arith.constant 0 : index
    %c2_18 = arith.constant 2 : index
    %c2_19 = arith.constant 2 : index
    %c0_20 = arith.constant 0 : index
    %12 = vector.load %arg0[%c0_17, %c2_18, %c2_19, %c0_20] : memref<2x12x12x128xbf16, #tpu.memory_space<vmem>>, vector<2x8x8x128xbf16>
    %13 = vector.shape_cast %12 : vector<2x8x8x128xbf16> to vector<128x128xbf16>
    %c0_21 = arith.constant 0 : index
    %c512 = arith.constant 512 : index
    %14 = vector.load %arg7[%c0_21, %c512] : memref<128x2304xbf16, #tpu.memory_space<vmem>>, vector<128x128xbf16>
    tpu.vector_store %arg7[%c0_21, %c512], %13 {strides = array<i32>} : memref<128x2304xbf16, #tpu.memory_space<vmem>>, vector<128x128xbf16>,
    %c0_22 = arith.constant 0 : index
    %c2_23 = arith.constant 2 : index
    %c3_24 = arith.constant 3 : index
    %c0_25 = arith.constant 0 : index
    %15 = vector.load %arg0[%c0_22, %c2_23, %c3_24, %c0_25] : memref<2x12x12x128xbf16, #tpu.memory_space<vmem>>, vector<2x8x8x128xbf16>
    %16 = vector.shape_cast %15 : vector<2x8x8x128xbf16> to vector<128x128xbf16>
    %c0_26 = arith.constant 0 : index
    %c640 = arith.constant 640 : index
    %17 = vector.load %arg7[%c0_26, %c640] : memref<128x2304xbf16, #tpu.memory_space<vmem>>, vector<128x128xbf16>
    tpu.vector_store %arg7[%c0_26, %c640], %16 {strides = array<i32>} : memref<128x2304xbf16, #tpu.memory_space<vmem>>, vector<128x128xbf16>,
    %c0_27 = arith.constant 0 : index
    %c3_28 = arith.constant 3 : index
    %c1_29 = arith.constant 1 : index
    %c0_30 = arith.constant 0 : index
    %18 = vector.load %arg0[%c0_27, %c3_28, %c1_29, %c0_30] : memref<2x12x12x128xbf16, #tpu.memory_space<vmem>>, vector<2x8x8x128xbf16>
    %19 = vector.shape_cast %18 : vector<2x8x8x128xbf16> to vector<128x128xbf16>
    %c0_31 = arith.constant 0 : index
    %c768 = arith.constant 768 : index
    %20 = vector.load %arg7[%c0_31, %c768] : memref<128x2304xbf16, #tpu.memory_space<vmem>>, vector<128x128xbf16>
    tpu.vector_store %arg7[%c0_31, %c768], %19 {strides = array<i32>} : memref<128x2304xbf16, #tpu.memory_space<vmem>>, vector<128x128xbf16>,
    %c0_32 = arith.constant 0 : index
    %c3_33 = arith.constant 3 : index
    %c2_34 = arith.constant 2 : index
    %c0_35 = arith.constant 0 : index
    %21 = vector.load %arg0[%c0_32, %c3_33, %c2_34, %c0_35] : memref<2x12x12x128xbf16, #tpu.memory_space<vmem>>, vector<2x8x8x128xbf16>
    %22 = vector.shape_cast %21 : vector<2x8x8x128xbf16> to vector<128x128xbf16>
    %c0_36 = arith.constant 0 : index
    %c896 = arith.constant 896 : index
    %23 = vector.load %arg7[%c0_36, %c896] : memref<128x2304xbf16, #tpu.memory_space<vmem>>, vector<128x128xbf16>
    tpu.vector_store %arg7[%c0_36, %c896], %22 {strides = array<i32>} : memref<128x2304xbf16, #tpu.memory_space<vmem>>, vector<128x128xbf16>,
    %c0_37 = arith.constant 0 : index
    %c3_38 = arith.constant 3 : index
    %c3_39 = arith.constant 3 : index
    %c0_40 = arith.constant 0 : index
    %24 = vector.load %arg0[%c0_37, %c3_38, %c3_39, %c0_40] : memref<2x12x12x128xbf16, #tpu.memory_space<vmem>>, vector<2x8x8x128xbf16>
    %25 = vector.shape_cast %24 : vector<2x8x8x128xbf16> to vector<128x128xbf16>
    %c0_41 = arith.constant 0 : index
    %c1024 = arith.constant 1024 : index
    %26 = vector.load %arg7[%c0_41, %c1024] : memref<128x2304xbf16, #tpu.memory_space<vmem>>, vector<128x128xbf16>
    tpu.vector_store %arg7[%c0_41, %c1024], %25 {strides = array<i32>} : memref<128x2304xbf16, #tpu.memory_space<vmem>>, vector<128x128xbf16>,
    %c0_42 = arith.constant 0 : index
    %c0_43 = arith.constant 0 : index
    %c0_44 = arith.constant 0 : index
    %c0_45 = arith.constant 0 : index
    %27 = vector.load %arg0[%c0_42, %c0_43, %c0_44, %c0_45] : memref<2x12x12x128xbf16, #tpu.memory_space<vmem>>, vector<2x8x8x128xbf16>
    %28 = vector.shape_cast %27 : vector<2x8x8x128xbf16> to vector<128x128xbf16>
    %c0_46 = arith.constant 0 : index
    %c1152 = arith.constant 1152 : index
    %29 = vector.load %arg7[%c0_46, %c1152] : memref<128x2304xbf16, #tpu.memory_space<vmem>>, vector<128x128xbf16>
    tpu.vector_store %arg7[%c0_46, %c1152], %28 {strides = array<i32>} : memref<128x2304xbf16, #tpu.memory_space<vmem>>, vector<128x128xbf16>,
    %c0_47 = arith.constant 0 : index
    %c0_48 = arith.constant 0 : index
    %c2_49 = arith.constant 2 : index
    %c0_50 = arith.constant 0 : index
    %30 = vector.load %arg0[%c0_47, %c0_48, %c2_49, %c0_50] : memref<2x12x12x128xbf16, #tpu.memory_space<vmem>>, vector<2x8x8x128xbf16>
    %31 = vector.shape_cast %30 : vector<2x8x8x128xbf16> to vector<128x128xbf16>
    %c0_51 = arith.constant 0 : index
    %c1280 = arith.constant 1280 : index
    %32 = vector.load %arg7[%c0_51, %c1280] : memref<128x2304xbf16, #tpu.memory_space<vmem>>, vector<128x128xbf16>
    tpu.vector_store %arg7[%c0_51, %c1280], %31 {strides = array<i32>} : memref<128x2304xbf16, #tpu.memory_space<vmem>>, vector<128x128xbf16>,
    %c0_52 = arith.constant 0 : index
    %c0_53 = arith.constant 0 : index
    %c4 = arith.constant 4 : index
    %c0_54 = arith.constant 0 : index
    %33 = vector.load %arg0[%c0_52, %c0_53, %c4, %c0_54] : memref<2x12x12x128xbf16, #tpu.memory_space<vmem>>, vector<2x8x8x128xbf16>
    %34 = vector.shape_cast %33 : vector<2x8x8x128xbf16> to vector<128x128xbf16>
    %c0_55 = arith.constant 0 : index
    %c1408 = arith.constant 1408 : index
    %35 = vector.load %arg7[%c0_55, %c1408] : memref<128x2304xbf16, #tpu.memory_space<vmem>>, vector<128x128xbf16>
    tpu.vector_store %arg7[%c0_55, %c1408], %34 {strides = array<i32>} : memref<128x2304xbf16, #tpu.memory_space<vmem>>, vector<128x128xbf16>,
    %c0_56 = arith.constant 0 : index
    %c2_57 = arith.constant 2 : index
    %c0_58 = arith.constant 0 : index
    %c0_59 = arith.constant 0 : index
    %36 = vector.load %arg0[%c0_56, %c2_57, %c0_58, %c0_59] : memref<2x12x12x128xbf16, #tpu.memory_space<vmem>>, vector<2x8x8x128xbf16>
    %37 = vector.shape_cast %36 : vector<2x8x8x128xbf16> to vector<128x128xbf16>
    %c0_60 = arith.constant 0 : index
    %c1536 = arith.constant 1536 : index
    %38 = vector.load %arg7[%c0_60, %c1536] : memref<128x2304xbf16, #tpu.memory_space<vmem>>, vector<128x128xbf16>
    tpu.vector_store %arg7[%c0_60, %c1536], %37 {strides = array<i32>} : memref<128x2304xbf16, #tpu.memory_space<vmem>>, vector<128x128xbf16>,
    %c0_61 = arith.constant 0 : index
    %c2_62 = arith.constant 2 : index
    %c2_63 = arith.constant 2 : index
    %c0_64 = arith.constant 0 : index
    %39 = vector.load %arg0[%c0_61, %c2_62, %c2_63, %c0_64] : memref<2x12x12x128xbf16, #tpu.memory_space<vmem>>, vector<2x8x8x128xbf16>
    %40 = vector.shape_cast %39 : vector<2x8x8x128xbf16> to vector<128x128xbf16>
    %c0_65 = arith.constant 0 : index
    %c1664 = arith.constant 1664 : index
    %41 = vector.load %arg7[%c0_65, %c1664] : memref<128x2304xbf16, #tpu.memory_space<vmem>>, vector<128x128xbf16>
    tpu.vector_store %arg7[%c0_65, %c1664], %40 {strides = array<i32>} : memref<128x2304xbf16, #tpu.memory_space<vmem>>, vector<128x128xbf16>,
    %c0_66 = arith.constant 0 : index
    %c2_67 = arith.constant 2 : index
    %c4_68 = arith.constant 4 : index
    %c0_69 = arith.constant 0 : index
    %42 = vector.load %arg0[%c0_66, %c2_67, %c4_68, %c0_69] : memref<2x12x12x128xbf16, #tpu.memory_space<vmem>>, vector<2x8x8x128xbf16>
    %43 = vector.shape_cast %42 : vector<2x8x8x128xbf16> to vector<128x128xbf16>
    %c0_70 = arith.constant 0 : index
    %c1792 = arith.constant 1792 : index
    %44 = vector.load %arg7[%c0_70, %c1792] : memref<128x2304xbf16, #tpu.memory_space<vmem>>, vector<128x128xbf16>
    tpu.vector_store %arg7[%c0_70, %c1792], %43 {strides = array<i32>} : memref<128x2304xbf16, #tpu.memory_space<vmem>>, vector<128x128xbf16>,
    %c0_71 = arith.constant 0 : index
    %c4_72 = arith.constant 4 : index
    %c0_73 = arith.constant 0 : index
    %c0_74 = arith.constant 0 : index
    %45 = vector.load %arg0[%c0_71, %c4_72, %c0_73, %c0_74] : memref<2x12x12x128xbf16, #tpu.memory_space<vmem>>, vector<2x8x8x128xbf16>
    %46 = vector.shape_cast %45 : vector<2x8x8x128xbf16> to vector<128x128xbf16>
    %c0_75 = arith.constant 0 : index
    %c1920 = arith.constant 1920 : index
    %47 = vector.load %arg7[%c0_75, %c1920] : memref<128x2304xbf16, #tpu.memory_space<vmem>>, vector<128x128xbf16>
    tpu.vector_store %arg7[%c0_75, %c1920], %46 {strides = array<i32>} : memref<128x2304xbf16, #tpu.memory_space<vmem>>, vector<128x128xbf16>,
    %c0_76 = arith.constant 0 : index
    %c4_77 = arith.constant 4 : index
    %c2_78 = arith.constant 2 : index
    %c0_79 = arith.constant 0 : index
    %48 = vector.load %arg0[%c0_76, %c4_77, %c2_78, %c0_79] : memref<2x12x12x128xbf16, #tpu.memory_space<vmem>>, vector<2x8x8x128xbf16>
    %49 = vector.shape_cast %48 : vector<2x8x8x128xbf16> to vector<128x128xbf16>
    %c0_80 = arith.constant 0 : index
    %c2048 = arith.constant 2048 : index
    %50 = vector.load %arg7[%c0_80, %c2048] : memref<128x2304xbf16, #tpu.memory_space<vmem>>, vector<128x128xbf16>
    tpu.vector_store %arg7[%c0_80, %c2048], %49 {strides = array<i32>} : memref<128x2304xbf16, #tpu.memory_space<vmem>>, vector<128x128xbf16>,
    %c0_81 = arith.constant 0 : index
    %c4_82 = arith.constant 4 : index
    %c4_83 = arith.constant 4 : index
    %c0_84 = arith.constant 0 : index
    %51 = vector.load %arg0[%c0_81, %c4_82, %c4_83, %c0_84] : memref<2x12x12x128xbf16, #tpu.memory_space<vmem>>, vector<2x8x8x128xbf16>
    %52 = vector.shape_cast %51 : vector<2x8x8x128xbf16> to vector<128x128xbf16>
    %c0_85 = arith.constant 0 : index
    %c2176 = arith.constant 2176 : index
    %53 = vector.load %arg7[%c0_85, %c2176] : memref<128x2304xbf16, #tpu.memory_space<vmem>>, vector<128x128xbf16>
    tpu.vector_store %arg7[%c0_85, %c2176], %52 {strides = array<i32>} : memref<128x2304xbf16, #tpu.memory_space<vmem>>, vector<128x128xbf16>,
    %c0_86 = arith.constant 0 : index
    %c0_87 = arith.constant 0 : index
    %54 = vector.load %arg7[%c0_86, %c0_87] : memref<128x2304xbf16, #tpu.memory_space<vmem>>, vector<128x2304xbf16>
    %c0_88 = arith.constant 0 : index
    %c0_89 = arith.constant 0 : index
    %55 = vector.load %arg1[%c0_88, %c0_89] : memref<2304x192xbf16, #tpu.memory_space<vmem>>, vector<2304x192xbf16>
    %cst = arith.constant dense<0.000000e+00> : vector<128x192xf32>
    %56 = tpu.matmul %54, %55, %cst {dimension_numbers = #tpu.dot_dimension_numbers<[1], [0], [0], [1], [0, 0, 1, 1], [], []>} : vector<128x2304xbf16>, vector<2304x192xbf16>, vector<128x192xf32> -> vector<128x192xf32>
    %cst_90 = arith.constant dense<0.000000e+00> : vector<192xf32>
    %57 = vector.multi_reduction <add>, %56, %cst_90 [0] : vector<128x192xf32> to vector<192xf32>
    %58 = vector.shape_cast %57 : vector<192xf32> to vector<1x192xf32>
    %59 = vector.extract_strided_slice %58 {offsets = [0, 0], sizes = [1, 24], strides = [1, 1]} : vector<1x192xf32> to vector<1x24xf32>
    %60 = vector.extract_strided_slice %58 {offsets = [0, 24], sizes = [1, 24], strides = [1, 1]} : vector<1x192xf32> to vector<1x24xf32>
    %61 = arith.addf %59, %60 : vector<1x24xf32>
    %62 = vector.extract_strided_slice %58 {offsets = [0, 48], sizes = [1, 24], strides = [1, 1]} : vector<1x192xf32> to vector<1x24xf32>
    %63 = arith.addf %61, %62 : vector<1x24xf32>
    %64 = vector.extract_strided_slice %58 {offsets = [0, 72], sizes = [1, 24], strides = [1, 1]} : vector<1x192xf32> to vector<1x24xf32>
    %65 = arith.addf %63, %64 : vector<1x24xf32>
    %66 = vector.extract_strided_slice %58 {offsets = [0, 96], sizes = [1, 24], strides = [1, 1]} : vector<1x192xf32> to vector<1x24xf32>
    %67 = arith.addf %65, %66 : vector<1x24xf32>
    %68 = vector.extract_strided_slice %58 {offsets = [0, 120], sizes = [1, 24], strides = [1, 1]} : vector<1x192xf32> to vector<1x24xf32>
    %69 = arith.addf %67, %68 : vector<1x24xf32>
    %70 = vector.extract_strided_slice %58 {offsets = [0, 144], sizes = [1, 24], strides = [1, 1]} : vector<1x192xf32> to vector<1x24xf32>
    %71 = arith.addf %69, %70 : vector<1x24xf32>
    %72 = vector.extract_strided_slice %58 {offsets = [0, 168], sizes = [1, 24], strides = [1, 1]} : vector<1x192xf32> to vector<1x24xf32>
    %73 = arith.addf %71, %72 : vector<1x24xf32>
    %cst_91 = arith.constant 9.765625E-4 : f32
    %74 = vector.broadcast %cst_91 : f32 to vector<1x24xf32>
    %75 = arith.mulf %73, %74 : vector<1x24xf32>
    %76 = tpu.concatenate %75, %75, %75, %75, %75, %75, %75, %75 in 1 : vector<1x24xf32>, vector<1x24xf32>, vector<1x24xf32>, vector<1x24xf32>, vector<1x24xf32>, vector<1x24xf32>, vector<1x24xf32>, vector<1x24xf32> -> vector<1x192xf32>
    %77 = vector.broadcast %76 : vector<1x192xf32> to vector<128x192xf32>
    %78 = arith.subf %56, %77 : vector<128x192xf32>
    %79 = arith.mulf %78, %78 : vector<128x192xf32>
    %cst_92 = arith.constant dense<0.000000e+00> : vector<192xf32>
    %80 = vector.multi_reduction <add>, %79, %cst_92 [0] : vector<128x192xf32> to vector<192xf32>
    %81 = vector.shape_cast %80 : vector<192xf32> to vector<1x192xf32>
    %82 = vector.extract_strided_slice %81 {offsets = [0, 0], sizes = [1, 24], strides = [1, 1]} : vector<1x192xf32> to vector<1x24xf32>
    %83 = vector.extract_strided_slice %81 {offsets = [0, 24], sizes = [1, 24], strides = [1, 1]} : vector<1x192xf32> to vector<1x24xf32>
    %84 = arith.addf %82, %83 : vector<1x24xf32>
    %85 = vector.extract_strided_slice %81 {offsets = [0, 48], sizes = [1, 24], strides = [1, 1]} : vector<1x192xf32> to vector<1x24xf32>
    %86 = arith.addf %84, %85 : vector<1x24xf32>
    %87 = vector.extract_strided_slice %81 {offsets = [0, 72], sizes = [1, 24], strides = [1, 1]} : vector<1x192xf32> to vector<1x24xf32>
    %88 = arith.addf %86, %87 : vector<1x24xf32>
    %89 = vector.extract_strided_slice %81 {offsets = [0, 96], sizes = [1, 24], strides = [1, 1]} : vector<1x192xf32> to vector<1x24xf32>
    %90 = arith.addf %88, %89 : vector<1x24xf32>
    %91 = vector.extract_strided_slice %81 {offsets = [0, 120], sizes = [1, 24], strides = [1, 1]} : vector<1x192xf32> to vector<1x24xf32>
    %92 = arith.addf %90, %91 : vector<1x24xf32>
    %93 = vector.extract_strided_slice %81 {offsets = [0, 144], sizes = [1, 24], strides = [1, 1]} : vector<1x192xf32> to vector<1x24xf32>
    %94 = arith.addf %92, %93 : vector<1x24xf32>
    %95 = vector.extract_strided_slice %81 {offsets = [0, 168], sizes = [1, 24], strides = [1, 1]} : vector<1x192xf32> to vector<1x24xf32>
    %96 = arith.addf %94, %95 : vector<1x24xf32>
    %cst_93 = arith.constant 9.765625E-4 : f32
    %97 = vector.broadcast %cst_93 : f32 to vector<1x24xf32>
    %98 = arith.mulf %96, %97 : vector<1x24xf32>
    %c0_94 = arith.constant 0 : index
    %c0_95 = arith.constant 0 : index
    %99 = vector.load %arg2[%c0_94, %c0_95] : memref<1x24xf32, #tpu.memory_space<vmem>>, vector<1x24xf32>
    %cst_96 = arith.constant 9.99999974E-6 : f32
    %100 = vector.broadcast %cst_96 : f32 to vector<1x24xf32>
    %101 = arith.addf %98, %100 : vector<1x24xf32>
    %102 = math.rsqrt %101 : vector<1x24xf32>
    %103 = arith.mulf %99, %102 : vector<1x24xf32>
    %104 = tpu.concatenate %103, %103, %103, %103, %103, %103, %103, %103 in 1 : vector<1x24xf32>, vector<1x24xf32>, vector<1x24xf32>, vector<1x24xf32>, vector<1x24xf32>, vector<1x24xf32>, vector<1x24xf32>, vector<1x24xf32> -> vector<1x192xf32>
    %105 = vector.broadcast %104 : vector<1x192xf32> to vector<128x192xf32>
    %106 = arith.mulf %78, %105 : vector<128x192xf32>
    %c0_97 = arith.constant 0 : index
    %c0_98 = arith.constant 0 : index
    %107 = vector.load %arg3[%c0_97, %c0_98] : memref<1x24xf32, #tpu.memory_space<vmem>>, vector<1x24xf32>
    %108 = tpu.concatenate %107, %107, %107, %107, %107, %107, %107, %107 in 1 : vector<1x24xf32>, vector<1x24xf32>, vector<1x24xf32>, vector<1x24xf32>, vector<1x24xf32>, vector<1x24xf32>, vector<1x24xf32>, vector<1x24xf32> -> vector<1x192xf32>
    %109 = vector.broadcast %108 : vector<1x192xf32> to vector<128x192xf32>
    %110 = arith.addf %106, %109 : vector<128x192xf32>
    %cst_99 = arith.constant 0.000000e+00 : f32
    %111 = vector.broadcast %cst_99 : f32 to vector<128x192xf32>
    %112 = arith.maximumf %110, %111 : vector<128x192xf32>
    %113 = arith.truncf %112 : vector<128x192xf32> to vector<128x192xbf16>
    %c0_100 = arith.constant 0 : index
    %c0_101 = arith.constant 0 : index
    %114 = vector.load %arg4[%c0_100, %c0_101] : memref<192x64xbf16, #tpu.memory_space<vmem>>, vector<192x64xbf16>
    %cst_102 = arith.constant dense<0.000000e+00> : vector<128x64xf32>
    %115 = tpu.matmul %113, %114, %cst_102 {dimension_numbers = #tpu.dot_dimension_numbers<[1], [0], [0], [1], [0, 0, 1, 1], [], []>} : vector<128x192xbf16>, vector<192x64xbf16>, vector<128x64xf32> -> vector<128x64xf32>
    %c0_103 = arith.constant 0 : index
    %c0_104 = arith.constant 0 : index
    %116 = vector.load %arg5[%c0_103, %c0_104] : memref<1x8xf32, #tpu.memory_space<vmem>>, vector<1x8xf32>
    %117 = tpu.concatenate %116, %116, %116, %116, %116, %116, %116, %116 in 1 : vector<1x8xf32>, vector<1x8xf32>, vector<1x8xf32>, vector<1x8xf32>, vector<1x8xf32>, vector<1x8xf32>, vector<1x8xf32>, vector<1x8xf32> -> vector<1x64xf32>
    %118 = vector.broadcast %117 : vector<1x64xf32> to vector<128x64xf32>
    %119 = arith.addf %115, %118 : vector<128x64xf32>
    %c0_105 = arith.constant 0 : index
    %c0_106 = arith.constant 0 : index
    %120 = vector.load %arg6[%c0_105, %c0_106] : memref<128x64xf32, #tpu.memory_space<vmem>>, vector<128x64xf32>
    tpu.vector_store %arg6[%c0_105, %c0_106], %119 {strides = array<i32>} : memref<128x64xf32, #tpu.memory_space<vmem>>, vector<128x64xf32>,
    return
  }
}

</mosaic_0001>

<bundles_post_ra>
// kernel: double_conv_1.1
= control target key start
LH: loop header
LB: loop body
LE: loop exit
PB: predicated region body
PF: predicated region fallthrough
CT: control target
= control target key end

     0   :  { %vm57_vm0 = vsmask.f32 3328  ;;  %vm58_vm1 = vsmask.f32 7440  ;;  %vm380_vm2 = vcmask 1042432   ;;  %vm381_vm3 = vcmask 1046532   ;;  %s13778_s1 = inlined_call_operand.vmem [shape: bf16[2304,192], index: 1, kind: input, shape index: {}]   ;;  %s13779_s0 = inlined_call_operand.vmem [shape: bf16[2,12,12,128], index: 0, kind: input, shape index: {}]   ;;  %s13780_s3 = inlined_call_operand.vmem [shape: f32[1,24], index: 3, kind: input, shape index: {}]   ;;  %s13781_s4 = inlined_call_operand.vmem [shape: bf16[192,64], index: 4, kind: input, shape index: {}]   ;;  %s13782_s2 = inlined_call_operand.vmem [shape: f32[1,24], index: 2, kind: input, shape index: {}]   ;;  %s13783_s5 = inlined_call_operand.vmem [shape: f32[1,8], index: 5, kind: input, shape index: {}]   ;;  %s13784_s6 = inlined_call_operand.vmem [shape: f32[128,64], index: 6, kind: output, shape index: {}]  }
   0x1   :  { %v8934_v0 = vld [vmem:[%s13778_s1 + $0x74] ss:$8 sps:$4 sm:$0xff]   ;;  %v8938_v2 = vld [vmem:[%s13778_s1 + $0x70] ss:$8 sps:$4 sm:$0xff]   ;;  %v8940_v4 = vld [vmem:[%s13778_s1 + $0x64] ss:$8 sps:$4 sm:$0xff]  }
   0x2   :  { %v8936_v1 = vld [vmem:[%s13778_s1 + $0x174] ss:$8 sps:$4 sm:$0xff]   ;;  %6088 = vmatprep.subr.bf16.mxu0 %v8934_v0  ;;  %v8939_v3 = vld [vmem:[%s13778_s1 + $0x170] ss:$8 sps:$4 sm:$0xff]   ;;  %v8942_v5 = vld [vmem:[%s13778_s1 + $0x164] ss:$8 sps:$4 sm:$0xff]  }
   0x3   :  { %6201 = vmatprep.subr.bf16.mxu1 %v8936_v1  ;;  %6089 = vmatpush1.bf16.msra.mxu0 %v8938_v2  ;;  %v8944_v6 = vld [vmem:[%s13778_s1 + $0x60] ss:$8 sps:$4 sm:$0xff]   ;;  %v8946_v8 = vld [vmem:[%s13778_s1 + $0x54] ss:$8 sps:$4 sm:$0xff]   ;;  %v8950_v10 = vld [vmem:[%s13778_s1 + $0x50] ss:$8 sps:$4 sm:$0xff]  }
   0x4   :  { %6202 = vmatpush1.bf16.msra.mxu1 %v8939_v3  ;;  %6090 = vmatprep.subr.bf16.mxu0 %v8940_v4  ;;  %v8945_v7 = vld [vmem:[%s13778_s1 + $0x160] ss:$8 sps:$4 sm:$0xff]   ;;  %v8948_v9 = vld [vmem:[%s13778_s1 + $0x154] ss:$8 sps:$4 sm:$0xff]   ;;  %v8951_v11 = vld [vmem:[%s13778_s1 + $0x150] ss:$8 sps:$4 sm:$0xff]  }
   0x5   :  { %6203 = vmatprep.subr.bf16.mxu1 %v8942_v5  ;;  %v8952_v12 = vld [vmem:[%s13778_s1 + $0x44] ss:$8 sps:$4 sm:$0xff]   ;;  %v8956_v14 = vld [vmem:[%s13778_s1 + $0x40] ss:$8 sps:$4 sm:$0xff]   ;;  %v8958_v16 = vld [vmem:[%s13778_s1 + $0x34] ss:$8 sps:$4 sm:$0xff]  }
   0x6   :  { %v8954_v13 = vld [vmem:[%s13778_s1 + $0x144] ss:$8 sps:$4 sm:$0xff]   ;;  %v8957_v15 = vld [vmem:[%s13778_s1 + $0x140] ss:$8 sps:$4 sm:$0xff]   ;;  %v8960_v17 = vld [vmem:[%s13778_s1 + $0x134] ss:$8 sps:$4 sm:$0xff]  }
   0x7   :  { %6091 = vmatpush1.bf16.msra.mxu0 %v8944_v6  ;;  %v8962_v18 = vld [vmem:[%s13778_s1 + $0x30] ss:$8 sps:$4 sm:$0xff]   ;;  %v8964_v20 = vld [vmem:[%s13778_s1 + $0x24] ss:$8 sps:$4 sm:$0xff]   ;;  %v8968_v22 = vld [vmem:[%s13778_s1 + $0x20] ss:$8 sps:$4 sm:$0xff]  }
   0x8   :  { %6204 = vmatpush1.bf16.msra.mxu1 %v8945_v7  ;;  %6092 = vmatprep.subr.bf16.mxu0 %v8946_v8  ;;  %v8963_v19 = vld [vmem:[%s13778_s1 + $0x130] ss:$8 sps:$4 sm:$0xff]   ;;  %v8966_v21 = vld [vmem:[%s13778_s1 + $0x124] ss:$8 sps:$4 sm:$0xff]   ;;  %v8969_v23 = vld [vmem:[%s13778_s1 + $0x120] ss:$8 sps:$4 sm:$0xff]  }
   0x9   :  { %6205 = vmatprep.subr.bf16.mxu1 %v8948_v9  ;;  %v8970_v24 = vld [vmem:[%s13778_s1 + $0x14] ss:$8 sps:$4 sm:$0xff]   ;;  %v8974_v26 = vld [vmem:[%s13778_s1 + $0x10] ss:$8 sps:$4 sm:$0xff]   ;;  %v8976_v28 = vld [vmem:[%s13778_s1 + $0x4] ss:$8 sps:$4 sm:$0xff]  }
   0xa   :  { %v8972_v25 = vld [vmem:[%s13778_s1 + $0x114] ss:$8 sps:$4 sm:$0xff]   ;;  %v8975_v27 = vld [vmem:[%s13778_s1 + $0x110] ss:$8 sps:$4 sm:$0xff]   ;;  %v8978_v29 = vld [vmem:[%s13778_s1 + $0x104] ss:$8 sps:$4 sm:$0xff]  }
   0xb   :  { %6093 = vmatpush1.bf16.msra.mxu0 %v8950_v10  ;;  %v8980_v30 = vld [vmem:[%s13778_s1] ss:$8 sps:$4 sm:$0xff]   ;;  %v8982_v32 = vld [vmem:[%s13778_s1 + $0xf4] ss:$8 sps:$4 sm:$0xff]   ;;  %v8986_v34 = vld [vmem:[%s13778_s1 + $0xf0] ss:$8 sps:$4 sm:$0xff]  }
   0xc   :  { %6206 = vmatpush1.bf16.msra.mxu1 %v8951_v11  ;;  %6094 = vmatprep.subr.bf16.mxu0 %v8952_v12  ;;  %v8981_v31 = vld [vmem:[%s13778_s1 + $0x100] ss:$8 sps:$4 sm:$0xff]   ;;  %v8984_v33 = vld [vmem:[%s13778_s1 + $0x1f4] ss:$8 sps:$4 sm:$0xff]   ;;  %v8987_v35 = vld [vmem:[%s13778_s1 + $0x1f0] ss:$8 sps:$4 sm:$0xff]  }
   0xd   :  { %6207 = vmatprep.subr.bf16.mxu1 %v8954_v13  ;;  %v8988_v36 = vld [vmem:[%s13778_s1 + $0xe4] ss:$8 sps:$4 sm:$0xff]   ;;  %v8992_v38 = vld [vmem:[%s13778_s1 + $0xe0] ss:$8 sps:$4 sm:$0xff]   ;;  %v8994_v40 = vld [vmem:[%s13778_s1 + $0xd4] ss:$8 sps:$4 sm:$0xff]  }
   0xe   :  { %v8990_v37 = vld [vmem:[%s13778_s1 + $0x1e4] ss:$8 sps:$4 sm:$0xff]   ;;  %v8993_v39 = vld [vmem:[%s13778_s1 + $0x1e0] ss:$8 sps:$4 sm:$0xff]   ;;  %v8996_v41 = vld [vmem:[%s13778_s1 + $0x1d4] ss:$8 sps:$4 sm:$0xff]  }
   0xf   :  { %6095 = vmatpush1.bf16.msra.mxu0 %v8956_v14  ;;  %v8998_v42 = vld [vmem:[%s13778_s1 + $0xd0] ss:$8 sps:$4 sm:$0xff]   ;;  %v9000_v44 = vld [vmem:[%s13778_s1 + $0xc4] ss:$8 sps:$4 sm:$0xff]   ;;  %v9004_v46 = vld [vmem:[%s13778_s1 + $0xc0] ss:$8 sps:$4 sm:$0xff]  }
  0x10   :  { %6208 = vmatpush1.bf16.msra.mxu1 %v8957_v15  ;;  %6096 = vmatprep.subr.bf16.mxu0 %v8958_v16  ;;  %v8999_v43 = vld [vmem:[%s13778_s1 + $0x1d0] ss:$8 sps:$4 sm:$0xff]   ;;  %v9002_v45 = vld [vmem:[%s13778_s1 + $0x1c4] ss:$8 sps:$4 sm:$0xff]   ;;  %v9005_v47 = vld [vmem:[%s13778_s1 + $0x1c0] ss:$8 sps:$4 sm:$0xff]  }
  0x11   :  { %6209 = vmatprep.subr.bf16.mxu1 %v8960_v17  ;;  %v7875_v48 = vld [vmem:[%s13779_s0 + $0x8] sm:$0xf]  ;;  %vm511_vm4 = vsmask.f32 2304  ;;  %vm512_vm5 = vsmask.f32 6416  ;;  %vm9828_vm6 = vmor %vm380_vm2, %vm381_vm3 }
  0x12   :  { %v9006_v49 = vld [vmem:[%s13778_s1 + $0xb4] ss:$8 sps:$4 sm:$0xff]   ;;  %v7876_v51 = vld [vmem:[%s13779_s0 + $0xc] sm:$0x1]  ;;  %v7877_v52 = vld [vmem:[%s13779_s0 + $0x10] sm:$0xf] }
  0x13   :  { %6097 = vmatpush1.bf16.msra.mxu0 %v8962_v18  ;;  %v9008_v50 = vld [vmem:[%s13778_s1 + $0x1b4] ss:$8 sps:$4 sm:$0xff]   ;;  %v61_v54 = vshrl.u32 %v7875_v48, 16  ;;  %v64_v55 = vshll.u32 %v7875_v48, 16  ;;  %v70_v56 = vshll.u32 %v7876_v51, 16  ;;  %v75_v57 = vshrl.u32 %v7877_v52, 16  ;;  %vm9849_vm7 = vmor %vm57_vm0, %vm58_vm1 }
  0x14   :  { %6210 = vmatpush1.bf16.msra.mxu1 %v8963_v19  ;;  %6098 = vmatprep.subr.bf16.mxu0 %v8964_v20  ;;  %v7878_v53 = vld [vmem:[%s13779_s0 + $0x14] sm:$0x1]  ;;  %v7907_v58 = vld [vmem:[%s13779_s0 + $0x8] sm:$0xe]  ;;  %v78_v59 = vshll.u32 %v7877_v52, 16  ;;  %vm9884_vm8 = vmor %vm511_vm4, %vm512_vm5  ;;  %vm2692_vm9 = vcmask 1041408  }
  0x15   :  { %6211 = vmatprep.subr.bf16.mxu1 %v8966_v21  ;;  %v84_v60 = vshll.u32 %v7878_v53, 16  ;;  %v7908_v61 = vld [vmem:[%s13779_s0 + $0xc] sm:$0x1]  ;;  %v7909_v62 = vld [vmem:[%s13779_s0 + $0x10] sm:$0xe]  ;;  %v63_v1 = vrot.slane %v61_v54, 4 }
  0x16   :  { %v9010_v63 = vld [vmem:[%s13778_s1 + $0xb0] ss:$8 sps:$4 sm:$0xff]   ;;  %v66_v2 = vrot.slane %v64_v55, 5  ;;  %v72_v3 = vrot.slane %v70_v56, 5  ;;  %v77_v4 = vrot.slane %v75_v57, 4  ;;  %v80_v7 = vrot.slane %v78_v59, 5 }
  0x17   :  { %6099 = vmatpush1.bf16.msra.mxu0 %v8968_v22  ;;  %v9011_v0 = vld [vmem:[%s13778_s1 + $0x1b0] ss:$8 sps:$4 sm:$0xff]   ;;  %v7910_v5 = vld [vmem:[%s13779_s0 + $0x14] sm:$0x1]  ;;  %v86_v8 = vrot.slane %v84_v60, 5  ;;  %v7939_v9 = vrot.slane %v7907_v58, 9 }
  0x18   :  { %6212 = vmatpush1.bf16.msra.mxu1 %v8969_v23  ;;  %6100 = vmatprep.subr.bf16.mxu0 %v8970_v24  ;;  %v385_v10 = vrot.slane %v7908_v61, 5  ;;  %v7955_v11 = vld [vmem:[%s13779_s0 + $0x8] sm:$0xe]  ;;  %v67_v12 = vor.u32 %v66_v2, %v63_v1  ;;  %v7940_v13 = vrot.slane %v7909_v62, 9  ;;  %v389_v14 = vrot.slane %v7910_v5, 5  ;;  %s9597_s16 = smov 104  }
  0x19   :  { %6213 = vmatprep.subr.bf16.mxu1 %v8972_v25  ;;  %v7956_v15 = vld [vmem:[%s13779_s0 + $0xc] sm:$0x3]  ;;  %v7957_v16 = vld [vmem:[%s13779_s0 + $0x10] sm:$0xe]  ;;  %v81_v20 = vor.u32 %v80_v7, %v77_v4  ;;  %v515_v22 = vshrl.u32 %v7955_v11, 16  ;;  %v518_v23 = vshll.u32 %v7955_v11, 16 }
  0x1a   :  { %v9012_v17 = vld [vmem:[%s13778_s1 + $0xa4] ss:$8 sps:$4 sm:$0xff]   ;;  %v386_v21 = vsel %vm9828_vm6, %v7939_v9, %v385_v10  ;;  %v9016_v24 = vld [vmem:[%s13778_s1 + $0xa0] ss:$8 sps:$4 sm:$0xff]   ;;  %v7989_v48 = vld [vmem:[%s13779_s0 + $0x18] sm:$0xf] }
  0x1b   :  { %6101 = vmatpush1.bf16.msra.mxu0 %v8974_v26  ;;  %v9014_v18 = vld [vmem:[%s13778_s1 + $0x1a4] ss:$8 sps:$4 sm:$0xff]   ;;  %v9017_v25 = vld [vmem:[%s13778_s1 + $0x1a0] ss:$8 sps:$4 sm:$0xff]   ;;  %v68_v26 = vrot.slane %v67_v12, 4  ;;  %v885_v4 = vshll.u32 %v7989_v48, 16 }
  0x1c   :  { %6214 = vmatpush1.bf16.msra.mxu1 %v8975_v27  ;;  %6102 = vmatprep.subr.bf16.mxu0 %v8976_v28  ;;  %v390_v27 = vsel %vm9828_vm6, %v7940_v13, %v389_v14  ;;  %463 = vst [vmem:[#allocation2 + $0x4] sm:$0xf] %v386_v21  ;;  %v7958_v28 = vld [vmem:[%s13779_s0 + $0x14] sm:$0x3]  ;;  %v7990_v57 = vld [vmem:[%s13779_s0 + $0x1c] sm:$0x1] }
  0x1d   :  { %6215 = vmatprep.subr.bf16.mxu1 %v8978_v29  ;;  %v524_v29 = vshrl.u32 %v7956_v15, 16  ;;  %464 = vst [vmem:[#allocation2 + $0x4c] sm:$0xf] %v390_v27  ;;  %v545_v53 = vshll.u32 %v7958_v28, 16  ;;  %v9024_v60 = vld [vmem:[%s13778_s1 + $0x84] ss:$8 sps:$4 sm:$0xff]  }
  0x1e   :  { %v9026_v1 = vld [vmem:[%s13778_s1 + $0x184] ss:$8 sps:$4 sm:$0xff]   ;;  %v9028_v5 = vld [vmem:[%s13778_s1 + $0x80] ss:$8 sps:$4 sm:$0xff]   ;;  %v891_v11 = vshll.u32 %v7990_v57, 16  ;;  %v887_v14 = vrot.slane %v885_v4, 5 }
  0x1f   :  { %6103 = vmatpush1.bf16.msra.mxu0 %v8980_v30  ;;  %v527_v30 = vshll.u32 %v7956_v15, 16  ;;  %v547_v62 = vrot.slane %v545_v53, 6  ;;  %v9029_v7 = vld [vmem:[%s13778_s1 + $0x180] ss:$8 sps:$4 sm:$0xff]   ;;  %v9038_v15 = vld [vmem:[%s13778_s1 + $0x274] ss:$8 sps:$4 sm:$0xff]  }
  0x20   :  { %6216 = vmatpush1.bf16.msra.mxu1 %v8981_v31  ;;  %6104 = vmatprep.subr.bf16.mxu0 %v8982_v32  ;;  %v9018_v31 = vld [vmem:[%s13778_s1 + $0x94] ss:$8 sps:$4 sm:$0xff]   ;;  %v82_v32 = vrot.slane %v81_v20, 4  ;;  %v7879_v20 = vld [vmem:[%s13779_s0 + $0x18] sm:$0xf]  ;;  %vm2693_vm10 = vcmask 1045508  }
  0x21   :  { %6217 = vmatprep.subr.bf16.mxu1 %v8984_v33  ;;  %v517_v33 = vrot.slane %v515_v22, 5  ;;  %v7880_v21 = vld [vmem:[%s13779_s0 + $0x1c] sm:$0x1]  ;;  %v7881_v27 = vld [vmem:[%s13779_s0 + $0x20] sm:$0xf]  ;;  %vm11299_vm11 = vmor %vm2692_vm9, %vm2693_vm10  ;;  %vm7126_vm12 = vcmask 523264  }
  0x22   :  { %v7959_v53 = vld [vmem:[%s13779_s0 + $0x18] sm:$0xe]  ;;  %v7960_v57 = vld [vmem:[%s13779_s0 + $0x1c] sm:$0x3]  ;;  %s9598_s17 = smov 32   ;;  %s9599_s18 = smov 80  }
  0x23   :  { %6105 = vmatpush2.bf16.msra.mxu0 %v8986_v34  ;;  %v520_v34 = vrot.slane %v518_v23, 6  ;;  %s9600_s19 = smov 8   ;;  %s9601_s20 = smov 112   ;;  %vm7186_vm13 = vcmask 64512   ;;  %vm7221_vm14 = vcmask 195584   ;;  %vm7223_vm15 = vcmask 392192  }
  0x24   :  { %6218 = vmatpush2.bf16.msra.mxu1 %v8987_v35  ;;  %6106 = vmatprep.subr.bf16.mxu0 %v8988_v36  ;;  %v533_v35 = vshrl.u32 %v7957_v16, 16  ;;  %v7987_v36 = vld [vmem:[%s13779_s0 + $0x10] sm:$0xf]  ;;  %v9032_v23 = vld [vmem:[#allocation2 + $0x4] ss:$72 sps:$4 sm:$0xff]   ;;  %s9603_s21 = smov 48  }
  0x25   :  { %6219 = vmatprep.subr.bf16.mxu1 %v8990_v37  ;;  %v73_v37 = vsel %vm9849_vm7, %v68_v26, %v72_v3  ;;  %v868_v54 = vshrl.u32 %v7987_v36, 16  ;;  %v871_v58 = vshll.u32 %v7987_v36, 16  ;;  %v9036_v26 = vld [vmem:[%s13778_s1 + $0x270] ss:$8 sps:$4 sm:$0xff]   ;;  %6120 = vmatprep.mubr.bf16.mxu0 %v9032_v23  ;;  %s9604_s22 = smov 24   ;;  %s9605_s23 = smov 96  }
  0x26   :  { %300 = vst [vmem:[#allocation2] sm:$0xf] %v73_v37  ;;  %v7911_v36 = vld [vmem:[%s13779_s0 + $0x18] sm:$0xe]  ;;  %s9606_s24 = smov 72   ;;  %s9607_s25 = smov 16  }
  0x27   :  { %6107 = vmatpush2.bf16.msra.mxu0 %v8992_v38  ;;  %v526_v38 = vrot.slane %v524_v29, 5  ;;  %v873_v3 = vrot.slane %v871_v58, 5  ;;  %v89_v29 = vshrl.u32 %v7879_v20, 16  ;;  %v551_v58 = vshrl.u32 %v7959_v53, 16  ;;  %v9054_v23 = vld [vmem:[%s13778_s1 + $0x250] ss:$8 sps:$4 sm:$0xff]  }
  0x28   :  { %6220 = vmatpush2.bf16.msra.mxu1 %v8993_v39  ;;  %6108 = vmatprep.subr.bf16.mxu0 %v8994_v40  ;;  %v529_v39 = vrot.slane %v527_v30, 6  ;;  %v536_v40 = vshll.u32 %v7957_v16, 16  ;;  %v9041_v16 = vld [vmem:[%s13778_s1 + $0x374] ss:$8 sps:$4 sm:$0xff]   ;;  %v92_v30 = vshll.u32 %v7879_v20, 16  ;;  %s9608_s26 = smov 120  }
  0x29   :  { %6221 = vmatprep.subr.bf16.mxu1 %v8996_v41  ;;  %v7988_v41 = vld [vmem:[%s13779_s0 + $0x14] sm:$0x1]  ;;  %v91_v37 = vrot.slane %v89_v29, 4  ;;  %s9609_s27 = smov 40   ;;  %vm7225_vm0 = vcmask 588800   ;;  %vm7227_vm1 = vcmask 785408  }
  0x2a   :  { %v530_v51 = vor.u32 %v529_v39, %v526_v38  ;;  %v538_v52 = vrot.slane %v536_v40, 6  ;;  %v877_v59 = vshll.u32 %v7988_v41, 16  ;;  %v94_v38 = vrot.slane %v92_v30, 5  ;;  %v7912_v41 = vld [vmem:[%s13779_s0 + $0x1c] sm:$0x1] }
  0x2b   :  { %6109 = vmatpush2.bf16.msra.mxu0 %v8998_v42  ;;  %v9020_v42 = vld [vmem:[%s13778_s1 + $0x194] ss:$8 sps:$4 sm:$0xff]   ;;  %v106_v39 = vshll.u32 %v7881_v27, 16  ;;  %vm7229_vm2 = vcmask 982016   ;;  %vm7231_vm3 = vcmask 130048   ;;  %vm7233_vm4 = vcmask 326656  }
  0x2c   :  { %6222 = vmatpush2.bf16.msra.mxu1 %v8999_v43  ;;  %6110 = vmatprep.subr.bf16.mxu0 %v9000_v44  ;;  %v87_v43 = vsel %vm9849_vm7, %v82_v32, %v86_v8  ;;  %v879_v13 = vrot.slane %v877_v59, 5  ;;  %vm7652_vm5 = vcmask 261120  }
  0x2d   :  { %6223 = vmatprep.subr.bf16.mxu1 %v9002_v45  ;;  %v521_v45 = vor.u32 %v520_v34, %v517_v33  ;;  %301 = vst [vmem:[#allocation2 + $0x48] sm:$0xf] %v87_v43  ;;  %v9044_v33 = vld [vmem:[%s13778_s1 + $0x264] ss:$8 sps:$4 sm:$0xff]   ;;  %v98_v34 = vshll.u32 %v7880_v21, 16 }
  0x2f   :  { %6111 = vmatpush2.bf16.msra.mxu0 %v9004_v46  ;;  %v535_v46 = vrot.slane %v533_v35, 5  ;;  %v522_v55 = vrot.slane %v521_v45, 4  ;;  %v103_v35 = vshrl.u32 %v7881_v27, 16  ;;  %v100_v43 = vrot.slane %v98_v34, 5  ;;  %v7994_v34 = vld [vmem:[%s13779_s0 + $0x2c] sm:$0x1] }
  0x30   :  { %6224 = vmatpush2.bf16.msra.mxu1 %v9005_v47  ;;  %6112 = vmatprep.subr.bf16.mxu0 %v9006_v49  ;;  %v542_v47 = vshrl.u32 %v7958_v28, 16  ;;  %v9022_v49 = vld [vmem:[%s13778_s1 + $0x90] ss:$8 sps:$4 sm:$0xff]   ;;  %v7882_v28 = vld [vmem:[%s13779_s0 + $0x24] sm:$0x1] }
  0x31   :  { %6225 = vmatprep.subr.bf16.mxu1 %v9008_v50  ;;  %v9023_v50 = vld [vmem:[%s13778_s1 + $0x190] ss:$8 sps:$4 sm:$0xff]   ;;  %v539_v61 = vor.u32 %v538_v52, %v535_v46  ;;  %v531_v2 = vsel %vm9884_vm8, %v522_v55, %v530_v51  ;;  %v112_v40 = vshll.u32 %v7882_v28, 16  ;;  %v105_v45 = vrot.slane %v103_v35, 4  ;;  %v7913_v46 = vld [vmem:[%s13779_s0 + $0x20] sm:$0xe] }
  0x32   :  { %v544_v56 = vrot.slane %v542_v47, 5  ;;  %818 = vst [vmem:[#allocation2 + $0x8] sm:$0xf] %v531_v2  ;;  %v7914_v47 = vld [vmem:[%s13779_s0 + $0x24] sm:$0x1]  ;;  %v7941_v52 = vrot.slane %v7911_v36, 9 }
  0x33   :  { %6113 = vmatpush2.bf16.msra.mxu0 %v9010_v63  ;;  %v870_v63 = vrot.slane %v868_v54, 4  ;;  %v540_v8 = vrot.slane %v539_v61, 4  ;;  %v114_v51 = vrot.slane %v112_v40, 5  ;;  %v393_v54 = vrot.slane %v7912_v41, 5  ;;  %v7961_v61 = vld [vmem:[%s13779_s0 + $0x20] sm:$0xe] }
  0x34   :  { %6226 = vmatpush2.bf16.msra.mxu1 %v9011_v0  ;;  %6114 = vmatprep.subr.bf16.mxu0 %v9012_v17  ;;  %v882_v0 = vshrl.u32 %v7989_v48, 16  ;;  %v548_v9 = vor.u32 %v547_v62, %v544_v56  ;;  %v9030_v22 = vld [vmem:[#allocation2] ss:$72 sps:$4 sm:$0xff]   ;;  %v7942_v55 = vrot.slane %v7913_v46, 9  ;;  %v397_v56 = vrot.slane %v7914_v47, 5 }
  0x35   :  { %6227 = vmatprep.subr.bf16.mxu1 %v9014_v18  ;;  %v874_v12 = vor.u32 %v873_v3, %v870_v63  ;;  %v893_v18 = vrot.slane %v891_v11, 5  ;;  %v9042_v48 = vld [vmem:[%s13778_s1 + $0x260] ss:$8 sps:$4 sm:$0xff]   ;;  %v7962_v62 = vld [vmem:[%s13779_s0 + $0x24] sm:$0x3]  ;;  %v554_v63 = vshll.u32 %v7959_v53, 16 }
  0x36   :  { %v884_v10 = vrot.slane %v882_v0, 4  ;;  %v549_v17 = vsel %vm9884_vm8, %v540_v8, %v548_v9  ;;  %v394_v0 = vsel %vm9828_vm6, %v7941_v52, %v393_v54  ;;  %v553_v2 = vrot.slane %v551_v58, 5  ;;  %v7991_v9 = vld [vmem:[%s13779_s0 + $0x20] sm:$0xf]  ;;  %v9039_v11 = vld [vmem:[%s13778_s1 + $0x370] ss:$8 sps:$4 sm:$0xff]  }
  0x37   :  { %6115 = vmatpush2.bf16.msra.mxu0 %v9016_v24  ;;  %819 = vst [vmem:[#allocation2 + $0x50] sm:$0xf] %v549_v17  ;;  %v875_v24 = vrot.slane %v874_v12, 4  ;;  %v560_v3 = vshrl.u32 %v7960_v57, 16  ;;  %465 = vst [vmem:[#allocation2 + $0x94] sm:$0xf] %v394_v0 }
  0x38   :  { %6228 = vmatpush2.bf16.msra.mxu1 %v9017_v25  ;;  %6116 = vmatprep.subr.bf16.mxu0 %v9018_v31  ;;  %v888_v25 = vor.u32 %v887_v14, %v884_v10  ;;  %v563_v8 = vshll.u32 %v7960_v57, 16  ;;  %v7992_v10 = vld [vmem:[%s13779_s0 + $0x24] sm:$0x1]  ;;  %v572_v14 = vshll.u32 %v7961_v61, 16  ;;  %v581_v21 = vshll.u32 %v7962_v62, 16 }
  0x39   :  { %6229 = vmatprep.subr.bf16.mxu1 %v9020_v42  ;;  %v880_v31 = vsel %vm9849_vm7, %v875_v24, %v879_v13  ;;  %v562_v12 = vrot.slane %v560_v3, 5  ;;  %v569_v13 = vshrl.u32 %v7961_v61, 16  ;;  %v896_v35 = vshrl.u32 %v7991_v9, 16  ;;  %v7884_v0 = vld [vmem:[%s13779_s0 + $0x2c] sm:$0x1] }
  0x3a   :  { %v889_v32 = vrot.slane %v888_v25, 4  ;;  %1107 = vst [vmem:[#allocation2 + $0xc] sm:$0xf] %v880_v31  ;;  %v565_v20 = vrot.slane %v563_v8, 6  ;;  %v574_v29 = vrot.slane %v572_v14, 6  ;;  %v899_v36 = vshll.u32 %v7991_v9, 16 }
  0x3b   :  { %6117 = vmatpush2.bf16.msra.mxu0 %v9022_v49  ;;  %v95_v49 = vor.u32 %v94_v38, %v91_v37  ;;  %v9056_v31 = vld [vmem:[%s13778_s1 + $0x254] ss:$8 sps:$4 sm:$0xff]   ;;  %v905_v37 = vshll.u32 %v7992_v10, 16  ;;  %v898_v46 = vrot.slane %v896_v35, 4  ;;  %v919_v52 = vshll.u32 %v7994_v34, 16 }
  0x3c   :  { %6230 = vmatpush2.bf16.msra.mxu1 %v9023_v50  ;;  %6118 = vmatprep.subr.bf16.mxu0 %v9024_v60  ;;  %v894_v42 = vsel %vm9849_vm7, %v889_v32, %v893_v18  ;;  %v108_v50 = vrot.slane %v106_v39, 5  ;;  %v566_v28 = vor.u32 %v565_v20, %v562_v12  ;;  %v9045_v32 = vld [vmem:[%s13778_s1 + $0x360] ss:$8 sps:$4 sm:$0xff]   ;;  %v901_v47 = vrot.slane %v899_v36, 5  ;;  %v7916_v20 = vld [vmem:[%s13779_s0 + $0x2c] sm:$0x1] }
  0x3d   :  { %6231 = vmatprep.subr.bf16.mxu1 %v9026_v1  ;;  %1108 = vst [vmem:[#allocation2 + $0x54] sm:$0xf] %v894_v42  ;;  %v96_v59 = vrot.slane %v95_v49, 4  ;;  %v398_v1 = vsel %vm9828_vm6, %v7942_v55, %v397_v56  ;;  %v9059_v42 = vld [vmem:[%s13778_s1 + $0x354] ss:$8 sps:$4 sm:$0xff]   ;;  %v907_v54 = vrot.slane %v905_v37, 5 }
  0x3e   :  { %v109_v60 = vor.u32 %v108_v50, %v105_v45  ;;  %466 = vst [vmem:[#allocation2 + $0xdc] sm:$0xf] %v398_v1  ;;  %v9033_v24 = vld [vmem:[#allocation2 + $0x8] ss:$72 sps:$4 sm:$0xff]   ;;  %v902_v53 = vor.u32 %v901_v47, %v898_v46  ;;  %v7966_v37 = vld [vmem:[%s13779_s0 + $0x34] sm:$0x3] }
  0x3f   :  { %6119 = vmatpush2.bf16.msra.mxu0 %v9028_v5  ;;  %v101_v4 = vsel %vm9849_vm7, %v96_v59, %v100_v43  ;;  %v9060_v43 = vld [vmem:[%s13778_s1 + $0x240] ss:$8 sps:$4 sm:$0xff]   ;;  %v9057_v55 = vld [vmem:[%s13778_s1 + $0x350] ss:$8 sps:$4 sm:$0xff]  }
  0x40   :  { %6232 = vmatpush2.bf16.msra.mxu1 %v9029_v7  ;;  %6314 = vmatprep.subr.bf16.mxu0 %v9038_v15  ;;  %v110_v5 = vrot.slane %v109_v60, 4  ;;  %v556_v7 = vrot.slane %v554_v63, 6  ;;  %302 = vst [vmem:[#allocation2 + $0x90] sm:$0xf] %v101_v4  ;;  %v578_v15 = vshrl.u32 %v7962_v62, 16  ;;  %v921_v60 = vrot.slane %v919_v52, 5 }
  0x41   :  { %6427 = vmatprep.subr.bf16.mxu1 %v9041_v16  ;;  %v9047_v16 = vld [vmem:[%s13778_s1 + $0x364] ss:$8 sps:$4 sm:$0xff]   ;;  %v7883_v56 = vld [vmem:[%s13779_s0 + $0x28] sm:$0xf]  ;;  %v903_v63 = vrot.slane %v902_v53, 4 }
  0x42   :  { %6121 = vmatmul.mubr.bf16.vlgmr.msra.gmra.mxu0 %v9030_v22  ;;  %v115_v17 = vsel %vm9849_vm7, %v110_v5, %v114_v51  ;;  %v557_v18 = vor.u32 %v556_v7, %v553_v2  ;;  %v7993_v22 = vld [vmem:[%s13779_s0 + $0x28] sm:$0xf]  ;;  %v580_v30 = vrot.slane %v578_v15, 5  ;;  %v9065_v62 = vld [vmem:[%s13778_s1 + $0x344] ss:$8 sps:$4 sm:$0xff]   ;;  %v117_v2 = vshrl.u32 %v7883_v56, 16 }
  0x43   :  { %6315 = vmatpush1.bf16.msra.mxu0 %v9036_v26  ;;  %303 = vst [vmem:[#allocation2 + $0xd8] sm:$0xf] %v115_v17  ;;  %v571_v26 = vrot.slane %v569_v13, 5  ;;  %v910_v40 = vshrl.u32 %v7993_v22, 16  ;;  %v913_v41 = vshll.u32 %v7993_v22, 16  ;;  %v120_v5 = vshll.u32 %v7883_v56, 16 }
  0x44   :  { %6316 = vmatprep.subr.bf16.mxu0 %v9044_v33  ;;  %v9035_v25 = vld [vmem:[#allocation2 + $0xc] ss:$72 sps:$4 sm:$0xff]   ;;  %v558_v27 = vrot.slane %v557_v18, 4  ;;  %v583_v33 = vrot.slane %v581_v21, 6  ;;  %v7885_v1 = vld [vmem:[%s13779_s0 + $0x30] sm:$0xf]  ;;  %v908_v9 = vsel %vm9849_vm7, %v903_v63, %v907_v54 }
  0x45   :  { %6233 = vmatprep.mubr.bf16.mxu1 %v9035_v25  ;;  %v575_v39 = vor.u32 %v574_v29, %v571_v26  ;;  %v912_v50 = vrot.slane %v910_v40, 4  ;;  %v915_v51 = vrot.slane %v913_v41, 5  ;;  %v9048_v57 = vld [vmem:[#allocation2 + $0x94] ss:$72 sps:$4 sm:$0xff]   ;;  %v126_v7 = vshll.u32 %v7884_v0, 16 }
  0x46   :  { %6234 = vmatmul.mubr.bf16.vlgmr.msra.gmra.mxu1 %v9033_v24  ;;  %v567_v38 = vsel %vm9884_vm8, %v558_v27, %v566_v28  ;;  %v584_v45 = vor.u32 %v583_v33, %v580_v30  ;;  %6130 = vmatprep.mubr.bf16.mxu0 %v9048_v57  ;;  %v7886_v4 = vld [vmem:[%s13779_s0 + $0x34] sm:$0x1]  ;;  %v131_v8 = vshrl.u32 %v7885_v1, 16  ;;  %v9063_v10 = vld [vmem:[%s13778_s1 + $0x340] ss:$8 sps:$4 sm:$0xff]   ;;  %v134_v12 = vshll.u32 %v7885_v1, 16 }
  0x47   :  { %6317 = vmatpush1.bf16.msra.mxu0 %v9042_v48  ;;  %6428 = vmatpush1.bf16.msra.mxu1 %v9039_v11  ;;  %820 = vst [vmem:[#allocation2 + $0x98] sm:$0xf] %v567_v38  ;;  %v9062_v48 = vld [vmem:[%s13778_s1 + $0x244] ss:$8 sps:$4 sm:$0xff]   ;;  %v576_v49 = vrot.slane %v575_v39, 4  ;;  %v916_v59 = vor.u32 %v915_v51, %v912_v50  ;;  %v119_v11 = vrot.slane %v117_v2, 4 }
  0x48   :  { %6318 = vmatprep.subr.bf16.mxu0 %v9056_v31  ;;  %6429 = vmatprep.subr.bf16.mxu1 %v9047_v16  ;;  %v140_v13 = vshll.u32 %v7886_v4, 16  ;;  %v7915_v14 = vld [vmem:[%s13779_s0 + $0x28] sm:$0xe]  ;;  %1109 = vst [vmem:[#allocation2 + $0x9c] sm:$0xf] %v908_v9  ;;  %v122_v16 = vrot.slane %v120_v5, 5 }
  0x49   :  { %v585_v58 = vsel %vm9884_vm8, %v576_v49, %v584_v45  ;;  %v917_v3 = vrot.slane %v916_v59, 4  ;;  %v128_v17 = vrot.slane %v126_v7, 5  ;;  %v133_v18 = vrot.slane %v131_v8, 4  ;;  %v7918_v24 = vld [vmem:[%s13779_s0 + $0x34] sm:$0x1] }
  0x4a   :  { %v9052_v61 = vld [vmem:[#allocation2 + $0x90] ss:$72 sps:$4 sm:$0xff]   ;;  %821 = vst [vmem:[#allocation2 + $0xe0] sm:$0xf] %v585_v58  ;;  %v136_v21 = vrot.slane %v134_v12, 5  ;;  %v142_v22 = vrot.slane %v140_v13, 5  ;;  %v123_v25 = vor.u32 %v122_v16, %v119_v11 }
  0x4b   :  { %6319 = vmatpush1.bf16.msra.mxu0 %v9054_v23  ;;  %6430 = vmatpush1.bf16.msra.mxu1 %v9045_v32  ;;  %v922_v15 = vsel %vm9849_vm7, %v917_v3, %v921_v60  ;;  %v7917_v23 = vld [vmem:[%s13779_s0 + $0x30] sm:$0xe]  ;;  %v7943_v26 = vrot.slane %v7915_v14, 9  ;;  %v401_v27 = vrot.slane %v7916_v20, 5  ;;  %v7963_v29 = vld [vmem:[%s13779_s0 + $0x28] sm:$0xe] }
  0x4c   :  { %6320 = vmatprep.subr.bf16.mxu0 %v9062_v48  ;;  %6431 = vmatprep.subr.bf16.mxu1 %v9059_v42  ;;  %1110 = vst [vmem:[#allocation2 + $0xe4] sm:$0xf] %v922_v15  ;;  %v7944_v28 = vrot.slane %v7917_v23, 9  ;;  %v137_v30 = vor.u32 %v136_v21, %v133_v18  ;;  %v405_v31 = vrot.slane %v7918_v24, 5  ;;  %v7964_v32 = vld [vmem:[%s13779_s0 + $0x2c] sm:$0x3] }
  0x4d   :  { %6131 = vmatmul.mubr.bf16.gmra.mxu0 %v9052_v61  ;;  %v7965_v33 = vld [vmem:[%s13779_s0 + $0x30] sm:$0xe]  ;;  %v587_v34 = vshrl.u32 %v7963_v29, 16  ;;  %v124_v35 = vrot.slane %v123_v25, 4  ;;  %v402_v36 = vsel %vm9828_vm6, %v7943_v26, %v401_v27  ;;  %v590_v38 = vshll.u32 %v7963_v29, 16 }
  0x4e   :  { %v596_v39 = vshrl.u32 %v7964_v32, 16  ;;  %v138_v40 = vrot.slane %v137_v30, 4  ;;  %v406_v41 = vsel %vm9828_vm6, %v7944_v28, %v405_v31  ;;  %467 = vst [vmem:[#allocation2 + $0x124] sm:$0xf] %v402_v36  ;;  %v7995_v45 = vld [vmem:[%s13779_s0 + $0x30] sm:$0xf] }
  0x4f   :  { %6321 = vmatpush1.bf16.msra.mxu0 %v9060_v43  ;;  %6432 = vmatpush1.bf16.msra.mxu1 %v9057_v55  ;;  %v589_v42 = vrot.slane %v587_v34, 5  ;;  %v599_v43 = vshll.u32 %v7964_v32, 16  ;;  %v129_v46 = vsel %vm9849_vm7, %v124_v35, %v128_v17  ;;  %468 = vst [vmem:[#allocation2 + $0x16c] sm:$0xf] %v406_v41  ;;  %v592_v47 = vrot.slane %v590_v38, 6 }
  0x50   :  { %6433 = vmatprep.subr.bf16.mxu1 %v9065_v62  ;;  %v598_v48 = vrot.slane %v596_v39, 5  ;;  %v605_v49 = vshrl.u32 %v7965_v33, 16  ;;  %v7996_v50 = vld [vmem:[%s13779_s0 + $0x34] sm:$0x1]  ;;  %v143_v51 = vsel %vm9849_vm7, %v138_v40, %v142_v22  ;;  %304 = vst [vmem:[#allocation2 + $0x120] sm:$0xf] %v129_v46 }
  0x51   :  { %v601_v52 = vrot.slane %v599_v43, 6  ;;  %v608_v53 = vshll.u32 %v7965_v33, 16  ;;  %v614_v54 = vshrl.u32 %v7966_v37, 16  ;;  %v7997_v55 = vld [vmem:[%s13779_s0 + $0x38] sm:$0xf]  ;;  %v593_v58 = vor.u32 %v592_v47, %v589_v42 }
  0x52   :  { %v9053_v57 = vld [vmem:[#allocation2 + $0x98] ss:$72 sps:$4 sm:$0xff]   ;;  %305 = vst [vmem:[#allocation2 + $0x168] sm:$0xf] %v143_v51  ;;  %v607_v59 = vrot.slane %v605_v49, 5  ;;  %v617_v63 = vshll.u32 %v7966_v37, 16 }
  0x53   :  { %6434 = vmatpush1.bf16.msra.mxu1 %v9063_v10  ;;  %v9050_v56 = vld [vmem:[#allocation2 + $0x9c] ss:$72 sps:$4 sm:$0xff]   ;;  %v602_v60 = vor.u32 %v601_v52, %v598_v48  ;;  %v610_v61 = vrot.slane %v608_v53, 6  ;;  %v616_v62 = vrot.slane %v614_v54, 5  ;;  %v594_v1 = vrot.slane %v593_v58, 4 }
  0x54   :  { %v7998_v0 = vld [vmem:[%s13779_s0 + $0x3c] sm:$0x1]  ;;  %6243 = vmatprep.mubr.bf16.mxu1 %v9050_v56  ;;  %v924_v2 = vshrl.u32 %v7995_v45, 16  ;;  %v927_v3 = vshll.u32 %v7995_v45, 16  ;;  %v933_v4 = vshll.u32 %v7996_v50, 16  ;;  %v619_v8 = vrot.slane %v617_v63, 6 }
  0x55   :  { %v9072_v5 = vld [vmem:[%s13778_s1 + $0x230] ss:$8 sps:$4 sm:$0xff]   ;;  %6244 = vmatmul.mubr.bf16.gmra.mxu1 %v9053_v57  ;;  %v611_v7 = vor.u32 %v610_v61, %v607_v59  ;;  %v938_v9 = vshrl.u32 %v7997_v55, 16  ;;  %v941_v10 = vshll.u32 %v7997_v55, 16  ;;  %v9074_v11 = vld [vmem:[%s13778_s1 + $0x234] ss:$8 sps:$4 sm:$0xff]   ;;  %v603_v12 = vsel %vm9884_vm8, %v594_v1, %v602_v60 }
  0x56   :  { %v926_v13 = vrot.slane %v924_v2, 4  ;;  %v929_v14 = vrot.slane %v927_v3, 5  ;;  %v935_v15 = vrot.slane %v933_v4, 5  ;;  %v9075_v16 = vld [vmem:[%s13778_s1 + $0x330] ss:$8 sps:$4 sm:$0xff]   ;;  %v620_v18 = vor.u32 %v619_v8, %v616_v62  ;;  %6322 = vmatprep.subr.bf16.mxu0 %v9074_v11 }
  0x57   :  { %v612_v17 = vrot.slane %v611_v7, 4  ;;  %822 = vst [vmem:[#allocation2 + $0x128] sm:$0xf] %v603_v12  ;;  %v940_v20 = vrot.slane %v938_v9, 4  ;;  %v943_v21 = vrot.slane %v941_v10, 5  ;;  %v947_v24 = vshll.u32 %v7998_v0, 16  ;;  %6323 = vmatpush1.bf16.msra.mxu0 %v9072_v5 }
  0x58   :  { %v9077_v22 = vld [vmem:[%s13778_s1 + $0x334] ss:$8 sps:$4 sm:$0xff]   ;;  %v930_v23 = vor.u32 %v929_v14, %v926_v13  ;;  %v9078_v25 = vld [vmem:[%s13778_s1 + $0x220] ss:$8 sps:$4 sm:$0xff]   ;;  %v9080_v26 = vld [vmem:[%s13778_s1 + $0x224] ss:$8 sps:$4 sm:$0xff]  }
  0x59   :  { %v9066_v27 = vld [vmem:[#allocation2 + $0x124] ss:$72 sps:$4 sm:$0xff]   ;;  %v621_v28 = vsel %vm9884_vm8, %v612_v17, %v620_v18  ;;  %v944_v29 = vor.u32 %v943_v21, %v940_v20  ;;  %v9070_v30 = vld [vmem:[#allocation2 + $0x120] ss:$72 sps:$4 sm:$0xff]   ;;  %6435 = vmatprep.subr.bf16.mxu1 %v9077_v22  ;;  %v949_v32 = vrot.slane %v947_v24, 5  ;;  %6324 = vmatprep.subr.bf16.mxu0 %v9080_v26 }
  0x5a   :  { %823 = vst [vmem:[#allocation2 + $0x170] sm:$0xf] %v621_v28  ;;  %v931_v31 = vrot.slane %v930_v23, 4  ;;  %6436 = vmatpush1.bf16.msra.mxu1 %v9075_v16  ;;  %v9081_v33 = vld [vmem:[%s13778_s1 + $0x320] ss:$8 sps:$4 sm:$0xff]   ;;  %6140 = vmatprep.mubr.bf16.mxu0 %v9066_v27 }
  0x5b   :  { %v9083_v34 = vld [vmem:[%s13778_s1 + $0x324] ss:$8 sps:$4 sm:$0xff]   ;;  %v945_v35 = vrot.slane %v944_v29, 4  ;;  %v7887_v36 = vld [vmem:[%s13779_s0 + $0x38] sm:$0xf]  ;;  %6141 = vmatmul.mubr.bf16.gmra.mxu0 %v9070_v30 }
  0x5c   :  { %v7888_v37 = vld [vmem:[%s13779_s0 + $0x3c] sm:$0x1]  ;;  %v936_v38 = vsel %vm9849_vm7, %v931_v31, %v935_v15  ;;  %6437 = vmatprep.subr.bf16.mxu1 %v9083_v34  ;;  %v7889_v39 = vld [vmem:[%s13779_s0 + $0x40] sm:$0xf]  ;;  %v7890_v40 = vld [vmem:[%s13779_s0 + $0x44] sm:$0x1]  ;;  %6325 = vmatpush1.bf16.msra.mxu0 %v9078_v25 }
  0x5d   :  { %v145_v41 = vshrl.u32 %v7887_v36, 16  ;;  %v148_v42 = vshll.u32 %v7887_v36, 16  ;;  %v950_v43 = vsel %vm9849_vm7, %v945_v35, %v949_v32  ;;  %1111 = vst [vmem:[#allocation2 + $0x12c] sm:$0xf] %v936_v38  ;;  %v154_v45 = vshll.u32 %v7888_v37, 16 }
  0x5e   :  { %v159_v46 = vshrl.u32 %v7889_v39, 16  ;;  %v162_v47 = vshll.u32 %v7889_v39, 16  ;;  %v7919_v48 = vld [vmem:[%s13779_s0 + $0x38] sm:$0xe]  ;;  %1112 = vst [vmem:[#allocation2 + $0x174] sm:$0xf] %v950_v43  ;;  %6438 = vmatpush1.bf16.msra.mxu1 %v9081_v33 }
  0x5f   :  { %v147_v49 = vrot.slane %v145_v41, 4  ;;  %v150_v50 = vrot.slane %v148_v42, 5  ;;  %v168_v51 = vshll.u32 %v7890_v40, 16  ;;  %v7920_v52 = vld [vmem:[%s13779_s0 + $0x3c] sm:$0x1]  ;;  %v7945_v53 = vrot.slane %v7919_v48, 9 }
  0x60   :  { %v156_v54 = vrot.slane %v154_v45, 5  ;;  %v161_v55 = vrot.slane %v159_v46, 4  ;;  %v164_v56 = vrot.slane %v162_v47, 5  ;;  %v7921_v57 = vld [vmem:[%s13779_s0 + $0x40] sm:$0xe]  ;;  %v409_v58 = vrot.slane %v7920_v52, 5 }
  0x61   :  { %v151_v59 = vor.u32 %v150_v50, %v147_v49  ;;  %v170_v60 = vrot.slane %v168_v51, 5  ;;  %v7922_v61 = vld [vmem:[%s13779_s0 + $0x44] sm:$0x1]  ;;  %v7946_v62 = vrot.slane %v7921_v57, 9  ;;  %v7967_v63 = vld [vmem:[%s13779_s0 + $0x38] sm:$0xe] }
  0x62   :  { %v165_v0 = vor.u32 %v164_v56, %v161_v55  ;;  %v410_v1 = vsel %vm9828_vm6, %v7945_v53, %v409_v58  ;;  %v413_v2 = vrot.slane %v7922_v61, 5  ;;  %v7968_v3 = vld [vmem:[%s13779_s0 + $0x3c] sm:$0x3]  ;;  %v7969_v4 = vld [vmem:[%s13779_s0 + $0x40] sm:$0xe]  ;;  %v623_v5 = vshrl.u32 %v7967_v63, 16 }
  0x63   :  { %v152_v7 = vrot.slane %v151_v59, 4  ;;  %469 = vst [vmem:[#allocation2 + $0x1b4] sm:$0xf] %v410_v1  ;;  %v7970_v8 = vld [vmem:[%s13779_s0 + $0x44] sm:$0x3]  ;;  %v626_v9 = vshll.u32 %v7967_v63, 16 }
  0x64   :  { %v632_v10 = vshrl.u32 %v7968_v3, 16  ;;  %v635_v11 = vshll.u32 %v7968_v3, 16  ;;  %v166_v12 = vrot.slane %v165_v0, 4  ;;  %v414_v13 = vsel %vm9828_vm6, %v7946_v62, %v413_v2  ;;  %v7999_v16 = vld [vmem:[%s13779_s0 + $0x40] sm:$0xf] }
  0x65   :  { %v625_v14 = vrot.slane %v623_v5, 5  ;;  %v641_v15 = vshrl.u32 %v7969_v4, 16  ;;  %v157_v17 = vsel %vm9849_vm7, %v152_v7, %v156_v54  ;;  %470 = vst [vmem:[#allocation2 + $0x1fc] sm:$0xf] %v414_v13  ;;  %v628_v18 = vrot.slane %v626_v9, 6 }
  0x66   :  { %v634_v20 = vrot.slane %v632_v10, 5  ;;  %v637_v21 = vrot.slane %v635_v11, 6  ;;  %v8000_v22 = vld [vmem:[%s13779_s0 + $0x44] sm:$0x1]  ;;  %v9068_v23 = vld [vmem:[#allocation2 + $0x12c] ss:$72 sps:$4 sm:$0xff]   ;;  %v171_v25 = vsel %vm9849_vm7, %v166_v12, %v170_v60 }
  0x67   :  { %v9071_v24 = vld [vmem:[#allocation2 + $0x128] ss:$72 sps:$4 sm:$0xff]   ;;  %306 = vst [vmem:[#allocation2 + $0x1b0] sm:$0xf] %v157_v17  ;;  %v643_v26 = vrot.slane %v641_v15, 5  ;;  %v629_v27 = vor.u32 %v628_v18, %v625_v14  ;;  %v644_v29 = vshll.u32 %v7969_v4, 16  ;;  %6253 = vmatprep.mubr.bf16.mxu1 %v9068_v23 }
  0x68   :  { %307 = vst [vmem:[#allocation2 + $0x1f8] sm:$0xf] %v171_v25  ;;  %v638_v28 = vor.u32 %v637_v21, %v634_v20  ;;  %v650_v30 = vshrl.u32 %v7970_v8, 16  ;;  %v8001_v31 = vld [vmem:[%s13779_s0 + $0x48] sm:$0xf]  ;;  %v653_v33 = vshll.u32 %v7970_v8, 16  ;;  %6254 = vmatmul.mubr.bf16.gmra.mxu1 %v9071_v24 }
  0x69   :  { %v8002_v32 = vld [vmem:[%s13779_s0 + $0x4c] sm:$0x1]  ;;  %v952_v34 = vshrl.u32 %v7999_v16, 16  ;;  %v955_v35 = vshll.u32 %v7999_v16, 16  ;;  %v961_v36 = vshll.u32 %v8000_v22, 16  ;;  %v630_v38 = vrot.slane %v629_v27, 4 }
  0x6a   :  { %v9090_v37 = vld [vmem:[%s13778_s1 + $0x210] ss:$8 sps:$4 sm:$0xff]   ;;  %v646_v39 = vrot.slane %v644_v29, 6  ;;  %v652_v40 = vrot.slane %v650_v30, 5  ;;  %v966_v41 = vshrl.u32 %v8001_v31, 16  ;;  %v655_v43 = vrot.slane %v653_v33, 6 }
  0x6b   :  { %v9092_v42 = vld [vmem:[%s13778_s1 + $0x214] ss:$8 sps:$4 sm:$0xff]   ;;  %v954_v45 = vrot.slane %v952_v34, 4  ;;  %v957_v46 = vrot.slane %v955_v35, 5  ;;  %v963_v47 = vrot.slane %v961_v36, 5  ;;  %v639_v49 = vsel %vm9884_vm8, %v630_v38, %v638_v28 }
  0x6c   :  { %v9093_v48 = vld [vmem:[%s13778_s1 + $0x310] ss:$8 sps:$4 sm:$0xff]   ;;  %v647_v50 = vor.u32 %v646_v39, %v643_v26  ;;  %v968_v51 = vrot.slane %v966_v41, 4  ;;  %v969_v52 = vshll.u32 %v8001_v31, 16  ;;  %6326 = vmatprep.subr.bf16.mxu0 %v9092_v42  ;;  %v9095_v53 = vld [vmem:[%s13778_s1 + $0x314] ss:$8 sps:$4 sm:$0xff]   ;;  %v656_v54 = vor.u32 %v655_v43, %v652_v40 }
  0x6d   :  { %824 = vst [vmem:[#allocation2 + $0x1b8] sm:$0xf] %v639_v49  ;;  %v958_v55 = vor.u32 %v957_v46, %v954_v45  ;;  %v975_v56 = vshll.u32 %v8002_v32, 16  ;;  %6327 = vmatpush1.bf16.msra.mxu0 %v9090_v37  ;;  %v9096_v57 = vld [vmem:[%s13778_s1 + $0x200] ss:$8 sps:$4 sm:$0xff]   ;;  %6439 = vmatprep.subr.bf16.mxu1 %v9095_v53 }
  0x6e   :  { %v9098_v58 = vld [vmem:[%s13778_s1 + $0x204] ss:$8 sps:$4 sm:$0xff]   ;;  %v648_v59 = vrot.slane %v647_v50, 4  ;;  %v971_v60 = vrot.slane %v969_v52, 5  ;;  %v9099_v61 = vld [vmem:[%s13778_s1 + $0x300] ss:$8 sps:$4 sm:$0xff]   ;;  %6440 = vmatpush1.bf16.msra.mxu1 %v9093_v48 }
  0x6f   :  { %v9084_v62 = vld [vmem:[#allocation2 + $0x1b4] ss:$72 sps:$4 sm:$0xff]   ;;  %v959_v63 = vrot.slane %v958_v55, 4  ;;  %v977_v0 = vrot.slane %v975_v56, 5  ;;  %6328 = vmatprep.subr.bf16.mxu0 %v9098_v58  ;;  %v9088_v3 = vld [vmem:[#allocation2 + $0x1b0] ss:$72 sps:$4 sm:$0xff]  }
  0x70   :  { %v657_v1 = vsel %vm9884_vm8, %v648_v59, %v656_v54  ;;  %v972_v2 = vor.u32 %v971_v60, %v968_v51  ;;  %v9101_v4 = vld [vmem:[%s13778_s1 + $0x304] ss:$8 sps:$4 sm:$0xff]   ;;  %v7891_v5 = vld [vmem:[%s13779_s0 + $0x68] sm:$0xf]  ;;  %6150 = vmatprep.mubr.bf16.mxu0 %v9084_v62  ;;  %v7893_v9 = vld [vmem:[%s13779_s0 + $0x70] sm:$0xf] }
  0x71   :  { %825 = vst [vmem:[#allocation2 + $0x200] sm:$0xf] %v657_v1  ;;  %v964_v7 = vsel %vm9849_vm7, %v959_v63, %v963_v47  ;;  %6329 = vmatpush1.bf16.msra.mxu0 %v9096_v57  ;;  %v7892_v8 = vld [vmem:[%s13779_s0 + $0x6c] sm:$0x1]  ;;  %v7894_v10 = vld [vmem:[%s13779_s0 + $0x74] sm:$0x1]  ;;  %6441 = vmatprep.subr.bf16.mxu1 %v9101_v4 }
  0x72   :  { %v973_v11 = vrot.slane %v972_v2, 4  ;;  %1113 = vst [vmem:[#allocation2 + $0x1bc] sm:$0xf] %v964_v7  ;;  %6151 = vmatmul.mubr.bf16.gmra.mxu0 %v9088_v3  ;;  %v173_v12 = vshrl.u32 %v7891_v5, 16  ;;  %v176_v13 = vshll.u32 %v7891_v5, 16  ;;  %v182_v14 = vshll.u32 %v7892_v8, 16  ;;  %6442 = vmatpush1.bf16.msra.mxu1 %v9099_v61 }
  0x73   :  { %v7923_v15 = vld [vmem:[%s13779_s0 + $0x68] sm:$0xe]  ;;  %v187_v16 = vshrl.u32 %v7893_v9, 16  ;;  %v190_v17 = vshll.u32 %v7893_v9, 16  ;;  %v196_v18 = vshll.u32 %v7894_v10, 16 }
  0x74   :  { %v7924_v20 = vld [vmem:[%s13779_s0 + $0x6c] sm:$0x1]  ;;  %v7947_v21 = vrot.slane %v7923_v15, 9  ;;  %v978_v22 = vsel %vm9849_vm7, %v973_v11, %v977_v0  ;;  %v175_v23 = vrot.slane %v173_v12, 4  ;;  %v178_v24 = vrot.slane %v176_v13, 5 }
  0x75   :  { %v184_v25 = vrot.slane %v182_v14, 5  ;;  %v7925_v26 = vld [vmem:[%s13779_s0 + $0x70] sm:$0xe]  ;;  %1114 = vst [vmem:[#allocation2 + $0x204] sm:$0xf] %v978_v22  ;;  %v189_v27 = vrot.slane %v187_v16, 4 }
  0x76   :  { %v192_v28 = vrot.slane %v190_v17, 5  ;;  %v198_v29 = vrot.slane %v196_v18, 5  ;;  %v7926_v30 = vld [vmem:[%s13779_s0 + $0x74] sm:$0x1]  ;;  %v417_v31 = vrot.slane %v7924_v20, 5  ;;  %v179_v32 = vor.u32 %v178_v24, %v175_v23 }
  0x77   :  { %v7948_v33 = vrot.slane %v7925_v26, 9  ;;  %v421_v34 = vrot.slane %v7926_v30, 5  ;;  %v7971_v35 = vld [vmem:[%s13779_s0 + $0x68] sm:$0xe]  ;;  %v7972_v36 = vld [vmem:[%s13779_s0 + $0x6c] sm:$0x3] }
  0x78   :  { %v193_v37 = vor.u32 %v192_v28, %v189_v27  ;;  %v418_v38 = vsel %vm9828_vm6, %v7947_v21, %v417_v31  ;;  %v7973_v39 = vld [vmem:[%s13779_s0 + $0x70] sm:$0xe]  ;;  %v659_v40 = vshrl.u32 %v7971_v35, 16  ;;  %v662_v41 = vshll.u32 %v7971_v35, 16  ;;  %v7974_v45 = vld [vmem:[%s13779_s0 + $0x74] sm:$0x3] }
  0x79   :  { %v180_v42 = vrot.slane %v179_v32, 4  ;;  %v422_v43 = vsel %vm9828_vm6, %v7948_v33, %v421_v34  ;;  %471 = vst [vmem:[#allocation2 + $0x244] sm:$0xf] %v418_v38  ;;  %v668_v46 = vshrl.u32 %v7972_v36, 16  ;;  %v671_v47 = vshll.u32 %v7972_v36, 16 }
  0x7a   :  { %v194_v48 = vrot.slane %v193_v37, 4  ;;  %472 = vst [vmem:[#allocation2 + $0x28c] sm:$0xf] %v422_v43  ;;  %v661_v49 = vrot.slane %v659_v40, 5  ;;  %v664_v50 = vrot.slane %v662_v41, 6  ;;  %v677_v51 = vshrl.u32 %v7973_v39, 16 }
  0x7b   :  { %v185_v52 = vsel %vm9849_vm7, %v180_v42, %v184_v25  ;;  %v670_v53 = vrot.slane %v668_v46, 5  ;;  %v673_v54 = vrot.slane %v671_v47, 6  ;;  %v680_v55 = vshll.u32 %v7973_v39, 16  ;;  %v8003_v56 = vld [vmem:[%s13779_s0 + $0x70] sm:$0xf] }
  0x7c   :  { %v199_v57 = vsel %vm9849_vm7, %v194_v48, %v198_v29  ;;  %308 = vst [vmem:[#allocation2 + $0x240] sm:$0xf] %v185_v52  ;;  %v665_v58 = vor.u32 %v664_v50, %v661_v49  ;;  %v679_v59 = vrot.slane %v677_v51, 5  ;;  %v686_v60 = vshrl.u32 %v7974_v45, 16  ;;  %v8004_v61 = vld [vmem:[%s13779_s0 + $0x74] sm:$0x1] }
  0x7d   :  { %v8005_v62 = vld [vmem:[%s13779_s0 + $0x78] sm:$0xf]  ;;  %v9086_v63 = vld [vmem:[#allocation2 + $0x1bc] ss:$72 sps:$4 sm:$0xff]   ;;  %309 = vst [vmem:[#allocation2 + $0x288] sm:$0xf] %v199_v57  ;;  %v674_v1 = vor.u32 %v673_v54, %v670_v53 }
  0x7e   :  { %v9089_v0 = vld [vmem:[#allocation2 + $0x1b8] ss:$72 sps:$4 sm:$0xff]   ;;  %v682_v2 = vrot.slane %v680_v55, 6  ;;  %v8006_v3 = vld [vmem:[%s13779_s0 + $0x7c] sm:$0x1]  ;;  %v666_v4 = vrot.slane %v665_v58, 4  ;;  %6263 = vmatprep.mubr.bf16.mxu1 %v9086_v63 }
  0x7f   :  { %v688_v5 = vrot.slane %v686_v60, 5  ;;  %v689_v7 = vshll.u32 %v7974_v45, 16  ;;  %v980_v8 = vshrl.u32 %v8003_v56, 16  ;;  %v9108_v9 = vld [vmem:[%s13778_s1 + $0x2f0] ss:$8 sps:$4 sm:$0xff]   ;;  %v983_v11 = vshll.u32 %v8003_v56, 16  ;;  %6264 = vmatmul.mubr.bf16.gmra.mxu1 %v9089_v0 }
  0x80   :  { %v683_v10 = vor.u32 %v682_v2, %v679_v59  ;;  %v989_v12 = vshll.u32 %v8004_v61, 16  ;;  %v994_v13 = vshrl.u32 %v8005_v62, 16  ;;  %v9110_v14 = vld [vmem:[%s13778_s1 + $0x2f4] ss:$8 sps:$4 sm:$0xff]   ;;  %v675_v15 = vsel %vm9884_vm8, %v666_v4, %v674_v1  ;;  %v9111_v20 = vld [vmem:[%s13778_s1 + $0x3f0] ss:$8 sps:$4 sm:$0xff]  }
  0x81   :  { %v691_v16 = vrot.slane %v689_v7, 6  ;;  %v982_v17 = vrot.slane %v980_v8, 4  ;;  %v997_v18 = vshll.u32 %v8005_v62, 16  ;;  %826 = vst [vmem:[#allocation2 + $0x248] sm:$0xf] %v675_v15  ;;  %v985_v22 = vrot.slane %v983_v11, 5  ;;  %6330 = vmatprep.subr.bf16.mxu0 %v9110_v14 }
  0x82   :  { %v684_v21 = vrot.slane %v683_v10, 4  ;;  %v996_v23 = vrot.slane %v994_v13, 4  ;;  %v9113_v24 = vld [vmem:[%s13778_s1 + $0x3f4] ss:$8 sps:$4 sm:$0xff]   ;;  %v1003_v27 = vshll.u32 %v8006_v3, 16  ;;  %6331 = vmatpush2.bf16.msra.mxu0 %v9108_v9  ;;  %v991_v31 = vrot.slane %v989_v12, 5 }
  0x83   :  { %v692_v25 = vor.u32 %v691_v16, %v688_v5  ;;  %v999_v26 = vrot.slane %v997_v18, 5  ;;  %v9114_v28 = vld [vmem:[%s13778_s1 + $0x2e0] ss:$8 sps:$4 sm:$0xff]   ;;  %v9116_v29 = vld [vmem:[%s13778_s1 + $0x2e4] ss:$8 sps:$4 sm:$0xff]   ;;  %v986_v30 = vor.u32 %v985_v22, %v982_v17  ;;  %6443 = vmatprep.subr.bf16.mxu1 %v9113_v24 }
  0x84   :  { %v9117_v32 = vld [vmem:[%s13778_s1 + $0x3e0] ss:$8 sps:$4 sm:$0xff]   ;;  %v9119_v33 = vld [vmem:[%s13778_s1 + $0x3e4] ss:$8 sps:$4 sm:$0xff]   ;;  %v1005_v37 = vrot.slane %v1003_v27, 5  ;;  %6444 = vmatpush2.bf16.msra.mxu1 %v9111_v20  ;;  %6332 = vmatprep.subr.bf16.mxu0 %v9116_v29 }
  0x85   :  { %v9102_v34 = vld [vmem:[#allocation2 + $0x244] ss:$72 sps:$4 sm:$0xff]   ;;  %v693_v35 = vsel %vm9884_vm8, %v684_v21, %v692_v25  ;;  %v1000_v36 = vor.u32 %v999_v26, %v996_v23  ;;  %v9106_v38 = vld [vmem:[#allocation2 + $0x240] ss:$72 sps:$4 sm:$0xff]   ;;  %v987_v39 = vrot.slane %v986_v30, 4  ;;  %6445 = vmatprep.subr.bf16.mxu1 %v9119_v33 }
  0x86   :  { %827 = vst [vmem:[#allocation2 + $0x290] sm:$0xf] %v693_v35  ;;  %v7895_v40 = vld [vmem:[%s13779_s0 + $0x78] sm:$0xf]  ;;  %v7896_v41 = vld [vmem:[%s13779_s0 + $0x7c] sm:$0x1]  ;;  %6160 = vmatprep.mubr.bf16.mxu0 %v9102_v34  ;;  %6333 = vmatpush2.bf16.msra.mxu0 %v9114_v28 }
  0x87   :  { %v1001_v42 = vrot.slane %v1000_v36, 4  ;;  %v7897_v43 = vld [vmem:[%s13779_s0 + $0x80] sm:$0xf]  ;;  %v7898_v45 = vld [vmem:[%s13779_s0 + $0x84] sm:$0x1]  ;;  %v201_v46 = vshrl.u32 %v7895_v40, 16  ;;  %v992_v47 = vsel %vm9849_vm7, %v987_v39, %v991_v31  ;;  %6161 = vmatmul.mubr.bf16.gmra.mxu0 %v9106_v38 }
  0x88   :  { %v204_v48 = vshll.u32 %v7895_v40, 16  ;;  %v210_v49 = vshll.u32 %v7896_v41, 16  ;;  %v215_v50 = vshrl.u32 %v7897_v43, 16  ;;  %v7927_v51 = vld [vmem:[%s13779_s0 + $0x78] sm:$0xe]  ;;  %v218_v54 = vshll.u32 %v7897_v43, 16  ;;  %6446 = vmatpush2.bf16.msra.mxu1 %v9117_v32 }
  0x89   :  { %v1006_v52 = vsel %vm9849_vm7, %v1001_v42, %v1005_v37  ;;  %1115 = vst [vmem:[#allocation2 + $0x24c] sm:$0xf] %v992_v47  ;;  %v203_v53 = vrot.slane %v201_v46, 4  ;;  %v224_v55 = vshll.u32 %v7898_v45, 16  ;;  %v7928_v56 = vld [vmem:[%s13779_s0 + $0x7c] sm:$0x1] }
  0x8a   :  { %1116 = vst [vmem:[#allocation2 + $0x294] sm:$0xf] %v1006_v52  ;;  %v206_v57 = vrot.slane %v204_v48, 5  ;;  %v212_v58 = vrot.slane %v210_v49, 5  ;;  %v217_v59 = vrot.slane %v215_v50, 4  ;;  %v7949_v61 = vrot.slane %v7927_v51, 9 }
  0x8b   :  { %v7929_v60 = vld [vmem:[%s13779_s0 + $0x80] sm:$0xe]  ;;  %v220_v62 = vrot.slane %v218_v54, 5  ;;  %v226_v63 = vrot.slane %v224_v55, 5  ;;  %v7930_v0 = vld [vmem:[%s13779_s0 + $0x84] sm:$0x1] }
  0x8c   :  { %v425_v1 = vrot.slane %v7928_v56, 5  ;;  %v7950_v2 = vrot.slane %v7929_v60, 9  ;;  %v207_v3 = vor.u32 %v206_v57, %v203_v53  ;;  %v429_v4 = vrot.slane %v7930_v0, 5  ;;  %v7975_v5 = vld [vmem:[%s13779_s0 + $0x78] sm:$0xe] }
  0x8d   :  { %v7976_v7 = vld [vmem:[%s13779_s0 + $0x7c] sm:$0x3]  ;;  %v221_v8 = vor.u32 %v220_v62, %v217_v59  ;;  %v7977_v10 = vld [vmem:[%s13779_s0 + $0x80] sm:$0xe]  ;;  %v7978_v11 = vld [vmem:[%s13779_s0 + $0x84] sm:$0x3] }
  0x8e   :  { %v426_v9 = vsel %vm9828_vm6, %v7949_v61, %v425_v1  ;;  %v695_v12 = vshrl.u32 %v7975_v5, 16  ;;  %v698_v13 = vshll.u32 %v7975_v5, 16  ;;  %v208_v14 = vrot.slane %v207_v3, 4  ;;  %v8007_v18 = vld [vmem:[%s13779_s0 + $0x80] sm:$0xf] }
  0x8f   :  { %v430_v15 = vsel %vm9828_vm6, %v7950_v2, %v429_v4  ;;  %473 = vst [vmem:[#allocation2 + $0x2d4] sm:$0xf] %v426_v9  ;;  %v704_v16 = vshrl.u32 %v7976_v7, 16  ;;  %v707_v17 = vshll.u32 %v7976_v7, 16  ;;  %v222_v20 = vrot.slane %v221_v8, 4 }
  0x90   :  { %474 = vst [vmem:[#allocation2 + $0x31c] sm:$0xf] %v430_v15  ;;  %v697_v21 = vrot.slane %v695_v12, 5  ;;  %v700_v22 = vrot.slane %v698_v13, 6  ;;  %v713_v23 = vshrl.u32 %v7977_v10, 16  ;;  %v213_v25 = vsel %vm9849_vm7, %v208_v14, %v212_v58 }
  0x91   :  { %v8008_v24 = vld [vmem:[%s13779_s0 + $0x84] sm:$0x1]  ;;  %v706_v26 = vrot.slane %v704_v16, 5  ;;  %v709_v27 = vrot.slane %v707_v17, 6  ;;  %v716_v28 = vshll.u32 %v7977_v10, 16  ;;  %v227_v32 = vsel %vm9849_vm7, %v222_v20, %v226_v63 }
  0x92   :  { %v8009_v29 = vld [vmem:[%s13779_s0 + $0x88] sm:$0xf]  ;;  %v9104_v30 = vld [vmem:[#allocation2 + $0x24c] ss:$72 sps:$4 sm:$0xff]   ;;  %310 = vst [vmem:[#allocation2 + $0x2d0] sm:$0xf] %v213_v25  ;;  %v701_v33 = vor.u32 %v700_v22, %v697_v21 }
  0x93   :  { %v9107_v31 = vld [vmem:[#allocation2 + $0x248] ss:$72 sps:$4 sm:$0xff]   ;;  %v715_v34 = vrot.slane %v713_v23, 5  ;;  %311 = vst [vmem:[#allocation2 + $0x318] sm:$0xf] %v227_v32  ;;  %v710_v35 = vor.u32 %v709_v27, %v706_v26  ;;  %v718_v36 = vrot.slane %v716_v28, 6  ;;  %6273 = vmatprep.mubr.bf16.mxu1 %v9104_v30 }
  0x94   :  { %v722_v37 = vshrl.u32 %v7978_v11, 16  ;;  %v725_v38 = vshll.u32 %v7978_v11, 16  ;;  %v8010_v39 = vld [vmem:[%s13779_s0 + $0x8c] sm:$0x1]  ;;  %v702_v40 = vrot.slane %v701_v33, 4  ;;  %v1008_v41 = vshrl.u32 %v8007_v18, 16  ;;  %6274 = vmatmul.mubr.bf16.gmra.mxu1 %v9107_v31 }
  0x95   :  { %v1011_v42 = vshll.u32 %v8007_v18, 16  ;;  %v1017_v43 = vshll.u32 %v8008_v24, 16  ;;  %v9126_v45 = vld [vmem:[%s13778_s1 + $0x2d0] ss:$8 sps:$4 sm:$0xff]   ;;  %v719_v46 = vor.u32 %v718_v36, %v715_v34  ;;  %v1022_v49 = vshrl.u32 %v8009_v29, 16 }
  0x96   :  { %v724_v47 = vrot.slane %v722_v37, 5  ;;  %v727_v48 = vrot.slane %v725_v38, 6  ;;  %v9128_v50 = vld [vmem:[%s13778_s1 + $0x2d4] ss:$8 sps:$4 sm:$0xff]   ;;  %v711_v51 = vsel %vm9884_vm8, %v702_v40, %v710_v35  ;;  %v1010_v52 = vrot.slane %v1008_v41, 4 }
  0x97   :  { %v1013_v53 = vrot.slane %v1011_v42, 5  ;;  %v1019_v54 = vrot.slane %v1017_v43, 5  ;;  %v9129_v55 = vld [vmem:[%s13778_s1 + $0x3d0] ss:$8 sps:$4 sm:$0xff]   ;;  %v720_v56 = vrot.slane %v719_v46, 4  ;;  %v1024_v58 = vrot.slane %v1022_v49, 4  ;;  %6334 = vmatprep.subr.bf16.mxu0 %v9128_v50 }
  0x98   :  { %v728_v57 = vor.u32 %v727_v48, %v724_v47  ;;  %828 = vst [vmem:[#allocation2 + $0x2d8] sm:$0xf] %v711_v51  ;;  %v1025_v59 = vshll.u32 %v8009_v29, 16  ;;  %v9131_v60 = vld [vmem:[%s13778_s1 + $0x3d4] ss:$8 sps:$4 sm:$0xff]   ;;  %v1031_v62 = vshll.u32 %v8010_v39, 16  ;;  %6335 = vmatpush2.bf16.msra.mxu0 %v9126_v45 }
  0x99   :  { %v1014_v61 = vor.u32 %v1013_v53, %v1010_v52  ;;  %v9132_v63 = vld [vmem:[%s13778_s1 + $0x2c0] ss:$8 sps:$4 sm:$0xff]   ;;  %v9134_v0 = vld [vmem:[%s13778_s1 + $0x2c4] ss:$8 sps:$4 sm:$0xff]   ;;  %6447 = vmatprep.subr.bf16.mxu1 %v9131_v60  ;;  %v9120_v5 = vld [vmem:[#allocation2 + $0x2d4] ss:$72 sps:$4 sm:$0xff]  }
  0x9a   :  { %v729_v1 = vsel %vm9884_vm8, %v720_v56, %v728_v57  ;;  %v1027_v2 = vrot.slane %v1025_v59, 5  ;;  %v9135_v3 = vld [vmem:[%s13778_s1 + $0x3c0] ss:$8 sps:$4 sm:$0xff]   ;;  %v9137_v4 = vld [vmem:[%s13778_s1 + $0x3c4] ss:$8 sps:$4 sm:$0xff]   ;;  %v1033_v8 = vrot.slane %v1031_v62, 5  ;;  %6448 = vmatpush2.bf16.msra.mxu1 %v9129_v55  ;;  %6336 = vmatprep.subr.bf16.mxu0 %v9134_v0 }
  0x9b   :  { %829 = vst [vmem:[#allocation2 + $0x320] sm:$0xf] %v729_v1  ;;  %v1015_v7 = vrot.slane %v1014_v61, 4  ;;  %v9124_v10 = vld [vmem:[#allocation2 + $0x2d0] ss:$72 sps:$4 sm:$0xff]   ;;  %6449 = vmatprep.subr.bf16.mxu1 %v9137_v4  ;;  %6170 = vmatprep.mubr.bf16.mxu0 %v9120_v5 }
  0x9c   :  { %v1028_v9 = vor.u32 %v1027_v2, %v1024_v58  ;;  %v7899_v11 = vld [vmem:[%s13779_s0 + $0x88] sm:$0xf]  ;;  %v7900_v12 = vld [vmem:[%s13779_s0 + $0x8c] sm:$0x1]  ;;  %6337 = vmatpush2.bf16.msra.mxu0 %v9132_v63  ;;  %v7901_v14 = vld [vmem:[%s13779_s0 + $0x90] sm:$0xf] }
  0x9d   :  { %v1020_v13 = vsel %vm9849_vm7, %v1015_v7, %v1019_v54  ;;  %v7902_v15 = vld [vmem:[%s13779_s0 + $0x94] sm:$0x1]  ;;  %v229_v16 = vshrl.u32 %v7899_v11, 16  ;;  %v232_v17 = vshll.u32 %v7899_v11, 16  ;;  %6171 = vmatmul.mubr.bf16.gmra.mxu0 %v9124_v10  ;;  %v238_v20 = vshll.u32 %v7900_v12, 16 }
  0x9e   :  { %v1029_v18 = vrot.slane %v1028_v9, 4  ;;  %1117 = vst [vmem:[#allocation2 + $0x2dc] sm:$0xf] %v1020_v13  ;;  %v243_v21 = vshrl.u32 %v7901_v14, 16  ;;  %v246_v22 = vshll.u32 %v7901_v14, 16  ;;  %v252_v26 = vshll.u32 %v7902_v15, 16  ;;  %6450 = vmatpush2.bf16.msra.mxu1 %v9135_v3 }
  0x9f   :  { %v7931_v23 = vld [vmem:[%s13779_s0 + $0x88] sm:$0xe]  ;;  %v231_v24 = vrot.slane %v229_v16, 4  ;;  %v234_v25 = vrot.slane %v232_v17, 5  ;;  %v7932_v27 = vld [vmem:[%s13779_s0 + $0x8c] sm:$0x1] }
  0xa0   :  { %v7951_v28 = vrot.slane %v7931_v23, 9  ;;  %v1034_v29 = vsel %vm9849_vm7, %v1029_v18, %v1033_v8  ;;  %v240_v30 = vrot.slane %v238_v20, 5  ;;  %v245_v31 = vrot.slane %v243_v21, 4  ;;  %v7933_v33 = vld [vmem:[%s13779_s0 + $0x90] sm:$0xe] }
  0xa1   :  { %v248_v32 = vrot.slane %v246_v22, 5  ;;  %1118 = vst [vmem:[#allocation2 + $0x324] sm:$0xf] %v1034_v29  ;;  %v235_v34 = vor.u32 %v234_v25, %v231_v24  ;;  %v254_v35 = vrot.slane %v252_v26, 5  ;;  %v7934_v36 = vld [vmem:[%s13779_s0 + $0x94] sm:$0x1] }
  0xa2   :  { %v433_v37 = vrot.slane %v7932_v27, 5  ;;  %v7952_v38 = vrot.slane %v7933_v33, 9  ;;  %v437_v40 = vrot.slane %v7934_v36, 5  ;;  %v7979_v41 = vld [vmem:[%s13779_s0 + $0x88] sm:$0xe] }
  0xa3   :  { %v249_v39 = vor.u32 %v248_v32, %v245_v31  ;;  %v7980_v42 = vld [vmem:[%s13779_s0 + $0x8c] sm:$0x3]  ;;  %v236_v43 = vrot.slane %v235_v34, 4  ;;  %v7981_v46 = vld [vmem:[%s13779_s0 + $0x90] sm:$0xe]  ;;  %v731_v47 = vshrl.u32 %v7979_v41, 16 }
  0xa4   :  { %v434_v45 = vsel %vm9828_vm6, %v7951_v28, %v433_v37  ;;  %v438_v49 = vsel %vm9828_vm6, %v7952_v38, %v437_v40  ;;  %v7982_v50 = vld [vmem:[%s13779_s0 + $0x94] sm:$0x3]  ;;  %v734_v51 = vshll.u32 %v7979_v41, 16  ;;  %v740_v52 = vshrl.u32 %v7980_v42, 16  ;;  %v8011_v57 = vld [vmem:[%s13779_s0 + $0x90] sm:$0xf] }
  0xa5   :  { %v250_v48 = vrot.slane %v249_v39, 4  ;;  %475 = vst [vmem:[#allocation2 + $0x364] sm:$0xf] %v434_v45  ;;  %v241_v53 = vsel %vm9849_vm7, %v236_v43, %v240_v30  ;;  %476 = vst [vmem:[#allocation2 + $0x3ac] sm:$0xf] %v438_v49  ;;  %v733_v54 = vrot.slane %v731_v47, 5 }
  0xa6   :  { %v743_v55 = vshll.u32 %v7980_v42, 16  ;;  %v749_v56 = vshrl.u32 %v7981_v46, 16  ;;  %312 = vst [vmem:[#allocation2 + $0x360] sm:$0xf] %v241_v53  ;;  %v736_v59 = vrot.slane %v734_v51, 6  ;;  %v742_v60 = vrot.slane %v740_v52, 5 }
  0xa7   :  { %v255_v58 = vsel %vm9849_vm7, %v250_v48, %v254_v35  ;;  %v752_v61 = vshll.u32 %v7981_v46, 16  ;;  %v8012_v62 = vld [vmem:[%s13779_s0 + $0x94] sm:$0x1]  ;;  %v758_v1 = vshrl.u32 %v7982_v50, 16  ;;  %v761_v2 = vshll.u32 %v7982_v50, 16 }
  0xa8   :  { %313 = vst [vmem:[#allocation2 + $0x3a8] sm:$0xf] %v255_v58  ;;  %v745_v63 = vrot.slane %v743_v55, 6  ;;  %v751_v0 = vrot.slane %v749_v56, 5  ;;  %v8013_v3 = vld [vmem:[%s13779_s0 + $0x98] sm:$0xf]  ;;  %v737_v7 = vor.u32 %v736_v59, %v733_v54 }
  0xa9   :  { %v9122_v4 = vld [vmem:[#allocation2 + $0x2dc] ss:$72 sps:$4 sm:$0xff]   ;;  %v9125_v5 = vld [vmem:[#allocation2 + $0x2d8] ss:$72 sps:$4 sm:$0xff]   ;;  %v754_v8 = vrot.slane %v752_v61, 6  ;;  %v760_v11 = vrot.slane %v758_v1, 5 }
  0xaa   :  { %v8014_v9 = vld [vmem:[%s13779_s0 + $0x9c] sm:$0x1]  ;;  %v746_v10 = vor.u32 %v745_v63, %v742_v60  ;;  %v763_v12 = vrot.slane %v761_v2, 6  ;;  %v1036_v13 = vshrl.u32 %v8011_v57, 16  ;;  %v9144_v14 = vld [vmem:[%s13778_s1 + $0x2b0] ss:$8 sps:$4 sm:$0xff]   ;;  %6283 = vmatprep.mubr.bf16.mxu1 %v9122_v4 }
  0xab   :  { %v738_v15 = vrot.slane %v737_v7, 4  ;;  %v755_v16 = vor.u32 %v754_v8, %v751_v0  ;;  %v1039_v17 = vshll.u32 %v8011_v57, 16  ;;  %v1045_v18 = vshll.u32 %v8012_v62, 16  ;;  %v9146_v20 = vld [vmem:[%s13778_s1 + $0x2b4] ss:$8 sps:$4 sm:$0xff]   ;;  %6284 = vmatmul.mubr.bf16.gmra.mxu1 %v9125_v5 }
  0xac   :  { %v764_v21 = vor.u32 %v763_v12, %v760_v11  ;;  %v1038_v22 = vrot.slane %v1036_v13, 4  ;;  %v1050_v23 = vshrl.u32 %v8013_v3, 16  ;;  %v1053_v24 = vshll.u32 %v8013_v3, 16  ;;  %v9147_v25 = vld [vmem:[%s13778_s1 + $0x3b0] ss:$8 sps:$4 sm:$0xff]   ;;  %6338 = vmatprep.subr.bf16.mxu0 %v9146_v20 }
  0xad   :  { %v747_v26 = vsel %vm9884_vm8, %v738_v15, %v746_v10  ;;  %v756_v27 = vrot.slane %v755_v16, 4  ;;  %v1041_v28 = vrot.slane %v1039_v17, 5  ;;  %v9149_v29 = vld [vmem:[%s13778_s1 + $0x3b4] ss:$8 sps:$4 sm:$0xff]   ;;  %v1059_v32 = vshll.u32 %v8014_v9, 16  ;;  %6339 = vmatpush2.bf16.msra.mxu0 %v9144_v14 }
  0xae   :  { %830 = vst [vmem:[#allocation2 + $0x368] sm:$0xf] %v747_v26  ;;  %v1052_v30 = vrot.slane %v1050_v23, 4  ;;  %v1055_v31 = vrot.slane %v1053_v24, 5  ;;  %v9150_v33 = vld [vmem:[%s13778_s1 + $0x2a0] ss:$8 sps:$4 sm:$0xff]   ;;  %6451 = vmatprep.subr.bf16.mxu1 %v9149_v29 }
  0xaf   :  { %v9138_v34 = vld [vmem:[#allocation2 + $0x364] ss:$72 sps:$4 sm:$0xff]   ;;  %v765_v35 = vsel %vm9884_vm8, %v756_v27, %v764_v21  ;;  %v1042_v36 = vor.u32 %v1041_v28, %v1038_v22  ;;  %v1047_v37 = vrot.slane %v1045_v18, 5  ;;  %v9142_v38 = vld [vmem:[#allocation2 + $0x360] ss:$72 sps:$4 sm:$0xff]   ;;  %v1061_v40 = vrot.slane %v1059_v32, 5  ;;  %6452 = vmatpush2.bf16.msra.mxu1 %v9147_v25 }
  0xb0   :  { %831 = vst [vmem:[#allocation2 + $0x3b0] sm:$0xf] %v765_v35  ;;  %v1056_v39 = vor.u32 %v1055_v31, %v1052_v30  ;;  %v9152_v41 = vld [vmem:[%s13778_s1 + $0x2a4] ss:$8 sps:$4 sm:$0xff]   ;;  %v9153_v42 = vld [vmem:[%s13778_s1 + $0x3a0] ss:$8 sps:$4 sm:$0xff]   ;;  %6180 = vmatprep.mubr.bf16.mxu0 %v9138_v34 }
  0xb1   :  { %v1043_v43 = vrot.slane %v1042_v36, 4  ;;  %v9155_v45 = vld [vmem:[%s13778_s1 + $0x3a4] ss:$8 sps:$4 sm:$0xff]   ;;  %v7903_v46 = vld [vmem:[%s13779_s0 + $0x98] sm:$0xf]  ;;  %6181 = vmatmul.mubr.bf16.gmra.mxu0 %v9142_v38  ;;  %6340 = vmatprep.subr.bf16.mxu0 %v9152_v41 }
  0xb2   :  { %v1057_v47 = vrot.slane %v1056_v39, 4  ;;  %v7904_v48 = vld [vmem:[%s13779_s0 + $0x9c] sm:$0x1]  ;;  %v7905_v49 = vld [vmem:[%s13779_s0 + $0xa0] sm:$0xf]  ;;  %v257_v50 = vshrl.u32 %v7903_v46, 16  ;;  %6341 = vmatpush2.bf16.msra.mxu0 %v9150_v33  ;;  %6453 = vmatprep.subr.bf16.mxu1 %v9155_v45 }
  0xb3   :  { %v1048_v51 = vsel %vm9849_vm7, %v1043_v43, %v1047_v37  ;;  %v7906_v52 = vld [vmem:[%s13779_s0 + $0xa4] sm:$0x1]  ;;  %v260_v53 = vshll.u32 %v7903_v46, 16  ;;  %v266_v54 = vshll.u32 %v7904_v48, 16  ;;  %v271_v55 = vshrl.u32 %v7905_v49, 16  ;;  %6454 = vmatpush2.bf16.msra.mxu1 %v9153_v42 }
  0xb4   :  { %v1062_v56 = vsel %vm9849_vm7, %v1057_v47, %v1061_v40  ;;  %1119 = vst [vmem:[#allocation2 + $0x36c] sm:$0xf] %v1048_v51  ;;  %v259_v57 = vrot.slane %v257_v50, 4  ;;  %v274_v58 = vshll.u32 %v7905_v49, 16  ;;  %v280_v59 = vshll.u32 %v7906_v52, 16 }
  0xb5   :  { %v7935_v60 = vld [vmem:[%s13779_s0 + $0x98] sm:$0xe]  ;;  %1120 = vst [vmem:[#allocation2 + $0x3b4] sm:$0xf] %v1062_v56  ;;  %v262_v61 = vrot.slane %v260_v53, 5  ;;  %v273_v62 = vrot.slane %v271_v55, 4 }
  0xb6   :  { %v7936_v63 = vld [vmem:[%s13779_s0 + $0x9c] sm:$0x1]  ;;  %v7953_v0 = vrot.slane %v7935_v60, 9  ;;  %v268_v1 = vrot.slane %v266_v54, 5  ;;  %v276_v2 = vrot.slane %v274_v58, 5  ;;  %v282_v12 = vrot.slane %v280_v59, 5 }
  0xb7   :  { %v7937_v3 = vld [vmem:[%s13779_s0 + $0xa0] sm:$0xe]  ;;  %v7938_v4 = vld [vmem:[%s13779_s0 + $0xa4] sm:$0x1]  ;;  %v263_v5 = vor.u32 %v262_v61, %v259_v57  ;;  %v441_v7 = vrot.slane %v7936_v63, 5 }
  0xb8   :  { %v7954_v8 = vrot.slane %v7937_v3, 9  ;;  %v445_v9 = vrot.slane %v7938_v4, 5  ;;  %v7983_v10 = vld [vmem:[%s13779_s0 + $0x98] sm:$0xe]  ;;  %v277_v11 = vor.u32 %v276_v2, %v273_v62  ;;  %v7984_v13 = vld [vmem:[%s13779_s0 + $0x9c] sm:$0x3] }
  0xb9   :  { %v7985_v14 = vld [vmem:[%s13779_s0 + $0xa0] sm:$0xe]  ;;  %v264_v15 = vrot.slane %v263_v5, 4  ;;  %v442_v16 = vsel %vm9828_vm6, %v7953_v0, %v441_v7  ;;  %v7986_v18 = vld [vmem:[%s13779_s0 + $0xa4] sm:$0x3]  ;;  %v767_v20 = vshrl.u32 %v7983_v10, 16 }
  0xba   :  { %v446_v17 = vsel %vm9828_vm6, %v7954_v8, %v445_v9  ;;  %v278_v21 = vrot.slane %v277_v11, 4  ;;  %477 = vst [vmem:[#allocation2 + $0x3f4] sm:$0xf] %v442_v16  ;;  %v770_v22 = vshll.u32 %v7983_v10, 16  ;;  %v776_v23 = vshrl.u32 %v7984_v13, 16 }
  0xbb   :  { %478 = vst [vmem:[#allocation2 + $0x43c] sm:$0xf] %v446_v17  ;;  %v779_v24 = vshll.u32 %v7984_v13, 16  ;;  %v8015_v25 = vld [vmem:[%s13779_s0 + $0xa0] sm:$0xf]  ;;  %v269_v26 = vsel %vm9849_vm7, %v264_v15, %v268_v1  ;;  %v769_v27 = vrot.slane %v767_v20, 5 }
  0xbc   :  { %v785_v28 = vshrl.u32 %v7985_v14, 16  ;;  %v788_v29 = vshll.u32 %v7985_v14, 16  ;;  %v8016_v30 = vld [vmem:[%s13779_s0 + $0xa4] sm:$0x1]  ;;  %v9140_v31 = vld [vmem:[#allocation2 + $0x36c] ss:$72 sps:$4 sm:$0xff]   ;;  %v283_v33 = vsel %vm9849_vm7, %v278_v21, %v282_v12 }
  0xbd   :  { %v9143_v32 = vld [vmem:[#allocation2 + $0x368] ss:$72 sps:$4 sm:$0xff]   ;;  %314 = vst [vmem:[#allocation2 + $0x3f0] sm:$0xf] %v269_v26  ;;  %v772_v34 = vrot.slane %v770_v22, 6  ;;  %v778_v36 = vrot.slane %v776_v23, 5  ;;  %6293 = vmatprep.mubr.bf16.mxu1 %v9140_v31 }
  0xbe   :  { %v8017_v35 = vld [vmem:[%s13779_s0 + $0xa8] sm:$0xf]  ;;  %315 = vst [vmem:[#allocation2 + $0x438] sm:$0xf] %v283_v33  ;;  %v781_v37 = vrot.slane %v779_v24, 6  ;;  %v787_v38 = vrot.slane %v785_v28, 5  ;;  %6294 = vmatmul.mubr.bf16.gmra.mxu1 %v9143_v32 }
  0xbf   :  { %v790_v39 = vrot.slane %v788_v29, 6  ;;  %v8018_v40 = vld [vmem:[%s13779_s0 + $0xac] sm:$0x1]  ;;  %v9162_v41 = vld [vmem:[%s13778_s1 + $0x290] ss:$8 sps:$4 sm:$0xff]   ;;  %v773_v42 = vor.u32 %v772_v34, %v769_v27  ;;  %v794_v43 = vshrl.u32 %v7986_v18, 16 }
  0xc0   :  { %v797_v45 = vshll.u32 %v7986_v18, 16  ;;  %v1064_v46 = vshrl.u32 %v8015_v25, 16  ;;  %v9164_v47 = vld [vmem:[%s13778_s1 + $0x294] ss:$8 sps:$4 sm:$0xff]   ;;  %v782_v48 = vor.u32 %v781_v37, %v778_v36  ;;  %v1067_v50 = vshll.u32 %v8015_v25, 16 }
  0xc1   :  { %v791_v49 = vor.u32 %v790_v39, %v787_v38  ;;  %v1073_v51 = vshll.u32 %v8016_v30, 16  ;;  %v9165_v52 = vld [vmem:[%s13778_s1 + $0x390] ss:$8 sps:$4 sm:$0xff]   ;;  %v9167_v53 = vld [vmem:[%s13778_s1 + $0x394] ss:$8 sps:$4 sm:$0xff]   ;;  %v774_v54 = vrot.slane %v773_v42, 4  ;;  %6342 = vmatprep.subr.bf16.mxu0 %v9164_v47 }
  0xc2   :  { %v796_v55 = vrot.slane %v794_v43, 5  ;;  %v799_v56 = vrot.slane %v797_v45, 6  ;;  %v1066_v57 = vrot.slane %v1064_v46, 4  ;;  %v9168_v58 = vld [vmem:[%s13778_s1 + $0x280] ss:$8 sps:$4 sm:$0xff]   ;;  %v1069_v60 = vrot.slane %v1067_v50, 5  ;;  %6343 = vmatpush2.bf16.msra.mxu0 %v9162_v41  ;;  %6455 = vmatprep.subr.bf16.mxu1 %v9167_v53 }
  0xc3   :  { %v792_v59 = vrot.slane %v791_v49, 4  ;;  %v1075_v61 = vrot.slane %v1073_v51, 5  ;;  %v1078_v62 = vshrl.u32 %v8017_v35, 16  ;;  %v9170_v63 = vld [vmem:[%s13778_s1 + $0x284] ss:$8 sps:$4 sm:$0xff]   ;;  %v783_v0 = vsel %vm9884_vm8, %v774_v54, %v782_v48  ;;  %6456 = vmatpush2.bf16.msra.mxu1 %v9165_v52 }
  0xc4   :  { %v800_v1 = vor.u32 %v799_v56, %v796_v55  ;;  %v1081_v2 = vshll.u32 %v8017_v35, 16  ;;  %v1087_v3 = vshll.u32 %v8018_v40, 16  ;;  %v9171_v4 = vld [vmem:[%s13778_s1 + $0x380] ss:$8 sps:$4 sm:$0xff]   ;;  %v9173_v5 = vld [vmem:[%s13778_s1 + $0x384] ss:$8 sps:$4 sm:$0xff]   ;;  %v1070_v7 = vor.u32 %v1069_v60, %v1066_v57  ;;  %6344 = vmatprep.subr.bf16.mxu0 %v9170_v63 }
  0xc5   :  { %832 = vst [vmem:[#allocation2 + $0x3f8] sm:$0xf] %v783_v0  ;;  %v1080_v8 = vrot.slane %v1078_v62, 4  ;;  %v8019_v9 = vld [vmem:[%s13779_s0 + $0x10] sm:$0xe]  ;;  %6457 = vmatprep.subr.bf16.mxu1 %v9173_v5 }
  0xc6   :  { %v8020_v10 = vld [vmem:[%s13779_s0 + $0x14] sm:$0x1]  ;;  %v801_v12 = vsel %vm9884_vm8, %v792_v59, %v800_v1  ;;  %v1083_v13 = vrot.slane %v1081_v2, 5  ;;  %v1089_v14 = vrot.slane %v1087_v3, 5  ;;  %v8051_v15 = vrot.slane %v8019_v9, 9  ;;  %6345 = vmatpush2.bf16.msra.mxu0 %v9168_v58 }
  0xc7   :  { %v9156_v11 = vld [vmem:[#allocation2 + $0x3f4] ss:$72 sps:$4 sm:$0xff]   ;;  %833 = vst [vmem:[#allocation2 + $0x440] sm:$0xf] %v801_v12  ;;  %v1071_v16 = vrot.slane %v1070_v7, 4  ;;  %v1189_v20 = vrot.slane %v8020_v10, 5  ;;  %6458 = vmatpush2.bf16.msra.mxu1 %v9171_v4 }
  0xc8   :  { %v9160_v17 = vld [vmem:[#allocation2 + $0x3f0] ss:$72 sps:$4 sm:$0xff]   ;;  %6190 = vmatprep.mubr.bf16.mxu0 %v9156_v11  ;;  %v1084_v21 = vor.u32 %v1083_v13, %v1080_v8  ;;  %v8022_v22 = vld [vmem:[%s13779_s0 + $0x1c] sm:$0x1]  ;;  %v8068_v28 = vld [vmem:[%s13779_s0 + $0x14] sm:$0x3] }
  0xc9   :  { %v8021_v18 = vld [vmem:[%s13779_s0 + $0x18] sm:$0xe]  ;;  %v8067_v24 = vld [vmem:[%s13779_s0 + $0x10] sm:$0xe]  ;;  %v1076_v25 = vsel %vm9849_vm7, %v1071_v16, %v1075_v61  ;;  %6191 = vmatmul.mubr.bf16.gmra.mxu0 %v9160_v17  ;;  %v1190_v26 = vsel %vm9828_vm6, %v8051_v15, %v1189_v20  ;;  %v1193_v27 = vrot.slane %v8022_v22, 5  ;;  %v1325_v34 = vshrl.u32 %v8068_v28, 16 }
  0xca   :  { %v8052_v23 = vrot.slane %v8021_v18, 9  ;;  %v8069_v29 = vld [vmem:[%s13779_s0 + $0x18] sm:$0xe]  ;;  %v1316_v30 = vshrl.u32 %v8067_v24, 16  ;;  %v1085_v31 = vrot.slane %v1084_v21, 4  ;;  %v1319_v33 = vshll.u32 %v8067_v24, 16 }
  0xcb   :  { %1121 = vst [vmem:[#allocation2 + $0x3fc] sm:$0xf] %v1076_v25  ;;  %1267 = vst [vmem:[#allocation2 + $0x10] sm:$0xf] %v1190_v26  ;;  %v8070_v32 = vld [vmem:[%s13779_s0 + $0x1c] sm:$0x3] }
  0xcc   :  { %v1328_v35 = vshll.u32 %v8068_v28, 16  ;;  %v1194_v36 = vsel %vm9828_vm6, %v8052_v23, %v1193_v27  ;;  %v1318_v37 = vrot.slane %v1316_v30, 5  ;;  %v1334_v38 = vshrl.u32 %v8069_v29, 16  ;;  %v9179_v45 = vld [vmem:[%s13778_s1 + $0x474] ss:$8 sps:$4 sm:$0xff]  }
  0xcd   :  { %v1337_v39 = vshll.u32 %v8069_v29, 16  ;;  %v1090_v40 = vsel %vm9849_vm7, %v1085_v31, %v1089_v14  ;;  %1268 = vst [vmem:[#allocation2 + $0x58] sm:$0xf] %v1194_v36  ;;  %v1321_v41 = vrot.slane %v1319_v33, 6  ;;  %v1327_v42 = vrot.slane %v1325_v34, 5  ;;  %6540 = vmatprep.subr.bf16.mxu0 %v9179_v45 }
  0xce   :  { %v1330_v43 = vrot.slane %v1328_v35, 6  ;;  %1122 = vst [vmem:[#allocation2 + $0x444] sm:$0xf] %v1090_v40  ;;  %v1336_v46 = vrot.slane %v1334_v38, 5  ;;  %v1343_v48 = vshrl.u32 %v8070_v32, 16  ;;  %v1346_v49 = vshll.u32 %v8070_v32, 16 }
  0xcf   :  { %v1339_v47 = vrot.slane %v1337_v39, 6  ;;  %v8099_v50 = vld [vmem:[%s13779_s0 + $0x18] sm:$0xf]  ;;  %v1322_v51 = vor.u32 %v1321_v41, %v1318_v37  ;;  %v8100_v53 = vld [vmem:[%s13779_s0 + $0x1c] sm:$0x1] }
  0xd0   :  { %v1331_v52 = vor.u32 %v1330_v43, %v1327_v42  ;;  %v8101_v54 = vld [vmem:[%s13779_s0 + $0x20] sm:$0xf]  ;;  %v8102_v55 = vld [vmem:[%s13779_s0 + $0x24] sm:$0x1]  ;;  %v1345_v57 = vrot.slane %v1343_v48, 5  ;;  %v1348_v58 = vrot.slane %v1346_v49, 6 }
  0xd1   :  { %v1340_v56 = vor.u32 %v1339_v47, %v1336_v46  ;;  %v1669_v59 = vshrl.u32 %v8099_v50, 16  ;;  %v8131_v60 = vld [vmem:[%s13779_s0 + $0x18] sm:$0xe]  ;;  %v1323_v61 = vrot.slane %v1322_v51, 4  ;;  %v1672_v62 = vshll.u32 %v8099_v50, 16 }
  0xd2   :  { %v1678_v63 = vshll.u32 %v8100_v53, 16  ;;  %v1683_v0 = vshrl.u32 %v8101_v54, 16  ;;  %v8132_v1 = vld [vmem:[%s13779_s0 + $0x1c] sm:$0x1]  ;;  %v1349_v3 = vor.u32 %v1348_v58, %v1345_v57  ;;  %v1686_v5 = vshll.u32 %v8101_v54, 16 }
  0xd3   :  { %v1341_v2 = vrot.slane %v1340_v56, 4  ;;  %v1671_v4 = vrot.slane %v1669_v59, 4  ;;  %v8133_v7 = vld [vmem:[%s13779_s0 + $0x20] sm:$0xe]  ;;  %v1332_v8 = vsel %vm9884_vm8, %v1323_v61, %v1331_v52  ;;  %v1674_v9 = vrot.slane %v1672_v62, 5 }
  0xd4   :  { %v1680_v10 = vrot.slane %v1678_v63, 5  ;;  %v1685_v11 = vrot.slane %v1683_v0, 4  ;;  %v8134_v12 = vld [vmem:[%s13779_s0 + $0x24] sm:$0x1]  ;;  %1619 = vst [vmem:[#allocation2 + $0x14] sm:$0xf] %v1332_v8 }
  0xd5   :  { %v1350_v13 = vsel %vm9884_vm8, %v1341_v2, %v1349_v3  ;;  %v1688_v14 = vrot.slane %v1686_v5, 5  ;;  %v1692_v15 = vshll.u32 %v8102_v55, 16  ;;  %v8163_v16 = vrot.slane %v8131_v60, 9  ;;  %v9158_v17 = vld [vmem:[#allocation2 + $0x3fc] ss:$72 sps:$4 sm:$0xff]  }
  0xd6   :  { %v9161_v18 = vld [vmem:[#allocation2 + $0x3f8] ss:$72 sps:$4 sm:$0xff]   ;;  %1620 = vst [vmem:[#allocation2 + $0x5c] sm:$0xf] %v1350_v13  ;;  %v1675_v20 = vor.u32 %v1674_v9, %v1671_v4  ;;  %v1990_v21 = vrot.slane %v8132_v1, 5  ;;  %v8164_v24 = vrot.slane %v8133_v7, 9  ;;  %6303 = vmatprep.mubr.bf16.mxu1 %v9158_v17 }
  0xd7   :  { %v1689_v22 = vor.u32 %v1688_v14, %v1685_v11  ;;  %v1694_v23 = vrot.slane %v1692_v15, 5  ;;  %v1994_v25 = vrot.slane %v8134_v12, 5  ;;  %v9185_v26 = vld [vmem:[%s13778_s1 + $0x574] ss:$8 sps:$4 sm:$0xff]   ;;  %6304 = vmatmul.mubr.bf16.gmra.mxu1 %v9161_v18  ;;  %v8023_v32 = vld [vmem:[%s13779_s0 + $0x20] sm:$0xe] }
  0xd8   :  { %v1676_v27 = vrot.slane %v1675_v20, 4  ;;  %v1991_v28 = vsel %vm9828_vm6, %v8163_v16, %v1990_v21  ;;  %6653 = vmatprep.subr.bf16.mxu1 %v9185_v26  ;;  %v8024_v33 = vld [vmem:[%s13779_s0 + $0x24] sm:$0x1]  ;;  %v8025_v34 = vld [vmem:[%s13779_s0 + $0x28] sm:$0xe]  ;;  %v8053_v38 = vrot.slane %v8023_v32, 9 }
  0xd9   :  { %v1690_v29 = vrot.slane %v1689_v22, 4  ;;  %v1995_v30 = vsel %vm9828_vm6, %v8164_v24, %v1994_v25  ;;  %2068 = vst [vmem:[#allocation2 + $0x1c] sm:$0xf] %v1991_v28  ;;  %v9177_v35 = vld [vmem:[%s13778_s1 + $0x470] ss:$8 sps:$4 sm:$0xff]   ;;  %v1197_v39 = vrot.slane %v8024_v33, 5 }
  0xda   :  { %v1681_v31 = vsel %vm9849_vm7, %v1676_v27, %v1680_v10  ;;  %2069 = vst [vmem:[#allocation2 + $0x64] sm:$0xf] %v1995_v30  ;;  %v8026_v37 = vld [vmem:[%s13779_s0 + $0x2c] sm:$0x1]  ;;  %v8054_v40 = vrot.slane %v8025_v34, 9 }
  0xdb   :  { %v1695_v36 = vsel %vm9849_vm7, %v1690_v29, %v1694_v23  ;;  %1908 = vst [vmem:[#allocation2 + $0x18] sm:$0xf] %v1681_v31  ;;  %v9188_v41 = vld [vmem:[%s13778_s1 + $0x464] ss:$8 sps:$4 sm:$0xff]   ;;  %v1201_v42 = vrot.slane %v8026_v37, 5  ;;  %v1198_v48 = vsel %vm9828_vm6, %v8053_v38, %v1197_v39 }
  0xdc   :  { %1909 = vst [vmem:[#allocation2 + $0x60] sm:$0xf] %v1695_v36  ;;  %v8071_v43 = vld [vmem:[%s13779_s0 + $0x20] sm:$0xe]  ;;  %v8072_v45 = vld [vmem:[%s13779_s0 + $0x24] sm:$0x3] }
  0xdd   :  { %v9174_v46 = vld [vmem:[#allocation2 + $0x10] ss:$72 sps:$4 sm:$0xff]   ;;  %v9176_v47 = vld [vmem:[#allocation2 + $0x14] ss:$72 sps:$4 sm:$0xff]   ;;  %v1352_v49 = vshrl.u32 %v8071_v43, 16  ;;  %v1202_v50 = vsel %vm9828_vm6, %v8054_v40, %v1201_v42  ;;  %v1355_v53 = vshll.u32 %v8071_v43, 16 }
  0xde   :  { %1269 = vst [vmem:[#allocation2 + $0xa0] sm:$0xf] %v1198_v48  ;;  %v8073_v51 = vld [vmem:[%s13779_s0 + $0x28] sm:$0xe]  ;;  %v8074_v52 = vld [vmem:[%s13779_s0 + $0x2c] sm:$0x3]  ;;  %6346 = vmatprep.mubr.bf16.mxu0 %v9176_v47 }
  0xdf   :  { %v1361_v54 = vshrl.u32 %v8072_v45, 16  ;;  %v9186_v55 = vld [vmem:[%s13778_s1 + $0x460] ss:$8 sps:$4 sm:$0xff]   ;;  %1270 = vst [vmem:[#allocation2 + $0xe8] sm:$0xf] %v1202_v50  ;;  %v1354_v56 = vrot.slane %v1352_v49, 5  ;;  %6347 = vmatmul.mubr.bf16.vlgmr.msra.gmra.mxu0 %v9174_v46 }
  0xe0   :  { %v1364_v57 = vshll.u32 %v8072_v45, 16  ;;  %v1370_v58 = vshrl.u32 %v8073_v51, 16  ;;  %v1373_v59 = vshll.u32 %v8073_v51, 16  ;;  %v1357_v60 = vrot.slane %v1355_v53, 6  ;;  %v9197_v0 = vld [vmem:[%s13778_s1 + $0x454] ss:$8 sps:$4 sm:$0xff]   ;;  %6541 = vmatpush1.bf16.msra.mxu0 %v9177_v35 }
  0xe1   :  { %v1363_v61 = vrot.slane %v1361_v54, 5  ;;  %v1379_v62 = vshrl.u32 %v8074_v52, 16  ;;  %v1382_v63 = vshll.u32 %v8074_v52, 16  ;;  %v9183_v1 = vld [vmem:[%s13778_s1 + $0x570] ss:$8 sps:$4 sm:$0xff]   ;;  %6542 = vmatprep.subr.bf16.mxu0 %v9188_v41 }
  0xe2   :  { %v1366_v2 = vrot.slane %v1364_v57, 6  ;;  %v1372_v3 = vrot.slane %v1370_v58, 5  ;;  %v1375_v4 = vrot.slane %v1373_v59, 6  ;;  %v8103_v5 = vld [vmem:[%s13779_s0 + $0x28] sm:$0xf]  ;;  %v1358_v8 = vor.u32 %v1357_v60, %v1354_v56 }
  0xe3   :  { %v9191_v7 = vld [vmem:[%s13778_s1 + $0x564] ss:$8 sps:$4 sm:$0xff]   ;;  %v1381_v9 = vrot.slane %v1379_v62, 5  ;;  %v1384_v10 = vrot.slane %v1382_v63, 6  ;;  %v1697_v12 = vshrl.u32 %v8103_v5, 16  ;;  %v1700_v18 = vshll.u32 %v8103_v5, 16 }
  0xe4   :  { %v8104_v11 = vld [vmem:[%s13779_s0 + $0x2c] sm:$0x1]  ;;  %v9180_v13 = vld [vmem:[#allocation2 + $0x18] ss:$72 sps:$4 sm:$0xff]   ;;  %v9182_v14 = vld [vmem:[#allocation2 + $0x1c] ss:$72 sps:$4 sm:$0xff]   ;;  %v1367_v15 = vor.u32 %v1366_v2, %v1363_v61  ;;  %v1376_v16 = vor.u32 %v1375_v4, %v1372_v3  ;;  %6543 = vmatpush1.bf16.msra.mxu0 %v9186_v55 }
  0xe5   :  { %v9195_v17 = vld [vmem:[%s13778_s1 + $0x450] ss:$8 sps:$4 sm:$0xff]   ;;  %v1359_v20 = vrot.slane %v1358_v8, 4  ;;  %v1385_v21 = vor.u32 %v1384_v10, %v1381_v9  ;;  %v8106_v23 = vld [vmem:[%s13779_s0 + $0x34] sm:$0x1]  ;;  %v1699_v24 = vrot.slane %v1697_v12, 4  ;;  %6459 = vmatprep.mubr.bf16.mxu1 %v9182_v14  ;;  %6544 = vmatprep.subr.bf16.mxu0 %v9197_v0 }
  0xe6   :  { %v8105_v22 = vld [vmem:[%s13779_s0 + $0x30] sm:$0xf]  ;;  %v1377_v25 = vrot.slane %v1376_v16, 4  ;;  %v1702_v26 = vrot.slane %v1700_v18, 5  ;;  %v1706_v27 = vshll.u32 %v8104_v11, 16  ;;  %6460 = vmatmul.mubr.bf16.vlgmr.msra.gmra.mxu1 %v9180_v13  ;;  %v1720_v32 = vshll.u32 %v8106_v23, 16 }
  0xe7   :  { %v1711_v28 = vshrl.u32 %v8105_v22, 16  ;;  %v8135_v29 = vld [vmem:[%s13779_s0 + $0x28] sm:$0xe]  ;;  %v1368_v30 = vsel %vm9884_vm8, %v1359_v20, %v1367_v15  ;;  %v1714_v31 = vshll.u32 %v8105_v22, 16  ;;  %v8136_v33 = vld [vmem:[%s13779_s0 + $0x2c] sm:$0x1]  ;;  %6654 = vmatpush1.bf16.msra.mxu1 %v9183_v1 }
  0xe8   :  { %v8137_v34 = vld [vmem:[%s13779_s0 + $0x30] sm:$0xe]  ;;  %v9189_v35 = vld [vmem:[%s13778_s1 + $0x560] ss:$8 sps:$4 sm:$0xff]   ;;  %v1386_v36 = vsel %vm9884_vm8, %v1377_v25, %v1385_v21  ;;  %1621 = vst [vmem:[#allocation2 + $0xa4] sm:$0xf] %v1368_v30  ;;  %v1703_v37 = vor.u32 %v1702_v26, %v1699_v24  ;;  %6655 = vmatprep.subr.bf16.mxu1 %v9191_v7  ;;  %6545 = vmatpush1.bf16.msra.mxu0 %v9195_v17 }
  0xe9   :  { %v1708_v38 = vrot.slane %v1706_v27, 5  ;;  %v1713_v39 = vrot.slane %v1711_v28, 4  ;;  %v8138_v40 = vld [vmem:[%s13779_s0 + $0x34] sm:$0x1]  ;;  %1622 = vst [vmem:[#allocation2 + $0xec] sm:$0xf] %v1386_v36 }
  0xea   :  { %v1716_v41 = vrot.slane %v1714_v31, 5  ;;  %v8165_v42 = vrot.slane %v8135_v29, 9  ;;  %v1998_v43 = vrot.slane %v8136_v33, 5  ;;  %v9203_v45 = vld [vmem:[%s13778_s1 + $0x554] ss:$8 sps:$4 sm:$0xff]   ;;  %v1704_v46 = vrot.slane %v1703_v37, 4 }
  0xeb   :  { %v8166_v47 = vrot.slane %v8137_v34, 9  ;;  %v2002_v48 = vrot.slane %v8138_v40, 5  ;;  %v9204_v49 = vld [vmem:[%s13778_s1 + $0x440] ss:$8 sps:$4 sm:$0xff]   ;;  %v1722_v51 = vrot.slane %v1720_v32, 5  ;;  %6656 = vmatpush1.bf16.msra.mxu1 %v9189_v35 }
  0xec   :  { %v1717_v50 = vor.u32 %v1716_v41, %v1713_v39  ;;  %v1999_v52 = vsel %vm9828_vm6, %v8165_v42, %v1998_v43  ;;  %v9206_v53 = vld [vmem:[%s13778_s1 + $0x444] ss:$8 sps:$4 sm:$0xff]   ;;  %v1709_v54 = vsel %vm9849_vm7, %v1704_v46, %v1708_v38  ;;  %v9201_v56 = vld [vmem:[%s13778_s1 + $0x550] ss:$8 sps:$4 sm:$0xff]   ;;  %6657 = vmatprep.subr.bf16.mxu1 %v9203_v45  ;;  %v8028_v60 = vld [vmem:[%s13779_s0 + $0x34] sm:$0x1] }
  0xed   :  { %v2003_v55 = vsel %vm9828_vm6, %v8166_v47, %v2002_v48  ;;  %2070 = vst [vmem:[#allocation2 + $0xac] sm:$0xf] %v1999_v52  ;;  %v9209_v57 = vld [vmem:[%s13778_s1 + $0x544] ss:$8 sps:$4 sm:$0xff]   ;;  %v8027_v58 = vld [vmem:[%s13779_s0 + $0x30] sm:$0xe]  ;;  %6546 = vmatprep.subr.bf16.mxu0 %v9206_v53 }
  0xee   :  { %v1718_v59 = vrot.slane %v1717_v50, 4  ;;  %1910 = vst [vmem:[#allocation2 + $0xa8] sm:$0xf] %v1709_v54  ;;  %2071 = vst [vmem:[#allocation2 + $0xf4] sm:$0xf] %v2003_v55  ;;  %v8055_v62 = vrot.slane %v8027_v58, 9  ;;  %6547 = vmatpush1.bf16.msra.mxu0 %v9204_v49 }
  0xef   :  { %v8029_v61 = vld [vmem:[%s13779_s0 + $0x38] sm:$0xe]  ;;  %v9207_v63 = vld [vmem:[%s13778_s1 + $0x540] ss:$8 sps:$4 sm:$0xff]   ;;  %v8030_v0 = vld [vmem:[%s13779_s0 + $0x3c] sm:$0x1]  ;;  %6658 = vmatpush1.bf16.msra.mxu1 %v9201_v56 }
  0xf0   :  { %v1205_v1 = vrot.slane %v8028_v60, 5  ;;  %v8056_v2 = vrot.slane %v8029_v61, 9  ;;  %v8075_v3 = vld [vmem:[%s13779_s0 + $0x30] sm:$0xe]  ;;  %v1723_v4 = vsel %vm9849_vm7, %v1718_v59, %v1722_v51  ;;  %v1209_v5 = vrot.slane %v8030_v0, 5  ;;  %6659 = vmatprep.subr.bf16.mxu1 %v9209_v57 }
  0xf1   :  { %v8076_v7 = vld [vmem:[%s13779_s0 + $0x34] sm:$0x3]  ;;  %v8077_v8 = vld [vmem:[%s13779_s0 + $0x38] sm:$0xe]  ;;  %v9192_v9 = vld [vmem:[#allocation2 + $0xa4] ss:$72 sps:$4 sm:$0xff]  }
  0xf2   :  { %v9194_v10 = vld [vmem:[#allocation2 + $0xa0] ss:$72 sps:$4 sm:$0xff]   ;;  %1911 = vst [vmem:[#allocation2 + $0xf0] sm:$0xf] %v1723_v4  ;;  %v1206_v11 = vsel %vm9828_vm6, %v8055_v62, %v1205_v1  ;;  %v1388_v12 = vshrl.u32 %v8075_v3, 16  ;;  %v1210_v13 = vsel %vm9828_vm6, %v8056_v2, %v1209_v5  ;;  %v1391_v15 = vshll.u32 %v8075_v3, 16  ;;  %6356 = vmatprep.mubr.bf16.mxu0 %v9192_v9 }
  0xf3   :  { %1271 = vst [vmem:[#allocation2 + $0x130] sm:$0xf] %v1206_v11  ;;  %v8078_v14 = vld [vmem:[%s13779_s0 + $0x3c] sm:$0x3]  ;;  %v1397_v16 = vshrl.u32 %v8076_v7, 16  ;;  %v1400_v17 = vshll.u32 %v8076_v7, 16  ;;  %6357 = vmatmul.mubr.bf16.gmra.mxu0 %v9194_v10  ;;  %6660 = vmatpush1.bf16.msra.mxu1 %v9207_v63 }
  0xf4   :  { %1272 = vst [vmem:[#allocation2 + $0x178] sm:$0xf] %v1210_v13  ;;  %v1390_v18 = vrot.slane %v1388_v12, 5  ;;  %v1406_v20 = vshrl.u32 %v8077_v8, 16  ;;  %v1409_v21 = vshll.u32 %v8077_v8, 16  ;;  %v1415_v22 = vshrl.u32 %v8078_v14, 16 }
  0xf5   :  { %v1393_v23 = vrot.slane %v1391_v15, 6  ;;  %v1399_v24 = vrot.slane %v1397_v16, 5  ;;  %v1402_v25 = vrot.slane %v1400_v17, 6  ;;  %v1418_v26 = vshll.u32 %v8078_v14, 16  ;;  %v9213_v27 = vld [vmem:[%s13778_s1 + $0x430] ss:$8 sps:$4 sm:$0xff]  }
  0xf6   :  { %v1408_v28 = vrot.slane %v1406_v20, 5  ;;  %v1411_v29 = vrot.slane %v1409_v21, 6  ;;  %v1417_v30 = vrot.slane %v1415_v22, 5  ;;  %v9215_v31 = vld [vmem:[%s13778_s1 + $0x434] ss:$8 sps:$4 sm:$0xff]  }
  0xf7   :  { %v1394_v32 = vor.u32 %v1393_v23, %v1390_v18  ;;  %v1403_v33 = vor.u32 %v1402_v25, %v1399_v24  ;;  %v1420_v34 = vrot.slane %v1418_v26, 6  ;;  %v8107_v35 = vld [vmem:[%s13779_s0 + $0x38] sm:$0xf]  ;;  %v8108_v36 = vld [vmem:[%s13779_s0 + $0x3c] sm:$0x1]  ;;  %6548 = vmatprep.subr.bf16.mxu0 %v9215_v31 }
  0xf8   :  { %v1412_v37 = vor.u32 %v1411_v29, %v1408_v28  ;;  %v8109_v38 = vld [vmem:[%s13779_s0 + $0x40] sm:$0xf]  ;;  %v8110_v39 = vld [vmem:[%s13779_s0 + $0x44] sm:$0x1]  ;;  %v1725_v40 = vshrl.u32 %v8107_v35, 16  ;;  %v1728_v41 = vshll.u32 %v8107_v35, 16  ;;  %6549 = vmatpush1.bf16.msra.mxu0 %v9213_v27 }
  0xf9   :  { %v9198_v42 = vld [vmem:[#allocation2 + $0xac] ss:$72 sps:$4 sm:$0xff]   ;;  %v9200_v43 = vld [vmem:[#allocation2 + $0xa8] ss:$72 sps:$4 sm:$0xff]   ;;  %v1395_v45 = vrot.slane %v1394_v32, 4  ;;  %v1421_v46 = vor.u32 %v1420_v34, %v1417_v30  ;;  %v1734_v50 = vshll.u32 %v8108_v36, 16 }
  0xfa   :  { %v1413_v47 = vrot.slane %v1412_v37, 4  ;;  %v1727_v48 = vrot.slane %v1725_v40, 4  ;;  %v1730_v49 = vrot.slane %v1728_v41, 5  ;;  %v8139_v51 = vld [vmem:[%s13779_s0 + $0x38] sm:$0xe]  ;;  %6469 = vmatprep.mubr.bf16.mxu1 %v9198_v42  ;;  %v1739_v53 = vshrl.u32 %v8109_v38, 16 }
  0xfb   :  { %v1404_v52 = vsel %vm9884_vm8, %v1395_v45, %v1403_v33  ;;  %v1742_v54 = vshll.u32 %v8109_v38, 16  ;;  %v1748_v55 = vshll.u32 %v8110_v39, 16  ;;  %v8140_v56 = vld [vmem:[%s13779_s0 + $0x3c] sm:$0x1]  ;;  %6470 = vmatmul.mubr.bf16.gmra.mxu1 %v9200_v43  ;;  %v1736_v59 = vrot.slane %v1734_v50, 5 }
  0xfc   :  { %v1422_v57 = vsel %vm9884_vm8, %v1413_v47, %v1421_v46  ;;  %1623 = vst [vmem:[#allocation2 + $0x134] sm:$0xf] %v1404_v52  ;;  %v1731_v58 = vor.u32 %v1730_v49, %v1727_v48  ;;  %v8141_v60 = vld [vmem:[%s13779_s0 + $0x40] sm:$0xe]  ;;  %v8142_v61 = vld [vmem:[%s13779_s0 + $0x44] sm:$0x1] }
  0xfd   :  { %v8167_v62 = vrot.slane %v8139_v51, 9  ;;  %1624 = vst [vmem:[#allocation2 + $0x17c] sm:$0xf] %v1422_v57  ;;  %v1741_v63 = vrot.slane %v1739_v53, 4  ;;  %v1744_v0 = vrot.slane %v1742_v54, 5  ;;  %v2006_v1 = vrot.slane %v8140_v56, 5 }
  0xfe   :  { %v9219_v2 = vld [vmem:[%s13778_s1 + $0x530] ss:$8 sps:$4 sm:$0xff]   ;;  %v1732_v3 = vrot.slane %v1731_v58, 4  ;;  %v8168_v4 = vrot.slane %v8141_v60, 9  ;;  %v2010_v5 = vrot.slane %v8142_v61, 5  ;;  %v1750_v9 = vrot.slane %v1748_v55, 5 }
  0xff   :  { %v9221_v7 = vld [vmem:[%s13778_s1 + $0x534] ss:$8 sps:$4 sm:$0xff]   ;;  %v1745_v8 = vor.u32 %v1744_v0, %v1741_v63  ;;  %v2007_v10 = vsel %vm9828_vm6, %v8167_v62, %v2006_v1  ;;  %v9222_v11 = vld [vmem:[%s13778_s1 + $0x420] ss:$8 sps:$4 sm:$0xff]   ;;  %v9224_v12 = vld [vmem:[%s13778_s1 + $0x424] ss:$8 sps:$4 sm:$0xff]  }
 0x100   :  { %v1737_v13 = vsel %vm9849_vm7, %v1732_v3, %v1736_v59  ;;  %v2011_v14 = vsel %vm9828_vm6, %v8168_v4, %v2010_v5  ;;  %2072 = vst [vmem:[#allocation2 + $0x13c] sm:$0xf] %v2007_v10  ;;  %6661 = vmatprep.subr.bf16.mxu1 %v9221_v7  ;;  %v9225_v15 = vld [vmem:[%s13778_s1 + $0x520] ss:$8 sps:$4 sm:$0xff]   ;;  %v9227_v16 = vld [vmem:[%s13778_s1 + $0x524] ss:$8 sps:$4 sm:$0xff]   ;;  %6550 = vmatprep.subr.bf16.mxu0 %v9224_v12 }
 0x101   :  { %v1746_v17 = vrot.slane %v1745_v8, 4  ;;  %1912 = vst [vmem:[#allocation2 + $0x138] sm:$0xf] %v1737_v13  ;;  %2073 = vst [vmem:[#allocation2 + $0x184] sm:$0xf] %v2011_v14  ;;  %6662 = vmatpush1.bf16.msra.mxu1 %v9219_v2  ;;  %6551 = vmatpush1.bf16.msra.mxu0 %v9222_v11 }
 0x102   :  { %v8031_v18 = vld [vmem:[%s13779_s0 + $0x40] sm:$0xe]  ;;  %v8032_v20 = vld [vmem:[%s13779_s0 + $0x44] sm:$0x1]  ;;  %6663 = vmatprep.subr.bf16.mxu1 %v9227_v16  ;;  %v8033_v21 = vld [vmem:[%s13779_s0 + $0x48] sm:$0xe] }
 0x103   :  { %v8034_v22 = vld [vmem:[%s13779_s0 + $0x4c] sm:$0x1]  ;;  %v8057_v23 = vrot.slane %v8031_v18, 9  ;;  %v1213_v24 = vrot.slane %v8032_v20, 5  ;;  %v1751_v25 = vsel %vm9849_vm7, %v1746_v17, %v1750_v9  ;;  %v8058_v26 = vrot.slane %v8033_v21, 9 }
 0x104   :  { %v1217_v27 = vrot.slane %v8034_v22, 5  ;;  %v8079_v28 = vld [vmem:[%s13779_s0 + $0x40] sm:$0xe]  ;;  %v9210_v29 = vld [vmem:[#allocation2 + $0x134] ss:$72 sps:$4 sm:$0xff]  }
 0x105   :  { %v9212_v30 = vld [vmem:[#allocation2 + $0x130] ss:$72 sps:$4 sm:$0xff]   ;;  %1913 = vst [vmem:[#allocation2 + $0x180] sm:$0xf] %v1751_v25  ;;  %v1214_v31 = vsel %vm9828_vm6, %v8057_v23, %v1213_v24  ;;  %v1424_v32 = vshrl.u32 %v8079_v28, 16  ;;  %6664 = vmatpush1.bf16.msra.mxu1 %v9225_v15  ;;  %6366 = vmatprep.mubr.bf16.mxu0 %v9210_v29  ;;  %v1427_v38 = vshll.u32 %v8079_v28, 16 }
 0x106   :  { %v1218_v33 = vsel %vm9828_vm6, %v8058_v26, %v1217_v27  ;;  %1273 = vst [vmem:[#allocation2 + $0x1c0] sm:$0xf] %v1214_v31  ;;  %v8080_v34 = vld [vmem:[%s13779_s0 + $0x44] sm:$0x3]  ;;  %v8081_v35 = vld [vmem:[%s13779_s0 + $0x48] sm:$0xe]  ;;  %6367 = vmatmul.mubr.bf16.gmra.mxu0 %v9212_v30 }
 0x107   :  { %v8082_v36 = vld [vmem:[%s13779_s0 + $0x4c] sm:$0x3]  ;;  %1274 = vst [vmem:[#allocation2 + $0x208] sm:$0xf] %v1218_v33  ;;  %v1426_v37 = vrot.slane %v1424_v32, 5  ;;  %v1433_v39 = vshrl.u32 %v8080_v34, 16 }
 0x108   :  { %v1436_v40 = vshll.u32 %v8080_v34, 16  ;;  %v9231_v41 = vld [vmem:[%s13778_s1 + $0x410] ss:$8 sps:$4 sm:$0xff]   ;;  %v1442_v42 = vshrl.u32 %v8081_v35, 16  ;;  %v1445_v43 = vshll.u32 %v8081_v35, 16  ;;  %v1451_v45 = vshrl.u32 %v8082_v36, 16 }
 0x109   :  { %v1454_v46 = vshll.u32 %v8082_v36, 16  ;;  %v9233_v47 = vld [vmem:[%s13778_s1 + $0x414] ss:$8 sps:$4 sm:$0xff]   ;;  %v1429_v48 = vrot.slane %v1427_v38, 6  ;;  %v1435_v49 = vrot.slane %v1433_v39, 5 }
 0x10a   :  { %v1438_v50 = vrot.slane %v1436_v40, 6  ;;  %v8111_v51 = vld [vmem:[%s13779_s0 + $0x48] sm:$0xf]  ;;  %v1444_v52 = vrot.slane %v1442_v42, 5  ;;  %v1447_v53 = vrot.slane %v1445_v43, 6  ;;  %v1453_v54 = vrot.slane %v1451_v45, 5  ;;  %6552 = vmatprep.subr.bf16.mxu0 %v9233_v47 }
 0x10b   :  { %v1456_v55 = vrot.slane %v1454_v46, 6  ;;  %v8112_v56 = vld [vmem:[%s13779_s0 + $0x4c] sm:$0x1]  ;;  %v1430_v57 = vor.u32 %v1429_v48, %v1426_v37  ;;  %v8113_v59 = vld [vmem:[%s13779_s0 + $0x50] sm:$0xf]  ;;  %v1753_v61 = vshrl.u32 %v8111_v51, 16  ;;  %6553 = vmatpush1.bf16.msra.mxu0 %v9231_v41 }
 0x10c   :  { %v1439_v58 = vor.u32 %v1438_v50, %v1435_v49  ;;  %v8114_v60 = vld [vmem:[%s13779_s0 + $0x54] sm:$0x1]  ;;  %v1756_v62 = vshll.u32 %v8111_v51, 16  ;;  %v9216_v63 = vld [vmem:[#allocation2 + $0x13c] ss:$72 sps:$4 sm:$0xff]   ;;  %v1448_v1 = vor.u32 %v1447_v53, %v1444_v52  ;;  %v1762_v3 = vshll.u32 %v8112_v56, 16 }
 0x10d   :  { %v9218_v0 = vld [vmem:[#allocation2 + $0x138] ss:$72 sps:$4 sm:$0xff]   ;;  %v1457_v2 = vor.u32 %v1456_v55, %v1453_v54  ;;  %v1431_v4 = vrot.slane %v1430_v57, 4  ;;  %v1755_v5 = vrot.slane %v1753_v61, 4  ;;  %v1767_v8 = vshrl.u32 %v8113_v59, 16  ;;  %6479 = vmatprep.mubr.bf16.mxu1 %v9216_v63 }
 0x10e   :  { %v1758_v7 = vrot.slane %v1756_v62, 5  ;;  %v8143_v9 = vld [vmem:[%s13779_s0 + $0x48] sm:$0xe]  ;;  %v1449_v10 = vrot.slane %v1448_v1, 4  ;;  %v1764_v11 = vrot.slane %v1762_v3, 5  ;;  %v1770_v12 = vshll.u32 %v8113_v59, 16  ;;  %6480 = vmatmul.mubr.bf16.gmra.mxu1 %v9218_v0 }
 0x10f   :  { %v1776_v13 = vshll.u32 %v8114_v60, 16  ;;  %v8144_v14 = vld [vmem:[%s13779_s0 + $0x4c] sm:$0x1]  ;;  %v1440_v15 = vsel %vm9884_vm8, %v1431_v4, %v1439_v58  ;;  %v1769_v17 = vrot.slane %v1767_v8, 4  ;;  %v8145_v18 = vld [vmem:[%s13779_s0 + $0x50] sm:$0xe] }
 0x110   :  { %v1759_v16 = vor.u32 %v1758_v7, %v1755_v5  ;;  %v8146_v20 = vld [vmem:[%s13779_s0 + $0x54] sm:$0x1]  ;;  %v8169_v21 = vrot.slane %v8143_v9, 9  ;;  %v1458_v22 = vsel %vm9884_vm8, %v1449_v10, %v1457_v2  ;;  %1625 = vst [vmem:[#allocation2 + $0x1c4] sm:$0xf] %v1440_v15  ;;  %v1772_v23 = vrot.slane %v1770_v12, 5 }
 0x111   :  { %v1778_v24 = vrot.slane %v1776_v13, 5  ;;  %v2014_v25 = vrot.slane %v8144_v14, 5  ;;  %1626 = vst [vmem:[#allocation2 + $0x20c] sm:$0xf] %v1458_v22  ;;  %v8170_v27 = vrot.slane %v8145_v18, 9  ;;  %v2018_v28 = vrot.slane %v8146_v20, 5 }
 0x112   :  { %v1760_v26 = vrot.slane %v1759_v16, 4  ;;  %v9237_v29 = vld [vmem:[%s13778_s1 + $0x510] ss:$8 sps:$4 sm:$0xff]   ;;  %v1773_v30 = vor.u32 %v1772_v23, %v1769_v17  ;;  %v9239_v32 = vld [vmem:[%s13778_s1 + $0x514] ss:$8 sps:$4 sm:$0xff]  }
 0x113   :  { %v2015_v31 = vsel %vm9828_vm6, %v8169_v21, %v2014_v25  ;;  %v9240_v33 = vld [vmem:[%s13778_s1 + $0x400] ss:$8 sps:$4 sm:$0xff]   ;;  %v9242_v34 = vld [vmem:[%s13778_s1 + $0x404] ss:$8 sps:$4 sm:$0xff]   ;;  %v2019_v36 = vsel %vm9828_vm6, %v8170_v27, %v2018_v28  ;;  %6665 = vmatprep.subr.bf16.mxu1 %v9239_v32  ;;  %v8035_v40 = vld [vmem:[%s13779_s0 + $0x70] sm:$0xe] }
 0x114   :  { %v1765_v35 = vsel %vm9849_vm7, %v1760_v26, %v1764_v11  ;;  %2074 = vst [vmem:[#allocation2 + $0x1cc] sm:$0xf] %v2015_v31  ;;  %v9243_v37 = vld [vmem:[%s13778_s1 + $0x500] ss:$8 sps:$4 sm:$0xff]   ;;  %v1774_v38 = vrot.slane %v1773_v30, 4  ;;  %6554 = vmatprep.subr.bf16.mxu0 %v9242_v34  ;;  %6666 = vmatpush1.bf16.msra.mxu1 %v9237_v29  ;;  %v8059_v46 = vrot.slane %v8035_v40, 9 }
 0x115   :  { %1914 = vst [vmem:[#allocation2 + $0x1c8] sm:$0xf] %v1765_v35  ;;  %2075 = vst [vmem:[#allocation2 + $0x214] sm:$0xf] %v2019_v36  ;;  %v9245_v39 = vld [vmem:[%s13778_s1 + $0x504] ss:$8 sps:$4 sm:$0xff]   ;;  %6555 = vmatpush1.bf16.msra.mxu0 %v9240_v33 }
 0x116   :  { %v8036_v41 = vld [vmem:[%s13779_s0 + $0x74] sm:$0x1]  ;;  %v8037_v42 = vld [vmem:[%s13779_s0 + $0x78] sm:$0xe]  ;;  %v8038_v43 = vld [vmem:[%s13779_s0 + $0x7c] sm:$0x1]  ;;  %v1779_v45 = vsel %vm9849_vm7, %v1774_v38, %v1778_v24  ;;  %6667 = vmatprep.subr.bf16.mxu1 %v9245_v39 }
 0x117   :  { %v1221_v47 = vrot.slane %v8036_v41, 5  ;;  %v8060_v48 = vrot.slane %v8037_v42, 9  ;;  %v8083_v49 = vld [vmem:[%s13779_s0 + $0x70] sm:$0xe]  ;;  %1915 = vst [vmem:[#allocation2 + $0x210] sm:$0xf] %v1779_v45 }
 0x118   :  { %v1225_v50 = vrot.slane %v8038_v43, 5  ;;  %v8084_v51 = vld [vmem:[%s13779_s0 + $0x74] sm:$0x3]  ;;  %v8085_v52 = vld [vmem:[%s13779_s0 + $0x78] sm:$0xe]  ;;  %v1460_v56 = vshrl.u32 %v8083_v49, 16  ;;  %6668 = vmatpush1.bf16.msra.mxu1 %v9243_v37 }
 0x119   :  { %v9228_v53 = vld [vmem:[#allocation2 + $0x1c4] ss:$72 sps:$4 sm:$0xff]   ;;  %v9230_v54 = vld [vmem:[#allocation2 + $0x1c0] ss:$72 sps:$4 sm:$0xff]   ;;  %v1222_v55 = vsel %vm9828_vm6, %v8059_v46, %v1221_v47  ;;  %v8086_v58 = vld [vmem:[%s13779_s0 + $0x7c] sm:$0x3] }
 0x11a   :  { %v1226_v57 = vsel %vm9828_vm6, %v8060_v48, %v1225_v50  ;;  %1275 = vst [vmem:[#allocation2 + $0x250] sm:$0xf] %v1222_v55  ;;  %v1463_v59 = vshll.u32 %v8083_v49, 16  ;;  %v1469_v60 = vshrl.u32 %v8084_v51, 16  ;;  %v1472_v61 = vshll.u32 %v8084_v51, 16  ;;  %6376 = vmatprep.mubr.bf16.mxu0 %v9228_v53 }
 0x11b   :  { %1276 = vst [vmem:[#allocation2 + $0x298] sm:$0xf] %v1226_v57  ;;  %v1462_v62 = vrot.slane %v1460_v56, 5  ;;  %v1478_v63 = vshrl.u32 %v8085_v52, 16  ;;  %v1481_v0 = vshll.u32 %v8085_v52, 16  ;;  %v1487_v1 = vshrl.u32 %v8086_v58, 16  ;;  %6377 = vmatmul.mubr.bf16.gmra.mxu0 %v9230_v54 }
 0x11c   :  { %v9249_v2 = vld [vmem:[%s13778_s1 + $0x4f0] ss:$8 sps:$4 sm:$0xff]   ;;  %v1465_v3 = vrot.slane %v1463_v59, 6  ;;  %v1471_v4 = vrot.slane %v1469_v60, 5  ;;  %v1474_v5 = vrot.slane %v1472_v61, 6  ;;  %v1490_v7 = vshll.u32 %v8086_v58, 16 }
 0x11d   :  { %v1480_v8 = vrot.slane %v1478_v63, 5  ;;  %v1483_v9 = vrot.slane %v1481_v0, 6  ;;  %v1489_v10 = vrot.slane %v1487_v1, 5  ;;  %v9251_v11 = vld [vmem:[%s13778_s1 + $0x4f4] ss:$8 sps:$4 sm:$0xff]  }
 0x11e   :  { %v1466_v12 = vor.u32 %v1465_v3, %v1462_v62  ;;  %v1475_v13 = vor.u32 %v1474_v5, %v1471_v4  ;;  %v1492_v14 = vrot.slane %v1490_v7, 6  ;;  %v8115_v15 = vld [vmem:[%s13779_s0 + $0x78] sm:$0xf]  ;;  %v8116_v16 = vld [vmem:[%s13779_s0 + $0x7c] sm:$0x1]  ;;  %6556 = vmatprep.subr.bf16.mxu0 %v9251_v11 }
 0x11f   :  { %v9234_v17 = vld [vmem:[#allocation2 + $0x1cc] ss:$72 sps:$4 sm:$0xff]   ;;  %v9236_v18 = vld [vmem:[#allocation2 + $0x1c8] ss:$72 sps:$4 sm:$0xff]   ;;  %v1484_v20 = vor.u32 %v1483_v9, %v1480_v8  ;;  %v1781_v21 = vshrl.u32 %v8115_v15, 16  ;;  %v1784_v26 = vshll.u32 %v8115_v15, 16  ;;  %6557 = vmatpush2.bf16.msra.mxu0 %v9249_v2 }
 0x120   :  { %v1467_v22 = vrot.slane %v1466_v12, 4  ;;  %v1493_v23 = vor.u32 %v1492_v14, %v1489_v10  ;;  %v8117_v24 = vld [vmem:[%s13779_s0 + $0x80] sm:$0xf]  ;;  %v8118_v25 = vld [vmem:[%s13779_s0 + $0x84] sm:$0x1]  ;;  %6489 = vmatprep.mubr.bf16.mxu1 %v9234_v17  ;;  %v1790_v29 = vshll.u32 %v8116_v16, 16 }
 0x121   :  { %v1485_v27 = vrot.slane %v1484_v20, 4  ;;  %v1783_v28 = vrot.slane %v1781_v21, 4  ;;  %v1795_v30 = vshrl.u32 %v8117_v24, 16  ;;  %v8147_v31 = vld [vmem:[%s13779_s0 + $0x78] sm:$0xe]  ;;  %6490 = vmatmul.mubr.bf16.gmra.mxu1 %v9236_v18  ;;  %v1786_v33 = vrot.slane %v1784_v26, 5 }
 0x122   :  { %v1476_v32 = vsel %vm9884_vm8, %v1467_v22, %v1475_v13  ;;  %v1798_v34 = vshll.u32 %v8117_v24, 16  ;;  %v1804_v35 = vshll.u32 %v8118_v25, 16  ;;  %v8148_v36 = vld [vmem:[%s13779_s0 + $0x7c] sm:$0x1]  ;;  %v1792_v38 = vrot.slane %v1790_v29, 5 }
 0x123   :  { %v1494_v37 = vsel %vm9884_vm8, %v1485_v27, %v1493_v23  ;;  %1627 = vst [vmem:[#allocation2 + $0x254] sm:$0xf] %v1476_v32  ;;  %v1797_v39 = vrot.slane %v1795_v30, 4  ;;  %v8149_v40 = vld [vmem:[%s13779_s0 + $0x80] sm:$0xe]  ;;  %v1787_v42 = vor.u32 %v1786_v33, %v1783_v28  ;;  %v8171_v46 = vrot.slane %v8147_v31, 9 }
 0x124   :  { %v8150_v41 = vld [vmem:[%s13779_s0 + $0x84] sm:$0x1]  ;;  %1628 = vst [vmem:[#allocation2 + $0x29c] sm:$0xf] %v1494_v37  ;;  %v1800_v43 = vrot.slane %v1798_v34, 5  ;;  %v1806_v45 = vrot.slane %v1804_v35, 5 }
 0x125   :  { %v9255_v47 = vld [vmem:[%s13778_s1 + $0x5f0] ss:$8 sps:$4 sm:$0xff]   ;;  %v2022_v48 = vrot.slane %v8148_v36, 5  ;;  %v8172_v49 = vrot.slane %v8149_v40, 9  ;;  %v2026_v50 = vrot.slane %v8150_v41, 5  ;;  %v1788_v52 = vrot.slane %v1787_v42, 4 }
 0x126   :  { %v9257_v51 = vld [vmem:[%s13778_s1 + $0x5f4] ss:$8 sps:$4 sm:$0xff]   ;;  %v1801_v53 = vor.u32 %v1800_v43, %v1797_v39  ;;  %v9258_v54 = vld [vmem:[%s13778_s1 + $0x4e0] ss:$8 sps:$4 sm:$0xff]   ;;  %v9260_v55 = vld [vmem:[%s13778_s1 + $0x4e4] ss:$8 sps:$4 sm:$0xff]  }
 0x127   :  { %v2023_v56 = vsel %vm9828_vm6, %v8171_v46, %v2022_v48  ;;  %v2027_v57 = vsel %vm9828_vm6, %v8172_v49, %v2026_v50  ;;  %6669 = vmatprep.subr.bf16.mxu1 %v9257_v51  ;;  %v9261_v58 = vld [vmem:[%s13778_s1 + $0x5e0] ss:$8 sps:$4 sm:$0xff]   ;;  %v9263_v59 = vld [vmem:[%s13778_s1 + $0x5e4] ss:$8 sps:$4 sm:$0xff]   ;;  %v1793_v61 = vsel %vm9849_vm7, %v1788_v52, %v1792_v38  ;;  %6558 = vmatprep.subr.bf16.mxu0 %v9260_v55  ;;  %v9248_v12 = vld [vmem:[#allocation2 + $0x250] ss:$72 sps:$4 sm:$0xff]  }
 0x128   :  { %v8039_v60 = vld [vmem:[%s13779_s0 + $0x80] sm:$0xe]  ;;  %v1802_v62 = vrot.slane %v1801_v53, 4  ;;  %2076 = vst [vmem:[#allocation2 + $0x25c] sm:$0xf] %v2023_v56  ;;  %6670 = vmatpush2.bf16.msra.mxu1 %v9255_v47  ;;  %6559 = vmatpush2.bf16.msra.mxu0 %v9258_v54 }
 0x129   :  { %2077 = vst [vmem:[#allocation2 + $0x2a4] sm:$0xf] %v2027_v57  ;;  %v8040_v63 = vld [vmem:[%s13779_s0 + $0x84] sm:$0x1]  ;;  %v8041_v0 = vld [vmem:[%s13779_s0 + $0x88] sm:$0xe]  ;;  %6671 = vmatprep.subr.bf16.mxu1 %v9263_v59 }
 0x12a   :  { %v8061_v1 = vrot.slane %v8039_v60, 9  ;;  %1916 = vst [vmem:[#allocation2 + $0x258] sm:$0xf] %v1793_v61  ;;  %v8042_v2 = vld [vmem:[%s13779_s0 + $0x8c] sm:$0x1]  ;;  %v1229_v3 = vrot.slane %v8040_v63, 5  ;;  %v1807_v7 = vsel %vm9849_vm7, %v1802_v62, %v1806_v45 }
 0x12b   :  { %v8062_v4 = vrot.slane %v8041_v0, 9  ;;  %v8087_v5 = vld [vmem:[%s13779_s0 + $0x80] sm:$0xe]  ;;  %v1233_v8 = vrot.slane %v8042_v2, 5  ;;  %v8088_v9 = vld [vmem:[%s13779_s0 + $0x84] sm:$0x3] }
 0x12c   :  { %v8089_v10 = vld [vmem:[%s13779_s0 + $0x88] sm:$0xe]  ;;  %v9246_v11 = vld [vmem:[#allocation2 + $0x254] ss:$72 sps:$4 sm:$0xff]   ;;  %1917 = vst [vmem:[#allocation2 + $0x2a0] sm:$0xf] %v1807_v7  ;;  %v1230_v13 = vsel %vm9828_vm6, %v8061_v1, %v1229_v3  ;;  %6672 = vmatpush2.bf16.msra.mxu1 %v9261_v58 }
 0x12d   :  { %v1496_v14 = vshrl.u32 %v8087_v5, 16  ;;  %v1234_v15 = vsel %vm9828_vm6, %v8062_v4, %v1233_v8  ;;  %1277 = vst [vmem:[#allocation2 + $0x2e0] sm:$0xf] %v1230_v13  ;;  %v8090_v16 = vld [vmem:[%s13779_s0 + $0x8c] sm:$0x3]  ;;  %v1499_v17 = vshll.u32 %v8087_v5, 16  ;;  %6386 = vmatprep.mubr.bf16.mxu0 %v9246_v11 }
 0x12e   :  { %v1505_v18 = vshrl.u32 %v8088_v9, 16  ;;  %v1508_v20 = vshll.u32 %v8088_v9, 16  ;;  %1278 = vst [vmem:[#allocation2 + $0x328] sm:$0xf] %v1234_v15  ;;  %v1514_v22 = vshrl.u32 %v8089_v10, 16  ;;  %v1517_v23 = vshll.u32 %v8089_v10, 16  ;;  %6387 = vmatmul.mubr.bf16.gmra.mxu0 %v9248_v12 }
 0x12f   :  { %v1498_v21 = vrot.slane %v1496_v14, 5  ;;  %v1523_v24 = vshrl.u32 %v8090_v16, 16  ;;  %v9267_v25 = vld [vmem:[%s13778_s1 + $0x4d0] ss:$8 sps:$4 sm:$0xff]   ;;  %v1501_v26 = vrot.slane %v1499_v17, 6  ;;  %v1526_v29 = vshll.u32 %v8090_v16, 16 }
 0x130   :  { %v1507_v27 = vrot.slane %v1505_v18, 5  ;;  %v1510_v28 = vrot.slane %v1508_v20, 6  ;;  %v9269_v30 = vld [vmem:[%s13778_s1 + $0x4d4] ss:$8 sps:$4 sm:$0xff]   ;;  %v1516_v31 = vrot.slane %v1514_v22, 5  ;;  %v1519_v32 = vrot.slane %v1517_v23, 6 }
 0x131   :  { %v1525_v33 = vrot.slane %v1523_v24, 5  ;;  %v8119_v34 = vld [vmem:[%s13779_s0 + $0x88] sm:$0xf]  ;;  %v1502_v35 = vor.u32 %v1501_v26, %v1498_v21  ;;  %v1528_v37 = vrot.slane %v1526_v29, 6  ;;  %6560 = vmatprep.subr.bf16.mxu0 %v9269_v30  ;;  %v8120_v38 = vld [vmem:[%s13779_s0 + $0x8c] sm:$0x1] }
 0x132   :  { %v1511_v36 = vor.u32 %v1510_v28, %v1507_v27  ;;  %v8121_v39 = vld [vmem:[%s13779_s0 + $0x90] sm:$0xf]  ;;  %v1520_v40 = vor.u32 %v1519_v32, %v1516_v31  ;;  %v8122_v41 = vld [vmem:[%s13779_s0 + $0x94] sm:$0x1]  ;;  %v1809_v42 = vshrl.u32 %v8119_v34, 16  ;;  %v1812_v43 = vshll.u32 %v8119_v34, 16  ;;  %6561 = vmatpush2.bf16.msra.mxu0 %v9267_v25 }
 0x133   :  { %v1818_v45 = vshll.u32 %v8120_v38, 16  ;;  %v9252_v46 = vld [vmem:[#allocation2 + $0x25c] ss:$72 sps:$4 sm:$0xff]   ;;  %v9254_v47 = vld [vmem:[#allocation2 + $0x258] ss:$72 sps:$4 sm:$0xff]   ;;  %v1503_v48 = vrot.slane %v1502_v35, 4  ;;  %v1529_v49 = vor.u32 %v1528_v37, %v1525_v33 }
 0x134   :  { %v1521_v50 = vrot.slane %v1520_v40, 4  ;;  %v1811_v51 = vrot.slane %v1809_v42, 4  ;;  %v1814_v52 = vrot.slane %v1812_v43, 5  ;;  %v8151_v54 = vld [vmem:[%s13779_s0 + $0x88] sm:$0xe]  ;;  %6499 = vmatprep.mubr.bf16.mxu1 %v9252_v46  ;;  %v1823_v56 = vshrl.u32 %v8121_v39, 16 }
 0x135   :  { %v1820_v53 = vrot.slane %v1818_v45, 5  ;;  %v1512_v55 = vsel %vm9884_vm8, %v1503_v48, %v1511_v36  ;;  %v1826_v57 = vshll.u32 %v8121_v39, 16  ;;  %v1832_v58 = vshll.u32 %v8122_v41, 16  ;;  %v8152_v59 = vld [vmem:[%s13779_s0 + $0x8c] sm:$0x1]  ;;  %6500 = vmatmul.mubr.bf16.gmra.mxu1 %v9254_v47 }
 0x136   :  { %v1530_v60 = vsel %vm9884_vm8, %v1521_v50, %v1529_v49  ;;  %1629 = vst [vmem:[#allocation2 + $0x2e4] sm:$0xf] %v1512_v55  ;;  %v1815_v61 = vor.u32 %v1814_v52, %v1811_v51  ;;  %v8153_v62 = vld [vmem:[%s13779_s0 + $0x90] sm:$0xe]  ;;  %v8154_v63 = vld [vmem:[%s13779_s0 + $0x94] sm:$0x1] }
 0x137   :  { %v8173_v0 = vrot.slane %v8151_v54, 9  ;;  %v2030_v1 = vrot.slane %v8152_v59, 5  ;;  %1630 = vst [vmem:[#allocation2 + $0x32c] sm:$0xf] %v1530_v60  ;;  %v1825_v2 = vrot.slane %v1823_v56, 4  ;;  %v1828_v3 = vrot.slane %v1826_v57, 5 }
 0x138   :  { %v8174_v4 = vrot.slane %v8153_v62, 9  ;;  %v9273_v5 = vld [vmem:[%s13778_s1 + $0x5d0] ss:$8 sps:$4 sm:$0xff]   ;;  %v1816_v7 = vrot.slane %v1815_v61, 4  ;;  %v2034_v9 = vrot.slane %v8154_v63, 5  ;;  %v1834_v13 = vrot.slane %v1832_v58, 5 }
 0x139   :  { %v2031_v8 = vsel %vm9828_vm6, %v8173_v0, %v2030_v1  ;;  %v9275_v10 = vld [vmem:[%s13778_s1 + $0x5d4] ss:$8 sps:$4 sm:$0xff]   ;;  %v9276_v11 = vld [vmem:[%s13778_s1 + $0x4c0] ss:$8 sps:$4 sm:$0xff]   ;;  %v1829_v12 = vor.u32 %v1828_v3, %v1825_v2  ;;  %v9278_v14 = vld [vmem:[%s13778_s1 + $0x4c4] ss:$8 sps:$4 sm:$0xff]  }
 0x13a   :  { %2078 = vst [vmem:[#allocation2 + $0x2ec] sm:$0xf] %v2031_v8  ;;  %v1821_v15 = vsel %vm9849_vm7, %v1816_v7, %v1820_v53  ;;  %v2035_v16 = vsel %vm9828_vm6, %v8174_v4, %v2034_v9  ;;  %6673 = vmatprep.subr.bf16.mxu1 %v9275_v10  ;;  %v9279_v17 = vld [vmem:[%s13778_s1 + $0x5c0] ss:$8 sps:$4 sm:$0xff]   ;;  %v9281_v18 = vld [vmem:[%s13778_s1 + $0x5c4] ss:$8 sps:$4 sm:$0xff]   ;;  %6562 = vmatprep.subr.bf16.mxu0 %v9278_v14 }
 0x13b   :  { %v8043_v20 = vld [vmem:[%s13779_s0 + $0x90] sm:$0xe]  ;;  %v1830_v21 = vrot.slane %v1829_v12, 4  ;;  %1918 = vst [vmem:[#allocation2 + $0x2e8] sm:$0xf] %v1821_v15  ;;  %6674 = vmatpush2.bf16.msra.mxu1 %v9273_v5  ;;  %6563 = vmatpush2.bf16.msra.mxu0 %v9276_v11 }
 0x13c   :  { %2079 = vst [vmem:[#allocation2 + $0x334] sm:$0xf] %v2035_v16  ;;  %v8044_v22 = vld [vmem:[%s13779_s0 + $0x94] sm:$0x1]  ;;  %v8045_v23 = vld [vmem:[%s13779_s0 + $0x98] sm:$0xe]  ;;  %6675 = vmatprep.subr.bf16.mxu1 %v9281_v18 }
 0x13d   :  { %v8063_v24 = vrot.slane %v8043_v20, 9  ;;  %v8046_v25 = vld [vmem:[%s13779_s0 + $0x9c] sm:$0x1]  ;;  %v1237_v26 = vrot.slane %v8044_v22, 5  ;;  %v8064_v27 = vrot.slane %v8045_v23, 9  ;;  %v1835_v29 = vsel %vm9849_vm7, %v1830_v21, %v1834_v13 }
 0x13e   :  { %v8091_v28 = vld [vmem:[%s13779_s0 + $0x90] sm:$0xe]  ;;  %v1241_v30 = vrot.slane %v8046_v25, 5  ;;  %v8092_v31 = vld [vmem:[%s13779_s0 + $0x94] sm:$0x3] }
 0x13f   :  { %v8093_v32 = vld [vmem:[%s13779_s0 + $0x98] sm:$0xe]  ;;  %v9264_v33 = vld [vmem:[#allocation2 + $0x2e4] ss:$72 sps:$4 sm:$0xff]   ;;  %v9266_v34 = vld [vmem:[#allocation2 + $0x2e0] ss:$72 sps:$4 sm:$0xff]   ;;  %v1238_v35 = vsel %vm9828_vm6, %v8063_v24, %v1237_v26  ;;  %6676 = vmatpush2.bf16.msra.mxu1 %v9279_v17 }
 0x140   :  { %1919 = vst [vmem:[#allocation2 + $0x330] sm:$0xf] %v1835_v29  ;;  %v1532_v36 = vshrl.u32 %v8091_v28, 16  ;;  %v1242_v37 = vsel %vm9828_vm6, %v8064_v27, %v1241_v30  ;;  %1279 = vst [vmem:[#allocation2 + $0x370] sm:$0xf] %v1238_v35  ;;  %v1535_v39 = vshll.u32 %v8091_v28, 16  ;;  %6396 = vmatprep.mubr.bf16.mxu0 %v9264_v33 }
 0x141   :  { %v8094_v38 = vld [vmem:[%s13779_s0 + $0x9c] sm:$0x3]  ;;  %v1541_v40 = vshrl.u32 %v8092_v31, 16  ;;  %v1544_v41 = vshll.u32 %v8092_v31, 16  ;;  %1280 = vst [vmem:[#allocation2 + $0x3b8] sm:$0xf] %v1242_v37  ;;  %6397 = vmatmul.mubr.bf16.gmra.mxu0 %v9266_v34 }
 0x142   :  { %v1534_v42 = vrot.slane %v1532_v36, 5  ;;  %v1550_v43 = vshrl.u32 %v8093_v32, 16  ;;  %v1553_v45 = vshll.u32 %v8093_v32, 16  ;;  %v1559_v46 = vshrl.u32 %v8094_v38, 16  ;;  %v9285_v51 = vld [vmem:[%s13778_s1 + $0x4b0] ss:$8 sps:$4 sm:$0xff]  }
 0x143   :  { %v1537_v47 = vrot.slane %v1535_v39, 6  ;;  %v1543_v48 = vrot.slane %v1541_v40, 5  ;;  %v1546_v49 = vrot.slane %v1544_v41, 6  ;;  %v1562_v50 = vshll.u32 %v8094_v38, 16  ;;  %v9287_v55 = vld [vmem:[%s13778_s1 + $0x4b4] ss:$8 sps:$4 sm:$0xff]  }
 0x144   :  { %v1552_v52 = vrot.slane %v1550_v43, 5  ;;  %v1555_v53 = vrot.slane %v1553_v45, 6  ;;  %v1561_v54 = vrot.slane %v1559_v46, 5  ;;  %v8123_v59 = vld [vmem:[%s13779_s0 + $0x98] sm:$0xf]  ;;  %6564 = vmatprep.subr.bf16.mxu0 %v9287_v55 }
 0x145   :  { %v1538_v56 = vor.u32 %v1537_v47, %v1534_v42  ;;  %v1547_v57 = vor.u32 %v1546_v49, %v1543_v48  ;;  %v1564_v58 = vrot.slane %v1562_v50, 6  ;;  %v8124_v60 = vld [vmem:[%s13779_s0 + $0x9c] sm:$0x1]  ;;  %v8125_v62 = vld [vmem:[%s13779_s0 + $0xa0] sm:$0xf]  ;;  %v1837_v0 = vshrl.u32 %v8123_v59, 16  ;;  %6565 = vmatpush2.bf16.msra.mxu0 %v9285_v51 }
 0x146   :  { %v1556_v61 = vor.u32 %v1555_v53, %v1552_v52  ;;  %v8126_v63 = vld [vmem:[%s13779_s0 + $0xa4] sm:$0x1]  ;;  %v1840_v1 = vshll.u32 %v8123_v59, 16  ;;  %v9270_v2 = vld [vmem:[#allocation2 + $0x2ec] ss:$72 sps:$4 sm:$0xff]   ;;  %v1846_v10 = vshll.u32 %v8124_v60, 16 }
 0x147   :  { %v9272_v3 = vld [vmem:[#allocation2 + $0x2e8] ss:$72 sps:$4 sm:$0xff]   ;;  %v1539_v4 = vrot.slane %v1538_v56, 4  ;;  %v1565_v5 = vor.u32 %v1564_v58, %v1561_v54  ;;  %v1839_v8 = vrot.slane %v1837_v0, 4  ;;  %v8155_v11 = vld [vmem:[%s13779_s0 + $0x98] sm:$0xe]  ;;  %6509 = vmatprep.mubr.bf16.mxu1 %v9270_v2 }
 0x148   :  { %v1557_v7 = vrot.slane %v1556_v61, 4  ;;  %v1842_v9 = vrot.slane %v1840_v1, 5  ;;  %v1851_v13 = vshrl.u32 %v8125_v62, 16  ;;  %v1854_v14 = vshll.u32 %v8125_v62, 16  ;;  %v8156_v16 = vld [vmem:[%s13779_s0 + $0x9c] sm:$0x1]  ;;  %6510 = vmatmul.mubr.bf16.gmra.mxu1 %v9272_v3 }
 0x149   :  { %v1548_v12 = vsel %vm9884_vm8, %v1539_v4, %v1547_v57  ;;  %v1860_v15 = vshll.u32 %v8126_v63, 16  ;;  %v1848_v20 = vrot.slane %v1846_v10, 5  ;;  %v8157_v21 = vld [vmem:[%s13779_s0 + $0xa0] sm:$0xe]  ;;  %v8158_v22 = vld [vmem:[%s13779_s0 + $0xa4] sm:$0x1] }
 0x14a   :  { %v1566_v17 = vsel %vm9884_vm8, %v1557_v7, %v1565_v5  ;;  %1631 = vst [vmem:[#allocation2 + $0x374] sm:$0xf] %v1548_v12  ;;  %v1843_v18 = vor.u32 %v1842_v9, %v1839_v8  ;;  %v8175_v23 = vrot.slane %v8155_v11, 9  ;;  %v1853_v24 = vrot.slane %v1851_v13, 4  ;;  %v9291_v27 = vld [vmem:[%s13778_s1 + $0x5b0] ss:$8 sps:$4 sm:$0xff]  }
 0x14b   :  { %1632 = vst [vmem:[#allocation2 + $0x3bc] sm:$0xf] %v1566_v17  ;;  %v1856_v25 = vrot.slane %v1854_v14, 5  ;;  %v2038_v26 = vrot.slane %v8156_v16, 5  ;;  %v8176_v29 = vrot.slane %v8157_v21, 9  ;;  %v2042_v30 = vrot.slane %v8158_v22, 5 }
 0x14c   :  { %v1844_v28 = vrot.slane %v1843_v18, 4  ;;  %v9293_v31 = vld [vmem:[%s13778_s1 + $0x5b4] ss:$8 sps:$4 sm:$0xff]   ;;  %v1862_v33 = vrot.slane %v1860_v15, 5  ;;  %v9294_v35 = vld [vmem:[%s13778_s1 + $0x4a0] ss:$8 sps:$4 sm:$0xff]  }
 0x14d   :  { %v1857_v32 = vor.u32 %v1856_v25, %v1853_v24  ;;  %v2039_v34 = vsel %vm9828_vm6, %v8175_v23, %v2038_v26  ;;  %v9296_v36 = vld [vmem:[%s13778_s1 + $0x4a4] ss:$8 sps:$4 sm:$0xff]   ;;  %v2043_v38 = vsel %vm9828_vm6, %v8176_v29, %v2042_v30  ;;  %6677 = vmatprep.subr.bf16.mxu1 %v9293_v31  ;;  %v9297_v39 = vld [vmem:[%s13778_s1 + $0x5a0] ss:$8 sps:$4 sm:$0xff]   ;;  %v9284_v54 = vld [vmem:[#allocation2 + $0x370] ss:$72 sps:$4 sm:$0xff]  }
 0x14e   :  { %v1849_v37 = vsel %vm9849_vm7, %v1844_v28, %v1848_v20  ;;  %2080 = vst [vmem:[#allocation2 + $0x37c] sm:$0xf] %v2039_v34  ;;  %v9299_v40 = vld [vmem:[%s13778_s1 + $0x5a4] ss:$8 sps:$4 sm:$0xff]   ;;  %2081 = vst [vmem:[#allocation2 + $0x3c4] sm:$0xf] %v2043_v38  ;;  %6678 = vmatpush2.bf16.msra.mxu1 %v9291_v27  ;;  %6566 = vmatprep.subr.bf16.mxu0 %v9296_v36 }
 0x14f   :  { %v1858_v41 = vrot.slane %v1857_v32, 4  ;;  %1920 = vst [vmem:[#allocation2 + $0x378] sm:$0xf] %v1849_v37  ;;  %v8047_v42 = vld [vmem:[%s13779_s0 + $0xa0] sm:$0xe]  ;;  %6567 = vmatpush2.bf16.msra.mxu0 %v9294_v35  ;;  %6679 = vmatprep.subr.bf16.mxu1 %v9299_v40 }
 0x150   :  { %v8048_v43 = vld [vmem:[%s13779_s0 + $0xa4] sm:$0x1]  ;;  %v8049_v45 = vld [vmem:[%s13779_s0 + $0xa8] sm:$0xe]  ;;  %v8050_v46 = vld [vmem:[%s13779_s0 + $0xac] sm:$0x1] }
 0x151   :  { %v8065_v47 = vrot.slane %v8047_v42, 9  ;;  %v1245_v48 = vrot.slane %v8048_v43, 5  ;;  %v1863_v49 = vsel %vm9849_vm7, %v1858_v41, %v1862_v33  ;;  %v8066_v50 = vrot.slane %v8049_v45, 9  ;;  %v8095_v52 = vld [vmem:[%s13779_s0 + $0xa0] sm:$0xe] }
 0x152   :  { %v1249_v51 = vrot.slane %v8050_v46, 5  ;;  %v9282_v53 = vld [vmem:[#allocation2 + $0x374] ss:$72 sps:$4 sm:$0xff]   ;;  %1921 = vst [vmem:[#allocation2 + $0x3c0] sm:$0xf] %v1863_v49  ;;  %v1568_v56 = vshrl.u32 %v8095_v52, 16  ;;  %6680 = vmatpush2.bf16.msra.mxu1 %v9297_v39 }
 0x153   :  { %v1246_v55 = vsel %vm9828_vm6, %v8065_v47, %v1245_v48  ;;  %v8096_v58 = vld [vmem:[%s13779_s0 + $0xa4] sm:$0x3]  ;;  %v8097_v59 = vld [vmem:[%s13779_s0 + $0xa8] sm:$0xe]  ;;  %v8098_v60 = vld [vmem:[%s13779_s0 + $0xac] sm:$0x3]  ;;  %6406 = vmatprep.mubr.bf16.mxu0 %v9282_v53 }
 0x154   :  { %v1250_v57 = vsel %vm9828_vm6, %v8066_v50, %v1249_v51  ;;  %1281 = vst [vmem:[#allocation2 + $0x400] sm:$0xf] %v1246_v55  ;;  %v1570_v61 = vrot.slane %v1568_v56, 5  ;;  %v1571_v62 = vshll.u32 %v8095_v52, 16  ;;  %v1577_v63 = vshrl.u32 %v8096_v58, 16  ;;  %6407 = vmatmul.mubr.bf16.gmra.mxu0 %v9284_v54 }
 0x155   :  { %1282 = vst [vmem:[#allocation2 + $0x448] sm:$0xf] %v1250_v57  ;;  %v1580_v0 = vshll.u32 %v8096_v58, 16  ;;  %v9303_v1 = vld [vmem:[%s13778_s1 + $0x490] ss:$8 sps:$4 sm:$0xff]   ;;  %v1586_v2 = vshrl.u32 %v8097_v59, 16 }
 0x156   :  { %v1589_v3 = vshll.u32 %v8097_v59, 16  ;;  %v1595_v4 = vshrl.u32 %v8098_v60, 16  ;;  %v1598_v5 = vshll.u32 %v8098_v60, 16  ;;  %v9305_v7 = vld [vmem:[%s13778_s1 + $0x494] ss:$8 sps:$4 sm:$0xff]   ;;  %v1573_v8 = vrot.slane %v1571_v62, 6 }
 0x157   :  { %v1579_v9 = vrot.slane %v1577_v63, 5  ;;  %v1582_v10 = vrot.slane %v1580_v0, 6  ;;  %v8127_v11 = vld [vmem:[%s13779_s0 + $0xa8] sm:$0xf]  ;;  %v1588_v12 = vrot.slane %v1586_v2, 5  ;;  %6568 = vmatprep.subr.bf16.mxu0 %v9305_v7 }
 0x158   :  { %v1591_v13 = vrot.slane %v1589_v3, 6  ;;  %v1597_v14 = vrot.slane %v1595_v4, 5  ;;  %v1600_v15 = vrot.slane %v1598_v5, 6  ;;  %v8128_v16 = vld [vmem:[%s13779_s0 + $0xac] sm:$0x1]  ;;  %v1574_v17 = vor.u32 %v1573_v8, %v1570_v61  ;;  %6569 = vmatpush2.bf16.msra.mxu0 %v9303_v1 }
 0x159   :  { %v1583_v18 = vor.u32 %v1582_v10, %v1579_v9  ;;  %v8129_v20 = vld [vmem:[%s13779_s0 + $0xb0] sm:$0xf]  ;;  %v8130_v21 = vld [vmem:[%s13779_s0 + $0xb4] sm:$0x1]  ;;  %v1865_v22 = vshrl.u32 %v8127_v11, 16  ;;  %v1868_v23 = vshll.u32 %v8127_v11, 16 }
 0x15a   :  { %v9288_v24 = vld [vmem:[#allocation2 + $0x37c] ss:$72 sps:$4 sm:$0xff]   ;;  %v9290_v25 = vld [vmem:[#allocation2 + $0x378] ss:$72 sps:$4 sm:$0xff]   ;;  %v1592_v26 = vor.u32 %v1591_v13, %v1588_v12  ;;  %v1601_v27 = vor.u32 %v1600_v15, %v1597_v14  ;;  %v1874_v28 = vshll.u32 %v8128_v16, 16  ;;  %v1575_v29 = vrot.slane %v1574_v17, 4 }
 0x15b   :  { %v1867_v30 = vrot.slane %v1865_v22, 4  ;;  %v1870_v31 = vrot.slane %v1868_v23, 5  ;;  %v1879_v32 = vshrl.u32 %v8129_v20, 16  ;;  %v8159_v33 = vld [vmem:[%s13779_s0 + $0xa8] sm:$0xe]  ;;  %6519 = vmatprep.mubr.bf16.mxu1 %v9288_v24  ;;  %v1882_v36 = vshll.u32 %v8129_v20, 16 }
 0x15c   :  { %v1593_v34 = vrot.slane %v1592_v26, 4  ;;  %v1876_v35 = vrot.slane %v1874_v28, 5  ;;  %v1888_v37 = vshll.u32 %v8130_v21, 16  ;;  %v8160_v38 = vld [vmem:[%s13779_s0 + $0xac] sm:$0x1]  ;;  %6520 = vmatmul.mubr.bf16.gmra.mxu1 %v9290_v25  ;;  %v1584_v39 = vsel %vm9884_vm8, %v1575_v29, %v1583_v18 }
 0x15d   :  { %v1871_v40 = vor.u32 %v1870_v31, %v1867_v30  ;;  %v1881_v41 = vrot.slane %v1879_v32, 4  ;;  %v8161_v42 = vld [vmem:[%s13779_s0 + $0xb0] sm:$0xe]  ;;  %v8162_v43 = vld [vmem:[%s13779_s0 + $0xb4] sm:$0x1]  ;;  %v8177_v45 = vrot.slane %v8159_v33, 9 }
 0x15e   :  { %v1602_v46 = vsel %vm9884_vm8, %v1593_v34, %v1601_v27  ;;  %1633 = vst [vmem:[#allocation2 + $0x404] sm:$0xf] %v1584_v39  ;;  %v1884_v47 = vrot.slane %v1882_v36, 5  ;;  %v1890_v48 = vrot.slane %v1888_v37, 5  ;;  %v2046_v49 = vrot.slane %v8160_v38, 5 }
 0x15f   :  { %1634 = vst [vmem:[#allocation2 + $0x44c] sm:$0xf] %v1602_v46  ;;  %v1872_v50 = vrot.slane %v1871_v40, 4  ;;  %v8178_v51 = vrot.slane %v8161_v42, 9  ;;  %v2050_v52 = vrot.slane %v8162_v43, 5 }
 0x160   :  { %v9309_v53 = vld [vmem:[%s13778_s1 + $0x590] ss:$8 sps:$4 sm:$0xff]   ;;  %v1885_v54 = vor.u32 %v1884_v47, %v1881_v41  ;;  %v2047_v55 = vsel %vm9828_vm6, %v8177_v45, %v2046_v49  ;;  %v9311_v56 = vld [vmem:[%s13778_s1 + $0x594] ss:$8 sps:$4 sm:$0xff]   ;;  %v9312_v57 = vld [vmem:[%s13778_s1 + $0x480] ss:$8 sps:$4 sm:$0xff]  }
 0x161   :  { %v9314_v58 = vld [vmem:[%s13778_s1 + $0x484] ss:$8 sps:$4 sm:$0xff]   ;;  %v1877_v59 = vsel %vm9849_vm7, %v1872_v50, %v1876_v35  ;;  %v2051_v60 = vsel %vm9828_vm6, %v8178_v51, %v2050_v52  ;;  %2082 = vst [vmem:[#allocation2 + $0x40c] sm:$0xf] %v2047_v55  ;;  %v9315_v61 = vld [vmem:[%s13778_s1 + $0x580] ss:$8 sps:$4 sm:$0xff]   ;;  %6681 = vmatprep.subr.bf16.mxu1 %v9311_v56  ;;  %v6235_v55 = vpop.f32.mrf.mxu1 }
 0x162   :  { %v1886_v62 = vrot.slane %v1885_v54, 4  ;;  %1922 = vst [vmem:[#allocation2 + $0x408] sm:$0xf] %v1877_v59  ;;  %2083 = vst [vmem:[#allocation2 + $0x454] sm:$0xf] %v2051_v60  ;;  %6570 = vmatprep.subr.bf16.mxu0 %v9314_v58  ;;  %6682 = vmatpush2.bf16.msra.mxu1 %v9309_v53  ;;  %v6122_v54 = vpop.f32.mrf.mxu0 }
 0x163   :  { %v9317_v63 = vld [vmem:[%s13778_s1 + $0x584] ss:$8 sps:$4 sm:$0xff]   ;;  %v8179_v0 = vld [vmem:[%s13779_s0 + $0x18] sm:$0xe]  ;;  %6571 = vmatpush2.bf16.msra.mxu0 %v9312_v57  ;;  %v8180_v1 = vld [vmem:[%s13779_s0 + $0x1c] sm:$0x3]  ;;  %v11326_v60 = vadd.f32 %v6235_v55, %v6122_v54 }
 0x164   :  { %v8181_v2 = vld [vmem:[%s13779_s0 + $0x20] sm:$0xe]  ;;  %v8182_v3 = vld [vmem:[%s13779_s0 + $0x24] sm:$0x3]  ;;  %v1891_v4 = vsel %vm9849_vm7, %v1886_v62, %v1890_v48  ;;  %6683 = vmatprep.subr.bf16.mxu1 %v9317_v63  ;;  %v2117_v5 = vshrl.u32 %v8179_v0, 16  ;;  %v2120_v7 = vshll.u32 %v8179_v0, 16 }
 0x165   :  { %v2126_v8 = vshrl.u32 %v8180_v1, 16  ;;  %v2436_v9 = vld [vmem:[%s13779_s0] sm:$0xf]  ;;  %1923 = vst [vmem:[#allocation2 + $0x450] sm:$0xf] %v1891_v4  ;;  %v2129_v10 = vshll.u32 %v8180_v1, 16 }
 0x166   :  { %v2135_v11 = vshrl.u32 %v8181_v2, 16  ;;  %v2138_v12 = vshll.u32 %v8181_v2, 16  ;;  %v2144_v13 = vshrl.u32 %v8182_v3, 16  ;;  %2452 = vst [vmem:[#allocation2 + $0x24] sm:$0xf] %v2436_v9  ;;  %v2119_v16 = vrot.slane %v2117_v5, 5  ;;  %6684 = vmatpush2.bf16.msra.mxu1 %v9315_v61  ;;  %v6124_v2 = vpop.f32.mrf.mxu0 }
 0x167   :  { %v9300_v14 = vld [vmem:[#allocation2 + $0x404] ss:$72 sps:$4 sm:$0xff]   ;;  %v9302_v15 = vld [vmem:[#allocation2 + $0x400] ss:$72 sps:$4 sm:$0xff]   ;;  %v2122_v17 = vrot.slane %v2120_v7, 6  ;;  %v2128_v19 = vrot.slane %v2126_v8, 5 }
 0x168   :  { %v2131_v18 = vrot.slane %v2129_v10, 6  ;;  %v2137_v20 = vrot.slane %v2135_v11, 5  ;;  %v2437_v21 = vld [vmem:[%s13779_s0 + $0x8] sm:$0xf]  ;;  %6416 = vmatprep.mubr.bf16.mxu0 %v9300_v14  ;;  %v2140_v22 = vrot.slane %v2138_v12, 6  ;;  %v2146_v23 = vrot.slane %v2144_v13, 5 }
 0x169   :  { %v2147_v24 = vshll.u32 %v8182_v3, 16  ;;  %2453 = vst [vmem:[#allocation2 + $0x6c] sm:$0xf] %v2437_v21  ;;  %6417 = vmatmul.mubr.bf16.gmra.mxu0 %v9302_v15  ;;  %v2123_v25 = vor.u32 %v2122_v17, %v2119_v16  ;;  %v9323_v27 = vld [vmem:[%s13778_s1 + $0x674] ss:$8 sps:$4 sm:$0xff]   ;;  %v6237_v3 = vpop.f32.mrf.mxu1  ;;  %v6126_v16 = vpop.f32.mrf.mxu0 }
 0x16a   :  { %v2132_v26 = vor.u32 %v2131_v18, %v2128_v19  ;;  %v2468_v28 = vld [vmem:[%s13779_s0] sm:$0xe]  ;;  %v2141_v29 = vor.u32 %v2140_v22, %v2137_v20  ;;  %v2469_v31 = vld [vmem:[%s13779_s0 + $0x4] sm:$0x1]  ;;  %v2470_v32 = vld [vmem:[%s13779_s0 + $0x8] sm:$0xe]  ;;  %6766 = vmatprep.subr.bf16.mxu0 %v9323_v27 }
 0x16b   :  { %v2149_v30 = vrot.slane %v2147_v24, 6  ;;  %v8211_v33 = vrot.slane %v2468_v28, 9  ;;  %v2124_v34 = vrot.slane %v2123_v25, 4  ;;  %v2471_v35 = vld [vmem:[%s13779_s0 + $0xc] sm:$0x1]  ;;  %v2534_v36 = vrot.slane %v2469_v31, 5  ;;  %v6239_v17 = vpop.f32.mrf.mxu1  ;;  %v11357_v28 = vpop.f32.mrf.mxu0 }
 0x16c   :  { %v8212_v37 = vrot.slane %v2470_v32, 9  ;;  %v9306_v39 = vld [vmem:[#allocation2 + $0x40c] ss:$72 sps:$4 sm:$0xff]   ;;  %v9308_v40 = vld [vmem:[#allocation2 + $0x408] ss:$72 sps:$4 sm:$0xff]   ;;  %v2142_v41 = vrot.slane %v2141_v29, 4  ;;  %v11355_v27 = vadd.f32 %v6239_v17, %v6126_v16 }
 0x16d   :  { %v2150_v42 = vor.u32 %v2149_v30, %v2146_v23  ;;  %v2133_v43 = vsel %vm9884_vm8, %v2124_v34, %v2132_v26  ;;  %v2535_v45 = vsel %vm9828_vm6, %v8211_v33, %v2534_v36  ;;  %v2538_v46 = vrot.slane %v2471_v35, 5  ;;  %v2628_v47 = vld [vmem:[%s13779_s0] sm:$0xc]  ;;  %v2629_v48 = vld [vmem:[%s13779_s0 + $0x4] sm:$0x3]  ;;  %6529 = vmatprep.mubr.bf16.mxu1 %v9306_v39  ;;  %v11359_v29 = vpop.f32.mrf.mxu1 }
 0x16e   :  { %2420 = vst [vmem:[#allocation2 + $0x20] sm:$0xf] %v2133_v43  ;;  %2612 = vst [vmem:[#allocation2 + $0x28] sm:$0xf] %v2535_v45  ;;  %v2630_v50 = vld [vmem:[%s13779_s0 + $0x8] sm:$0xc]  ;;  %6530 = vmatmul.mubr.bf16.gmra.mxu1 %v9308_v40  ;;  %v11353_v26 = vadd.f32 %v6237_v3, %v6124_v2  ;;  %v6132_v40 = vpop.f32.mrf.mxu0 }
 0x16f   :  { %v2151_v49 = vsel %vm9884_vm8, %v2142_v41, %v2150_v42  ;;  %v2631_v51 = vld [vmem:[%s13779_s0 + $0xc] sm:$0x3]  ;;  %v8227_v52 = vrot.slane %v2628_v47, 10  ;;  %v2697_v53 = vrot.slane %v2629_v48, 6  ;;  %v2539_v56 = vsel %vm9828_vm6, %v8212_v37, %v2538_v46  ;;  %v9329_v59 = vld [vmem:[%s13778_s1 + $0x774] ss:$8 sps:$4 sm:$0xff]   ;;  %v6245_v41 = vpop.f32.mrf.mxu1 }
 0x170   :  { %2421 = vst [vmem:[#allocation2 + $0x68] sm:$0xf] %v2151_v49  ;;  %v8228_v57 = vrot.slane %v2630_v50, 10  ;;  %v2701_v58 = vrot.slane %v2631_v51, 6  ;;  %2613 = vst [vmem:[#allocation2 + $0x70] sm:$0xf] %v2539_v56  ;;  %6879 = vmatprep.subr.bf16.mxu1 %v9329_v59  ;;  %v11376_v48 = vadd.f32 %v6245_v41, %v6132_v40  ;;  %v6134_v59 = vpop.f32.mrf.mxu0 }
 0x171   :  { %v2698_v61 = vsel %vm11299_vm11, %v8227_v52, %v2697_v53  ;;  %v8183_v63 = vld [vmem:[%s13779_s0 + $0x28] sm:$0xe]  ;;  %v8184_v0 = vld [vmem:[%s13779_s0 + $0x2c] sm:$0x3]  ;;  %v8185_v1 = vld [vmem:[%s13779_s0 + $0x30] sm:$0xe] }
 0x172   :  { %v2702_v62 = vsel %vm11299_vm11, %v8228_v57, %v2701_v58  ;;  %2775 = vst [vmem:[#allocation2 + $0x2c] sm:$0xf] %v2698_v61  ;;  %v8186_v4 = vld [vmem:[%s13779_s0 + $0x34] sm:$0x3]  ;;  %v2153_v5 = vshrl.u32 %v8183_v63, 16  ;;  %v2156_v7 = vshll.u32 %v8183_v63, 16  ;;  %v6247_v61 = vpop.f32.mrf.mxu1 }
 0x173   :  { %2776 = vst [vmem:[#allocation2 + $0x74] sm:$0xf] %v2702_v62  ;;  %v2162_v8 = vshrl.u32 %v8184_v0, 16  ;;  %v2165_v9 = vshll.u32 %v8184_v0, 16  ;;  %v9321_v10 = vld [vmem:[%s13778_s1 + $0x670] ss:$8 sps:$4 sm:$0xff]   ;;  %v11401_v2 = vadd.f32 %v6247_v61, %v6134_v59 }
 0x174   :  { %v2171_v11 = vshrl.u32 %v8185_v1, 16  ;;  %v2174_v12 = vshll.u32 %v8185_v1, 16  ;;  %v2180_v13 = vshrl.u32 %v8186_v4, 16  ;;  %v2183_v14 = vshll.u32 %v8186_v4, 16  ;;  %v2438_v15 = vld [vmem:[%s13779_s0 + $0x10] sm:$0xf] }
 0x175   :  { %v9332_v19 = vld [vmem:[%s13778_s1 + $0x664] ss:$8 sps:$4 sm:$0xff]   ;;  %v2155_v18 = vrot.slane %v2153_v5, 5  ;;  %v2158_v20 = vrot.slane %v2156_v7, 6  ;;  %v2164_v21 = vrot.slane %v2162_v8, 5  ;;  %v2167_v22 = vrot.slane %v2165_v9, 6 }
 0x176   :  { %2454 = vst [vmem:[#allocation2 + $0xb4] sm:$0xf] %v2438_v15  ;;  %v9320_v24 = vld [vmem:[#allocation2 + $0x24] ss:$72 sps:$4 sm:$0xff]   ;;  %v2173_v25 = vrot.slane %v2171_v11, 5  ;;  %v2176_v33 = vrot.slane %v2174_v12, 6  ;;  %v6249_v11 = vpop.f32.mrf.mxu1 }
 0x177   :  { %v9318_v23 = vld [vmem:[#allocation2 + $0x20] ss:$72 sps:$4 sm:$0xff]   ;;  %v9327_v30 = vld [vmem:[%s13778_s1 + $0x770] ss:$8 sps:$4 sm:$0xff]   ;;  %v2159_v31 = vor.u32 %v2158_v20, %v2155_v18  ;;  %v2168_v32 = vor.u32 %v2167_v22, %v2164_v21  ;;  %v2182_v34 = vrot.slane %v2180_v13, 5  ;;  %6572 = vmatprep.mubr.bf16.mxu0 %v9320_v24  ;;  %v2185_v39 = vrot.slane %v2183_v14, 6 }
 0x178   :  { %v2439_v35 = vld [vmem:[%s13779_s0 + $0x18] sm:$0xf]  ;;  %v9330_v36 = vld [vmem:[%s13778_s1 + $0x660] ss:$8 sps:$4 sm:$0xff]   ;;  %v9335_v37 = vld [vmem:[%s13778_s1 + $0x764] ss:$8 sps:$4 sm:$0xff]   ;;  %6573 = vmatmul.mubr.bf16.vlgmr.msra.gmra.mxu0 %v9318_v23  ;;  %v2177_v46 = vor.u32 %v2176_v33, %v2173_v25  ;;  %v11430_v21 = vpop.f32.mrf.mxu1 }
 0x179   :  { %2455 = vst [vmem:[#allocation2 + $0xfc] sm:$0xf] %v2439_v35  ;;  %v9324_v42 = vld [vmem:[#allocation2 + $0x28] ss:$72 sps:$4 sm:$0xff]   ;;  %v2160_v45 = vrot.slane %v2159_v31, 4  ;;  %6767 = vmatpush1.bf16.msra.mxu0 %v9321_v10  ;;  %v2186_v49 = vor.u32 %v2185_v39, %v2182_v34  ;;  %v6136_v10 = vpop.f32.mrf.mxu0  ;;  %13794 = vst [vmem:[#allocation4_spill] sm:$0xff] %v11430_v21 }
 0x17a   :  { %v9326_v43 = vld [vmem:[#allocation2 + $0x2c] ss:$72 sps:$4 sm:$0xff]   ;;  %v2472_v50 = vld [vmem:[%s13779_s0 + $0x10] sm:$0xe]  ;;  %v2474_v52 = vld [vmem:[%s13779_s0 + $0x18] sm:$0xe]  ;;  %6768 = vmatprep.subr.bf16.mxu0 %v9332_v19  ;;  %v11421_v17 = vadd.f32 %v6249_v11, %v6136_v10 }
 0x17b   :  { %v9341_v47 = vld [vmem:[%s13778_s1 + $0x654] ss:$8 sps:$4 sm:$0xff]   ;;  %6685 = vmatprep.mubr.bf16.mxu1 %v9326_v43  ;;  %v9333_v53 = vld [vmem:[%s13778_s1 + $0x760] ss:$8 sps:$4 sm:$0xff]   ;;  %v2169_v54 = vsel %vm9884_vm8, %v2160_v45, %v2168_v32  ;;  %v2178_v55 = vrot.slane %v2177_v46, 4  ;;  %v8213_v57 = vrot.slane %v2472_v50, 9  ;;  %v11428_v20 = vpop.f32.mrf.mxu0  ;;  %v6255_v32 = vpop.f32.mrf.mxu1 }
 0x17c   :  { %v2473_v51 = vld [vmem:[%s13779_s0 + $0x14] sm:$0x1]  ;;  %v2475_v56 = vld [vmem:[%s13779_s0 + $0x1c] sm:$0x1]  ;;  %6686 = vmatmul.mubr.bf16.vlgmr.msra.gmra.mxu1 %v9324_v42  ;;  %2422 = vst [vmem:[#allocation2 + $0xb0] sm:$0xf] %v2169_v54 }
 0x17d   :  { %v2542_v58 = vrot.slane %v2473_v51, 5  ;;  %v8214_v62 = vrot.slane %v2474_v52, 9  ;;  %v2546_v63 = vrot.slane %v2475_v56, 5  ;;  %v2632_v0 = vld [vmem:[%s13779_s0 + $0x10] sm:$0xc]  ;;  %6880 = vmatpush1.bf16.msra.mxu1 %v9327_v30  ;;  %v2187_v3 = vsel %vm9884_vm8, %v2178_v55, %v2186_v49  ;;  %6769 = vmatpush1.bf16.msra.mxu0 %v9330_v36  ;;  %13793 = vst [vmem:[#allocation3_spill] sm:$0xff] %v11428_v20  ;;  %v6142_v31 = vpop.f32.mrf.mxu0  ;;  %v6257_v59 = vpop.f32.mrf.mxu1 }
 0x17e   :  { %v2633_v1 = vld [vmem:[%s13779_s0 + $0x14] sm:$0x3]  ;;  %v2634_v5 = vld [vmem:[%s13779_s0 + $0x18] sm:$0xc]  ;;  %v2635_v7 = vld [vmem:[%s13779_s0 + $0x1c] sm:$0x3]  ;;  %6881 = vmatprep.subr.bf16.mxu1 %v9335_v37  ;;  %6770 = vmatprep.subr.bf16.mxu0 %v9341_v47  ;;  %v11455_v36 = vadd.f32 %v6255_v32, %v6142_v31 }
 0x17f   :  { %v2543_v4 = vsel %vm9828_vm6, %v8213_v57, %v2542_v58  ;;  %v8229_v8 = vrot.slane %v2632_v0, 10  ;;  %v2705_v9 = vrot.slane %v2633_v1, 6  ;;  %2423 = vst [vmem:[#allocation2 + $0xf8] sm:$0xf] %v2187_v3  ;;  %v9339_v12 = vld [vmem:[%s13778_s1 + $0x650] ss:$8 sps:$4 sm:$0xff]   ;;  %v2547_v13 = vsel %vm9828_vm6, %v8214_v62, %v2546_v63  ;;  %v6144_v58 = vpop.f32.mrf.mxu0 }
 0x180   :  { %2614 = vst [vmem:[#allocation2 + $0xb8] sm:$0xf] %v2543_v4  ;;  %v8230_v14 = vrot.slane %v2634_v5, 10  ;;  %v2709_v15 = vrot.slane %v2635_v7, 6  ;;  %v9347_v16 = vld [vmem:[%s13778_s1 + $0x754] ss:$8 sps:$4 sm:$0xff]   ;;  %v11466_v0 = vadd.f32 %v6257_v59, %v6144_v58 }
 0x181   :  { %2615 = vst [vmem:[#allocation2 + $0x100] sm:$0xf] %v2547_v13  ;;  %v2706_v19 = vsel %vm11299_vm11, %v8229_v8, %v2705_v9  ;;  %v9345_v18 = vld [vmem:[%s13778_s1 + $0x750] ss:$8 sps:$4 sm:$0xff]   ;;  %v9350_v23 = vld [vmem:[%s13778_s1 + $0x644] ss:$8 sps:$4 sm:$0xff]   ;;  %6882 = vmatpush1.bf16.msra.mxu1 %v9333_v53  ;;  %6771 = vmatpush1.bf16.msra.mxu0 %v9339_v12  ;;  %v6146_v7 = vpop.f32.mrf.mxu0  ;;  %v6259_v8 = vpop.f32.mrf.mxu1 }
 0x182   :  { %v2710_v22 = vsel %vm11299_vm11, %v8230_v14, %v2709_v15  ;;  %2777 = vst [vmem:[#allocation2 + $0xbc] sm:$0xf] %v2706_v19  ;;  %v9348_v24 = vld [vmem:[%s13778_s1 + $0x640] ss:$8 sps:$4 sm:$0xff]   ;;  %v9353_v25 = vld [vmem:[%s13778_s1 + $0x744] ss:$8 sps:$4 sm:$0xff]   ;;  %6883 = vmatprep.subr.bf16.mxu1 %v9347_v16  ;;  %6772 = vmatprep.subr.bf16.mxu0 %v9350_v23  ;;  %v11477_v14 = vadd.f32 %v6259_v8, %v6146_v7 }
 0x183   :  { %2778 = vst [vmem:[#allocation2 + $0x104] sm:$0xf] %v2710_v22  ;;  %v8187_v30 = vld [vmem:[%s13779_s0 + $0x38] sm:$0xe]  ;;  %v8188_v33 = vld [vmem:[%s13779_s0 + $0x3c] sm:$0x3]  ;;  %v11485_v22 = vpop.f32.mrf.mxu0  ;;  %v11487_v23 = vpop.f32.mrf.mxu1 }
 0x184   :  { %v8189_v34 = vld [vmem:[%s13779_s0 + $0x40] sm:$0xe]  ;;  %v8190_v35 = vld [vmem:[%s13779_s0 + $0x44] sm:$0x3]  ;;  %v2189_v39 = vshrl.u32 %v8187_v30, 16  ;;  %v2192_v40 = vshll.u32 %v8187_v30, 16 }
 0x185   :  { %v9351_v37 = vld [vmem:[%s13778_s1 + $0x740] ss:$8 sps:$4 sm:$0xff]   ;;  %v2198_v41 = vshrl.u32 %v8188_v33, 16  ;;  %v2201_v42 = vshll.u32 %v8188_v33, 16  ;;  %v2207_v43 = vshrl.u32 %v8189_v34, 16  ;;  %v2210_v45 = vshll.u32 %v8189_v34, 16  ;;  %6884 = vmatpush1.bf16.msra.mxu1 %v9345_v18  ;;  %6773 = vmatpush1.bf16.msra.mxu0 %v9348_v24 }
 0x186   :  { %v2216_v46 = vshrl.u32 %v8190_v35, 16  ;;  %v2219_v47 = vshll.u32 %v8190_v35, 16  ;;  %v2440_v49 = vld [vmem:[%s13779_s0 + $0x20] sm:$0xf]  ;;  %v9336_v50 = vld [vmem:[#allocation2 + $0xb4] ss:$72 sps:$4 sm:$0xff]   ;;  %6885 = vmatprep.subr.bf16.mxu1 %v9353_v25 }
 0x187   :  { %v9338_v51 = vld [vmem:[#allocation2 + $0xb0] ss:$72 sps:$4 sm:$0xff]   ;;  %v2191_v52 = vrot.slane %v2189_v39, 5  ;;  %2456 = vst [vmem:[#allocation2 + $0x144] sm:$0xf] %v2440_v49  ;;  %v2194_v53 = vrot.slane %v2192_v40, 6  ;;  %6582 = vmatprep.mubr.bf16.mxu0 %v9336_v50  ;;  %v6265_v39 = vpop.f32.mrf.mxu1 }
 0x188   :  { %v2200_v54 = vrot.slane %v2198_v41, 5  ;;  %v2203_v55 = vrot.slane %v2201_v42, 6  ;;  %v2209_v56 = vrot.slane %v2207_v43, 5  ;;  %v2441_v57 = vld [vmem:[%s13779_s0 + $0x28] sm:$0xf]  ;;  %v2212_v61 = vrot.slane %v2210_v45, 6  ;;  %6583 = vmatmul.mubr.bf16.gmra.mxu0 %v9338_v51 }
 0x189   :  { %v2218_v62 = vrot.slane %v2216_v46, 5  ;;  %v2221_v63 = vrot.slane %v2219_v47, 6  ;;  %2457 = vst [vmem:[#allocation2 + $0x18c] sm:$0xf] %v2441_v57  ;;  %v9344_v3 = vld [vmem:[#allocation2 + $0xb8] ss:$72 sps:$4 sm:$0xff]   ;;  %v2195_v4 = vor.u32 %v2194_v53, %v2191_v52  ;;  %6886 = vmatpush1.bf16.msra.mxu1 %v9351_v37  ;;  %v6152_v37 = vpop.f32.mrf.mxu0  ;;  %v6267_v58 = vpop.f32.mrf.mxu1 }
 0x18a   :  { %v9342_v1 = vld [vmem:[#allocation2 + $0xbc] ss:$72 sps:$4 sm:$0xff]   ;;  %v2204_v5 = vor.u32 %v2203_v55, %v2200_v54  ;;  %v2213_v9 = vor.u32 %v2212_v61, %v2209_v56  ;;  %v9357_v11 = vld [vmem:[%s13778_s1 + $0x630] ss:$8 sps:$4 sm:$0xff]   ;;  %v2476_v13 = vld [vmem:[%s13779_s0 + $0x20] sm:$0xe]  ;;  %v11518_v53 = vadd.f32 %v6265_v39, %v6152_v37 }
 0x18b   :  { %v2222_v10 = vor.u32 %v2221_v63, %v2218_v62  ;;  %v9359_v12 = vld [vmem:[%s13778_s1 + $0x634] ss:$8 sps:$4 sm:$0xff]   ;;  %6695 = vmatprep.mubr.bf16.mxu1 %v9342_v1  ;;  %v2196_v15 = vrot.slane %v2195_v4, 4  ;;  %v2477_v16 = vld [vmem:[%s13779_s0 + $0x24] sm:$0x1]  ;;  %v8215_v18 = vrot.slane %v2476_v13, 9  ;;  %v6154_v57 = vpop.f32.mrf.mxu0 }
 0x18c   :  { %v2478_v19 = vld [vmem:[%s13779_s0 + $0x28] sm:$0xe]  ;;  %13795 = vst [vmem:[#allocation5_spill] sm:$0xff] %v11485_v22  ;;  %13796 = vst [vmem:[#allocation6_spill] sm:$0xff] %v11487_v23  ;;  %6696 = vmatmul.mubr.bf16.gmra.mxu1 %v9344_v3  ;;  %v2214_v24 = vrot.slane %v2213_v9, 4  ;;  %6774 = vmatprep.subr.bf16.mxu0 %v9359_v12  ;;  %v2550_v30 = vrot.slane %v2477_v16, 5  ;;  %v11533_v62 = vadd.f32 %v6267_v58, %v6154_v57 }
 0x18d   :  { %v2479_v25 = vld [vmem:[%s13779_s0 + $0x2c] sm:$0x1]  ;;  %v8216_v31 = vrot.slane %v2478_v19, 9  ;;  %v2205_v32 = vsel %vm9884_vm8, %v2196_v15, %v2204_v5  ;;  %v2636_v34 = vld [vmem:[%s13779_s0 + $0x20] sm:$0xc]  ;;  %6775 = vmatpush1.bf16.msra.mxu0 %v9357_v11  ;;  %v6156_v4 = vpop.f32.mrf.mxu0  ;;  %v6269_v5 = vpop.f32.mrf.mxu1 }
 0x18e   :  { %v2554_v33 = vrot.slane %v2479_v25, 5  ;;  %v2637_v35 = vld [vmem:[%s13779_s0 + $0x24] sm:$0x3]  ;;  %v2223_v40 = vsel %vm9884_vm8, %v2214_v24, %v2222_v10  ;;  %2424 = vst [vmem:[#allocation2 + $0x140] sm:$0xf] %v2205_v32  ;;  %v2551_v41 = vsel %vm9828_vm6, %v8215_v18, %v2550_v30  ;;  %v8231_v45 = vrot.slane %v2636_v34, 10 }
 0x18f   :  { %v2638_v42 = vld [vmem:[%s13779_s0 + $0x28] sm:$0xc]  ;;  %v2639_v43 = vld [vmem:[%s13779_s0 + $0x2c] sm:$0x3]  ;;  %v2713_v46 = vrot.slane %v2637_v35, 6  ;;  %v11550_v11 = vadd.f32 %v6269_v5, %v6156_v4  ;;  %v11555_v18 = vpop.f32.mrf.mxu0  ;;  %v11557_v24 = vpop.f32.mrf.mxu1 }
 0x190   :  { %2425 = vst [vmem:[#allocation2 + $0x188] sm:$0xf] %v2223_v40  ;;  %v2555_v47 = vsel %vm9828_vm6, %v8216_v31, %v2554_v33  ;;  %2616 = vst [vmem:[#allocation2 + $0x148] sm:$0xf] %v2551_v41  ;;  %v8232_v49 = vrot.slane %v2638_v42, 10  ;;  %v2717_v50 = vrot.slane %v2639_v43, 6 }
 0x191   :  { %v9363_v51 = vld [vmem:[%s13778_s1 + $0x730] ss:$8 sps:$4 sm:$0xff]   ;;  %v9365_v52 = vld [vmem:[%s13778_s1 + $0x734] ss:$8 sps:$4 sm:$0xff]   ;;  %2617 = vst [vmem:[#allocation2 + $0x190] sm:$0xf] %v2555_v47  ;;  %v2714_v54 = vsel %vm11299_vm11, %v8231_v45, %v2713_v46  ;;  %v6162_v37 = vpop.f32.mrf.mxu0  ;;  %v6275_v39 = vpop.f32.mrf.mxu1 }
 0x192   :  { %v9366_v55 = vld [vmem:[%s13778_s1 + $0x620] ss:$8 sps:$4 sm:$0xff]   ;;  %v9368_v56 = vld [vmem:[%s13778_s1 + $0x624] ss:$8 sps:$4 sm:$0xff]   ;;  %v2718_v59 = vsel %vm11299_vm11, %v8232_v49, %v2717_v50  ;;  %2779 = vst [vmem:[#allocation2 + $0x14c] sm:$0xf] %v2714_v54  ;;  %6887 = vmatprep.subr.bf16.mxu1 %v9365_v52  ;;  %v11565_v50 = vadd.f32 %v6275_v39, %v6162_v37 }
 0x193   :  { %v9369_v61 = vld [vmem:[%s13778_s1 + $0x720] ss:$8 sps:$4 sm:$0xff]   ;;  %2780 = vst [vmem:[#allocation2 + $0x194] sm:$0xf] %v2718_v59  ;;  %6888 = vmatpush1.bf16.msra.mxu1 %v9363_v51  ;;  %6776 = vmatprep.subr.bf16.mxu0 %v9368_v56  ;;  %v9371_v63 = vld [vmem:[%s13778_s1 + $0x724] ss:$8 sps:$4 sm:$0xff]  }
 0x194   :  { %v8191_v1 = vld [vmem:[%s13779_s0 + $0x48] sm:$0xe]  ;;  %v8192_v3 = vld [vmem:[%s13779_s0 + $0x4c] sm:$0x3]  ;;  %6777 = vmatpush1.bf16.msra.mxu0 %v9366_v55  ;;  %v8193_v7 = vld [vmem:[%s13779_s0 + $0x50] sm:$0xe]  ;;  %6889 = vmatprep.subr.bf16.mxu1 %v9371_v63 }
 0x195   :  { %v8194_v8 = vld [vmem:[%s13779_s0 + $0x54] sm:$0x3]  ;;  %v2225_v9 = vshrl.u32 %v8191_v1, 16  ;;  %v2228_v10 = vshll.u32 %v8191_v1, 16  ;;  %v2234_v12 = vshrl.u32 %v8192_v3, 16  ;;  %v2237_v13 = vshll.u32 %v8192_v3, 16 }
 0x196   :  { %v2243_v15 = vshrl.u32 %v8193_v7, 16  ;;  %v2246_v16 = vshll.u32 %v8193_v7, 16  ;;  %v2442_v19 = vld [vmem:[%s13779_s0 + $0x30] sm:$0xf]  ;;  %13797 = vst [vmem:[#allocation7_spill] sm:$0xff] %v11555_v18  ;;  %13798 = vst [vmem:[#allocation8_spill] sm:$0xff] %v11557_v24  ;;  %v6164_v7 = vpop.f32.mrf.mxu0 }
 0x197   :  { %v2227_v25 = vrot.slane %v2225_v9, 5  ;;  %v2230_v30 = vrot.slane %v2228_v10, 6  ;;  %v2252_v31 = vshrl.u32 %v8194_v8, 16  ;;  %v2255_v32 = vshll.u32 %v8194_v8, 16  ;;  %2458 = vst [vmem:[#allocation2 + $0x1d4] sm:$0xf] %v2442_v19  ;;  %6890 = vmatpush1.bf16.msra.mxu1 %v9369_v61  ;;  %v6277_v8 = vpop.f32.mrf.mxu1 }
 0x198   :  { %v9354_v33 = vld [vmem:[#allocation2 + $0x144] ss:$72 sps:$4 sm:$0xff]   ;;  %v9356_v34 = vld [vmem:[#allocation2 + $0x140] ss:$72 sps:$4 sm:$0xff]   ;;  %v2236_v35 = vrot.slane %v2234_v12, 5  ;;  %v2239_v41 = vrot.slane %v2237_v13, 6 }
 0x199   :  { %v2231_v40 = vor.u32 %v2230_v30, %v2227_v25  ;;  %v2245_v42 = vrot.slane %v2243_v15, 5  ;;  %v2248_v43 = vrot.slane %v2246_v16, 6  ;;  %v2443_v45 = vld [vmem:[%s13779_s0 + $0x38] sm:$0xf]  ;;  %6592 = vmatprep.mubr.bf16.mxu0 %v9354_v33  ;;  %v2254_v46 = vrot.slane %v2252_v31, 5  ;;  %v6166_v31 = vpop.f32.mrf.mxu0 }
 0x19a   :  { %v2257_v47 = vrot.slane %v2255_v32, 6  ;;  %2459 = vst [vmem:[#allocation2 + $0x21c] sm:$0xf] %v2443_v45  ;;  %v9375_v49 = vld [vmem:[%s13778_s1 + $0x610] ss:$8 sps:$4 sm:$0xff]   ;;  %6593 = vmatmul.mubr.bf16.gmra.mxu0 %v9356_v34  ;;  %v2240_v55 = vor.u32 %v2239_v41, %v2236_v35  ;;  %v11587_v15 = vadd.f32 %v6277_v8, %v6164_v7  ;;  %v6279_v32 = vpop.f32.mrf.mxu1 }
 0x19b   :  { %v9360_v51 = vld [vmem:[#allocation2 + $0x14c] ss:$72 sps:$4 sm:$0xff]   ;;  %v9362_v52 = vld [vmem:[#allocation2 + $0x148] ss:$72 sps:$4 sm:$0xff]   ;;  %v2232_v54 = vrot.slane %v2231_v40, 4  ;;  %v2249_v56 = vor.u32 %v2248_v43, %v2245_v42  ;;  %v11613_v45 = vadd.f32 %v6279_v32, %v6166_v31 }
 0x19c   :  { %v2258_v57 = vor.u32 %v2257_v47, %v2254_v46  ;;  %v9377_v58 = vld [vmem:[%s13778_s1 + $0x614] ss:$8 sps:$4 sm:$0xff]   ;;  %v2480_v59 = vld [vmem:[%s13779_s0 + $0x30] sm:$0xe]  ;;  %6705 = vmatprep.mubr.bf16.mxu1 %v9360_v51  ;;  %v2482_v3 = vld [vmem:[%s13779_s0 + $0x38] sm:$0xe]  ;;  %v11615_v46 = vpop.f32.mrf.mxu0  ;;  %v11617_v47 = vpop.f32.mrf.mxu1 }
 0x19d   :  { %v2481_v61 = vld [vmem:[%s13779_s0 + $0x34] sm:$0x1]  ;;  %v2241_v63 = vsel %vm9884_vm8, %v2232_v54, %v2240_v55  ;;  %v2250_v1 = vrot.slane %v2249_v56, 4  ;;  %v2483_v4 = vld [vmem:[%s13779_s0 + $0x3c] sm:$0x1]  ;;  %v8217_v5 = vrot.slane %v2480_v59, 9  ;;  %6706 = vmatmul.mubr.bf16.gmra.mxu1 %v9362_v52  ;;  %6778 = vmatprep.subr.bf16.mxu0 %v9377_v58 }
 0x19e   :  { %2426 = vst [vmem:[#allocation2 + $0x1d0] sm:$0xf] %v2241_v63  ;;  %v2558_v9 = vrot.slane %v2481_v61, 5  ;;  %v8218_v10 = vrot.slane %v2482_v3, 9  ;;  %v2562_v12 = vrot.slane %v2483_v4, 5  ;;  %6779 = vmatpush1.bf16.msra.mxu0 %v9375_v49  ;;  %v6285_v58 = vpop.f32.mrf.mxu1 }
 0x19f   :  { %v2640_v13 = vld [vmem:[%s13779_s0 + $0x30] sm:$0xc]  ;;  %v2259_v16 = vsel %vm9884_vm8, %v2250_v1, %v2258_v57  ;;  %v2641_v19 = vld [vmem:[%s13779_s0 + $0x34] sm:$0x3]  ;;  %v2642_v25 = vld [vmem:[%s13779_s0 + $0x38] sm:$0xc]  ;;  %v6172_v57 = vpop.f32.mrf.mxu0 }
 0x1a0   :  { %v2643_v30 = vld [vmem:[%s13779_s0 + $0x3c] sm:$0x3]  ;;  %2427 = vst [vmem:[#allocation2 + $0x218] sm:$0xf] %v2259_v16  ;;  %v2559_v33 = vsel %vm9828_vm6, %v8217_v5, %v2558_v9  ;;  %v2563_v34 = vsel %vm9828_vm6, %v8218_v10, %v2562_v12  ;;  %v8233_v35 = vrot.slane %v2640_v13, 10  ;;  %v2721_v37 = vrot.slane %v2641_v19, 6  ;;  %v6287_v19 = vpop.f32.mrf.mxu1 }
 0x1a1   :  { %v9381_v39 = vld [vmem:[%s13778_s1 + $0x710] ss:$8 sps:$4 sm:$0xff]   ;;  %v9383_v40 = vld [vmem:[%s13778_s1 + $0x714] ss:$8 sps:$4 sm:$0xff]   ;;  %2618 = vst [vmem:[#allocation2 + $0x1d8] sm:$0xf] %v2559_v33  ;;  %v11644_v1 = vadd.f32 %v6285_v58, %v6172_v57  ;;  %v6174_v16 = vpop.f32.mrf.mxu0 }
 0x1a2   :  { %2619 = vst [vmem:[#allocation2 + $0x220] sm:$0xf] %v2563_v34  ;;  %v8234_v41 = vrot.slane %v2642_v25, 10  ;;  %v2725_v42 = vrot.slane %v2643_v30, 6  ;;  %v9384_v43 = vld [vmem:[%s13778_s1 + $0x600] ss:$8 sps:$4 sm:$0xff]   ;;  %v2722_v49 = vsel %vm11299_vm11, %v8233_v35, %v2721_v37  ;;  %6891 = vmatprep.subr.bf16.mxu1 %v9383_v40  ;;  %v11649_v32 = vadd.f32 %v6287_v19, %v6174_v16 }
 0x1a3   :  { %v9386_v51 = vld [vmem:[%s13778_s1 + $0x604] ss:$8 sps:$4 sm:$0xff]   ;;  %2781 = vst [vmem:[#allocation2 + $0x1dc] sm:$0xf] %v2722_v49  ;;  %6892 = vmatpush1.bf16.msra.mxu1 %v9381_v39  ;;  %v9387_v54 = vld [vmem:[%s13778_s1 + $0x700] ss:$8 sps:$4 sm:$0xff]   ;;  %v6176_v40 = vpop.f32.mrf.mxu0 }
 0x1a4   :  { %v2726_v52 = vsel %vm11299_vm11, %v8234_v41, %v2725_v42  ;;  %v9389_v55 = vld [vmem:[%s13778_s1 + $0x704] ss:$8 sps:$4 sm:$0xff]   ;;  %v8195_v56 = vld [vmem:[%s13779_s0 + $0x78] sm:$0xe]  ;;  %6780 = vmatprep.subr.bf16.mxu0 %v9386_v51  ;;  %v8196_v59 = vld [vmem:[%s13779_s0 + $0x7c] sm:$0x3]  ;;  %v6289_v41 = vpop.f32.mrf.mxu1 }
 0x1a5   :  { %2782 = vst [vmem:[#allocation2 + $0x224] sm:$0xf] %v2726_v52  ;;  %v8197_v61 = vld [vmem:[%s13779_s0 + $0x80] sm:$0xe]  ;;  %v8198_v63 = vld [vmem:[%s13779_s0 + $0x84] sm:$0x3]  ;;  %6781 = vmatpush1.bf16.msra.mxu0 %v9384_v43  ;;  %6893 = vmatprep.subr.bf16.mxu1 %v9389_v55  ;;  %v11657_v52 = vadd.f32 %v6289_v41, %v6176_v40  ;;  %v11665_v58 = vpop.f32.mrf.mxu0 }
 0x1a6   :  { %v2261_v3 = vshrl.u32 %v8195_v56, 16  ;;  %v2264_v4 = vshll.u32 %v8195_v56, 16  ;;  %v2270_v5 = vshrl.u32 %v8196_v59, 16  ;;  %v2273_v7 = vshll.u32 %v8196_v59, 16  ;;  %v2444_v13 = vld [vmem:[%s13779_s0 + $0x60] sm:$0xf]  ;;  %v11667_v59 = vpop.f32.mrf.mxu1 }
 0x1a7   :  { %v2279_v8 = vshrl.u32 %v8197_v61, 16  ;;  %v2282_v9 = vshll.u32 %v8197_v61, 16  ;;  %v2288_v10 = vshrl.u32 %v8198_v63, 16  ;;  %v2291_v12 = vshll.u32 %v8198_v63, 16  ;;  %v9372_v25 = vld [vmem:[#allocation2 + $0x1d4] ss:$72 sps:$4 sm:$0xff]   ;;  %6894 = vmatpush1.bf16.msra.mxu1 %v9387_v54 }
 0x1a8   :  { %v9374_v30 = vld [vmem:[#allocation2 + $0x1d0] ss:$72 sps:$4 sm:$0xff]   ;;  %v2263_v31 = vrot.slane %v2261_v3, 5  ;;  %2460 = vst [vmem:[#allocation2 + $0x264] sm:$0xf] %v2444_v13  ;;  %v2266_v33 = vrot.slane %v2264_v4, 6  ;;  %6602 = vmatprep.mubr.bf16.mxu0 %v9372_v25 }
 0x1a9   :  { %v2272_v34 = vrot.slane %v2270_v5, 5  ;;  %v2275_v35 = vrot.slane %v2273_v7, 6  ;;  %v2281_v37 = vrot.slane %v2279_v8, 5  ;;  %v2445_v39 = vld [vmem:[%s13779_s0 + $0x68] sm:$0xf]  ;;  %v2284_v42 = vrot.slane %v2282_v9, 6  ;;  %6603 = vmatmul.mubr.bf16.gmra.mxu0 %v9374_v30 }
 0x1aa   :  { %v2290_v43 = vrot.slane %v2288_v10, 5  ;;  %v2293_v49 = vrot.slane %v2291_v12, 6  ;;  %2461 = vst [vmem:[#allocation2 + $0x2ac] sm:$0xf] %v2445_v39  ;;  %v9393_v51 = vld [vmem:[%s13778_s1 + $0x6f0] ss:$8 sps:$4 sm:$0xff]   ;;  %v2267_v54 = vor.u32 %v2266_v33, %v2263_v31  ;;  %v6182_v10 = vpop.f32.mrf.mxu0  ;;  %v6295_v12 = vpop.f32.mrf.mxu1 }
 0x1ab   :  { %v2276_v55 = vor.u32 %v2275_v35, %v2272_v34  ;;  %v9395_v56 = vld [vmem:[%s13778_s1 + $0x6f4] ss:$8 sps:$4 sm:$0xff]   ;;  %v2484_v57 = vld [vmem:[%s13779_s0 + $0x60] sm:$0xe]  ;;  %v2285_v3 = vor.u32 %v2284_v42, %v2281_v37  ;;  %v2485_v8 = vld [vmem:[%s13779_s0 + $0x64] sm:$0x1]  ;;  %v11678_v30 = vadd.f32 %v6295_v12, %v6182_v10 }
 0x1ac   :  { %v9378_v61 = vld [vmem:[#allocation2 + $0x1dc] ss:$72 sps:$4 sm:$0xff]   ;;  %v9380_v63 = vld [vmem:[#allocation2 + $0x1d8] ss:$72 sps:$4 sm:$0xff]   ;;  %v2294_v4 = vor.u32 %v2293_v49, %v2290_v43  ;;  %v8219_v5 = vrot.slane %v2484_v57, 9  ;;  %v2268_v7 = vrot.slane %v2267_v54, 4  ;;  %6782 = vmatprep.subr.bf16.mxu0 %v9395_v56 }
 0x1ad   :  { %v2486_v9 = vld [vmem:[%s13779_s0 + $0x68] sm:$0xe]  ;;  %6715 = vmatprep.mubr.bf16.mxu1 %v9378_v61  ;;  %v2286_v13 = vrot.slane %v2285_v3, 4  ;;  %v2487_v16 = vld [vmem:[%s13779_s0 + $0x6c] sm:$0x1]  ;;  %v2566_v19 = vrot.slane %v2485_v8, 5  ;;  %6783 = vmatpush2.bf16.msra.mxu0 %v9393_v51  ;;  %v6184_v3 = vpop.f32.mrf.mxu0 }
 0x1ae   :  { %v8220_v25 = vrot.slane %v2486_v9, 9  ;;  %6716 = vmatmul.mubr.bf16.gmra.mxu1 %v9380_v63  ;;  %v2277_v31 = vsel %vm9884_vm8, %v2268_v7, %v2276_v55  ;;  %v2570_v33 = vrot.slane %v2487_v16, 5  ;;  %v2644_v34 = vld [vmem:[%s13779_s0 + $0x60] sm:$0xc]  ;;  %v2645_v35 = vld [vmem:[%s13779_s0 + $0x64] sm:$0x3] }
 0x1af   :  { %v2295_v37 = vsel %vm9884_vm8, %v2286_v13, %v2294_v4  ;;  %2428 = vst [vmem:[#allocation2 + $0x260] sm:$0xf] %v2277_v31  ;;  %v2567_v39 = vsel %vm9828_vm6, %v8219_v5, %v2566_v19  ;;  %v2646_v40 = vld [vmem:[%s13779_s0 + $0x68] sm:$0xc]  ;;  %v2647_v41 = vld [vmem:[%s13779_s0 + $0x6c] sm:$0x3]  ;;  %v6297_v4 = vpop.f32.mrf.mxu1  ;;  %v6186_v13 = vpop.f32.mrf.mxu0 }
 0x1b0   :  { %v8235_v42 = vrot.slane %v2644_v34, 10  ;;  %v2729_v43 = vrot.slane %v2645_v35, 6  ;;  %2429 = vst [vmem:[#allocation2 + $0x2a8] sm:$0xf] %v2295_v37  ;;  %v2571_v49 = vsel %vm9828_vm6, %v8220_v25, %v2570_v33  ;;  %2620 = vst [vmem:[#allocation2 + $0x268] sm:$0xf] %v2567_v39  ;;  %v11719_v8 = vadd.f32 %v6297_v4, %v6184_v3 }
 0x1b1   :  { %v8236_v51 = vrot.slane %v2646_v40, 10  ;;  %v2733_v54 = vrot.slane %v2647_v41, 6  ;;  %v9399_v55 = vld [vmem:[%s13778_s1 + $0x7f0] ss:$8 sps:$4 sm:$0xff]   ;;  %v9401_v56 = vld [vmem:[%s13778_s1 + $0x7f4] ss:$8 sps:$4 sm:$0xff]   ;;  %v6299_v16 = vpop.f32.mrf.mxu1 }
 0x1b2   :  { %2621 = vst [vmem:[#allocation2 + $0x2b0] sm:$0xf] %v2571_v49  ;;  %v2730_v57 = vsel %vm11299_vm11, %v8235_v42, %v2729_v43  ;;  %v9402_v61 = vld [vmem:[%s13778_s1 + $0x6e0] ss:$8 sps:$4 sm:$0xff]   ;;  %v9404_v63 = vld [vmem:[%s13778_s1 + $0x6e4] ss:$8 sps:$4 sm:$0xff]   ;;  %6895 = vmatprep.subr.bf16.mxu1 %v9401_v56  ;;  %v11736_v34 = vadd.f32 %v6299_v16, %v6186_v13  ;;  %v11741_v42 = vpop.f32.mrf.mxu0 }
 0x1b3   :  { %v2734_v5 = vsel %vm11299_vm11, %v8236_v51, %v2733_v54  ;;  %2783 = vst [vmem:[#allocation2 + $0x26c] sm:$0xf] %v2730_v57  ;;  %v9405_v7 = vld [vmem:[%s13778_s1 + $0x7e0] ss:$8 sps:$4 sm:$0xff]   ;;  %6896 = vmatpush2.bf16.msra.mxu1 %v9399_v55  ;;  %6784 = vmatprep.subr.bf16.mxu0 %v9404_v63  ;;  %v9407_v9 = vld [vmem:[%s13778_s1 + $0x7e4] ss:$8 sps:$4 sm:$0xff]   ;;  %v11743_v43 = vpop.f32.mrf.mxu1 }
 0x1b4   :  { %2784 = vst [vmem:[#allocation2 + $0x2b4] sm:$0xf] %v2734_v5  ;;  %v8199_v10 = vld [vmem:[%s13779_s0 + $0x88] sm:$0xe]  ;;  %v8200_v12 = vld [vmem:[%s13779_s0 + $0x8c] sm:$0x3]  ;;  %6785 = vmatpush2.bf16.msra.mxu0 %v9402_v61  ;;  %6897 = vmatprep.subr.bf16.mxu1 %v9407_v9  ;;  %v6192_v63 = vpop.f32.mrf.mxu0 }
 0x1b5   :  { %v8201_v19 = vld [vmem:[%s13779_s0 + $0x90] sm:$0xe]  ;;  %v8202_v25 = vld [vmem:[%s13779_s0 + $0x94] sm:$0x3]  ;;  %v2297_v31 = vshrl.u32 %v8199_v10, 16  ;;  %v2300_v33 = vshll.u32 %v8199_v10, 16  ;;  %v6305_v3 = vpop.f32.mrf.mxu1 }
 0x1b6   :  { %v2306_v35 = vshrl.u32 %v8200_v12, 16  ;;  %v2309_v37 = vshll.u32 %v8200_v12, 16  ;;  %v2315_v39 = vshrl.u32 %v8201_v19, 16  ;;  %v2318_v40 = vshll.u32 %v8201_v19, 16  ;;  %v2446_v41 = vld [vmem:[%s13779_s0 + $0x70] sm:$0xf] }
 0x1b7   :  { %v2299_v49 = vrot.slane %v2297_v31, 5  ;;  %v2302_v51 = vrot.slane %v2300_v33, 6  ;;  %v2324_v54 = vshrl.u32 %v8202_v25, 16  ;;  %v2327_v55 = vshll.u32 %v8202_v25, 16  ;;  %2462 = vst [vmem:[#allocation2 + $0x2f4] sm:$0xf] %v2446_v41  ;;  %6898 = vmatpush2.bf16.msra.mxu1 %v9405_v7 }
 0x1b8   :  { %v9390_v56 = vld [vmem:[#allocation2 + $0x264] ss:$72 sps:$4 sm:$0xff]   ;;  %v9392_v57 = vld [vmem:[#allocation2 + $0x260] ss:$72 sps:$4 sm:$0xff]   ;;  %v2308_v61 = vrot.slane %v2306_v35, 5  ;;  %v2311_v5 = vrot.slane %v2309_v37, 6  ;;  %v11751_v25 = vadd.f32 %v6305_v3, %v6192_v63 }
 0x1b9   :  { %v2303_v4 = vor.u32 %v2302_v51, %v2299_v49  ;;  %v2317_v9 = vrot.slane %v2315_v39, 5  ;;  %v2320_v10 = vrot.slane %v2318_v40, 6  ;;  %v2447_v12 = vld [vmem:[%s13779_s0 + $0x78] sm:$0xf]  ;;  %6612 = vmatprep.mubr.bf16.mxu0 %v9390_v56  ;;  %v2326_v13 = vrot.slane %v2324_v54, 5  ;;  %v6194_v39 = vpop.f32.mrf.mxu0  ;;  %v6307_v40 = vpop.f32.mrf.mxu1 }
 0x1ba   :  { %v2329_v16 = vrot.slane %v2327_v55, 6  ;;  %2463 = vst [vmem:[#allocation2 + $0x33c] sm:$0xf] %v2447_v12  ;;  %v9411_v19 = vld [vmem:[%s13778_s1 + $0x6d0] ss:$8 sps:$4 sm:$0xff]   ;;  %6613 = vmatmul.mubr.bf16.gmra.mxu0 %v9392_v57  ;;  %v2312_v35 = vor.u32 %v2311_v5, %v2308_v61  ;;  %v11762_v55 = vadd.f32 %v6307_v40, %v6194_v39 }
 0x1bb   :  { %v9396_v7 = vld [vmem:[#allocation2 + $0x26c] ss:$72 sps:$4 sm:$0xff]   ;;  %v9398_v31 = vld [vmem:[#allocation2 + $0x268] ss:$72 sps:$4 sm:$0xff]   ;;  %v2304_v33 = vrot.slane %v2303_v4, 4  ;;  %v2321_v37 = vor.u32 %v2320_v10, %v2317_v9  ;;  %v6196_v4 = vpop.f32.mrf.mxu0  ;;  %v6309_v5 = vpop.f32.mrf.mxu1 }
 0x1bc   :  { %v2330_v41 = vor.u32 %v2329_v16, %v2326_v13  ;;  %v9413_v49 = vld [vmem:[%s13778_s1 + $0x6d4] ss:$8 sps:$4 sm:$0xff]   ;;  %v2488_v51 = vld [vmem:[%s13779_s0 + $0x70] sm:$0xe]  ;;  %6725 = vmatprep.mubr.bf16.mxu1 %v9396_v7  ;;  %v2490_v61 = vld [vmem:[%s13779_s0 + $0x78] sm:$0xe]  ;;  %v11775_v16 = vadd.f32 %v6309_v5, %v6196_v4 }
 0x1bd   :  { %v2489_v54 = vld [vmem:[%s13779_s0 + $0x74] sm:$0x1]  ;;  %v2313_v56 = vsel %vm9884_vm8, %v2304_v33, %v2312_v35  ;;  %v2322_v57 = vrot.slane %v2321_v37, 4  ;;  %v2491_v63 = vld [vmem:[%s13779_s0 + $0x7c] sm:$0x1]  ;;  %v8221_v3 = vrot.slane %v2488_v51, 9  ;;  %6726 = vmatmul.mubr.bf16.gmra.mxu1 %v9398_v31  ;;  %6786 = vmatprep.subr.bf16.mxu0 %v9413_v49 }
 0x1be   :  { %2430 = vst [vmem:[#allocation2 + $0x2f0] sm:$0xf] %v2313_v56  ;;  %v2574_v9 = vrot.slane %v2489_v54, 5  ;;  %v8222_v10 = vrot.slane %v2490_v61, 9  ;;  %v2578_v12 = vrot.slane %v2491_v63, 5  ;;  %6787 = vmatpush2.bf16.msra.mxu0 %v9411_v19  ;;  %v11798_v54 = vpop.f32.mrf.mxu0 }
 0x1bf   :  { %v2648_v13 = vld [vmem:[%s13779_s0 + $0x70] sm:$0xc]  ;;  %v2331_v7 = vsel %vm9884_vm8, %v2322_v57, %v2330_v41  ;;  %v2649_v33 = vld [vmem:[%s13779_s0 + $0x74] sm:$0x3]  ;;  %v2650_v31 = vld [vmem:[%s13779_s0 + $0x78] sm:$0xc] }
 0x1c0   :  { %v2651_v35 = vld [vmem:[%s13779_s0 + $0x7c] sm:$0x3]  ;;  %2431 = vst [vmem:[#allocation2 + $0x338] sm:$0xf] %v2331_v7  ;;  %v2575_v37 = vsel %vm9828_vm6, %v8221_v3, %v2574_v9  ;;  %v2579_v39 = vsel %vm9828_vm6, %v8222_v10, %v2578_v12  ;;  %v8237_v40 = vrot.slane %v2648_v13, 10  ;;  %v2737_v41 = vrot.slane %v2649_v33, 6  ;;  %v11819_v10 = vpop.f32.mrf.mxu1  ;;  %v6348_v33 = vpop.f32.mrf.mxu0 }
 0x1c1   :  { %v9417_v49 = vld [vmem:[%s13778_s1 + $0x7d0] ss:$8 sps:$4 sm:$0xff]   ;;  %v9419_v51 = vld [vmem:[%s13778_s1 + $0x7d4] ss:$8 sps:$4 sm:$0xff]   ;;  %2622 = vst [vmem:[#allocation2 + $0x2f8] sm:$0xf] %v2575_v37 }
 0x1c2   :  { %2623 = vst [vmem:[#allocation2 + $0x340] sm:$0xf] %v2579_v39  ;;  %v8238_v19 = vrot.slane %v2650_v31, 10  ;;  %v2741_v56 = vrot.slane %v2651_v35, 6  ;;  %v9420_v57 = vld [vmem:[%s13778_s1 + $0x6c0] ss:$8 sps:$4 sm:$0xff]   ;;  %v2738_v61 = vsel %vm11299_vm11, %v8237_v40, %v2737_v41  ;;  %6899 = vmatprep.subr.bf16.mxu1 %v9419_v51  ;;  %v6461_v40 = vpop.f32.mrf.mxu1 }
 0x1c3   :  { %v9422_v63 = vld [vmem:[%s13778_s1 + $0x6c4] ss:$8 sps:$4 sm:$0xff]   ;;  %2785 = vst [vmem:[#allocation2 + $0x2fc] sm:$0xf] %v2738_v61  ;;  %6900 = vmatpush2.bf16.msra.mxu1 %v9417_v49  ;;  %v9423_v4 = vld [vmem:[%s13778_s1 + $0x7c0] ss:$8 sps:$4 sm:$0xff]   ;;  %v6350_v61 = vpop.f32.mrf.mxu0 }
 0x1c4   :  { %v2742_v3 = vsel %vm11299_vm11, %v8238_v19, %v2741_v56  ;;  %v9425_v5 = vld [vmem:[%s13778_s1 + $0x7c4] ss:$8 sps:$4 sm:$0xff]   ;;  %v8203_v9 = vld [vmem:[%s13779_s0 + $0x98] sm:$0xe]  ;;  %6788 = vmatprep.subr.bf16.mxu0 %v9422_v63  ;;  %v8204_v12 = vld [vmem:[%s13779_s0 + $0x9c] sm:$0x3] }
 0x1c5   :  { %2786 = vst [vmem:[#allocation2 + $0x344] sm:$0xf] %v2742_v3  ;;  %v8205_v13 = vld [vmem:[%s13779_s0 + $0xa0] sm:$0xe]  ;;  %v8206_v7 = vld [vmem:[%s13779_s0 + $0xa4] sm:$0x3]  ;;  %6789 = vmatpush2.bf16.msra.mxu0 %v9420_v57  ;;  %6901 = vmatprep.subr.bf16.mxu1 %v9425_v5  ;;  %v6349_v57 = vadd.f32 %v6348_v33, %v11326_v60  ;;  %v6351_v5 = vadd.f32 %v6350_v61, %v11353_v26  ;;  %v6352_v22 = vpop.f32.mrf.mxu0 }
 0x1c6   :  { %v2333_v31 = vshrl.u32 %v8203_v9, 16  ;;  %v2336_v35 = vshll.u32 %v8203_v9, 16  ;;  %v2342_v37 = vshrl.u32 %v8204_v12, 16  ;;  %v2345_v39 = vshll.u32 %v8204_v12, 16  ;;  %v2448_v56 = vld [vmem:[%s13779_s0 + $0x80] sm:$0xf]  ;;  %v6463_v9 = vpop.f32.mrf.mxu1 }
 0x1c7   :  { %v2351_v41 = vshrl.u32 %v8205_v13, 16  ;;  %v2354_v49 = vshll.u32 %v8205_v13, 16  ;;  %v2360_v51 = vshrl.u32 %v8206_v7, 16  ;;  %v2363_v19 = vshll.u32 %v8206_v7, 16  ;;  %v9408_v63 = vld [vmem:[#allocation2 + $0x2f4] ss:$72 sps:$4 sm:$0xff]   ;;  %6902 = vmatpush2.bf16.msra.mxu1 %v9423_v4 }
 0x1c8   :  { %v9410_v3 = vld [vmem:[#allocation2 + $0x2f0] ss:$72 sps:$4 sm:$0xff]   ;;  %v2335_v24 = vrot.slane %v2333_v31, 5  ;;  %2464 = vst [vmem:[#allocation2 + $0x384] sm:$0xf] %v2448_v56  ;;  %v2338_v12 = vrot.slane %v2336_v35, 6  ;;  %6622 = vmatprep.mubr.bf16.mxu0 %v9408_v63  ;;  %v11841_v26 = vadd.f32 %v6461_v40, %v6349_v57  ;;  %v6465_v4 = vpop.f32.mrf.mxu1 }
 0x1c9   :  { %v2344_v18 = vrot.slane %v2342_v37, 5  ;;  %v2347_v13 = vrot.slane %v2345_v39, 6  ;;  %v2353_v23 = vrot.slane %v2351_v41, 5  ;;  %v2449_v7 = vld [vmem:[%s13779_s0 + $0x88] sm:$0xf]  ;;  %v2356_v21 = vrot.slane %v2354_v49, 6  ;;  %6623 = vmatmul.mubr.bf16.gmra.mxu0 %v9410_v3 }
 0x1ca   :  { %v2362_v20 = vrot.slane %v2360_v51, 5  ;;  %v2365_v31 = vrot.slane %v2363_v19, 6  ;;  %2465 = vst [vmem:[#allocation2 + $0x3cc] sm:$0xf] %v2449_v7  ;;  %v9429_v60 = vld [vmem:[%s13778_s1 + $0x6b0] ss:$8 sps:$4 sm:$0xff]   ;;  %v2339_v33 = vor.u32 %v2338_v12, %v2335_v24  ;;  %v6353_v41 = vadd.f32 %v6352_v22, %v11355_v27  ;;  %v11852_v51 = vpop.f32.mrf.mxu0 }
 0x1cb   :  { %v2348_v35 = vor.u32 %v2347_v13, %v2344_v18  ;;  %v9431_v37 = vld [vmem:[%s13778_s1 + $0x6b4] ss:$8 sps:$4 sm:$0xff]   ;;  %v2492_v39 = vld [vmem:[%s13779_s0 + $0x80] sm:$0xe]  ;;  %v11850_v49 = vadd.f32 %v6463_v9, %v6351_v5  ;;  %v2357_v56 = vor.u32 %v2356_v21, %v2353_v23  ;;  %v11854_v18 = vpop.f32.mrf.mxu1  ;;  %v2493_v3 = vld [vmem:[%s13779_s0 + $0x84] sm:$0x1] }
 0x1cc   :  { %v9414_v40 = vld [vmem:[#allocation2 + $0x2fc] ss:$72 sps:$4 sm:$0xff]   ;;  %v9416_v19 = vld [vmem:[#allocation2 + $0x2f8] ss:$72 sps:$4 sm:$0xff]   ;;  %v2366_v61 = vor.u32 %v2365_v31, %v2362_v20  ;;  %v8223_v24 = vrot.slane %v2492_v39, 9  ;;  %v2340_v63 = vrot.slane %v2339_v33, 4  ;;  %6790 = vmatprep.subr.bf16.mxu0 %v9431_v37  ;;  %v11862_v22 = vadd.f32 %v6465_v4, %v6353_v41  ;;  %v6358_v57 = vpop.f32.mrf.mxu0 }
 0x1cd   :  { %v2494_v27 = vld [vmem:[%s13779_s0 + $0x88] sm:$0xe]  ;;  %6735 = vmatprep.mubr.bf16.mxu1 %v9414_v40  ;;  %v2358_v5 = vrot.slane %v2357_v56, 4  ;;  %v2495_v20 = vld [vmem:[%s13779_s0 + $0x8c] sm:$0x1]  ;;  %v2582_v21 = vrot.slane %v2493_v3, 5  ;;  %6791 = vmatpush2.bf16.msra.mxu0 %v9429_v60  ;;  %v6359_v9 = vadd.f32 %v6358_v57, %v11376_v48  ;;  %v6471_v12 = vpop.f32.mrf.mxu1 }
 0x1ce   :  { %v8224_v23 = vrot.slane %v2494_v27, 9  ;;  %6736 = vmatmul.mubr.bf16.gmra.mxu1 %v9416_v19  ;;  %v2349_v13 = vsel %vm9884_vm8, %v2340_v63, %v2348_v35  ;;  %v2586_v7 = vrot.slane %v2495_v20, 5  ;;  %v2652_v31 = vld [vmem:[%s13779_s0 + $0x80] sm:$0xc]  ;;  %v2653_v4 = vld [vmem:[%s13779_s0 + $0x84] sm:$0x3]  ;;  %v6360_v33 = vpop.f32.mrf.mxu0 }
 0x1cf   :  { %v2367_v60 = vsel %vm9884_vm8, %v2358_v5, %v2366_v61  ;;  %2432 = vst [vmem:[#allocation2 + $0x380] sm:$0xf] %v2349_v13  ;;  %v2583_v48 = vsel %vm9828_vm6, %v8223_v24, %v2582_v21  ;;  %v2654_v35 = vld [vmem:[%s13779_s0 + $0x88] sm:$0xc]  ;;  %v2655_v37 = vld [vmem:[%s13779_s0 + $0x8c] sm:$0x3]  ;;  %v6473_v40 = vpop.f32.mrf.mxu1  ;;  %v6361_v3 = vadd.f32 %v6360_v33, %v11401_v2  ;;  %v11903_v21 = vadd.f32 %v6471_v12, %v6359_v9 }
 0x1d0   :  { %v8239_v39 = vrot.slane %v2652_v31, 10  ;;  %v2745_v41 = vrot.slane %v2653_v4, 6  ;;  %2433 = vst [vmem:[#allocation2 + $0x3c8] sm:$0xf] %v2367_v60  ;;  %v2587_v19 = vsel %vm9828_vm6, %v8224_v23, %v2586_v7  ;;  %2624 = vst [vmem:[#allocation2 + $0x388] sm:$0xf] %v2583_v48  ;;  %v6362_v27 = vpop.f32.mrf.mxu0 }
 0x1d1   :  { %v8240_v56 = vrot.slane %v2654_v35, 10  ;;  %v2749_v61 = vrot.slane %v2655_v37, 6  ;;  %v9435_v24 = vld [vmem:[%s13778_s1 + $0x7b0] ss:$8 sps:$4 sm:$0xff]   ;;  %v9437_v63 = vld [vmem:[%s13778_s1 + $0x7b4] ss:$8 sps:$4 sm:$0xff]   ;;  %v6363_v23 = vadd.f32 %v6362_v27, %v11421_v17  ;;  %v6475_v13 = vpop.f32.mrf.mxu1  ;;  %v11911_v31 = vadd.f32 %v6473_v40, %v6361_v3 }
 0x1d2   :  { %2625 = vst [vmem:[#allocation2 + $0x3d0] sm:$0xf] %v2587_v19  ;;  %v2746_v57 = vsel %vm11299_vm11, %v8239_v39, %v2745_v41  ;;  %v9438_v5 = vld [vmem:[%s13778_s1 + $0x6a0] ss:$8 sps:$4 sm:$0xff]   ;;  %v9440_v20 = vld [vmem:[%s13778_s1 + $0x6a4] ss:$8 sps:$4 sm:$0xff]   ;;  %6903 = vmatprep.subr.bf16.mxu1 %v9437_v63  ;;  %v11913_v4 = vpop.f32.mrf.mxu0 }
 0x1d3   :  { %v2750_v2 = vsel %vm11299_vm11, %v8240_v56, %v2749_v61  ;;  %2787 = vst [vmem:[#allocation2 + $0x38c] sm:$0xf] %v2746_v57  ;;  %v9441_v7 = vld [vmem:[%s13778_s1 + $0x7a0] ss:$8 sps:$4 sm:$0xff]   ;;  %6904 = vmatpush2.bf16.msra.mxu1 %v9435_v24  ;;  %6792 = vmatprep.subr.bf16.mxu0 %v9440_v20  ;;  %v9443_v17 = vld [vmem:[%s13778_s1 + $0x7a4] ss:$8 sps:$4 sm:$0xff]   ;;  %v11924_v33 = vadd.f32 %v6475_v13, %v6363_v23  ;;  %v11932_v41 = vpop.f32.mrf.mxu1 }
 0x1d4   :  { %2788 = vst [vmem:[#allocation2 + $0x3d4] sm:$0xf] %v2750_v2  ;;  %v8207_v9 = vld [vmem:[%s13779_s0 + $0xa8] sm:$0xe]  ;;  %v8208_v12 = vld [vmem:[%s13779_s0 + $0xac] sm:$0x3]  ;;  %6793 = vmatpush2.bf16.msra.mxu0 %v9438_v5  ;;  %v6368_v39 = vpop.f32.mrf.mxu0  ;;  %6905 = vmatprep.subr.bf16.mxu1 %v9443_v17 }
 0x1d5   :  { %13799 = vst [vmem:[#allocation9_spill] sm:$0xff] %v11924_v33  ;;  %v8209_v60 = vld [vmem:[%s13779_s0 + $0xb0] sm:$0xe]  ;;  %v8210_v48 = vld [vmem:[%s13779_s0 + $0xb4] sm:$0x3]  ;;  %v2369_v35 = vshrl.u32 %v8207_v9, 16  ;;  %v6369_v2 = vadd.f32 %v6368_v39, %v11455_v36 }
 0x1d6   :  { %v2372_v37 = vshll.u32 %v8207_v9, 16  ;;  %13800 = vst [vmem:[#allocation10_spill] sm:$0xff] %v11932_v41  ;;  %v2378_v40 = vshrl.u32 %v8208_v12, 16  ;;  %v2381_v19 = vshll.u32 %v8208_v12, 16  ;;  %v2387_v56 = vshrl.u32 %v8209_v60, 16  ;;  %v6370_v5 = vpop.f32.mrf.mxu0 }
 0x1d7   :  { %v2390_v61 = vshll.u32 %v8209_v60, 16  ;;  %v2450_v24 = vld [vmem:[%s13779_s0 + $0x90] sm:$0xf]  ;;  %v2371_v63 = vrot.slane %v2369_v35, 5  ;;  %v2396_v27 = vshrl.u32 %v8210_v48, 16  ;;  %v2399_v57 = vshll.u32 %v8210_v48, 16  ;;  %6906 = vmatpush2.bf16.msra.mxu1 %v9441_v7 }
 0x1d8   :  { %v2374_v3 = vrot.slane %v2372_v37, 6  ;;  %2466 = vst [vmem:[#allocation2 + $0x414] sm:$0xf] %v2450_v24  ;;  %v9426_v20 = vld [vmem:[#allocation2 + $0x384] ss:$72 sps:$4 sm:$0xff]   ;;  %v2380_v13 = vrot.slane %v2378_v40, 5  ;;  %v6371_v17 = vadd.f32 %v6370_v5, %v11466_v0  ;;  %v6481_v37 = vpop.f32.mrf.mxu1  ;;  %v6372_v48 = vpop.f32.mrf.mxu0 }
 0x1d9   :  { %v9428_v23 = vld [vmem:[#allocation2 + $0x380] ss:$72 sps:$4 sm:$0xff]   ;;  %v2383_v12 = vrot.slane %v2381_v19, 6  ;;  %v2389_v60 = vrot.slane %v2387_v56, 5  ;;  %v2392_v33 = vrot.slane %v2390_v61, 6  ;;  %6632 = vmatprep.mubr.bf16.mxu0 %v9426_v20  ;;  %v2398_v24 = vrot.slane %v2396_v27, 5 }
 0x1da   :  { %v2375_v9 = vor.u32 %v2374_v3, %v2371_v63  ;;  %v2451_v35 = vld [vmem:[%s13779_s0 + $0x98] sm:$0xf]  ;;  %v2401_v41 = vrot.slane %v2399_v57, 6  ;;  %v11945_v7 = vadd.f32 %v6481_v37, %v6369_v2  ;;  %v6373_v0 = vadd.f32 %v6372_v48, %v11477_v14  ;;  %6633 = vmatmul.mubr.bf16.gmra.mxu0 %v9428_v23  ;;  %v9434_v40 = vld [vmem:[#allocation2 + $0x388] ss:$72 sps:$4 sm:$0xff]   ;;  %v6483_v63 = vpop.f32.mrf.mxu1 }
 0x1db   :  { %2467 = vst [vmem:[#allocation2 + $0x45c] sm:$0xf] %v2451_v35  ;;  %v9447_v36 = vld [vmem:[%s13778_s1 + $0x690] ss:$8 sps:$4 sm:$0xff]   ;;  %v9432_v39 = vld [vmem:[#allocation2 + $0x38c] ss:$72 sps:$4 sm:$0xff]   ;;  %v2384_v56 = vor.u32 %v2383_v12, %v2380_v13  ;;  %v2393_v61 = vor.u32 %v2392_v33, %v2389_v60  ;;  %v11957_v5 = vadd.f32 %v6483_v63, %v6371_v17 }
 0x1dc   :  { %v2376_v19 = vrot.slane %v2375_v9, 4  ;;  %v2402_v3 = vor.u32 %v2401_v41, %v2398_v24  ;;  %v9449_v27 = vld [vmem:[%s13778_s1 + $0x694] ss:$8 sps:$4 sm:$0xff]   ;;  %v2496_v57 = vld [vmem:[%s13779_s0 + $0x90] sm:$0xe]  ;;  %6745 = vmatprep.mubr.bf16.mxu1 %v9432_v39  ;;  %v6485_v2 = vpop.f32.mrf.mxu1 }
 0x1dd   :  { %v2497_v14 = vld [vmem:[%s13779_s0 + $0x94] sm:$0x1]  ;;  %v2394_v20 = vrot.slane %v2393_v61, 4  ;;  %v2498_v41 = vld [vmem:[%s13779_s0 + $0x98] sm:$0xe]  ;;  %v8225_v13 = vrot.slane %v2496_v57, 9  ;;  %6746 = vmatmul.mubr.bf16.gmra.mxu1 %v9434_v40  ;;  %6794 = vmatprep.subr.bf16.mxu0 %v9449_v27  ;;  %v11970_v35 = vadd.f32 %v6485_v2, %v6373_v0  ;;  %v11996_v27 = vpop.f32.mrf.mxu0 }
 0x1de   :  { %v2385_v33 = vsel %vm9884_vm8, %v2376_v19, %v2384_v56  ;;  %v2499_v23 = vld [vmem:[%s13779_s0 + $0x9c] sm:$0x1]  ;;  %v2590_v17 = vrot.slane %v2497_v14, 5  ;;  %v8226_v9 = vrot.slane %v2498_v41, 9  ;;  %v2656_v60 = vld [vmem:[%s13779_s0 + $0x90] sm:$0xc]  ;;  %6795 = vmatpush2.bf16.msra.mxu0 %v9447_v36 }
 0x1df   :  { %2434 = vst [vmem:[#allocation2 + $0x410] sm:$0xf] %v2385_v33  ;;  %v2594_v12 = vrot.slane %v2499_v23, 5  ;;  %v2403_v37 = vsel %vm9884_vm8, %v2394_v20, %v2402_v3  ;;  %v2657_v48 = vld [vmem:[%s13779_s0 + $0x94] sm:$0x3]  ;;  %v8241_v40 = vrot.slane %v2656_v60, 10 }
 0x1e0   :  { %v2658_v24 = vld [vmem:[%s13779_s0 + $0x98] sm:$0xc]  ;;  %v2659_v39 = vld [vmem:[%s13779_s0 + $0x9c] sm:$0x3]  ;;  %2435 = vst [vmem:[#allocation2 + $0x458] sm:$0xf] %v2403_v37  ;;  %v2591_v0 = vsel %vm9828_vm6, %v8225_v13, %v2590_v17  ;;  %v6378_v37 = vpop.f32.mrf.mxu0 }
 0x1e1   :  { %v2595_v44 = vsel %vm9828_vm6, %v8226_v9, %v2594_v12  ;;  %v2753_v19 = vrot.slane %v2657_v48, 6  ;;  %v9453_v56 = vld [vmem:[%s13778_s1 + $0x790] ss:$8 sps:$4 sm:$0xff]   ;;  %v9455_v61 = vld [vmem:[%s13778_s1 + $0x794] ss:$8 sps:$4 sm:$0xff]   ;;  %v8242_v36 = vrot.slane %v2658_v24, 10 }
 0x1e2   :  { %2626 = vst [vmem:[#allocation2 + $0x418] sm:$0xf] %v2591_v0  ;;  %2627 = vst [vmem:[#allocation2 + $0x460] sm:$0xf] %v2595_v44  ;;  %v2757_v63 = vrot.slane %v2659_v39, 6  ;;  %6907 = vmatprep.subr.bf16.mxu1 %v9455_v61  ;;  %v6379_v0 = vadd.f32 %v6378_v37, %v11518_v53 }
 0x1e3   :  { %v9456_v3 = vld [vmem:[%s13778_s1 + $0x680] ss:$8 sps:$4 sm:$0xff]   ;;  %v2754_v57 = vsel %vm11299_vm11, %v8241_v40, %v2753_v19  ;;  %v9458_v14 = vld [vmem:[%s13778_s1 + $0x684] ss:$8 sps:$4 sm:$0xff]   ;;  %6908 = vmatpush2.bf16.msra.mxu1 %v9453_v56  ;;  %v8243_v23 = vld [vmem:[%s13779_s0 + $0x10] sm:$0xf]  ;;  %v12030_v19 = vpop.f32.mrf.mxu1  ;;  %v6380_v56 = vpop.f32.mrf.mxu0 }
 0x1e4   :  { %v2758_v33 = vsel %vm11299_vm11, %v8242_v36, %v2757_v63  ;;  %2789 = vst [vmem:[#allocation2 + $0x41c] sm:$0xf] %v2754_v57  ;;  %v9459_v20 = vld [vmem:[%s13778_s1 + $0x780] ss:$8 sps:$4 sm:$0xff]   ;;  %v9461_v41 = vld [vmem:[%s13778_s1 + $0x784] ss:$8 sps:$4 sm:$0xff]   ;;  %6796 = vmatprep.subr.bf16.mxu0 %v9458_v14 }
 0x1e5   :  { %2790 = vst [vmem:[#allocation2 + $0x464] sm:$0xf] %v2758_v33  ;;  %v8244_v13 = vld [vmem:[%s13779_s0 + $0x18] sm:$0xf]  ;;  %2807 = vst [vmem:[#allocation2 + $0x30] sm:$0xf] %v8243_v23  ;;  %6797 = vmatpush2.bf16.msra.mxu0 %v9456_v3  ;;  %6909 = vmatprep.subr.bf16.mxu1 %v9461_v41  ;;  %v6381_v3 = vadd.f32 %v6380_v56, %v11533_v62 }
 0x1e6   :  { %v8259_v2 = vld [vmem:[%s13779_s0 + $0x10] sm:$0xe]  ;;  %v8260_v17 = vld [vmem:[%s13779_s0 + $0x14] sm:$0x1]  ;;  %2808 = vst [vmem:[#allocation2 + $0x78] sm:$0xf] %v8244_v13 }
 0x1e7   :  { %v8261_v9 = vld [vmem:[%s13779_s0 + $0x18] sm:$0xe]  ;;  %v8262_v12 = vld [vmem:[%s13779_s0 + $0x1c] sm:$0x1]  ;;  %v8291_v60 = vrot.slane %v8259_v2, 9  ;;  %v2889_v48 = vrot.slane %v8260_v17, 5  ;;  %6910 = vmatpush2.bf16.msra.mxu1 %v9459_v20  ;;  %v6382_v20 = vpop.f32.mrf.mxu0 }
 0x1e8   :  { %v8292_v24 = vrot.slane %v8261_v9, 9  ;;  %v2893_v39 = vrot.slane %v8262_v12, 5  ;;  %v9444_v44 = vld [vmem:[#allocation2 + $0x414] ss:$72 sps:$4 sm:$0xff]   ;;  %v9446_v40 = vld [vmem:[#allocation2 + $0x410] ss:$72 sps:$4 sm:$0xff]   ;;  %v6491_v9 = vpop.f32.mrf.mxu1  ;;  %v6383_v12 = vadd.f32 %v6382_v20, %v11550_v11 }
 0x1e9   :  { %v2890_v61 = vsel %vm9828_vm6, %v8291_v60, %v2889_v48  ;;  %v9467_v63 = vld [vmem:[%s13778_s1 + $0x874] ss:$8 sps:$4 sm:$0xff]   ;;  %v8307_v53 = vld [vmem:[%s13779_s0 + $0x10] sm:$0xc]  ;;  %6642 = vmatprep.mubr.bf16.mxu0 %v9444_v44  ;;  %v8309_v14 = vld [vmem:[%s13779_s0 + $0x18] sm:$0xc] }
 0x1ea   :  { %v2894_v36 = vsel %vm9828_vm6, %v8292_v24, %v2893_v39  ;;  %2967 = vst [vmem:[#allocation2 + $0x34] sm:$0xf] %v2890_v61  ;;  %v8308_v57 = vld [vmem:[%s13779_s0 + $0x14] sm:$0x3]  ;;  %v8310_v33 = vld [vmem:[%s13779_s0 + $0x1c] sm:$0x3]  ;;  %6643 = vmatmul.mubr.bf16.gmra.mxu0 %v9446_v40  ;;  %6992 = vmatprep.subr.bf16.mxu0 %v9467_v63  ;;  %v12063_v39 = vadd.f32 %v6491_v9, %v6379_v0  ;;  %v6493_v40 = vpop.f32.mrf.mxu1 }
 0x1eb   :  { %2968 = vst [vmem:[#allocation2 + $0x7c] sm:$0xf] %v2894_v36  ;;  %v8339_v41 = vrot.slane %v8307_v53, 10  ;;  %v3049_v62 = vrot.slane %v8308_v57, 6  ;;  %v8340_v23 = vrot.slane %v8309_v14, 10  ;;  %v3053_v13 = vrot.slane %v8310_v33, 6 }
 0x1ec   :  { %v9450_v2 = vld [vmem:[#allocation2 + $0x41c] ss:$72 sps:$4 sm:$0xff]   ;;  %v9452_v17 = vld [vmem:[#allocation2 + $0x418] ss:$72 sps:$4 sm:$0xff]   ;;  %v8356_v24 = vld [vmem:[%s13779_s0 + $0x28] sm:$0xf]  ;;  %v12080_v36 = vadd.f32 %v6493_v40, %v6381_v3  ;;  %v6495_v33 = vpop.f32.mrf.mxu1 }
 0x1ed   :  { %v3050_v60 = vsel %vm11299_vm11, %v8339_v41, %v3049_v62  ;;  %v3054_v37 = vsel %vm11299_vm11, %v8340_v23, %v3053_v13  ;;  %v8355_v48 = vld [vmem:[%s13779_s0 + $0x20] sm:$0xf]  ;;  %6755 = vmatprep.mubr.bf16.mxu1 %v9450_v2  ;;  %3161 = vst [vmem:[#allocation2 + $0x84] sm:$0xf] %v8356_v24  ;;  %v8246_v44 = vld [vmem:[%s13779_s0 + $0x28] sm:$0xf]  ;;  %v12085_v62 = vadd.f32 %v6495_v33, %v6383_v12 }
 0x1ee   :  { %3127 = vst [vmem:[#allocation2 + $0x38] sm:$0xf] %v3050_v60  ;;  %3128 = vst [vmem:[#allocation2 + $0x80] sm:$0xf] %v3054_v37  ;;  %v8245_v11 = vld [vmem:[%s13779_s0 + $0x20] sm:$0xf]  ;;  %6756 = vmatmul.mubr.bf16.gmra.mxu1 %v9452_v17 }
 0x1ef   :  { %3160 = vst [vmem:[#allocation2 + $0x3c] sm:$0xf] %v8355_v48  ;;  %2809 = vst [vmem:[#allocation2 + $0xc0] sm:$0xf] %v8245_v11  ;;  %v8263_v0 = vld [vmem:[%s13779_s0 + $0x20] sm:$0xe] }
 0x1f0   :  { %2810 = vst [vmem:[#allocation2 + $0x108] sm:$0xf] %v8246_v44  ;;  %v8264_v56 = vld [vmem:[%s13779_s0 + $0x24] sm:$0x1]  ;;  %v8265_v61 = vld [vmem:[%s13779_s0 + $0x28] sm:$0xe]  ;;  %v12112_v44 = vpop.f32.mrf.mxu0 }
 0x1f1   :  { %v8266_v63 = vld [vmem:[%s13779_s0 + $0x2c] sm:$0x1]  ;;  %v8293_v53 = vrot.slane %v8263_v0, 9  ;;  %v2897_v57 = vrot.slane %v8264_v56, 5  ;;  %v8294_v14 = vrot.slane %v8265_v61, 9 }
 0x1f2   :  { %v9462_v20 = vld [vmem:[#allocation2 + $0x30] ss:$72 sps:$4 sm:$0xff]   ;;  %v2901_v41 = vrot.slane %v8266_v63, 5  ;;  %v9464_v23 = vld [vmem:[#allocation2 + $0x34] ss:$72 sps:$4 sm:$0xff]  }
 0x1f3   :  { %v9465_v13 = vld [vmem:[%s13778_s1 + $0x870] ss:$8 sps:$4 sm:$0xff]   ;;  %v2898_v3 = vsel %vm9828_vm6, %v8293_v53, %v2897_v57  ;;  %v9473_v2 = vld [vmem:[%s13778_s1 + $0x864] ss:$8 sps:$4 sm:$0xff]   ;;  %v8311_v9 = vld [vmem:[%s13779_s0 + $0x20] sm:$0xc]  ;;  %6798 = vmatprep.mubr.bf16.mxu0 %v9464_v23  ;;  %v6388_v23 = vpop.f32.mrf.mxu0 }
 0x1f4   :  { %v2902_v17 = vsel %vm9828_vm6, %v8294_v14, %v2901_v41  ;;  %2969 = vst [vmem:[#allocation2 + $0xc4] sm:$0xf] %v2898_v3  ;;  %v8312_v12 = vld [vmem:[%s13779_s0 + $0x24] sm:$0x3]  ;;  %v9471_v60 = vld [vmem:[%s13778_s1 + $0x860] ss:$8 sps:$4 sm:$0xff]   ;;  %6799 = vmatmul.mubr.bf16.vlgmr.msra.gmra.mxu0 %v9462_v20 }
 0x1f5   :  { %2970 = vst [vmem:[#allocation2 + $0x10c] sm:$0xf] %v2902_v17  ;;  %v8313_v37 = vld [vmem:[%s13779_s0 + $0x28] sm:$0xc]  ;;  %v8314_v48 = vld [vmem:[%s13779_s0 + $0x2c] sm:$0x3]  ;;  %6993 = vmatpush1.bf16.msra.mxu0 %v9465_v13 }
 0x1f6   :  { %v8341_v24 = vrot.slane %v8311_v9, 10  ;;  %v3057_v11 = vrot.slane %v8312_v12, 6  ;;  %v9468_v40 = vld [vmem:[#allocation2 + $0x38] ss:$72 sps:$4 sm:$0xff]   ;;  %v8342_v0 = vrot.slane %v8313_v37, 10  ;;  %v3061_v56 = vrot.slane %v8314_v48, 6  ;;  %6994 = vmatprep.subr.bf16.mxu0 %v9473_v2 }
 0x1f7   :  { %v9470_v61 = vld [vmem:[#allocation2 + $0x3c] ss:$72 sps:$4 sm:$0xff]   ;;  %v8357_v53 = vld [vmem:[%s13779_s0 + $0x30] sm:$0xf]  ;;  %v8358_v57 = vld [vmem:[%s13779_s0 + $0x38] sm:$0xf]  ;;  %v6389_v9 = vadd.f32 %v6388_v23, %v11565_v50 }
 0x1f8   :  { %v3058_v63 = vsel %vm11299_vm11, %v8341_v24, %v3057_v11  ;;  %v9479_v14 = vld [vmem:[%s13778_s1 + $0x854] ss:$8 sps:$4 sm:$0xff]   ;;  %v3062_v33 = vsel %vm11299_vm11, %v8342_v0, %v3061_v56  ;;  %3162 = vst [vmem:[#allocation2 + $0xcc] sm:$0xf] %v8357_v53  ;;  %3163 = vst [vmem:[#allocation2 + $0x114] sm:$0xf] %v8358_v57  ;;  %6911 = vmatprep.mubr.bf16.mxu1 %v9470_v61  ;;  %v6390_v11 = vpop.f32.mrf.mxu0  ;;  %v12149_v61 = vpop.f32.mrf.mxu1 }
 0x1f9   :  { %3129 = vst [vmem:[#allocation2 + $0xc8] sm:$0xf] %v3058_v63  ;;  %3130 = vst [vmem:[#allocation2 + $0x110] sm:$0xf] %v3062_v33  ;;  %v8247_v20 = vld [vmem:[%s13779_s0 + $0x30] sm:$0xf]  ;;  %6912 = vmatmul.mubr.bf16.vlgmr.msra.gmra.mxu1 %v9468_v40  ;;  %6995 = vmatpush1.bf16.msra.mxu0 %v9471_v60  ;;  %v6391_v63 = vadd.f32 %v6390_v11, %v11587_v15 }
 0x1fa   :  { %v8248_v41 = vld [vmem:[%s13779_s0 + $0x38] sm:$0xf]  ;;  %2811 = vst [vmem:[#allocation2 + $0x150] sm:$0xf] %v8247_v20  ;;  %v8267_v3 = vld [vmem:[%s13779_s0 + $0x30] sm:$0xe]  ;;  %6996 = vmatprep.subr.bf16.mxu0 %v9479_v14  ;;  %v6392_v53 = vpop.f32.mrf.mxu0 }
 0x1fb   :  { %v9477_v13 = vld [vmem:[%s13778_s1 + $0x850] ss:$8 sps:$4 sm:$0xff]   ;;  %2812 = vst [vmem:[#allocation2 + $0x198] sm:$0xf] %v8248_v41  ;;  %v8268_v2 = vld [vmem:[%s13779_s0 + $0x34] sm:$0x1]  ;;  %v6393_v20 = vadd.f32 %v6392_v53, %v11613_v45  ;;  %v6501_v45 = vpop.f32.mrf.mxu1 }
 0x1fc   :  { %v8269_v17 = vld [vmem:[%s13779_s0 + $0x38] sm:$0xe]  ;;  %v8270_v12 = vld [vmem:[%s13779_s0 + $0x3c] sm:$0x1]  ;;  %v8295_v37 = vrot.slane %v8267_v3, 9  ;;  %v2905_v48 = vrot.slane %v8268_v2, 5 }
 0x1fd   :  { %v8296_v24 = vrot.slane %v8269_v17, 9  ;;  %v9474_v40 = vld [vmem:[#allocation2 + $0xc4] ss:$72 sps:$4 sm:$0xff]   ;;  %v9476_v0 = vld [vmem:[#allocation2 + $0xc0] ss:$72 sps:$4 sm:$0xff]   ;;  %v2909_v56 = vrot.slane %v8270_v12, 5  ;;  %6997 = vmatpush1.bf16.msra.mxu0 %v9477_v13  ;;  %v6503_v53 = vpop.f32.mrf.mxu1 }
 0x1fe   :  { %v9485_v50 = vld [vmem:[%s13778_s1 + $0x844] ss:$8 sps:$4 sm:$0xff]   ;;  %v2906_v60 = vsel %vm9828_vm6, %v8295_v37, %v2905_v48  ;;  %6808 = vmatprep.mubr.bf16.mxu0 %v9474_v40  ;;  %v9483_v57 = vld [vmem:[%s13778_s1 + $0x840] ss:$8 sps:$4 sm:$0xff]   ;;  %v8315_v15 = vld [vmem:[%s13779_s0 + $0x30] sm:$0xc]  ;;  %v6394_v48 = vpop.f32.mrf.mxu0 }
 0x1ff   :  { %v2910_v14 = vsel %vm9828_vm6, %v8296_v24, %v2909_v56  ;;  %2971 = vst [vmem:[#allocation2 + $0x154] sm:$0xf] %v2906_v60  ;;  %v8316_v33 = vld [vmem:[%s13779_s0 + $0x34] sm:$0x3]  ;;  %6809 = vmatmul.mubr.bf16.gmra.mxu0 %v9476_v0  ;;  %v8317_v23 = vld [vmem:[%s13779_s0 + $0x38] sm:$0xc]  ;;  %6998 = vmatprep.subr.bf16.mxu0 %v9485_v50  ;;  %v6282_v56 = vadd.f32 %v11617_v47, %v11615_v46 }
 0x200   :  { %2972 = vst [vmem:[#allocation2 + $0x19c] sm:$0xf] %v2910_v14  ;;  %v9491_v41 = vld [vmem:[%s13778_s1 + $0x834] ss:$8 sps:$4 sm:$0xff]   ;;  %v8343_v2 = vrot.slane %v8315_v15, 10  ;;  %v3065_v37 = vrot.slane %v8316_v33, 6  ;;  %v12186_v60 = vadd.f32 %v6501_v45, %v6389_v9  ;;  %v12204_v15 = vadd.f32 %v6503_v53, %v6391_v63 }
 0x201   :  { %v8318_v3 = vld [vmem:[%s13779_s0 + $0x3c] sm:$0x3]  ;;  %v9480_v17 = vld [vmem:[#allocation2 + $0xcc] ss:$72 sps:$4 sm:$0xff]   ;;  %v9482_v12 = vld [vmem:[#allocation2 + $0xc8] ss:$72 sps:$4 sm:$0xff]   ;;  %v6395_v33 = vadd.f32 %v6394_v48, %v6282_v56  ;;  %6999 = vmatpush1.bf16.msra.mxu0 %v9483_v57 }
 0x202   :  { %v8344_v24 = vrot.slane %v8317_v23, 10  ;;  %v3069_v11 = vrot.slane %v8318_v3, 6  ;;  %v8359_v40 = vld [vmem:[%s13779_s0 + $0x40] sm:$0xf]  ;;  %v8360_v0 = vld [vmem:[%s13779_s0 + $0x48] sm:$0xf]  ;;  %6921 = vmatprep.mubr.bf16.mxu1 %v9480_v17  ;;  %v3066_v50 = vsel %vm11299_vm11, %v8343_v2, %v3065_v37  ;;  %v6505_v17 = vpop.f32.mrf.mxu1  ;;  %7000 = vmatprep.subr.bf16.mxu0 %v9491_v41 }
 0x203   :  { %v9489_v13 = vld [vmem:[%s13778_s1 + $0x830] ss:$8 sps:$4 sm:$0xff]   ;;  %3164 = vst [vmem:[#allocation2 + $0x15c] sm:$0xf] %v8359_v40  ;;  %3165 = vst [vmem:[#allocation2 + $0x1a4] sm:$0xf] %v8360_v0  ;;  %6922 = vmatmul.mubr.bf16.gmra.mxu1 %v9482_v12  ;;  %v12218_v45 = vadd.f32 %v6505_v17, %v6393_v20 }
 0x204   :  { %v3070_v14 = vsel %vm11299_vm11, %v8344_v24, %v3069_v11  ;;  %3131 = vst [vmem:[#allocation2 + $0x158] sm:$0xf] %v3066_v50  ;;  %v9497_v46 = vld [vmem:[%s13778_s1 + $0x824] ss:$8 sps:$4 sm:$0xff]   ;;  %v8249_v47 = vld [vmem:[%s13779_s0 + $0x40] sm:$0xf]  ;;  %v6507_v40 = vpop.f32.mrf.mxu1 }
 0x205   :  { %v8250_v9 = vld [vmem:[%s13779_s0 + $0x48] sm:$0xf]  ;;  %3132 = vst [vmem:[#allocation2 + $0x1a0] sm:$0xf] %v3070_v14  ;;  %2813 = vst [vmem:[#allocation2 + $0x1e0] sm:$0xf] %v8249_v47  ;;  %v12225_v56 = vadd.f32 %v6507_v40, %v6395_v33  ;;  %7001 = vmatpush1.bf16.msra.mxu0 %v9489_v13 }
 0x206   :  { %2814 = vst [vmem:[#allocation2 + $0x228] sm:$0xf] %v8250_v9  ;;  %v8271_v23 = vld [vmem:[%s13779_s0 + $0x40] sm:$0xe]  ;;  %v8272_v3 = vld [vmem:[%s13779_s0 + $0x44] sm:$0x1]  ;;  %7002 = vmatprep.subr.bf16.mxu0 %v9497_v46 }
 0x207   :  { %v8273_v2 = vld [vmem:[%s13779_s0 + $0x48] sm:$0xe]  ;;  %v8274_v63 = vld [vmem:[%s13779_s0 + $0x4c] sm:$0x1]  ;;  %v8297_v57 = vrot.slane %v8271_v23, 9  ;;  %v2913_v12 = vrot.slane %v8272_v3, 5 }
 0x208   :  { %v8298_v37 = vrot.slane %v8273_v2, 9  ;;  %v9486_v48 = vld [vmem:[#allocation2 + $0x154] ss:$72 sps:$4 sm:$0xff]   ;;  %v9488_v24 = vld [vmem:[#allocation2 + $0x150] ss:$72 sps:$4 sm:$0xff]   ;;  %v2917_v11 = vrot.slane %v8274_v63, 5 }
 0x209   :  { %v9495_v0 = vld [vmem:[%s13778_s1 + $0x820] ss:$8 sps:$4 sm:$0xff]   ;;  %v2914_v41 = vsel %vm9828_vm6, %v8297_v57, %v2913_v12  ;;  %6818 = vmatprep.mubr.bf16.mxu0 %v9486_v48  ;;  %v9503_v20 = vld [vmem:[%s13778_s1 + $0x814] ss:$8 sps:$4 sm:$0xff]   ;;  %v8320_v14 = vld [vmem:[%s13779_s0 + $0x44] sm:$0x3]  ;;  %v6398_v57 = vpop.f32.mrf.mxu0 }
 0x20a   :  { %v2918_v50 = vsel %vm9828_vm6, %v8298_v37, %v2917_v11  ;;  %2973 = vst [vmem:[#allocation2 + $0x1e4] sm:$0xf] %v2914_v41  ;;  %v8319_v53 = vld [vmem:[%s13779_s0 + $0x40] sm:$0xc]  ;;  %6819 = vmatmul.mubr.bf16.gmra.mxu0 %v9488_v24  ;;  %v8321_v13 = vld [vmem:[%s13779_s0 + $0x48] sm:$0xc]  ;;  %v6399_v24 = vadd.f32 %v6398_v57, %v11644_v1 }
 0x20b   :  { %2974 = vst [vmem:[#allocation2 + $0x22c] sm:$0xf] %v2918_v50  ;;  %v8322_v47 = vld [vmem:[%s13779_s0 + $0x4c] sm:$0x3]  ;;  %v8345_v9 = vrot.slane %v8319_v53, 10  ;;  %v3073_v33 = vrot.slane %v8320_v14, 6  ;;  %7003 = vmatpush1.bf16.msra.mxu0 %v9495_v0  ;;  %v6400_v41 = vpop.f32.mrf.mxu0 }
 0x20c   :  { %v8346_v23 = vrot.slane %v8321_v13, 10  ;;  %v3077_v3 = vrot.slane %v8322_v47, 6  ;;  %v8361_v2 = vld [vmem:[%s13779_s0 + $0x50] sm:$0xf]  ;;  %v9492_v17 = vld [vmem:[#allocation2 + $0x15c] ss:$72 sps:$4 sm:$0xff]   ;;  %7004 = vmatprep.subr.bf16.mxu0 %v9503_v20  ;;  %v6401_v14 = vadd.f32 %v6400_v41, %v11649_v32 }
 0x20d   :  { %v9494_v63 = vld [vmem:[#allocation2 + $0x158] ss:$72 sps:$4 sm:$0xff]   ;;  %v3074_v46 = vsel %vm11299_vm11, %v8345_v9, %v3073_v33  ;;  %3166 = vst [vmem:[#allocation2 + $0x1ec] sm:$0xf] %v8361_v2  ;;  %6931 = vmatprep.mubr.bf16.mxu1 %v9492_v17  ;;  %v9509_v11 = vld [vmem:[%s13778_s1 + $0x804] ss:$8 sps:$4 sm:$0xff]  }
 0x20e   :  { %v9501_v12 = vld [vmem:[%s13778_s1 + $0x810] ss:$8 sps:$4 sm:$0xff]   ;;  %v3078_v37 = vsel %vm11299_vm11, %v8346_v23, %v3077_v3  ;;  %3133 = vst [vmem:[#allocation2 + $0x1e8] sm:$0xf] %v3074_v46  ;;  %6932 = vmatmul.mubr.bf16.gmra.mxu1 %v9494_v63  ;;  %v9507_v1 = vld [vmem:[%s13778_s1 + $0x800] ss:$8 sps:$4 sm:$0xff]   ;;  %v6402_v23 = vpop.f32.mrf.mxu0 }
 0x20f   :  { %v8362_v48 = vld [vmem:[%s13779_s0 + $0x58] sm:$0xf]  ;;  %3134 = vst [vmem:[#allocation2 + $0x230] sm:$0xf] %v3078_v37  ;;  %v8251_v40 = vld [vmem:[%s13779_s0 + $0x70] sm:$0xf]  ;;  %7005 = vmatpush1.bf16.msra.mxu0 %v9501_v12  ;;  %v6403_v63 = vadd.f32 %v6402_v23, %v11657_v52 }
 0x210   :  { %3167 = vst [vmem:[#allocation2 + $0x234] sm:$0xf] %v8362_v48  ;;  %v8252_v0 = vld [vmem:[%s13779_s0 + $0x78] sm:$0xf]  ;;  %2815 = vst [vmem:[#allocation2 + $0x270] sm:$0xf] %v8251_v40  ;;  %7006 = vmatprep.subr.bf16.mxu0 %v9509_v11  ;;  %v6511_v48 = vpop.f32.mrf.mxu1  ;;  %v6404_v11 = vpop.f32.mrf.mxu0 }
 0x211   :  { %2816 = vst [vmem:[#allocation2 + $0x2b8] sm:$0xf] %v8252_v0  ;;  %v8275_v50 = vld [vmem:[%s13779_s0 + $0x70] sm:$0xe]  ;;  %v8276_v20 = vld [vmem:[%s13779_s0 + $0x74] sm:$0x1] }
 0x212   :  { %v8277_v53 = vld [vmem:[%s13779_s0 + $0x78] sm:$0xe]  ;;  %v8278_v13 = vld [vmem:[%s13779_s0 + $0x7c] sm:$0x1]  ;;  %v8299_v47 = vrot.slane %v8275_v50, 9  ;;  %v2921_v9 = vrot.slane %v8276_v20, 5  ;;  %v6292_v50 = vadd.f32 %v11667_v59, %v11665_v58  ;;  %v12308_v20 = vadd.f32 %v6511_v48, %v6399_v24 }
 0x213   :  { %v8300_v33 = vrot.slane %v8277_v53, 9  ;;  %v9498_v3 = vld [vmem:[#allocation2 + $0x1e4] ss:$72 sps:$4 sm:$0xff]   ;;  %v9500_v2 = vld [vmem:[#allocation2 + $0x1e0] ss:$72 sps:$4 sm:$0xff]   ;;  %v2925_v17 = vrot.slane %v8278_v13, 5  ;;  %7007 = vmatpush1.bf16.msra.mxu0 %v9507_v1 }
 0x214   :  { %v2922_v46 = vsel %vm9828_vm6, %v8299_v47, %v2921_v9  ;;  %6828 = vmatprep.mubr.bf16.mxu0 %v9498_v3  ;;  %v9513_v57 = vld [vmem:[%s13778_s1 + $0x8f0] ss:$8 sps:$4 sm:$0xff]   ;;  %v9515_v12 = vld [vmem:[%s13778_s1 + $0x8f4] ss:$8 sps:$4 sm:$0xff]   ;;  %v6513_v9 = vpop.f32.mrf.mxu1  ;;  %v8363_v3 = vld [vmem:[%s13779_s0 + $0x80] sm:$0xf]  ;;  %v6405_v58 = vadd.f32 %v6404_v11, %v6292_v50 }
 0x215   :  { %v2926_v32 = vsel %vm9828_vm6, %v8300_v33, %v2925_v17  ;;  %2975 = vst [vmem:[#allocation2 + $0x274] sm:$0xf] %v2922_v46  ;;  %v8323_v52 = vld [vmem:[%s13779_s0 + $0x70] sm:$0xc]  ;;  %v8324_v37 = vld [vmem:[%s13779_s0 + $0x74] sm:$0x3]  ;;  %6829 = vmatmul.mubr.bf16.gmra.mxu0 %v9500_v2  ;;  %7008 = vmatprep.subr.bf16.mxu0 %v9515_v12  ;;  %v12316_v17 = vadd.f32 %v6513_v9, %v6401_v14 }
 0x216   :  { %2976 = vst [vmem:[#allocation2 + $0x2bc] sm:$0xf] %v2926_v32  ;;  %v8325_v40 = vld [vmem:[%s13779_s0 + $0x78] sm:$0xc]  ;;  %v8326_v0 = vld [vmem:[%s13779_s0 + $0x7c] sm:$0x3]  ;;  %v6515_v1 = vpop.f32.mrf.mxu1 }
 0x217   :  { %v8347_v41 = vrot.slane %v8323_v52, 10  ;;  %v9504_v53 = vld [vmem:[#allocation2 + $0x1ec] ss:$72 sps:$4 sm:$0xff]   ;;  %v9506_v13 = vld [vmem:[#allocation2 + $0x1e8] ss:$72 sps:$4 sm:$0xff]   ;;  %v3081_v47 = vrot.slane %v8324_v37, 6  ;;  %v12334_v52 = vadd.f32 %v6515_v1, %v6403_v63  ;;  %7009 = vmatpush2.bf16.msra.mxu0 %v9513_v57 }
 0x218   :  { %v8348_v33 = vrot.slane %v8325_v40, 10  ;;  %v3085_v23 = vrot.slane %v8326_v0, 6  ;;  %v8364_v2 = vld [vmem:[%s13779_s0 + $0x88] sm:$0xf]  ;;  %6941 = vmatprep.mubr.bf16.mxu1 %v9504_v53  ;;  %3168 = vst [vmem:[#allocation2 + $0x27c] sm:$0xf] %v8363_v3  ;;  %v6517_v40 = vpop.f32.mrf.mxu1 }
 0x219   :  { %v3082_v59 = vsel %vm11299_vm11, %v8347_v41, %v3081_v47  ;;  %3169 = vst [vmem:[#allocation2 + $0x2c4] sm:$0xf] %v8364_v2  ;;  %v9519_v24 = vld [vmem:[%s13778_s1 + $0x8e0] ss:$8 sps:$4 sm:$0xff]   ;;  %6942 = vmatmul.mubr.bf16.gmra.mxu1 %v9506_v13  ;;  %v9521_v14 = vld [vmem:[%s13778_s1 + $0x8e4] ss:$8 sps:$4 sm:$0xff]   ;;  %v12348_v50 = vadd.f32 %v6517_v40, %v6405_v58 }
 0x21a   :  { %v3086_v46 = vsel %vm11299_vm11, %v8348_v33, %v3085_v23  ;;  %3135 = vst [vmem:[#allocation2 + $0x278] sm:$0xf] %v3082_v59  ;;  %v8253_v32 = vld [vmem:[%s13779_s0 + $0x80] sm:$0xf]  ;;  %v8254_v12 = vld [vmem:[%s13779_s0 + $0x88] sm:$0xf]  ;;  %7010 = vmatprep.subr.bf16.mxu0 %v9521_v14  ;;  %v6408_v14 = vpop.f32.mrf.mxu0 }
 0x21b   :  { %3136 = vst [vmem:[#allocation2 + $0x2c0] sm:$0xf] %v3086_v46  ;;  %2817 = vst [vmem:[#allocation2 + $0x300] sm:$0xf] %v8253_v32  ;;  %v8279_v37 = vld [vmem:[%s13779_s0 + $0x80] sm:$0xe]  ;;  %7011 = vmatpush2.bf16.msra.mxu0 %v9519_v24 }
 0x21c   :  { %2818 = vst [vmem:[#allocation2 + $0x348] sm:$0xf] %v8254_v12  ;;  %v8280_v48 = vld [vmem:[%s13779_s0 + $0x84] sm:$0x1]  ;;  %v8281_v11 = vld [vmem:[%s13779_s0 + $0x88] sm:$0xe] }
 0x21d   :  { %v8282_v63 = vld [vmem:[%s13779_s0 + $0x8c] sm:$0x1]  ;;  %v8301_v57 = vrot.slane %v8279_v37, 9  ;;  %v2929_v0 = vrot.slane %v8280_v48, 5  ;;  %v8302_v41 = vrot.slane %v8281_v11, 9  ;;  %v6409_v48 = vadd.f32 %v6408_v14, %v11678_v30 }
 0x21e   :  { %v9510_v53 = vld [vmem:[#allocation2 + $0x270] ss:$72 sps:$4 sm:$0xff]   ;;  %v9512_v13 = vld [vmem:[#allocation2 + $0x274] ss:$72 sps:$4 sm:$0xff]   ;;  %v2933_v47 = vrot.slane %v8282_v63, 5 }
 0x21f   :  { %v2930_v9 = vsel %vm9828_vm6, %v8301_v57, %v2929_v0  ;;  %v9525_v33 = vld [vmem:[%s13778_s1 + $0x8d0] ss:$8 sps:$4 sm:$0xff]   ;;  %6838 = vmatprep.mubr.bf16.mxu0 %v9512_v13  ;;  %v9527_v3 = vld [vmem:[%s13778_s1 + $0x8d4] ss:$8 sps:$4 sm:$0xff]   ;;  %v8327_v2 = vld [vmem:[%s13779_s0 + $0x80] sm:$0xc]  ;;  %v6410_v57 = vpop.f32.mrf.mxu0 }
 0x220   :  { %v2934_v23 = vsel %vm9828_vm6, %v8302_v41, %v2933_v47  ;;  %2977 = vst [vmem:[#allocation2 + $0x304] sm:$0xf] %v2930_v9  ;;  %v8328_v58 = vld [vmem:[%s13779_s0 + $0x84] sm:$0x3]  ;;  %6839 = vmatmul.mubr.bf16.gmra.mxu0 %v9510_v53  ;;  %v8329_v59 = vld [vmem:[%s13779_s0 + $0x88] sm:$0xc]  ;;  %7012 = vmatprep.subr.bf16.mxu0 %v9527_v3  ;;  %v6411_v53 = vadd.f32 %v6410_v57, %v11719_v8 }
 0x221   :  { %2978 = vst [vmem:[#allocation2 + $0x34c] sm:$0xf] %v2934_v23  ;;  %v8330_v24 = vld [vmem:[%s13779_s0 + $0x8c] sm:$0x3]  ;;  %v8349_v1 = vrot.slane %v8327_v2, 10  ;;  %v3089_v46 = vrot.slane %v8328_v58, 6  ;;  %7013 = vmatpush2.bf16.msra.mxu0 %v9525_v33  ;;  %v6412_v33 = vpop.f32.mrf.mxu0 }
 0x222   :  { %v8350_v32 = vrot.slane %v8329_v59, 10  ;;  %v3093_v12 = vrot.slane %v8330_v24, 6  ;;  %v8365_v37 = vld [vmem:[%s13779_s0 + $0x90] sm:$0xf]  ;;  %v9516_v11 = vld [vmem:[#allocation2 + $0x278] ss:$72 sps:$4 sm:$0xff]   ;;  %v6413_v2 = vadd.f32 %v6412_v33, %v11736_v34 }
 0x223   :  { %v9518_v40 = vld [vmem:[#allocation2 + $0x27c] ss:$72 sps:$4 sm:$0xff]   ;;  %v3090_v63 = vsel %vm11299_vm11, %v8349_v1, %v3089_v46  ;;  %3170 = vst [vmem:[#allocation2 + $0x30c] sm:$0xf] %v8365_v37  ;;  %v8366_v41 = vld [vmem:[%s13779_s0 + $0x98] sm:$0xf]  ;;  %v6414_v37 = vpop.f32.mrf.mxu0 }
 0x224   :  { %v3094_v0 = vsel %vm11299_vm11, %v8350_v32, %v3093_v12  ;;  %3137 = vst [vmem:[#allocation2 + $0x308] sm:$0xf] %v3090_v63  ;;  %v9531_v30 = vld [vmem:[%s13778_s1 + $0x8c0] ss:$8 sps:$4 sm:$0xff]   ;;  %6951 = vmatprep.mubr.bf16.mxu1 %v9518_v40  ;;  %3171 = vst [vmem:[#allocation2 + $0x354] sm:$0xf] %v8366_v41  ;;  %v6521_v12 = vpop.f32.mrf.mxu1  ;;  %v6302_v40 = vadd.f32 %v11743_v43, %v11741_v42 }
 0x225   :  { %3138 = vst [vmem:[#allocation2 + $0x350] sm:$0xf] %v3094_v0  ;;  %v9533_v13 = vld [vmem:[%s13778_s1 + $0x8c4] ss:$8 sps:$4 sm:$0xff]   ;;  %v8255_v47 = vld [vmem:[%s13779_s0 + $0x90] sm:$0xf]  ;;  %6952 = vmatmul.mubr.bf16.gmra.mxu1 %v9516_v11  ;;  %v12416_v63 = vadd.f32 %v6521_v12, %v6409_v48 }
 0x226   :  { %v8256_v9 = vld [vmem:[%s13779_s0 + $0x98] sm:$0xf]  ;;  %2819 = vst [vmem:[#allocation2 + $0x390] sm:$0xf] %v8255_v47  ;;  %v8283_v8 = vld [vmem:[%s13779_s0 + $0x90] sm:$0xe]  ;;  %7014 = vmatprep.subr.bf16.mxu0 %v9533_v13  ;;  %v6523_v42 = vpop.f32.mrf.mxu1 }
 0x227   :  { %2820 = vst [vmem:[#allocation2 + $0x3d8] sm:$0xf] %v8256_v9  ;;  %v8284_v23 = vld [vmem:[%s13779_s0 + $0x94] sm:$0x1]  ;;  %v8285_v3 = vld [vmem:[%s13779_s0 + $0x98] sm:$0xe]  ;;  %7015 = vmatpush2.bf16.msra.mxu0 %v9531_v30  ;;  %v12435_v47 = vadd.f32 %v6523_v42, %v6411_v53  ;;  %v6415_v9 = vadd.f32 %v6414_v37, %v6302_v40 }
 0x228   :  { %v8286_v58 = vld [vmem:[%s13779_s0 + $0x9c] sm:$0x1]  ;;  %v8303_v59 = vrot.slane %v8283_v8, 9  ;;  %v2937_v24 = vrot.slane %v8284_v23, 5  ;;  %v8304_v1 = vrot.slane %v8285_v3, 9  ;;  %v6525_v3 = vpop.f32.mrf.mxu1 }
 0x229   :  { %v9522_v46 = vld [vmem:[#allocation2 + $0x300] ss:$72 sps:$4 sm:$0xff]   ;;  %v9524_v14 = vld [vmem:[#allocation2 + $0x304] ss:$72 sps:$4 sm:$0xff]   ;;  %v2941_v32 = vrot.slane %v8286_v58, 5 }
 0x22a   :  { %v2938_v11 = vsel %vm9828_vm6, %v8303_v59, %v2937_v24  ;;  %v9537_v34 = vld [vmem:[%s13778_s1 + $0x8b0] ss:$8 sps:$4 sm:$0xff]   ;;  %6848 = vmatprep.mubr.bf16.mxu0 %v9524_v14  ;;  %v9539_v0 = vld [vmem:[%s13778_s1 + $0x8b4] ss:$8 sps:$4 sm:$0xff]   ;;  %v8367_v24 = vld [vmem:[%s13779_s0 + $0xa0] sm:$0xf] }
 0x22b   :  { %v2942_v57 = vsel %vm9828_vm6, %v8304_v1, %v2941_v32  ;;  %2979 = vst [vmem:[#allocation2 + $0x394] sm:$0xf] %v2938_v11  ;;  %v8331_v41 = vld [vmem:[%s13779_s0 + $0x90] sm:$0xc]  ;;  %v8332_v30 = vld [vmem:[%s13779_s0 + $0x94] sm:$0x3]  ;;  %6849 = vmatmul.mubr.bf16.gmra.mxu0 %v9522_v46  ;;  %7016 = vmatprep.subr.bf16.mxu0 %v9539_v0  ;;  %v12443_v46 = vadd.f32 %v6525_v3, %v6413_v2  ;;  %v6527_v32 = vpop.f32.mrf.mxu1 }
 0x22c   :  { %2980 = vst [vmem:[#allocation2 + $0x3dc] sm:$0xf] %v2942_v57  ;;  %v8333_v43 = vld [vmem:[%s13779_s0 + $0x98] sm:$0xc]  ;;  %v8334_v48 = vld [vmem:[%s13779_s0 + $0x9c] sm:$0x3]  ;;  %7017 = vmatpush2.bf16.msra.mxu0 %v9537_v34  ;;  %v12461_v34 = vadd.f32 %v6527_v32, %v6415_v9 }
 0x22d   :  { %v8351_v13 = vrot.slane %v8331_v41, 10  ;;  %v9528_v33 = vld [vmem:[#allocation2 + $0x308] ss:$72 sps:$4 sm:$0xff]   ;;  %v9530_v8 = vld [vmem:[#allocation2 + $0x30c] ss:$72 sps:$4 sm:$0xff]   ;;  %v3097_v23 = vrot.slane %v8332_v30, 6 }
 0x22e   :  { %v8352_v58 = vrot.slane %v8333_v43, 10  ;;  %v3101_v59 = vrot.slane %v8334_v48, 6  ;;  %v8368_v1 = vld [vmem:[%s13779_s0 + $0xa8] sm:$0xf]  ;;  %6961 = vmatprep.mubr.bf16.mxu1 %v9530_v8  ;;  %3172 = vst [vmem:[#allocation2 + $0x39c] sm:$0xf] %v8367_v24  ;;  %v6418_v24 = vpop.f32.mrf.mxu0 }
 0x22f   :  { %v3098_v53 = vsel %vm11299_vm11, %v8351_v13, %v3097_v23  ;;  %3173 = vst [vmem:[#allocation2 + $0x3e4] sm:$0xf] %v8368_v1  ;;  %v9543_v14 = vld [vmem:[%s13778_s1 + $0x8a0] ss:$8 sps:$4 sm:$0xff]   ;;  %6962 = vmatmul.mubr.bf16.gmra.mxu1 %v9528_v33  ;;  %v9545_v2 = vld [vmem:[%s13778_s1 + $0x8a4] ss:$8 sps:$4 sm:$0xff]  }
 0x230   :  { %v3102_v12 = vsel %vm11299_vm11, %v8352_v58, %v3101_v59  ;;  %3139 = vst [vmem:[#allocation2 + $0x398] sm:$0xf] %v3098_v53  ;;  %v8257_v37 = vld [vmem:[%s13779_s0 + $0xa0] sm:$0xf]  ;;  %v8258_v11 = vld [vmem:[%s13779_s0 + $0xa8] sm:$0xf]  ;;  %7018 = vmatprep.subr.bf16.mxu0 %v9545_v2 }
 0x231   :  { %3140 = vst [vmem:[#allocation2 + $0x3e0] sm:$0xf] %v3102_v12  ;;  %2821 = vst [vmem:[#allocation2 + $0x420] sm:$0xf] %v8257_v37  ;;  %v8287_v40 = vld [vmem:[%s13779_s0 + $0xa0] sm:$0xe]  ;;  %7019 = vmatpush2.bf16.msra.mxu0 %v9543_v14  ;;  %v6419_v12 = vadd.f32 %v6418_v24, %v11751_v25 }
 0x232   :  { %2822 = vst [vmem:[#allocation2 + $0x468] sm:$0xf] %v8258_v11  ;;  %v8288_v57 = vld [vmem:[%s13779_s0 + $0xa4] sm:$0x1]  ;;  %v8289_v0 = vld [vmem:[%s13779_s0 + $0xa8] sm:$0xe] }
 0x233   :  { %v8290_v41 = vld [vmem:[%s13779_s0 + $0xac] sm:$0x1]  ;;  %v8305_v30 = vrot.slane %v8287_v40, 9  ;;  %v2945_v42 = vrot.slane %v8288_v57, 5  ;;  %v8306_v43 = vrot.slane %v8289_v0, 9  ;;  %v6420_v40 = vpop.f32.mrf.mxu0 }
 0x234   :  { %v9534_v48 = vld [vmem:[#allocation2 + $0x390] ss:$72 sps:$4 sm:$0xff]   ;;  %v9536_v13 = vld [vmem:[#allocation2 + $0x394] ss:$72 sps:$4 sm:$0xff]   ;;  %v2949_v9 = vrot.slane %v8290_v41, 5 }
 0x235   :  { %v2946_v33 = vsel %vm9828_vm6, %v8305_v30, %v2945_v42  ;;  %v9549_v8 = vld [vmem:[%s13778_s1 + $0x890] ss:$8 sps:$4 sm:$0xff]   ;;  %6858 = vmatprep.mubr.bf16.mxu0 %v9536_v13  ;;  %v9551_v3 = vld [vmem:[%s13778_s1 + $0x894] ss:$8 sps:$4 sm:$0xff]   ;;  %v8335_v58 = vld [vmem:[%s13779_s0 + $0xa0] sm:$0xc]  ;;  %v6421_v30 = vadd.f32 %v6420_v40, %v11762_v55 }
 0x236   :  { %v2950_v23 = vsel %vm9828_vm6, %v8306_v43, %v2949_v9  ;;  %2981 = vst [vmem:[#allocation2 + $0x424] sm:$0xf] %v2946_v33  ;;  %v8336_v59 = vld [vmem:[%s13779_s0 + $0xa4] sm:$0x3]  ;;  %6859 = vmatmul.mubr.bf16.gmra.mxu0 %v9534_v48  ;;  %v8337_v1 = vld [vmem:[%s13779_s0 + $0xa8] sm:$0xc]  ;;  %7020 = vmatprep.subr.bf16.mxu0 %v9551_v3  ;;  %v6422_v48 = vpop.f32.mrf.mxu0 }
 0x237   :  { %2982 = vst [vmem:[#allocation2 + $0x46c] sm:$0xf] %v2950_v23  ;;  %v8338_v53 = vld [vmem:[%s13779_s0 + $0xac] sm:$0x3]  ;;  %v8353_v14 = vrot.slane %v8335_v58, 10  ;;  %v3105_v32 = vrot.slane %v8336_v59, 6  ;;  %7021 = vmatpush2.bf16.msra.mxu0 %v9549_v8  ;;  %v6423_v33 = vadd.f32 %v6422_v48, %v11775_v16  ;;  %v6531_v59 = vpop.f32.mrf.mxu1 }
 0x238   :  { %v8354_v2 = vrot.slane %v8337_v1, 10  ;;  %v3109_v37 = vrot.slane %v8338_v53, 6  ;;  %v8369_v11 = vld [vmem:[%s13779_s0 + $0xb0] sm:$0xf]  ;;  %v9540_v57 = vld [vmem:[#allocation2 + $0x398] ss:$72 sps:$4 sm:$0xff]   ;;  %v6424_v24 = vpop.f32.mrf.mxu0  ;;  %v6312_v1 = vadd.f32 %v11819_v10, %v11798_v54 }
 0x239   :  { %v9542_v0 = vld [vmem:[#allocation2 + $0x39c] ss:$72 sps:$4 sm:$0xff]   ;;  %v3106_v41 = vsel %vm11299_vm11, %v8353_v14, %v3105_v32  ;;  %3174 = vst [vmem:[#allocation2 + $0x42c] sm:$0xf] %v8369_v11  ;;  %v8370_v42 = vld [vmem:[%s13779_s0 + $0xb8] sm:$0xf]  ;;  %v12533_v32 = vadd.f32 %v6531_v59, %v6419_v12 }
 0x23a   :  { %v3110_v25 = vsel %vm11299_vm11, %v8354_v2, %v3109_v37  ;;  %3141 = vst [vmem:[#allocation2 + $0x428] sm:$0xf] %v3106_v41  ;;  %v9555_v43 = vld [vmem:[%s13778_s1 + $0x880] ss:$8 sps:$4 sm:$0xff]   ;;  %6971 = vmatprep.mubr.bf16.mxu1 %v9542_v0  ;;  %3175 = vst [vmem:[#allocation2 + $0x474] sm:$0xf] %v8370_v42 }
 0x23b   :  { %3142 = vst [vmem:[#allocation2 + $0x470] sm:$0xf] %v3110_v25  ;;  %v9557_v55 = vld [vmem:[%s13778_s1 + $0x884] ss:$8 sps:$4 sm:$0xff]   ;;  %v8371_v13 = vld [vmem:[%s13779_s0 + $0x20] sm:$0xe]  ;;  %6972 = vmatmul.mubr.bf16.gmra.mxu1 %v9540_v57  ;;  %v6533_v57 = vpop.f32.mrf.mxu1  ;;  %v6425_v25 = vadd.f32 %v6424_v24, %v6312_v1 }
 0x23c   :  { %v8372_v9 = vld [vmem:[%s13779_s0 + $0x24] sm:$0x1]  ;;  %v8373_v8 = vld [vmem:[%s13779_s0 + $0x28] sm:$0xe]  ;;  %v8374_v23 = vld [vmem:[%s13779_s0 + $0x2c] sm:$0x1]  ;;  %7022 = vmatprep.subr.bf16.mxu0 %v9557_v55  ;;  %v12548_v41 = vadd.f32 %v6533_v57, %v6421_v30 }
 0x23d   :  { %v8403_v3 = vrot.slane %v8371_v13, 9  ;;  %v3242_v58 = vrot.slane %v8372_v9, 5  ;;  %v8404_v53 = vrot.slane %v8373_v8, 9  ;;  %v3246_v14 = vrot.slane %v8374_v23, 5  ;;  %v8419_v16 = vld [vmem:[%s13779_s0 + $0x20] sm:$0xc]  ;;  %7023 = vmatpush2.bf16.msra.mxu0 %v9555_v43  ;;  %v6535_v13 = vpop.f32.mrf.mxu1 }
 0x23e   :  { %v9546_v2 = vld [vmem:[#allocation2 + $0x420] ss:$72 sps:$4 sm:$0xff]   ;;  %v9548_v37 = vld [vmem:[#allocation2 + $0x424] ss:$72 sps:$4 sm:$0xff]   ;;  %v8451_v40 = vrot.slane %v8419_v16, 10  ;;  %v12559_v23 = vadd.f32 %v6535_v13, %v6423_v33  ;;  %s9602_s1 = smov 88  }
 0x23f   :  { %v3243_v11 = vsel %vm9828_vm6, %v8403_v3, %v3242_v58  ;;  %v3247_v0 = vsel %vm9828_vm6, %v8404_v53, %v3246_v14  ;;  %v8420_v54 = vld [vmem:[%s13779_s0 + $0x24] sm:$0x3]  ;;  %v8421_v10 = vld [vmem:[%s13779_s0 + $0x28] sm:$0xc]  ;;  %v8422_v12 = vld [vmem:[%s13779_s0 + $0x2c] sm:$0x3]  ;;  %6868 = vmatprep.mubr.bf16.mxu0 %v9548_v37  ;;  %v6537_v53 = vpop.f32.mrf.mxu1  ;;  %v6242_v37 = vadd.f32 %v11359_v29, %v11357_v28 }
 0x240   :  { %3320 = vst [vmem:[#allocation2 + $0x40] sm:$0xf] %v3243_v11  ;;  %3321 = vst [vmem:[#allocation2 + $0x88] sm:$0xf] %v3247_v0  ;;  %v3402_v42 = vrot.slane %v8420_v54, 6  ;;  %v8452_v43 = vrot.slane %v8421_v10, 10  ;;  %6869 = vmatmul.mubr.bf16.gmra.mxu0 %v9546_v2  ;;  %v12571_v2 = vadd.f32 %v6537_v53, %v6425_v25 }
 0x241   :  { %v3406_v48 = vrot.slane %v8422_v12, 6  ;;  %v8375_v55 = vld [vmem:[%s13779_s0 + $0x30] sm:$0xe]  ;;  %v8376_v9 = vld [vmem:[%s13779_s0 + $0x34] sm:$0x1]  ;;  %v6355_v25 = vadd.f32 %v11852_v51, %v6242_v37 }
 0x242   :  { %v8377_v30 = vld [vmem:[%s13779_s0 + $0x38] sm:$0xe]  ;;  %v8405_v8 = vrot.slane %v8375_v55, 9  ;;  %v9552_v3 = vld [vmem:[#allocation2 + $0x428] ss:$72 sps:$4 sm:$0xff]   ;;  %v3403_v59 = vsel %vm11299_vm11, %v8451_v40, %v3402_v42  ;;  %v3250_v1 = vrot.slane %v8376_v9, 5  ;;  %v6574_v9 = vpop.f32.mrf.mxu0 }
 0x243   :  { %v9554_v58 = vld [vmem:[#allocation2 + $0x42c] ss:$72 sps:$4 sm:$0xff]   ;;  %v3407_v24 = vsel %vm11299_vm11, %v8452_v43, %v3406_v48  ;;  %3480 = vst [vmem:[#allocation2 + $0x44] sm:$0xf] %v3403_v59  ;;  %v8378_v14 = vld [vmem:[%s13779_s0 + $0x3c] sm:$0x1]  ;;  %v6575_v59 = vadd.f32 %v6574_v9, %v11841_v26 }
 0x244   :  { %3481 = vst [vmem:[#allocation2 + $0x8c] sm:$0xf] %v3407_v24  ;;  %v8406_v16 = vrot.slane %v8377_v30, 9  ;;  %v8423_v33 = vld [vmem:[%s13779_s0 + $0x30] sm:$0xc]  ;;  %6981 = vmatprep.mubr.bf16.mxu1 %v9554_v58  ;;  %v3251_v11 = vsel %vm9828_vm6, %v8405_v8, %v3250_v1  ;;  %v3254_v40 = vrot.slane %v8378_v14, 5 }
 0x245   :  { %v8424_v57 = vld [vmem:[%s13779_s0 + $0x34] sm:$0x3]  ;;  %v8425_v0 = vld [vmem:[%s13779_s0 + $0x38] sm:$0xc]  ;;  %v8453_v54 = vrot.slane %v8423_v33, 10  ;;  %6982 = vmatmul.mubr.bf16.gmra.mxu1 %v9552_v3  ;;  %v6576_v33 = vpop.f32.mrf.mxu0 }
 0x246   :  { %3322 = vst [vmem:[#allocation2 + $0xd0] sm:$0xf] %v3251_v11  ;;  %v8426_v28 = vld [vmem:[%s13779_s0 + $0x3c] sm:$0x3]  ;;  %v3410_v29 = vrot.slane %v8424_v57, 6  ;;  %v8454_v10 = vrot.slane %v8425_v0, 10  ;;  %v3255_v42 = vsel %vm9828_vm6, %v8406_v16, %v3254_v40  ;;  %v6577_v0 = vadd.f32 %v6576_v33, %v11850_v49 }
 0x247   :  { %v8379_v12 = vld [vmem:[%s13779_s0 + $0x40] sm:$0xe]  ;;  %v3414_v43 = vrot.slane %v8426_v28, 6  ;;  %v8380_v48 = vld [vmem:[%s13779_s0 + $0x44] sm:$0x1] }
 0x248   :  { %v8381_v55 = vld [vmem:[%s13779_s0 + $0x48] sm:$0xe]  ;;  %v8407_v13 = vrot.slane %v8379_v12, 9  ;;  %3323 = vst [vmem:[#allocation2 + $0x118] sm:$0xf] %v3255_v42  ;;  %v3411_v30 = vsel %vm11299_vm11, %v8453_v54, %v3410_v29  ;;  %v3258_v8 = vrot.slane %v8380_v48, 5  ;;  %v6687_v54 = vpop.f32.mrf.mxu1 }
 0x249   :  { %v8382_v51 = vld [vmem:[%s13779_s0 + $0x4c] sm:$0x1]  ;;  %v8408_v3 = vrot.slane %v8381_v55, 9  ;;  %v8427_v58 = vld [vmem:[%s13779_s0 + $0x40] sm:$0xc]  ;;  %v3415_v24 = vsel %vm11299_vm11, %v8454_v10, %v3414_v43  ;;  %v12626_v42 = vadd.f32 %v6687_v54, %v6575_v59  ;;  %v6578_v43 = vpop.f32.mrf.mxu0  ;;  %v6468_v55 = vadd.f32 %v11854_v18, %v6355_v25 }
 0x24a   :  { %3482 = vst [vmem:[#allocation2 + $0xd4] sm:$0xf] %v3411_v30  ;;  %v3262_v1 = vrot.slane %v8382_v51, 5  ;;  %v8428_v53 = vld [vmem:[%s13779_s0 + $0x44] sm:$0x3]  ;;  %v8455_v16 = vrot.slane %v8427_v58, 10  ;;  %v3259_v37 = vsel %vm9828_vm6, %v8407_v13, %v3258_v8  ;;  %v6579_v30 = vadd.f32 %v6578_v43, %v11862_v22  ;;  %v6689_v51 = vpop.f32.mrf.mxu1 }
 0x24b   :  { %v8429_v14 = vld [vmem:[%s13779_s0 + $0x48] sm:$0xc]  ;;  %3483 = vst [vmem:[#allocation2 + $0x11c] sm:$0xf] %v3415_v24  ;;  %v8430_v26 = vld [vmem:[%s13779_s0 + $0x4c] sm:$0x3]  ;;  %v12646_v59 = vadd.f32 %v6689_v51, %v6577_v0  ;;  %v6580_v24 = vpop.f32.mrf.mxu0 }
 0x24c   :  { %v3418_v11 = vrot.slane %v8428_v53, 6  ;;  %v8456_v40 = vrot.slane %v8429_v14, 10  ;;  %v8383_v57 = vld [vmem:[%s13779_s0 + $0x50] sm:$0xe]  ;;  %v9558_v28 = vld [vmem:[#allocation2 + $0x40] ss:$72 sps:$4 sm:$0xff]   ;;  %v3263_v29 = vsel %vm9828_vm6, %v8408_v3, %v3262_v1  ;;  %v6691_v33 = vpop.f32.mrf.mxu1 }
 0x24d   :  { %3324 = vst [vmem:[#allocation2 + $0x160] sm:$0xf] %v3259_v37  ;;  %v3422_v10 = vrot.slane %v8430_v26, 6  ;;  %v8409_v12 = vrot.slane %v8383_v57, 9  ;;  %v9560_v48 = vld [vmem:[#allocation2 + $0x44] ss:$72 sps:$4 sm:$0xff]   ;;  %v12662_v0 = vadd.f32 %v6691_v33, %v6579_v30 }
 0x24e   :  { %3325 = vst [vmem:[#allocation2 + $0x1a8] sm:$0xf] %v3263_v29  ;;  %v3419_v13 = vsel %vm11299_vm11, %v8455_v16, %v3418_v11  ;;  %v8384_v49 = vld [vmem:[%s13779_s0 + $0x54] sm:$0x1]  ;;  %v8385_v9 = vld [vmem:[%s13779_s0 + $0x58] sm:$0xe]  ;;  %7024 = vmatprep.mubr.bf16.mxu0 %v9560_v48  ;;  %v6581_v16 = vadd.f32 %v6580_v24, %v6468_v55 }
 0x24f   :  { %v3423_v8 = vsel %vm11299_vm11, %v8456_v40, %v3422_v10  ;;  %3484 = vst [vmem:[#allocation2 + $0x164] sm:$0xf] %v3419_v13  ;;  %v8386_v18 = vld [vmem:[%s13779_s0 + $0x5c] sm:$0x1]  ;;  %v3266_v25 = vrot.slane %v8384_v49, 5  ;;  %v8410_v3 = vrot.slane %v8385_v9, 9  ;;  %7025 = vmatmul.mubr.bf16.vlgmr.msra.gmra.mxu0 %v9558_v28 }
 0x250   :  { %v8431_v58 = vld [vmem:[%s13779_s0 + $0x50] sm:$0xc]  ;;  %3485 = vst [vmem:[#allocation2 + $0x1ac] sm:$0xf] %v3423_v8  ;;  %v3270_v22 = vrot.slane %v8386_v18, 5 }
 0x251   :  { %v8432_v1 = vld [vmem:[%s13779_s0 + $0x54] sm:$0x3]  ;;  %v8433_v53 = vld [vmem:[%s13779_s0 + $0x58] sm:$0xc]  ;;  %v8457_v14 = vrot.slane %v8431_v58, 10  ;;  %v3267_v37 = vsel %vm9828_vm6, %v8409_v12, %v3266_v25  ;;  %v6693_v12 = vpop.f32.mrf.mxu1 }
 0x252   :  { %v8434_v26 = vld [vmem:[%s13779_s0 + $0x5c] sm:$0x3]  ;;  %v3426_v11 = vrot.slane %v8432_v1, 6  ;;  %v8458_v40 = vrot.slane %v8433_v53, 10  ;;  %v8387_v57 = vld [vmem:[%s13779_s0 + $0x80] sm:$0xe]  ;;  %v3271_v54 = vsel %vm9828_vm6, %v8410_v3, %v3270_v22  ;;  %v12674_v49 = vadd.f32 %v6693_v12, %v6581_v16  ;;  %v6584_v12 = vpop.f32.mrf.mxu0 }
 0x253   :  { %3326 = vst [vmem:[#allocation2 + $0x1f0] sm:$0xf] %v3267_v37  ;;  %v3430_v28 = vrot.slane %v8434_v26, 6  ;;  %v8388_v29 = vld [vmem:[%s13779_s0 + $0x84] sm:$0x1]  ;;  %v8411_v13 = vrot.slane %v8387_v57, 9 }
 0x254   :  { %v8389_v10 = vld [vmem:[%s13779_s0 + $0x88] sm:$0xe]  ;;  %v9561_v43 = vld [vmem:[#allocation2 + $0xd0] ss:$72 sps:$4 sm:$0xff]   ;;  %v9563_v48 = vld [vmem:[#allocation2 + $0xd4] ss:$72 sps:$4 sm:$0xff]   ;;  %v3427_v55 = vsel %vm11299_vm11, %v8457_v14, %v3426_v11 }
 0x255   :  { %3327 = vst [vmem:[#allocation2 + $0x238] sm:$0xf] %v3271_v54  ;;  %v3431_v9 = vsel %vm11299_vm11, %v8458_v40, %v3430_v28  ;;  %3486 = vst [vmem:[#allocation2 + $0x1f4] sm:$0xf] %v3427_v55  ;;  %v8390_v30 = vld [vmem:[%s13779_s0 + $0x8c] sm:$0x1]  ;;  %7034 = vmatprep.mubr.bf16.mxu0 %v9563_v48 }
 0x256   :  { %v3274_v51 = vrot.slane %v8388_v29, 5  ;;  %v8412_v8 = vrot.slane %v8389_v10, 9  ;;  %v8435_v18 = vld [vmem:[%s13779_s0 + $0x80] sm:$0xc]  ;;  %3487 = vst [vmem:[#allocation2 + $0x23c] sm:$0xf] %v3431_v9 }
 0x257   :  { %v3278_v25 = vrot.slane %v8390_v30, 5  ;;  %v8436_v3 = vld [vmem:[%s13779_s0 + $0x84] sm:$0x3]  ;;  %v8437_v58 = vld [vmem:[%s13779_s0 + $0x88] sm:$0xc]  ;;  %v8459_v24 = vrot.slane %v8435_v18, 10  ;;  %7035 = vmatmul.mubr.bf16.gmra.mxu0 %v9561_v43  ;;  %v6586_v18 = vpop.f32.mrf.mxu0 }
 0x258   :  { %v13801_v22 = vld [vmem:[#allocation3_spill] sm:$0xff]  ;;  %v13802_v1 = vld [vmem:[#allocation4_spill] sm:$0xff]  ;;  %v3275_v14 = vsel %vm9828_vm6, %v8411_v13, %v3274_v51  ;;  %v3434_v33 = vrot.slane %v8436_v3, 6  ;;  %v8460_v37 = vrot.slane %v8437_v58, 10  ;;  %v8391_v28 = vld [vmem:[%s13779_s0 + $0x90] sm:$0xe] }
 0x259   :  { %v6252_v53 = vadd.f32 %v13802_v1, %v13801_v22  ;;  %v8438_v16 = vld [vmem:[%s13779_s0 + $0x8c] sm:$0x3]  ;;  %v3279_v11 = vsel %vm9828_vm6, %v8412_v8, %v3278_v25  ;;  %3328 = vst [vmem:[#allocation2 + $0x280] sm:$0xf] %v3275_v14  ;;  %v8392_v29 = vld [vmem:[%s13779_s0 + $0x94] sm:$0x1]  ;;  %v6585_v8 = vadd.f32 %v6584_v12, %v11903_v21  ;;  %v6587_v22 = vadd.f32 %v6586_v18, %v11911_v31  ;;  %v6697_v1 = vpop.f32.mrf.mxu1 }
 0x25a   :  { %v9566_v26 = vld [vmem:[#allocation2 + $0x164] ss:$72 sps:$4 sm:$0xff]   ;;  %v3438_v40 = vrot.slane %v8438_v16, 6  ;;  %3329 = vst [vmem:[#allocation2 + $0x2c8] sm:$0xf] %v3279_v11  ;;  %v3435_v54 = vsel %vm11299_vm11, %v8459_v24, %v3434_v33  ;;  %v8413_v55 = vrot.slane %v8391_v28, 9 }
 0x25b   :  { %v6365_v57 = vadd.f32 %v11913_v4, %v6252_v53  ;;  %v8393_v10 = vld [vmem:[%s13779_s0 + $0x98] sm:$0xe]  ;;  %3488 = vst [vmem:[#allocation2 + $0x284] sm:$0xf] %v3435_v54  ;;  %v8394_v48 = vld [vmem:[%s13779_s0 + $0x9c] sm:$0x1]  ;;  %7044 = vmatprep.mubr.bf16.mxu0 %v9566_v26  ;;  %v12734_v33 = vadd.f32 %v6697_v1, %v6585_v8  ;;  %v6699_v12 = vpop.f32.mrf.mxu1 }
 0x25c   :  { %v3439_v4 = vsel %vm11299_vm11, %v8460_v37, %v3438_v40  ;;  %v3282_v13 = vrot.slane %v8392_v29, 5  ;;  %v8414_v9 = vrot.slane %v8393_v10, 9  ;;  %v3286_v30 = vrot.slane %v8394_v48, 5  ;;  %v8439_v51 = vld [vmem:[%s13779_s0 + $0x90] sm:$0xc]  ;;  %v6588_v37 = vpop.f32.mrf.mxu0  ;;  %v13803_v26 = vld [vmem:[#allocation10_spill] sm:$0xff] }
 0x25d   :  { %3489 = vst [vmem:[#allocation2 + $0x2cc] sm:$0xf] %v3439_v4  ;;  %v8440_v43 = vld [vmem:[%s13779_s0 + $0x94] sm:$0x3]  ;;  %v8441_v3 = vld [vmem:[%s13779_s0 + $0x98] sm:$0xc]  ;;  %v6478_v11 = vadd.f32 %v13803_v26, %v6365_v57 }
 0x25e   :  { %v3283_v25 = vsel %vm9828_vm6, %v8413_v55, %v3282_v13  ;;  %v8442_v58 = vld [vmem:[%s13779_s0 + $0x9c] sm:$0x3]  ;;  %v8461_v24 = vrot.slane %v8439_v51, 10  ;;  %v9564_v53 = vld [vmem:[#allocation2 + $0x160] ss:$72 sps:$4 sm:$0xff]   ;;  %v3287_v21 = vsel %vm9828_vm6, %v8414_v9, %v3286_v30  ;;  %v3442_v16 = vrot.slane %v8440_v43, 6  ;;  %v6590_v30 = vpop.f32.mrf.mxu0 }
 0x25f   :  { %v9569_v14 = vld [vmem:[#allocation2 + $0x1f4] ss:$72 sps:$4 sm:$0xff]   ;;  %3330 = vst [vmem:[#allocation2 + $0x310] sm:$0xf] %v3283_v25  ;;  %3331 = vst [vmem:[#allocation2 + $0x358] sm:$0xf] %v3287_v21  ;;  %v12752_v9 = vadd.f32 %v6699_v12, %v6587_v22  ;;  %7045 = vmatmul.mubr.bf16.gmra.mxu0 %v9564_v53 }
 0x260   :  { %v8462_v40 = vrot.slane %v8441_v3, 10  ;;  %v3446_v54 = vrot.slane %v8442_v58, 6  ;;  %v8395_v31 = vld [vmem:[%s13779_s0 + $0xa0] sm:$0xe]  ;;  %v8396_v28 = vld [vmem:[%s13779_s0 + $0xa4] sm:$0x1]  ;;  %v3443_v4 = vsel %vm11299_vm11, %v8461_v24, %v3442_v16  ;;  %v6591_v3 = vadd.f32 %v6590_v30, %v6478_v11  ;;  %v6701_v58 = vpop.f32.mrf.mxu1  ;;  %7054 = vmatprep.mubr.bf16.mxu0 %v9569_v14 }
 0x261   :  { %v13804_v29 = vld [vmem:[#allocation9_spill] sm:$0xff]  ;;  %v8397_v57 = vld [vmem:[%s13779_s0 + $0xa8] sm:$0xe]  ;;  %v8398_v48 = vld [vmem:[%s13779_s0 + $0xac] sm:$0x1]  ;;  %v8415_v55 = vrot.slane %v8395_v31, 9 }
 0x262   :  { %v6589_v10 = vadd.f32 %v6588_v37, %v13804_v29  ;;  %v3290_v13 = vrot.slane %v8396_v28, 5  ;;  %v3447_v51 = vsel %vm11299_vm11, %v8462_v40, %v3446_v54  ;;  %3490 = vst [vmem:[#allocation2 + $0x314] sm:$0xf] %v3443_v4  ;;  %v8416_v43 = vrot.slane %v8397_v57, 9  ;;  %v8443_v18 = vld [vmem:[%s13779_s0 + $0xa0] sm:$0xc]  ;;  %v6703_v11 = vpop.f32.mrf.mxu1 }
 0x263   :  { %v3294_v8 = vrot.slane %v8398_v48, 5  ;;  %v8444_v25 = vld [vmem:[%s13779_s0 + $0xa4] sm:$0x3]  ;;  %3491 = vst [vmem:[#allocation2 + $0x35c] sm:$0xf] %v3447_v51  ;;  %v8463_v21 = vrot.slane %v8443_v18, 10  ;;  %v12780_v29 = vadd.f32 %v6703_v11, %v6591_v3 }
 0x264   :  { %v3291_v24 = vsel %vm9828_vm6, %v8415_v55, %v3290_v13  ;;  %v8445_v22 = vld [vmem:[%s13779_s0 + $0xa8] sm:$0xc]  ;;  %v8446_v1 = vld [vmem:[%s13779_s0 + $0xac] sm:$0x3]  ;;  %v12770_v16 = vadd.f32 %v6701_v58, %v6589_v10  ;;  %v3450_v26 = vrot.slane %v8444_v25, 6 }
 0x265   :  { %v3295_v37 = vsel %vm9828_vm6, %v8416_v43, %v3294_v8  ;;  %3332 = vst [vmem:[#allocation2 + $0x3a0] sm:$0xf] %v3291_v24  ;;  %v8464_v40 = vrot.slane %v8445_v22, 10  ;;  %v3454_v54 = vrot.slane %v8446_v1, 6  ;;  %v8399_v31 = vld [vmem:[%s13779_s0 + $0xb0] sm:$0xe] }
 0x266   :  { %3333 = vst [vmem:[#allocation2 + $0x3e8] sm:$0xf] %v3295_v37  ;;  %v8400_v28 = vld [vmem:[%s13779_s0 + $0xb4] sm:$0x1]  ;;  %v9567_v53 = vld [vmem:[#allocation2 + $0x1f0] ss:$72 sps:$4 sm:$0xff]   ;;  %v3451_v10 = vsel %vm11299_vm11, %v8463_v21, %v3450_v26 }
 0x267   :  { %v8401_v14 = vld [vmem:[%s13779_s0 + $0xb8] sm:$0xe]  ;;  %v8402_v12 = vld [vmem:[%s13779_s0 + $0xbc] sm:$0x1]  ;;  %v8417_v4 = vrot.slane %v8399_v31, 9  ;;  %v3298_v57 = vrot.slane %v8400_v28, 5  ;;  %v3455_v48 = vsel %vm11299_vm11, %v8464_v40, %v3454_v54  ;;  %v6594_v54 = vpop.f32.mrf.mxu0  ;;  %7055 = vmatmul.mubr.bf16.gmra.mxu0 %v9567_v53 }
 0x268   :  { %3492 = vst [vmem:[#allocation2 + $0x3a4] sm:$0xf] %v3451_v10  ;;  %v8418_v55 = vrot.slane %v8401_v14, 9  ;;  %v3302_v13 = vrot.slane %v8402_v12, 5  ;;  %v8447_v30 = vld [vmem:[%s13779_s0 + $0xb0] sm:$0xc]  ;;  %v6595_v6 = vadd.f32 %v6594_v54, %v11945_v7  ;;  %v6707_v14 = vpop.f32.mrf.mxu1 }
 0x269   :  { %v8448_v51 = vld [vmem:[%s13779_s0 + $0xb4] sm:$0x3]  ;;  %3493 = vst [vmem:[#allocation2 + $0x3ec] sm:$0xf] %v3455_v48  ;;  %v3299_v43 = vsel %vm9828_vm6, %v8417_v4, %v3298_v57  ;;  %v8449_v8 = vld [vmem:[%s13779_s0 + $0xb8] sm:$0xc]  ;;  %v6596_v28 = vpop.f32.mrf.mxu0 }
 0x26a   :  { %v8450_v18 = vld [vmem:[%s13779_s0 + $0xbc] sm:$0x3]  ;;  %v8465_v25 = vrot.slane %v8447_v30, 10  ;;  %v3458_v3 = vrot.slane %v8448_v51, 6  ;;  %v9572_v58 = vld [vmem:[#allocation2 + $0x284] ss:$72 sps:$4 sm:$0xff]   ;;  %v3303_v24 = vsel %vm9828_vm6, %v8418_v55, %v3302_v13  ;;  %v6597_v10 = vadd.f32 %v6596_v28, %v11957_v5  ;;  %v6709_v55 = vpop.f32.mrf.mxu1 }
 0x26b   :  { %3334 = vst [vmem:[#allocation2 + $0x430] sm:$0xf] %v3299_v43  ;;  %v8466_v22 = vrot.slane %v8449_v8, 10  ;;  %v3462_v1 = vrot.slane %v8450_v18, 6  ;;  %v13805_v21 = vld [vmem:[#allocation5_spill] sm:$0xff]  ;;  %v13806_v37 = vld [vmem:[#allocation6_spill] sm:$0xff]  ;;  %7064 = vmatprep.mubr.bf16.mxu0 %v9572_v58  ;;  %v12817_v12 = vadd.f32 %v6707_v14, %v6595_v6  ;;  %v6598_v4 = vpop.f32.mrf.mxu0 }
 0x26c   :  { %v6262_v26 = vadd.f32 %v13806_v37, %v13805_v21  ;;  %3335 = vst [vmem:[#allocation2 + $0x478] sm:$0xf] %v3303_v24  ;;  %v3459_v11 = vsel %vm11299_vm11, %v8465_v25, %v3458_v3  ;;  %v9570_v38 = vld [vmem:[#allocation2 + $0x280] ss:$72 sps:$4 sm:$0xff]   ;;  %v6599_v48 = vadd.f32 %v6598_v4, %v11970_v35  ;;  %v9575_v13 = vld [vmem:[#allocation2 + $0x314] ss:$72 sps:$4 sm:$0xff]   ;;  %v6711_v7 = vpop.f32.mrf.mxu1 }
 0x26d   :  { %v3463_v40 = vsel %vm11299_vm11, %v8466_v22, %v3462_v1  ;;  %3494 = vst [vmem:[#allocation2 + $0x434] sm:$0xf] %v3459_v11  ;;  %v6600_v53 = vpop.f32.mrf.mxu0  ;;  %v9573_v8 = vld [vmem:[#allocation2 + $0x310] ss:$72 sps:$4 sm:$0xff]   ;;  %v13807_v18 = vld [vmem:[#allocation7_spill] sm:$0xff]  ;;  %s9596_s0 = smov 56  }
 0x26e   :  { %v6375_v31 = vadd.f32 %v11996_v27, %v6262_v26  ;;  %3495 = vst [vmem:[#allocation2 + $0x47c] sm:$0xf] %v3463_v40  ;;  %v12821_v27 = vadd.f32 %v6709_v55, %v6597_v10  ;;  %v12823_v51 = vadd.f32 %v6711_v7, %v6599_v48  ;;  %v6713_v5 = vpop.f32.mrf.mxu1  ;;  %v9576_v54 = vld [vmem:[#allocation2 + $0x3a0] ss:$72 sps:$4 sm:$0xff]   ;;  %vm7656_vm6 = vcmask 457728  }
 0x26f   :  { %7065 = vmatmul.mubr.bf16.gmra.mxu0 %v9570_v38  ;;  %v6604_v35 = vpop.f32.mrf.mxu0 }
 0x270   :  { %v6488_v57 = vadd.f32 %v12030_v19, %v6375_v31  ;;  %7074 = vmatprep.mubr.bf16.mxu0 %v9575_v13  ;;  %v13808_v19 = vld [vmem:[#allocation8_spill] sm:$0xff]  ;;  %v6605_v24 = vadd.f32 %v6604_v35, %v12063_v39  ;;  %v6717_v21 = vpop.f32.mrf.mxu1 }
 0x271   :  { %v6272_v25 = vadd.f32 %v13808_v19, %v13807_v18  ;;  %v9578_v3 = vld [vmem:[#allocation2 + $0x3a4] ss:$72 sps:$4 sm:$0xff]   ;;  %v6606_v22 = vpop.f32.mrf.mxu0 }
 0x272   :  { %v6601_v30 = vadd.f32 %v6600_v53, %v6488_v57  ;;  %v6607_v1 = vadd.f32 %v6606_v22, %v12080_v36  ;;  %v12833_v11 = vadd.f32 %v6717_v21, %v6605_v24  ;;  %v6719_v31 = vpop.f32.mrf.mxu1 }
 0x273   :  { %v6385_v58 = vadd.f32 %v12112_v44, %v6272_v25  ;;  %v6608_v37 = vpop.f32.mrf.mxu0 }
 0x274   :  { %v12825_v43 = vadd.f32 %v6713_v5, %v6601_v30  ;;  %v6609_v40 = vadd.f32 %v6608_v37, %v12085_v62  ;;  %v12836_v44 = vadd.f32 %v6719_v31, %v6607_v1  ;;  %v6721_v10 = vpop.f32.mrf.mxu1 }
 0x275   :  { %v6498_v26 = vadd.f32 %v12149_v61, %v6385_v58  ;;  %v6610_v6 = vpop.f32.mrf.mxu0  ;;  %v9581_v28 = vld [vmem:[#allocation2 + $0x434] ss:$72 sps:$4 sm:$0xff]   ;;  %v9579_v61 = vld [vmem:[#allocation2 + $0x430] ss:$72 sps:$4 sm:$0xff]  }
 0x276   :  { %v12838_v14 = vadd.f32 %v6721_v10, %v6609_v40  ;;  %v6723_v36 = vpop.f32.mrf.mxu1 }
 0x277   :  { %7075 = vmatmul.mubr.bf16.gmra.mxu0 %v9573_v8  ;;  %v6611_v39 = vadd.f32 %v6610_v6, %v6498_v26 }
 0x278   :  { %7084 = vmatprep.mubr.bf16.mxu0 %v9578_v3 }
 0x279   :  { %v12840_v4 = vadd.f32 %v6723_v36, %v6611_v39 }
 0x27a   :  { %v6614_v57 = vpop.f32.mrf.mxu0 }
 0x27b   :  { %v6615_v38 = vadd.f32 %v6614_v57, %v12186_v60 }
 0x27c   :  { %v6616_v62 = vpop.f32.mrf.mxu0 }
 0x27d   :  { %v6617_v48 = vadd.f32 %v6616_v62, %v12204_v15  ;;  %v6727_v55 = vpop.f32.mrf.mxu1 }
 0x27e   :  { %v12844_v13 = vadd.f32 %v6727_v55, %v6615_v38  ;;  %v6618_v53 = vpop.f32.mrf.mxu0 }
 0x27f   :  { %7085 = vmatmul.mubr.bf16.gmra.mxu0 %v9576_v54  ;;  %v6619_v30 = vadd.f32 %v6618_v53, %v12218_v45  ;;  %v6729_v7 = vpop.f32.mrf.mxu1 }
 0x280   :  { %7094 = vmatprep.mubr.bf16.mxu0 %v9581_v28  ;;  %v12847_v5 = vadd.f32 %v6729_v7, %v6617_v48  ;;  %v6620_v8 = vpop.f32.mrf.mxu0 }
 0x281   :  { %v6621_v18 = vadd.f32 %v6620_v8, %v12225_v56  ;;  %v6731_v19 = vpop.f32.mrf.mxu1 }
 0x282   :  { %v12850_v25 = vadd.f32 %v6731_v19, %v6619_v30 }
 0x283   :  { %v6733_v60 = vpop.f32.mrf.mxu1 }
 0x284   :  { %v12852_v3 = vadd.f32 %v6733_v60, %v6621_v18 }
 0x287   :  { %7095 = vmatmul.mubr.bf16.gmra.mxu0 %v9579_v61 }
 0x289   :  { %v6624_v35 = vpop.f32.mrf.mxu0 }
 0x28a   :  { %v6625_v15 = vadd.f32 %v6624_v35, %v12308_v20 }
 0x28b   :  { %v6626_v58 = vpop.f32.mrf.mxu0 }
 0x28c   :  { %v6627_v24 = vadd.f32 %v6626_v58, %v12316_v17 }
 0x28d   :  { %v6628_v45 = vpop.f32.mrf.mxu0 }
 0x28e   :  { %v6737_v22 = vpop.f32.mrf.mxu1  ;;  %v6629_v21 = vadd.f32 %v6628_v45, %v12334_v52 }
 0x28f   :  { %v12856_v1 = vadd.f32 %v6737_v22, %v6625_v15  ;;  %v6630_v56 = vpop.f32.mrf.mxu0 }
 0x290   :  { %v6739_v37 = vpop.f32.mrf.mxu1  ;;  %v6631_v40 = vadd.f32 %v6630_v56, %v12348_v50 }
 0x291   :  { %v12859_v26 = vadd.f32 %v6739_v37, %v6627_v24 }
 0x292   :  { %v6741_v54 = vpop.f32.mrf.mxu1 }
 0x293   :  { %v12862_v31 = vadd.f32 %v6741_v54, %v6629_v21 }
 0x294   :  { %v6743_v6 = vpop.f32.mrf.mxu1 }
 0x295   :  { %v12864_v20 = vadd.f32 %v6743_v6, %v6631_v40 }
 0x29a   :  { %v6634_v28 = vpop.f32.mrf.mxu0 }
 0x29b   :  { %v6635_v17 = vadd.f32 %v6634_v28, %v12416_v63 }
 0x29c   :  { %v6636_v39 = vpop.f32.mrf.mxu0 }
 0x29d   :  { %v6637_v10 = vadd.f32 %v6636_v39, %v12435_v47  ;;  %v6747_v36 = vpop.f32.mrf.mxu1 }
 0x29e   :  { %v12868_v52 = vadd.f32 %v6747_v36, %v6635_v17  ;;  %v6638_v61 = vpop.f32.mrf.mxu0 }
 0x29f   :  { %v6639_v57 = vadd.f32 %v6638_v61, %v12443_v46  ;;  %v6749_v38 = vpop.f32.mrf.mxu1 }
 0x2a0   :  { %v12871_v50 = vadd.f32 %v6749_v38, %v6637_v10  ;;  %v6640_v62 = vpop.f32.mrf.mxu0 }
 0x2a1   :  { %v6641_v48 = vadd.f32 %v6640_v62, %v12461_v34  ;;  %v6751_v55 = vpop.f32.mrf.mxu1 }
 0x2a2   :  { %v12874_v53 = vadd.f32 %v6751_v55, %v6639_v57 }
 0x2a3   :  { %v6753_v30 = vpop.f32.mrf.mxu1 }
 0x2a4   :  { %v12876_v63 = vadd.f32 %v6753_v30, %v6641_v48 }
 0x2aa   :  { %v6644_v7 = vpop.f32.mrf.mxu0 }
 0x2ab   :  { %v12879_v47 = vadd.f32 %v6644_v7, %v12533_v32 }
 0x2ac   :  { %v6646_v8 = vpop.f32.mrf.mxu0 }
 0x2ad   :  { %13809 = vst [vmem:[#allocation3_spill] sm:$0xff] %v12879_v47  ;;  %v6647_v18 = vadd.f32 %v6646_v8, %v12548_v41 }
 0x2ae   :  { %v12882_v46 = vpop.f32.mrf.mxu1  ;;  %v6648_v19 = vpop.f32.mrf.mxu0 }
 0x2af   :  { %13810 = vst [vmem:[#allocation4_spill] sm:$0xff] %v12882_v46  ;;  %v12885_v60 = vadd.f32 %v6648_v19, %v12559_v23 }
 0x2b0   :  { %v6759_v34 = vpop.f32.mrf.mxu1  ;;  %v6650_v35 = vpop.f32.mrf.mxu0 }
 0x2b1   :  { %13811 = vst [vmem:[#allocation10_spill] sm:$0xff] %v12885_v60  ;;  %v12887_v15 = vadd.f32 %v6759_v34, %v6647_v18  ;;  %v6651_v58 = vadd.f32 %v6650_v35, %v12571_v2 }
 0x2b2   :  { %v12890_v24 = vpop.f32.mrf.mxu1 }
 0x2b3   :  { %13812 = vst [vmem:[#allocation9_spill] sm:$0xff] %v12890_v24 }
 0x2b4   :  { %v6763_v22 = vpop.f32.mrf.mxu1  ;;  %v6800_v32 = vpop.f32.mrf.mxu0 }
 0x2b5   :  { %v12892_v45 = vadd.f32 %v6763_v22, %v6651_v58  ;;  %v12895_v41 = vadd.f32 %v6800_v32, %v12626_v42 }
 0x2b6   :  { %v6802_v21 = vpop.f32.mrf.mxu0 }
 0x2b7   :  { %v12898_v37 = vadd.f32 %v6802_v21, %v12646_v59 }
 0x2b8   :  { %v6804_v23 = vpop.f32.mrf.mxu0 }
 0x2b9   :  { %v12901_v56 = vadd.f32 %v6804_v23, %v12662_v0  ;;  %v12915_v10 = vpop.f32.mrf.mxu1 }
 0x2ba   :  { %v6806_v40 = vpop.f32.mrf.mxu0  ;;  %v6914_v47 = vadd.f32 %v12915_v10, %v12895_v41 }
 0x2bb   :  { %v12904_v2 = vadd.f32 %v6806_v40, %v12674_v49  ;;  %v12920_v36 = vpop.f32.mrf.mxu1 }
 0x2bd   :  { %v12928_v38 = vpop.f32.mrf.mxu1 }
 0x2bf   :  { %v6810_v54 = vpop.f32.mrf.mxu0  ;;  %v12936_v48 = vpop.f32.mrf.mxu1 }
 0x2c0   :  { %v12907_v6 = vadd.f32 %v6810_v54, %v12734_v33  ;;  %v6920_v46 = vadd.f32 %v12936_v48, %v12904_v2 }
 0x2c1   :  { %v6812_v28 = vpop.f32.mrf.mxu0 }
 0x2c2   :  { %v12910_v42 = vadd.f32 %v6812_v28, %v12752_v9 }
 0x2c3   :  { %v6814_v17 = vpop.f32.mrf.mxu0  ;;  %v12941_v7 = vpop.f32.mrf.mxu1 }
 0x2c4   :  { %v12913_v59 = vadd.f32 %v6814_v17, %v12770_v16 }
 0x2c5   :  { %v6816_v39 = vpop.f32.mrf.mxu0  ;;  %v12949_v19 = vpop.f32.mrf.mxu1 }
 0x2c6   :  { %v12918_v0 = vadd.f32 %v6816_v39, %v12780_v29 }
 0x2c7   :  { %v12954_v35 = vpop.f32.mrf.mxu1 }
 0x2c8   :  { %v6928_v2 = vadd.f32 %v12954_v35, %v12913_v59 }
 0x2c9   :  { %v12962_v32 = vpop.f32.mrf.mxu1 }
 0x2ca   :  { %v6820_v49 = vpop.f32.mrf.mxu0  ;;  %v6930_v10 = vadd.f32 %v12962_v32, %v12918_v0 }
 0x2cb   :  { %v12923_v33 = vadd.f32 %v6820_v49, %v12817_v12 }
 0x2cc   :  { %v6822_v61 = vpop.f32.mrf.mxu0 }
 0x2cd   :  { %v12926_v9 = vadd.f32 %v6822_v61, %v12821_v27 }
 0x2ce   :  { %v6824_v57 = vpop.f32.mrf.mxu0  ;;  %v12970_v23 = vpop.f32.mrf.mxu1 }
 0x2cf   :  { %v12931_v16 = vadd.f32 %v6824_v57, %v12823_v51 }
 0x2d0   :  { %v6826_v62 = vpop.f32.mrf.mxu0  ;;  %v12975_v28 = vpop.f32.mrf.mxu1 }
 0x2d1   :  { %v12934_v29 = vadd.f32 %v6826_v62, %v12825_v43 }
 0x2d2   :  { %v12983_v49 = vpop.f32.mrf.mxu1 }
 0x2d3   :  { %v6938_v35 = vadd.f32 %v12983_v49, %v12931_v16 }
 0x2d4   :  { %v12988_v57 = vpop.f32.mrf.mxu1 }
 0x2d5   :  { %v6830_v55 = vpop.f32.mrf.mxu0 }
 0x2d6   :  { %v12939_v12 = vadd.f32 %v6830_v55, %v12833_v11 }
 0x2d7   :  { %v6832_v30 = vpop.f32.mrf.mxu0 }
 0x2d8   :  { %v12944_v27 = vadd.f32 %v6832_v30, %v12836_v44 }
 0x2d9   :  { %v6834_v8 = vpop.f32.mrf.mxu0  ;;  %v12996_v30 = vpop.f32.mrf.mxu1 }
 0x2da   :  { %v12947_v51 = vadd.f32 %v6834_v8, %v12838_v14 }
 0x2db   :  { %v6836_v18 = vpop.f32.mrf.mxu0 }
 0x2dc   :  { %v12952_v43 = vadd.f32 %v6836_v18, %v12840_v4  ;;  %v13004_v18 = vpop.f32.mrf.mxu1 }
 0x2dd   :  { %v6946_v16 = vadd.f32 %v13004_v18, %v12944_v27 }
 0x2e0   :  { %v6840_v34 = vpop.f32.mrf.mxu0 }
 0x2e1   :  { %v12957_v11 = vadd.f32 %v6840_v34, %v12844_v13 }
 0x2e2   :  { %v6842_v58 = vpop.f32.mrf.mxu0 }
 0x2e3   :  { %v12960_v44 = vadd.f32 %v6842_v58, %v12847_v5  ;;  %v13008_v58 = vpop.f32.mrf.mxu1 }
 0x2e4   :  { %v6844_v22 = vpop.f32.mrf.mxu0 }
 0x2e5   :  { %v12965_v14 = vadd.f32 %v6844_v22, %v12850_v25 }
 0x2e6   :  { %v6846_v21 = vpop.f32.mrf.mxu0 }
 0x2e7   :  { %v12968_v4 = vadd.f32 %v6846_v21, %v12852_v3 }
 0x2eb   :  { %v6850_v40 = vpop.f32.mrf.mxu0 }
 0x2ec   :  { %v12973_v13 = vadd.f32 %v6850_v40, %v12856_v1  ;;  %v13015_v40 = vpop.f32.mrf.mxu1 }
 0x2ed   :  { %v6852_v54 = vpop.f32.mrf.mxu0 }
 0x2ee   :  { %13813 = vst [vmem:[#allocation5_spill] sm:$0xff] %v12973_v13  ;;  %v12978_v5 = vadd.f32 %v6852_v54, %v12859_v26 }
 0x2ef   :  { %v6854_v17 = vpop.f32.mrf.mxu0 }
 0x2f0   :  { %13814 = vst [vmem:[#allocation6_spill] sm:$0xff] %v12978_v5  ;;  %v12981_v25 = vadd.f32 %v6854_v17, %v12862_v31 }
 0x2f1   :  { %v6856_v39 = vpop.f32.mrf.mxu0 }
 0x2f2   :  { %13815 = vst [vmem:[#allocation7_spill] sm:$0xff] %v12981_v25  ;;  %v12986_v3 = vadd.f32 %v6856_v39, %v12864_v20  ;;  %v6918_v25 = vadd.f32 %v12928_v38, %v12901_v56 }
 0x2f4   :  { %13816 = vst [vmem:[#allocation8_spill] sm:$0xff] %v12986_v3 }
 0x2f6   :  { %v6860_v61 = vpop.f32.mrf.mxu0 }
 0x2f7   :  { %v12991_v1 = vadd.f32 %v6860_v61, %v12868_v52 }
 0x2f8   :  { %v6862_v62 = vpop.f32.mrf.mxu0 }
 0x2f9   :  { %13817 = vst [vmem:[#allocation11_spill] sm:$0xff] %v12991_v1  ;;  %v12994_v26 = vadd.f32 %v6862_v62, %v12871_v50 }
 0x2fa   :  { %v6864_v55 = vpop.f32.mrf.mxu0 }
 0x2fb   :  { %13818 = vst [vmem:[#allocation12_spill] sm:$0xff] %v12994_v26  ;;  %v12999_v31 = vadd.f32 %v6864_v55, %v12874_v53 }
 0x2fc   :  { %v6866_v8 = vpop.f32.mrf.mxu0 }
 0x2fd   :  { %13819 = vst [vmem:[#allocation13_spill] sm:$0xff] %v12999_v31  ;;  %v13002_v20 = vadd.f32 %v6866_v8, %v12876_v63  ;;  %v13020_v63 = vpop.f32.mrf.mxu1 }
 0x2ff   :  { %13820 = vst [vmem:[#allocation14_spill] sm:$0xff] %v13002_v20  ;;  %v13022_v17 = vpop.f32.mrf.mxu1 }
 0x300   :  { %v13006_v34 = vpop.f32.mrf.mxu0 }
 0x301   :  { %13821 = vst [vmem:[#allocation15_spill] sm:$0xff] %v13006_v34  ;;  %v13024_v62 = vpop.f32.mrf.mxu1 }
 0x302   :  { %v6872_v52 = vpop.f32.mrf.mxu0 }
 0x303   :  { %v13011_v50 = vadd.f32 %v6872_v52, %v12887_v15  ;;  %v13026_v8 = vpop.f32.mrf.mxu1 }
 0x304   :  { %v13013_v22 = vpop.f32.mrf.mxu0 }
 0x305   :  { %13822 = vst [vmem:[#allocation16_spill] sm:$0xff] %v13011_v50  ;;  %13823 = vst [vmem:[#allocation17_spill] sm:$0xff] %v13013_v22  ;;  %v13028_v22 = vpop.f32.mrf.mxu1 }
 0x306   :  { %v6876_v21 = vpop.f32.mrf.mxu0  ;;  %13825 = vst [vmem:[#allocation19_spill] sm:$0xff] %v13028_v22  ;;  %v6926_v22 = vadd.f32 %v12949_v19, %v12910_v42  ;;  %v6936_v42 = vadd.f32 %v12975_v28, %v12926_v9 }
 0x307   :  { %v13018_v53 = vadd.f32 %v6876_v21, %v12892_v45  ;;  %v13030_v21 = vpop.f32.mrf.mxu1 }
 0x308   :  { %13826 = vst [vmem:[#allocation20_spill] sm:$0xff] %v13030_v21  ;;  %v6916_v21 = vadd.f32 %v12920_v36, %v12898_v37 }
 0x309   :  { %13824 = vst [vmem:[#allocation18_spill] sm:$0xff] %v13018_v53  ;;  %v13032_v24 = vpop.f32.mrf.mxu1 }
 0x30a   :  { %13827 = vst [vmem:[#allocation21_spill] sm:$0xff] %v13032_v24 }
 0x30b   :  { %v13034_v26 = vpop.f32.mrf.mxu1 }
 0x30c   :  { %13828 = vst [vmem:[#allocation22_spill] sm:$0xff] %v13034_v26  ;;  %v6924_v26 = vadd.f32 %v12941_v7, %v12907_v6 }
 0x30d   :  { %v13044_v5 = vpop.f32.mrf.mxu1 }
 0x30f   :  { %v7026_v54 = vpop.f32.mrf.mxu0  ;;  %v13070_v59 = vpop.f32.mrf.mxu1 }
 0x310   :  { %v13060_v36 = vadd.f32 %v7026_v54, %v6914_v47 }
 0x311   :  { %v7028_v39 = vpop.f32.mrf.mxu0 }
 0x312   :  { %v13056_v41 = vadd.f32 %v7028_v39, %v6916_v21 }
 0x313   :  { %v7030_v61 = vpop.f32.mrf.mxu0 }
 0x314   :  { %v13050_v13 = vadd.f32 %v7030_v61, %v6918_v25  ;;  %v7127_v9 = vsel %vm7126_vm12, %v13056_v41, 0.0 }
 0x315   :  { %v7032_v55 = vpop.f32.mrf.mxu0 }
 0x316   :  { %v13052_v56 = vadd.f32 %v7032_v55, %v6920_v46  ;;  %v6934_v46 = vadd.f32 %v12970_v23, %v12923_v33  ;;  %v7105_v7 = vadd.f32 %v13050_v13, %v13060_v36  ;;  %v6940_v33 = vadd.f32 %v12988_v57, %v12934_v29  ;;  %v6977_v29 = vpop.f32.mrf.mxu1 }
 0x317   :  { %v7036_v15 = vpop.f32.mrf.mxu0 }
 0x318   :  { %v13062_v6 = vadd.f32 %v7036_v15, %v6924_v26  ;;  %v7128_v47 = vsel %vm7126_vm12, %v13052_v56, 0.0 }
 0x319   :  { %v7038_v52 = vpop.f32.mrf.mxu0  ;;  %v7129_v49 = vadd.f32 %v7128_v47, %v7127_v9  ;;  %v13834_v9 = vld [vmem:[#allocation4_spill] sm:$0xff] }
 0x31a   :  { %v13064_v38 = vadd.f32 %v7038_v52, %v6926_v22  ;;  %v7106_v23 = vadd.f32 %v7105_v7, %v13062_v6  ;;  %v13832_v7 = vld [vmem:[#allocation20_spill] sm:$0xff] }
 0x31b   :  { %v7040_v50 = vpop.f32.mrf.mxu0 }
 0x31c   :  { %v13076_v0 = vadd.f32 %v7040_v50, %v6928_v2  ;;  %v7130_v28 = vsel %vm7126_vm12, %v13064_v38, 0.0 }
 0x31d   :  { %v7042_v20 = vpop.f32.mrf.mxu0 }
 0x31e   :  { %v13078_v19 = vadd.f32 %v7042_v20, %v6930_v10  ;;  %v6944_v20 = vadd.f32 %v12996_v30, %v12939_v12  ;;  %v7107_v50 = vadd.f32 %v7106_v23, %v13076_v0  ;;  %v6950_v12 = vadd.f32 %v13015_v40, %v12952_v43 }
 0x31f   :  { %v7046_v45 = vpop.f32.mrf.mxu0  ;;  %v7131_v30 = vadd.f32 %v7130_v28, %v7129_v49  ;;  %v13835_v28 = vld [vmem:[#allocation7_spill] sm:$0xff]  ;;  %v13837_v49 = vld [vmem:[#allocation8_spill] sm:$0xff] }
 0x320   :  { %v13089_v25 = vadd.f32 %v7046_v45, %v6934_v46  ;;  %v7132_v22 = vsel %vm7126_vm12, %v13078_v19, 0.0 }
 0x321   :  { %v7048_v53 = vpop.f32.mrf.mxu0 }
 0x322   :  { %v13091_v26 = vadd.f32 %v7048_v53, %v6936_v42  ;;  %v6948_v53 = vadd.f32 %v13008_v58, %v12947_v51  ;;  %v7108_v18 = vadd.f32 %v7107_v50, %v13089_v25  ;;  %v6956_v51 = vadd.f32 %v13022_v17, %v12960_v44  ;;  %v13831_v42 = vld [vmem:[#allocation6_spill] sm:$0xff] }
 0x323   :  { %v7050_v31 = vpop.f32.mrf.mxu0  ;;  %v7133_v58 = vadd.f32 %v7132_v22, %v7131_v30  ;;  %v13838_v50 = vld [vmem:[#allocation22_spill] sm:$0xff] }
 0x324   :  { %v13100_v54 = vadd.f32 %v7050_v31, %v6938_v35  ;;  %v7134_v61 = vsel %vm7126_vm12, %v13091_v26, 0.0  ;;  %v6979_v31 = vpop.f32.mrf.mxu1  ;;  %v6970_v22 = vadd.f32 %v13838_v50, %v13837_v49 }
 0x325   :  { %v7052_v60 = vpop.f32.mrf.mxu0 }
 0x326   :  { %v13102_v39 = vadd.f32 %v7052_v60, %v6940_v33  ;;  %v6954_v60 = vadd.f32 %v13020_v63, %v12957_v11  ;;  %v7109_v40 = vadd.f32 %v7108_v18, %v13100_v54  ;;  %v6960_v11 = vadd.f32 %v13026_v8, %v12968_v4 }
 0x327   :  { %v7056_v34 = vpop.f32.mrf.mxu0  ;;  %v7135_v63 = vadd.f32 %v7134_v61, %v7133_v58  ;;  %v13839_v61 = vld [vmem:[#allocation11_spill] sm:$0xff] }
 0x328   :  { %v13111_v55 = vadd.f32 %v7056_v34, %v6944_v20  ;;  %v7136_v52 = vsel %vm7126_vm12, %v13102_v39, 0.0  ;;  %v13836_v20 = vld [vmem:[#allocation21_spill] sm:$0xff] }
 0x329   :  { %v7058_v1 = vpop.f32.mrf.mxu0  ;;  %v7137_v47 = vadd.f32 %v7136_v52, %v7135_v63 }
 0x32a   :  { %v13113_v15 = vadd.f32 %v7058_v1, %v6946_v16  ;;  %v6958_v1 = vadd.f32 %v13024_v62, %v12965_v14  ;;  %v7110_v17 = vadd.f32 %v7109_v40, %v13111_v55  ;;  %v6966_v14 = vadd.f32 %v13832_v7, %v13831_v42  ;;  %v6983_v62 = vpop.f32.mrf.mxu1  ;;  %v13841_v40 = vld [vmem:[#allocation15_spill] sm:$0xff] }
 0x32b   :  { %v7060_v3 = vpop.f32.mrf.mxu0  ;;  %v6968_v16 = vadd.f32 %v13836_v20, %v13835_v28 }
 0x32c   :  { %v13122_v45 = vadd.f32 %v7060_v3, %v6948_v53  ;;  %v7138_v21 = vsel %vm7126_vm12, %v13113_v15, 0.0  ;;  %v13829_v3 = vld [vmem:[#allocation5_spill] sm:$0xff] }
 0x32d   :  { %v7062_v24 = vpop.f32.mrf.mxu0  ;;  %v7139_v53 = vadd.f32 %v7138_v21, %v7137_v47 }
 0x32e   :  { %v13124_v34 = vadd.f32 %v7062_v24, %v6950_v12  ;;  %v13830_v24 = vld [vmem:[#allocation19_spill] sm:$0xff]  ;;  %v7111_v8 = vadd.f32 %v7110_v17, %v13122_v45 }
 0x32f   :  { %v7066_v37 = vpop.f32.mrf.mxu0  ;;  %v6964_v46 = vadd.f32 %v13830_v24, %v13829_v3  ;;  %v13842_v3 = vld [vmem:[#allocation10_spill] sm:$0xff]  ;;  %v13843_v24 = vld [vmem:[#allocation9_spill] sm:$0xff] }
 0x330   :  { %v13133_v2 = vadd.f32 %v7066_v37, %v6954_v60  ;;  %v7140_v35 = vsel %vm7126_vm12, %v13124_v34, 0.0  ;;  %v6974_v60 = vadd.f32 %v13044_v5, %v13839_v61  ;;  %v6762_v5 = vadd.f32 %v13843_v24, %v13842_v3 }
 0x331   :  { %v7068_v48 = vpop.f32.mrf.mxu0 }
 0x332   :  { %v13135_v10 = vadd.f32 %v7068_v48, %v6956_v51  ;;  %v13833_v48 = vld [vmem:[#allocation3_spill] sm:$0xff]  ;;  %v7112_v30 = vadd.f32 %v7111_v8, %v13133_v2  ;;  %v13840_v51 = vld [vmem:[#allocation12_spill] sm:$0xff] }
 0x333   :  { %v7070_v32 = vpop.f32.mrf.mxu0  ;;  %v6758_v23 = vadd.f32 %v13834_v9, %v13833_v48  ;;  %v6976_v58 = vadd.f32 %v13070_v59, %v13840_v51  ;;  %v13845_v59 = vld [vmem:[#allocation14_spill] sm:$0xff]  ;;  %v13846_v9 = vld [vmem:[#allocation17_spill] sm:$0xff] }
 0x334   :  { %v13144_v33 = vadd.f32 %v7070_v32, %v6958_v1  ;;  %v7142_v18 = vsel %vm7126_vm12, %v13135_v10, 0.0  ;;  %v6985_v1 = vpop.f32.mrf.mxu1  ;;  %v6980_v7 = vadd.f32 %v6979_v31, %v13845_v59 }
 0x335   :  { %v7072_v57 = vpop.f32.mrf.mxu0  ;;  %v6871_v52 = vadd.f32 %v13841_v40, %v6758_v23  ;;  %v6875_v23 = vadd.f32 %v13846_v9, %v6762_v5 }
 0x336   :  { %v13146_v37 = vadd.f32 %v7072_v57, %v6960_v11  ;;  %v7141_v11 = vadd.f32 %v7140_v35, %v7139_v53  ;;  %v7113_v17 = vadd.f32 %v7112_v30, %v13144_v33  ;;  %v6987_v28 = vpop.f32.mrf.mxu1 }
 0x337   :  { %v7076_v27 = vpop.f32.mrf.mxu0  ;;  %v6988_v40 = vadd.f32 %v6987_v28, %v6875_v23 }
 0x338   :  { %v13157_v32 = vadd.f32 %v7076_v27, %v6964_v46  ;;  %v7144_v21 = vsel %vm7126_vm12, %v13146_v37, 0.0  ;;  %v13844_v46 = vld [vmem:[#allocation13_spill] sm:$0xff] }
 0x339   :  { %v7078_v43 = vpop.f32.mrf.mxu0  ;;  %v6978_v42 = vadd.f32 %v6977_v29, %v13844_v46 }
 0x33a   :  { %v13159_v57 = vadd.f32 %v7078_v43, %v6966_v14  ;;  %v7143_v14 = vadd.f32 %v7142_v18, %v7141_v11  ;;  %v7114_v8 = vadd.f32 %v7113_v17, %v13157_v32 }
 0x33b   :  { %v7080_v44 = vpop.f32.mrf.mxu0 }
 0x33c   :  { %v13169_v27 = vadd.f32 %v7080_v44, %v6968_v16  ;;  %v7146_v35 = vsel %vm7126_vm12, %v13159_v57, 0.0  ;;  %v7145_v20 = vadd.f32 %v7144_v21, %v7143_v14  ;;  %v13848_v21 = vld [vmem:[#allocation18_spill] sm:$0xff] }
 0x33d   :  { %v7082_v4 = vpop.f32.mrf.mxu0 }
 0x33e   :  { %v13171_v43 = vadd.f32 %v7082_v4, %v6970_v22  ;;  %v6984_v4 = vadd.f32 %v6983_v62, %v6871_v52  ;;  %v7115_v29 = vadd.f32 %v7114_v8, %v13169_v27  ;;  %v7147_v22 = vadd.f32 %v7146_v35, %v7145_v20 }
 0x33f   :  { %v7086_v12 = vpop.f32.mrf.mxu0 }
 0x340   :  { %v13180_v48 = vadd.f32 %v7086_v12, %v6974_v60  ;;  %v7148_v31 = vsel %vm7126_vm12, %v13171_v43, 0.0  ;;  %v13847_v12 = vld [vmem:[#allocation16_spill] sm:$0xff]  ;;  %v6989_v60 = vpop.f32.mrf.mxu1 }
 0x341   :  { %v7088_v63 = vpop.f32.mrf.mxu0  ;;  %v6986_v30 = vadd.f32 %v6985_v1, %v13847_v12  ;;  %v7149_v51 = vadd.f32 %v7148_v31, %v7147_v22  ;;  %v6990_v3 = vadd.f32 %v6989_v60, %v13848_v21 }
 0x342   :  { %v13182_v44 = vadd.f32 %v7088_v63, %v6976_v58  ;;  %v7116_v62 = vadd.f32 %v7115_v29, %v13180_v48 }
 0x343   :  { %v7090_v47 = vpop.f32.mrf.mxu0 }
 0x344   :  { %v13188_v49 = vadd.f32 %v7090_v47, %v6978_v42  ;;  %v7150_v18 = vsel %vm7126_vm12, %v13182_v44, 0.0 }
 0x345   :  { %v7092_v16 = vpop.f32.mrf.mxu0  ;;  %v7151_v17 = vadd.f32 %v7150_v18, %v7149_v51 }
 0x346   :  { %v13190_v50 = vadd.f32 %v7092_v16, %v6980_v7  ;;  %v7117_v52 = vadd.f32 %v7116_v62, %v13188_v49 }
 0x347   :  { %v7096_v53 = vpop.f32.mrf.mxu0 }
 0x348   :  { %v13196_v61 = vadd.f32 %v7096_v53, %v6984_v4  ;;  %v7152_v11 = vsel %vm7126_vm12, %v13190_v50, 0.0 }
 0x349   :  { %v7098_v58 = vpop.f32.mrf.mxu0  ;;  %v7153_v42 = vadd.f32 %v7152_v11, %v7151_v17 }
 0x34a   :  { %v13201_v63 = vadd.f32 %v7098_v58, %v6986_v30  ;;  %v7118_v24 = vadd.f32 %v7117_v52, %v13196_v61 }
 0x34b   :  { %v7100_v1 = vpop.f32.mrf.mxu0 }
 0x34c   :  { %v7154_v5 = vsel %vm7126_vm12, %v13201_v63, 0.0  ;;  %v13207_v46 = vadd.f32 %v7100_v1, %v6988_v40 }
 0x34d   :  { %v7102_v59 = vpop.f32.mrf.mxu0  ;;  %v7155_v47 = vadd.f32 %v7154_v5, %v7153_v42 }
 0x34e   :  { %v7119_v7 = vadd.f32 %v7118_v24, %v13207_v46  ;;  %v13210_v14 = vadd.f32 %v7102_v59, %v6990_v3 }
 0x350   :  { %v7120_v8 = vrot.slane %v7119_v7, 4  ;;  %v7156_v35 = vsel %vm7126_vm12, %v13210_v14, 0.0 }
 0x351   :  { %v7157_v4 = vadd.f32 %v7156_v35, %v7155_v47  ;;  %v7235_v47 = vlaneseq }
 0x352   :  { %v7121_v9 = vadd.f32 %v7120_v8, %v7119_v7 }
 0x353   :  { %v7158_v23 = vrot.slane %v7157_v4, 4 }
 0x354   :  { %v7122_v28 = vrot.slane %v7121_v9, 2 }
 0x355   :  { %v7159_v20 = vadd.f32 %v7158_v23, %v7157_v4 }
 0x356   :  { %v7123_v16 = vadd.f32 %v7122_v28, %v7121_v9  ;;  %v7236_v9 = vshrl.u32 %v7235_v47, 7 }
 0x357   :  { %v7160_v29 = vrot.slane %v7159_v20, 2 }
 0x358   :  { %v7124_v31 = vrot.slane %v7123_v16, 1 }
 0x359   :  { %v7161_v53 = vadd.f32 %v7160_v29, %v7159_v20  ;;  %v13233_v29 = vsub.s32 0, %v7236_v9 }
 0x35a   :  { %v7125_v22 = vadd.f32 %v7124_v31, %v7123_v16 }
 0x35b   :  { %v7162_v12 = vrot.slane %v7161_v53, 1 }
 0x35c   :  { %7173 = vrot.lane.b32.xlu1 %v7125_v22, %s9596_s0  ;;  %7165 = vrot.lane.b32.xlu0 %v7125_v22, %s9597_s16 }
 0x35d   :  { %v7163_v30 = vadd.f32 %v7162_v12, %v7161_v53 }
 0x360   :  { %7177 = vrot.lane.b32.xlu1 %v7125_v22, %s9598_s17  ;;  %7169 = vrot.lane.b32.xlu0 %v7125_v22, %s9599_s18 }
 0x364   :  { %7182 = vrot.lane.b32.xlu0 %v7125_v22, %s9600_s19  ;;  %7184 = vrot.lane.b32.xlu1 %v7163_v30, %s9600_s19 }
 0x368   :  { %7190 = vrot.lane.b32.xlu0 %v7163_v30, %s9601_s20  ;;  %7194 = vrot.lane.b32.xlu1 %v7163_v30, %s9602_s1 }
 0x3ce   :  { %v7174_v62 = vpop.permute.xlu1 %7173  ;;  %v7166_v18 = vpop.permute.xlu0 %7165 }
 0x3cf   :  { %v7168_v60 = vadd.f32 %v7166_v18, %v7125_v22 }
 0x3d2   :  { %v7178_v51 = vpop.permute.xlu1 %7177  ;;  %v7170_v58 = vpop.permute.xlu0 %7169 }
 0x3d3   :  { %v7172_v40 = vadd.f32 %v7170_v58, %v7168_v60 }
 0x3d5   :  { %v7176_v52 = vadd.f32 %v7174_v62, %v7172_v40 }
 0x3d6   :  { %v7183_v11 = vpop.permute.xlu0 %7182  ;;  %v7185_v17 = vpop.permute.xlu1 %7184 }
 0x3d7   :  { %v7187_v1 = vsel %vm7186_vm13, %v7183_v11, %v7185_v17  ;;  %v7180_v21 = vadd.f32 %v7178_v51, %v7176_v52 }
 0x3d9   :  { %v7189_v3 = vadd.f32 %v7187_v1, %v7180_v21 }
 0x3da   :  { %v7191_v24 = vpop.permute.xlu0 %7190  ;;  %v7195_v42 = vpop.permute.xlu1 %7194 }
 0x3db   :  { %v7193_v5 = vadd.f32 %v7191_v24, %v7189_v3 }
 0x3dd   :  { %v7197_v59 = vadd.f32 %v7195_v42, %v7193_v5 }
 0x3df   :  { %v7198_v7 = vmul.f32 0.0009765625, %v7197_v59 }
 0x3e1   :  { %7203 = vrot.lane.b32.xlu1 %v7198_v7, %s9603_s21  ;;  %7200 = vrot.lane.b32.xlu0 %v7198_v7, %s9604_s22 }
 0x3e5   :  { %7209 = vrot.lane.b32.xlu1 %v7198_v7, %s9605_s23  ;;  %7206 = vrot.lane.b32.xlu0 %v7198_v7, %s9606_s24 }
 0x3e9   :  { %7215 = vrot.lane.b32.xlu1 %v7198_v7, %s9607_s25  ;;  %7212 = vrot.lane.b32.xlu0 %v7198_v7, %s9608_s26 }
 0x3ed   :  { %7218 = vrot.lane.b32.xlu0 %v7198_v7, %s9609_s27 }
 0x453   :  { %v7204_v8 = vpop.permute.xlu1 %7203  ;;  %v7201_v35 = vpop.permute.xlu0 %7200 }
 0x454   :  { %v7222_v4 = vsel %vm7221_vm14, %v7198_v7, %v7201_v35 }
 0x455   :  { %v7224_v28 = vsel %vm7223_vm15, %v7222_v4, %v7204_v8 }
 0x457   :  { %v7210_v23 = vpop.permute.xlu1 %7209  ;;  %v7207_v20 = vpop.permute.xlu0 %7206 }
 0x458   :  { %v7226_v16 = vsel %vm7225_vm0, %v7224_v28, %v7207_v20 }
 0x459   :  { %v7228_v31 = vsel %vm7227_vm1, %v7226_v16, %v7210_v23 }
 0x45b   :  { %v7213_v22 = vpop.permute.xlu0 %7212  ;;  %v7216_v12 = vpop.permute.xlu1 %7215 }
 0x45c   :  { %v7230_v53 = vsel %vm7229_vm2, %v7228_v31, %v7213_v22  ;;  %v7232_v51 = vsel %vm7231_vm3, %v7213_v22, %v7216_v12 }
 0x45d   :  { %v13238_v30 = vrot.slane %v7230_v53, %v13233_v29 }
 0x45f   :  { %v7219_v62 = vpop.permute.xlu0 %7218  ;;  %v13242_v18 = vsub.f32 %v13060_v36, %v13238_v30  ;;  %v13246_v60 = vsub.f32 %v13050_v13, %v13238_v30  ;;  %v13252_v40 = vsub.f32 %v13062_v6, %v13238_v30  ;;  %v13263_v13 = vsub.f32 %v13076_v0, %v13238_v30 }
 0x460   :  { %v7234_v58 = vsel %vm7233_vm4, %v7232_v51, %v7219_v62  ;;  %v13267_v17 = vsub.f32 %v13089_v25, %v13238_v30  ;;  %v13277_v3 = vsub.f32 %v13100_v54, %v13238_v30  ;;  %v13287_v5 = vsub.f32 %v13111_v55, %v13238_v30 }
 0x461   :  { %v7275_v52 = vmul.f32 %v13242_v18, %v13242_v18  ;;  %v7277_v11 = vmul.f32 %v13246_v60, %v13246_v60  ;;  %v13259_v36 = vrot.slane %v7234_v58, %v13233_v29  ;;  %v7279_v6 = vmul.f32 %v13252_v40, %v13252_v40 }
 0x462   :  { %v7281_v0 = vmul.f32 %v13263_v13, %v13263_v13  ;;  %v13297_v59 = vsub.f32 %v13122_v45, %v13238_v30  ;;  %v7285_v7 = vmul.f32 %v13277_v3, %v13277_v3  ;;  %v7287_v45 = vmul.f32 %v13287_v5, %v13287_v5 }
 0x463   :  { %v7307_v1 = vadd.f32 %v7277_v11, %v7275_v52  ;;  %v13273_v21 = vsub.f32 %v13056_v41, %v13259_v36  ;;  %v13283_v25 = vsub.f32 %v13052_v56, %v13259_v36  ;;  %v7283_v41 = vmul.f32 %v13267_v17, %v13267_v17 }
 0x464   :  { %v13293_v54 = vsub.f32 %v13064_v38, %v13259_v36  ;;  %v13305_v47 = vsub.f32 %v13078_v19, %v13259_v36  ;;  %v13311_v38 = vsub.f32 %v13133_v2, %v13238_v30  ;;  %v13317_v4 = vsub.f32 %v13091_v26, %v13259_v36 }
 0x465   :  { %v7308_v24 = vadd.f32 %v7307_v1, %v7279_v6  ;;  %v7276_v56 = vmul.f32 %v13273_v21, %v13273_v21  ;;  %v7278_v8 = vmul.f32 %v13283_v25, %v13283_v25  ;;  %v13323_v19 = vsub.f32 %v13144_v33, %v13238_v30 }
 0x466   :  { %v7280_v9 = vmul.f32 %v13293_v54, %v13293_v54  ;;  %v7289_v23 = vmul.f32 %v13297_v59, %v13297_v59  ;;  %v13330_v20 = vsub.f32 %v13102_v39, %v13259_v36  ;;  %v7282_v26 = vmul.f32 %v13305_v47, %v13305_v47 }
 0x467   :  { %v7309_v42 = vadd.f32 %v7308_v24, %v7281_v0  ;;  %v7328_v2 = vsel %vm7126_vm12, %v7276_v56, 0.0  ;;  %v7329_v16 = vsel %vm7126_vm12, %v7278_v8, 0.0  ;;  %v13337_v31 = vsub.f32 %v13157_v32, %v13238_v30 }
 0x468   :  { %v7291_v33 = vmul.f32 %v13311_v38, %v13311_v38  ;;  %v7330_v22 = vadd.f32 %v7329_v16, %v7328_v2  ;;  %v13343_v12 = vsub.f32 %v13113_v15, %v13259_v36  ;;  %v7284_v39 = vmul.f32 %v13317_v4, %v13317_v4 }
 0x469   :  { %v7310_v55 = vadd.f32 %v7309_v42, %v7283_v41  ;;  %v7331_v62 = vsel %vm7126_vm12, %v7280_v9, 0.0  ;;  %v13350_v51 = vsub.f32 %v13169_v27, %v13238_v30  ;;  %v7293_v32 = vmul.f32 %v13323_v19, %v13323_v19 }
 0x46a   :  { %v7332_v58 = vadd.f32 %v7331_v62, %v7330_v22  ;;  %v13356_v11 = vsub.f32 %v13124_v34, %v13259_v36  ;;  %v7286_v15 = vmul.f32 %v13330_v20, %v13330_v20  ;;  %v7333_v6 = vsel %vm7126_vm12, %v7282_v26, 0.0 }
 0x46b   :  { %v7311_v35 = vadd.f32 %v7310_v55, %v7285_v7  ;;  %v13363_v1 = vsub.f32 %v13180_v48, %v13238_v30  ;;  %v7295_v27 = vmul.f32 %v13337_v31, %v13337_v31  ;;  %v13369_v41 = vsub.f32 %v13135_v10, %v13259_v36 }
 0x46c   :  { %v7334_v0 = vadd.f32 %v7333_v6, %v7332_v58  ;;  %v7288_v34 = vmul.f32 %v13343_v12, %v13343_v12  ;;  %v7335_v42 = vsel %vm7126_vm12, %v7284_v39, 0.0  ;;  %v13376_v56 = vsub.f32 %v13188_v49, %v13238_v30 }
 0x46d   :  { %v7312_v28 = vadd.f32 %v7311_v35, %v7287_v45  ;;  %v7297_v48 = vmul.f32 %v13350_v51, %v13350_v51  ;;  %v13382_v8 = vsub.f32 %v13146_v37, %v13259_v36  ;;  %v7290_v10 = vmul.f32 %v13356_v11, %v13356_v11 }
 0x46e   :  { %v7336_v7 = vadd.f32 %v7335_v42, %v7334_v0  ;;  %v7337_v45 = vsel %vm7126_vm12, %v7286_v15, 0.0  ;;  %v13389_v35 = vsub.f32 %v13196_v61, %v13238_v30  ;;  %v7299_v49 = vmul.f32 %v13363_v1, %v13363_v1 }
 0x46f   :  { %v7313_v53 = vadd.f32 %v7312_v28, %v7289_v23  ;;  %v13395_v2 = vsub.f32 %v13159_v57, %v13259_v36  ;;  %v7292_v37 = vmul.f32 %v13369_v41, %v13369_v41  ;;  %v7339_v28 = vsel %vm7126_vm12, %v7288_v34, 0.0 }
 0x470   :  { %v7338_v9 = vadd.f32 %v7337_v45, %v7336_v7  ;;  %v13402_v26 = vsub.f32 %v13207_v46, %v13238_v30  ;;  %v7301_v61 = vmul.f32 %v13376_v56, %v13376_v56  ;;  %v13408_v22 = vsub.f32 %v13171_v43, %v13259_v36 }
 0x471   :  { %v7314_v52 = vadd.f32 %v7313_v53, %v7291_v33  ;;  %v7294_v57 = vmul.f32 %v13382_v8, %v13382_v8  ;;  %v7341_v53 = vsel %vm7126_vm12, %v7290_v10, 0.0  ;;  %v7303_v39 = vmul.f32 %v13389_v35, %v13389_v35 }
 0x472   :  { %v7340_v16 = vadd.f32 %v7339_v28, %v7338_v9  ;;  %v13417_v30 = vsub.f32 %v13182_v44, %v13259_v36  ;;  %v7343_v43 = vsel %vm7126_vm12, %v7292_v37, 0.0  ;;  %v7305_v58 = vmul.f32 %v13402_v26, %v13402_v26 }
 0x473   :  { %v7315_v24 = vadd.f32 %v7314_v52, %v7293_v32  ;;  %v7296_v32 = vmul.f32 %v13395_v2, %v13395_v2  ;;  %v13426_v6 = vsub.f32 %v13190_v50, %v13259_v36  ;;  %v7345_v44 = vsel %vm7126_vm12, %v7294_v57, 0.0 }
 0x474   :  { %v7342_v62 = vadd.f32 %v7341_v53, %v7340_v16  ;;  %v13433_v34 = vsub.f32 %v13201_v63, %v13259_v36  ;;  %v7300_v42 = vmul.f32 %v13417_v30, %v13417_v30  ;;  %v13440_v50 = vsub.f32 %v13210_v14, %v13259_v36 }
 0x475   :  { %v7316_v55 = vadd.f32 %v7315_v24, %v7295_v27  ;;  %v7298_v27 = vmul.f32 %v13408_v22, %v13408_v22  ;;  %v7302_v10 = vmul.f32 %v13426_v6, %v13426_v6 }
 0x476   :  { %v7344_v52 = vadd.f32 %v7343_v43, %v7342_v62  ;;  %v7304_v63 = vmul.f32 %v13433_v34, %v13433_v34 }
 0x477   :  { %v7317_v23 = vadd.f32 %v7316_v55, %v7297_v48  ;;  %v7347_v48 = vsel %vm7126_vm12, %v7296_v32, 0.0  ;;  %v7349_v45 = vsel %vm7126_vm12, %v7298_v27, 0.0  ;;  %v7353_v14 = vsel %vm7126_vm12, %v7302_v10, 0.0  ;;  %v9586_v10 = vld [vmem:[%s13781_s4 + $0x18] sm:$0xff]  }
 0x478   :  { %v7346_v0 = vadd.f32 %v7345_v44, %v7344_v52  ;;  %v13464_v44 = vld [vmem:[%s13780_s3] sm:$0x1] }
 0x479   :  { %v7318_v33 = vadd.f32 %v7317_v23, %v7299_v49  ;;  %v7351_v23 = vsel %vm7126_vm12, %v7300_v42, 0.0  ;;  %v9582_v42 = vld [vmem:[%s13781_s4 + $0x38] sm:$0xff]  }
 0x47a   :  { %v7348_v7 = vadd.f32 %v7347_v48, %v7346_v0  ;;  %v13468_v0 = vrot.slane %v13464_v44, %v13233_v29  ;;  %v9583_v48 = vld [vmem:[%s13781_s4 + $0x30] sm:$0xff]  }
 0x47b   :  { %v7319_v46 = vadd.f32 %v7318_v33, %v7301_v61  ;;  %v7306_v61 = vmul.f32 %v13440_v50, %v13440_v50  ;;  %v7355_v33 = vsel %vm7126_vm12, %v7304_v63, 0.0 }
 0x47c   :  { %v7350_v49 = vadd.f32 %v7349_v45, %v7348_v7  ;;  %v9584_v7 = vld [vmem:[%s13781_s4 + $0x28] sm:$0xff]   ;;  %v9587_v45 = vld [vmem:[%s13781_s4 + $0x10] sm:$0xff]  }
 0x47d   :  { %v7320_v15 = vadd.f32 %v7319_v46, %v7303_v39  ;;  %v7357_v39 = vsel %vm7126_vm12, %v7306_v61, 0.0 }
 0x47e   :  { %v7352_v37 = vadd.f32 %v7351_v23, %v7350_v49  ;;  %v9588_v49 = vld [vmem:[%s13781_s4 + $0x8] sm:$0xff]  }
 0x47f   :  { %v7321_v24 = vadd.f32 %v7320_v15, %v7305_v58 }
 0x480   :  { %v7354_v36 = vadd.f32 %v7353_v14, %v7352_v37 }
 0x481   :  { %v7322_v55 = vrot.slane %v7321_v24, 4 }
 0x482   :  { %v7356_v57 = vadd.f32 %v7355_v33, %v7354_v36 }
 0x483   :  { %v7323_v9 = vadd.f32 %v7322_v55, %v7321_v24  ;;  %v9610_v24 = vmov 0   ;;  %v9585_v55 = vld [vmem:[%s13781_s4 + $0x20] sm:$0xff]  }
 0x484   :  { %v7358_v62 = vadd.f32 %v7357_v39, %v7356_v57  ;;  %7758 = vmatprep.subr.bf16.mxu1 %v9610_v24 }
 0x485   :  { %v7324_v28 = vrot.slane %v7323_v9, 2  ;;  %7759 = vmatpush1.bf16.msra.mxu1 %v9582_v42 }
 0x486   :  { %v7359_v32 = vrot.slane %v7358_v62, 4  ;;  %7760 = vmatprep.subr.bf16.mxu1 %v9610_v24 }
 0x487   :  { %v7325_v16 = vadd.f32 %v7324_v28, %v7323_v9 }
 0x488   :  { %v7360_v43 = vadd.f32 %v7359_v32, %v7358_v62 }
 0x489   :  { %v7326_v53 = vrot.slane %v7325_v16, 1  ;;  %7761 = vmatpush1.bf16.msra.mxu1 %v9583_v48 }
 0x48a   :  { %v7361_v58 = vrot.slane %v7360_v43, 2  ;;  %7762 = vmatprep.subr.bf16.mxu1 %v9610_v24 }
 0x48b   :  { %v7327_v46 = vadd.f32 %v7326_v53, %v7325_v16 }
 0x48c   :  { %v7362_v52 = vadd.f32 %v7361_v58, %v7360_v43 }
 0x48d   :  { %7370 = vrot.lane.b32.xlu0 %v7327_v46, %s9599_s18  ;;  %7366 = vrot.lane.b32.xlu1 %v7327_v46, %s9597_s16 }
 0x48e   :  { %v7363_v15 = vrot.slane %v7362_v52, 1  ;;  %7763 = vmatpush1.bf16.msra.mxu1 %v9584_v7  ;;  %v9591_v7 = vld [vmem:[%s13781_s4 + $0x50] sm:$0xff]  }
 0x48f   :  { %7764 = vmatprep.subr.bf16.mxu1 %v9610_v24 }
 0x490   :  { %v7364_v27 = vadd.f32 %v7363_v15, %v7362_v52  ;;  %v9590_v15 = vld [vmem:[%s13781_s4 + $0x58] sm:$0xff]  }
 0x491   :  { %7378 = vrot.lane.b32.xlu0 %v7327_v46, %s9598_s17  ;;  %7374 = vrot.lane.b32.xlu1 %v7327_v46, %s9596_s0 }
 0x492   :  { %7765 = vmatpush1.bf16.msra.mxu1 %v9585_v55 }
 0x493   :  { %7766 = vmatprep.subr.bf16.mxu1 %v9610_v24 }
 0x495   :  { %7383 = vrot.lane.b32.xlu1 %v7327_v46, %s9600_s19  ;;  %7385 = vrot.lane.b32.xlu0 %v7364_v27, %s9600_s19 }
 0x496   :  { %7767 = vmatpush1.bf16.msra.mxu1 %v9586_v10  ;;  %v9592_v10 = vld [vmem:[%s13781_s4 + $0x48] sm:$0xff]  }
 0x497   :  { %7768 = vmatprep.subr.bf16.mxu1 %v9610_v24 }
 0x499   :  { %7390 = vrot.lane.b32.xlu1 %v7364_v27, %s9601_s20  ;;  %7394 = vrot.lane.b32.xlu0 %v7364_v27, %s9602_s1  ;;  %v7399_v27 = vld [vmem:[%s13782_s2] sm:$0x1] }
 0x49a   :  { %7769 = vmatpush1.bf16.msra.mxu1 %v9587_v45  ;;  %v9593_v45 = vld [vmem:[%s13781_s4 + $0x40] sm:$0xff]  }
 0x49b   :  { %7770 = vmatprep.subr.bf16.mxu1 %v9610_v24 }
 0x49d   :  { %7482 = vrot.lane.b32.xlu0 %v13468_v0, %s9604_s22  ;;  %7485 = vrot.lane.b32.xlu1 %v13468_v0, %s9603_s21 }
 0x49e   :  { %7771 = vmatpush1.bf16.msra.mxu1 %v9588_v49  ;;  %v13547_v49 = vld [vmem:[%s13783_s5] sm:$0x1] }
 0x49f   :  { %7772 = vmatprep.subr.bf16.mxu1 %v9610_v24 }
 0x4a1   :  { %7488 = vrot.lane.b32.xlu0 %v13468_v0, %s9606_s24  ;;  %7494 = vrot.lane.b32.xlu1 %v13468_v0, %s9608_s26 }
 0x4a5   :  { %7497 = vrot.lane.b32.xlu0 %v13468_v0, %s9607_s25 }
 0x4ff   :  { %v7367_v9 = vpop.permute.xlu1 %7366  ;;  %v7371_v63 = vpop.permute.xlu0 %7370 }
 0x500   :  { %v7369_v23 = vadd.f32 %v7367_v9, %v7327_v46  ;;  %v9589_v46 = vld [vmem:[%s13781_s4] sm:$0xff]   ;;  %v7627_v9 = vrot.slane %v13547_v49, %v13233_v29 }
 0x501   :  { %7773 = vmatpush1.bf16.msra.mxu1 %v9589_v46 }
 0x502   :  { %v7373_v37 = vadd.f32 %v7371_v63, %v7369_v23  ;;  %7782 = vmatprep.subr.bf16.mxu1 %v9610_v24 }
 0x503   :  { %v7375_v28 = vpop.permute.xlu1 %7374  ;;  %v7379_v14 = vpop.permute.xlu0 %7378 }
 0x504   :  { %v7377_v61 = vadd.f32 %v7375_v28, %v7373_v37 }
 0x505   :  { %7783 = vmatpush2.bf16.msra.mxu1 %v9590_v15 }
 0x506   :  { %v7381_v16 = vadd.f32 %v7379_v14, %v7377_v61  ;;  %7784 = vmatprep.subr.bf16.mxu1 %v9610_v24 }
 0x507   :  { %v7384_v36 = vpop.permute.xlu1 %7383  ;;  %v7386_v33 = vpop.permute.xlu0 %7385 }
 0x508   :  { %v7387_v57 = vsel %vm7186_vm13, %v7384_v36, %v7386_v33 }
 0x509   :  { %v7389_v39 = vadd.f32 %v7387_v57, %v7381_v16  ;;  %7785 = vmatpush2.bf16.msra.mxu1 %v9591_v7 }
 0x50a   :  { %7786 = vmatprep.subr.bf16.mxu1 %v9610_v24 }
 0x50b   :  { %v7391_v53 = vpop.permute.xlu1 %7390  ;;  %v7395_v32 = vpop.permute.xlu0 %7394 }
 0x50c   :  { %v7393_v62 = vadd.f32 %v7391_v53, %v7389_v39 }
 0x50d   :  { %7787 = vmatpush2.bf16.msra.mxu1 %v9592_v10 }
 0x50e   :  { %v7397_v43 = vadd.f32 %v7395_v32, %v7393_v62  ;;  %7788 = vmatprep.subr.bf16.mxu1 %v9610_v24 }
 0x50f   :  { %v7486_v24 = vpop.permute.xlu1 %7485 }
 0x510   :  { %v7398_v58 = vmul.f32 0.0009765625, %v7397_v43 }
 0x511   :  { %7789 = vmatpush2.bf16.msra.mxu1 %v9593_v45 }
 0x512   :  { %v7400_v52 = vadd.f32 1e-05, %v7398_v58 }
 0x513   :  { %v7495_v23 = vpop.permute.xlu1 %7494 }
 0x514   :  { %9594 = vrsqrt.f32 %v7400_v52 }
 0x521   :  { %v9595_v42 = vpop.eup %9594 }
 0x522   :  { %v7402_v48 = vmul.f32 %v9595_v42, %v7399_v27 }
 0x524   :  { %v7407_v55 = vrot.slane %v7402_v48, %v13233_v29 }
 0x526   :  { %7411 = vrot.lane.b32.xlu0 %v7407_v55, %s9603_s21  ;;  %7408 = vrot.lane.b32.xlu1 %v7407_v55, %s9604_s22 }
 0x52a   :  { %7420 = vrot.lane.b32.xlu0 %v7407_v55, %s9608_s26  ;;  %7414 = vrot.lane.b32.xlu1 %v7407_v55, %s9606_s24 }
 0x52e   :  { %7426 = vrot.lane.b32.xlu0 %v7407_v55, %s9609_s27  ;;  %7423 = vrot.lane.b32.xlu1 %v7407_v55, %s9607_s25 }
 0x532   :  { %7500 = vrot.lane.b32.xlu0 %v13468_v0, %s9609_s27  ;;  %7417 = vrot.lane.b32.xlu1 %v7407_v55, %s9605_s23 }
 0x536   :  { %7491 = vrot.lane.b32.xlu1 %v13468_v0, %s9605_s23  ;;  %7631 = vrot.lane.b32.xlu0 %v7627_v9, %s9607_s25  ;;  %v7483_v0 = vpop.permute.xlu0 %7482 }
 0x537   :  { %v7503_v53 = vsel %vm7221_vm14, %v13464_v44, %v7483_v0 }
 0x538   :  { %v7504_v58 = vsel %vm7223_vm15, %v7503_v53, %v7486_v24 }
 0x53a   :  { %7628 = vrot.lane.b32.xlu1 %v7627_v9, %s9600_s19  ;;  %7637 = vrot.lane.b32.xlu0 %v7627_v9, %s9598_s17  ;;  %v7489_v63 = vpop.permute.xlu0 %7488 }
 0x53b   :  { %v7505_v24 = vsel %vm7225_vm0, %v7504_v58, %v7489_v63 }
 0x53e   :  { %7634 = vrot.lane.b32.xlu1 %v7627_v9, %s9604_s22  ;;  %7643 = vrot.lane.b32.xlu0 %v7627_v9, %s9603_s21  ;;  %v7498_v37 = vpop.permute.xlu0 %7497 }
 0x53f   :  { %v7508_v52 = vsel %vm7231_vm3, %v7495_v23, %v7498_v37 }
 0x542   :  { %7640 = vrot.lane.b32.xlu1 %v7627_v9, %s9609_s27 }
 0x546   :  { %7646 = vrot.lane.b32.xlu1 %v7627_v9, %s9596_s0 }
 0x598   :  { %v7409_v28 = vpop.permute.xlu1 %7408  ;;  %v7412_v61 = vpop.permute.xlu0 %7411 }
 0x599   :  { %v7429_v16 = vsel %vm7221_vm14, %v7402_v48, %v7409_v28 }
 0x59a   :  { %v7430_v32 = vsel %vm7223_vm15, %v7429_v16, %v7412_v61 }
 0x59c   :  { %v7415_v14 = vpop.permute.xlu1 %7414  ;;  %v7421_v36 = vpop.permute.xlu0 %7420 }
 0x59d   :  { %v7431_v46 = vsel %vm7225_vm0, %v7430_v32, %v7415_v14 }
 0x5a0   :  { %v7424_v33 = vpop.permute.xlu1 %7423  ;;  %v7427_v57 = vpop.permute.xlu0 %7426 }
 0x5a1   :  { %v7434_v39 = vsel %vm7231_vm3, %v7421_v36, %v7424_v33 }
 0x5a2   :  { %v7435_v62 = vsel %vm7233_vm4, %v7434_v39, %v7427_v57 }
 0x5a3   :  { %v13565_v43 = vrot.slane %v7435_v62, %v13233_v29 }
 0x5a4   :  { %v7418_v15 = vpop.permute.xlu1 %7417  ;;  %v7501_v27 = vpop.permute.xlu0 %7500 }
 0x5a5   :  { %v7432_v42 = vsel %vm7227_vm1, %v7431_v46, %v7418_v15  ;;  %v7509_v44 = vsel %vm7233_vm4, %v7508_v52, %v7501_v27  ;;  %v7445_v48 = vmul.f32 %v13565_v43, %v13273_v21  ;;  %v7447_v7 = vmul.f32 %v13565_v43, %v13283_v25 }
 0x5a6   :  { %v7433_v55 = vsel %vm7229_vm2, %v7432_v42, %v7421_v36  ;;  %v13578_v10 = vrot.slane %v7509_v44, %v13233_v29  ;;  %v7449_v45 = vmul.f32 %v13565_v43, %v13293_v54  ;;  %v7451_v9 = vmul.f32 %v13565_v43, %v13305_v47 }
 0x5a7   :  { %v13585_v0 = vrot.slane %v7433_v55, %v13233_v29  ;;  %v7453_v32 = vmul.f32 %v13565_v43, %v13317_v4  ;;  %v7455_v58 = vmul.f32 %v13565_v43, %v13330_v20 }
 0x5a8   :  { %v7492_v21 = vpop.permute.xlu1 %7491  ;;  %v7519_v37 = vadd.f32 %v13578_v10, %v7445_v48  ;;  %v7521_v25 = vadd.f32 %v13578_v10, %v7447_v7  ;;  %v7523_v61 = vadd.f32 %v13578_v10, %v7449_v45  ;;  %v7525_v47 = vadd.f32 %v13578_v10, %v7451_v9 }
 0x5a9   :  { %v7506_v28 = vsel %vm7227_vm1, %v7505_v24, %v7492_v21  ;;  %v7444_v63 = vmul.f32 %v13585_v0, %v13242_v18  ;;  %v7446_v33 = vmul.f32 %v13585_v0, %v13246_v60  ;;  %v7448_v60 = vmul.f32 %v13585_v0, %v13252_v40 }
 0x5aa   :  { %v7507_v14 = vsel %vm7229_vm2, %v7506_v28, %v7495_v23  ;;  %v7551_v54 = vmax.f32 %v7519_v37, 0.0  ;;  %v7553_v36 = vmax.f32 %v7521_v25, 0.0  ;;  %v7555_v23 = vmax.f32 %v7523_v61, 0.0 }
 0x5ab   :  { %v13595_v16 = vrot.slane %v7507_v14, %v13233_v29  ;;  %v7557_v62 = vmax.f32 %v7525_v47, 0.0  ;;  %v7450_v46 = vmul.f32 %v13585_v0, %v13263_v13  ;;  %v7527_v48 = vadd.f32 %v13578_v10, %v7453_v32 }
 0x5ac   :  { %v7583_v57 = vpack.c.bf16 %v7553_v36, %v7551_v54  ;;  %v7529_v4 = vadd.f32 %v13578_v10, %v7455_v58  ;;  %v7457_v13 = vmul.f32 %v13565_v43, %v13343_v12  ;;  %v7459_v45 = vmul.f32 %v13565_v43, %v13356_v11 }
 0x5ad   :  { %v7518_v53 = vadd.f32 %v13595_v16, %v7444_v63  ;;  %v7520_v39 = vadd.f32 %v13595_v16, %v7446_v33  ;;  %v7522_v27 = vadd.f32 %v13595_v16, %v7448_v60  ;;  %v7524_v42 = vadd.f32 %v13595_v16, %v7450_v46 }
 0x5ae   :  { %8911 = vmatprep.mubr.msk.bf16.mxu1 %vm7126_vm12, %v7583_v57  ;;  %v7585_v44 = vpack.c.bf16 %v7557_v62, %v7555_v23  ;;  %v7559_v55 = vmax.f32 %v7527_v48, 0.0  ;;  %v7561_v40 = vmax.f32 %v7529_v4, 0.0  ;;  %v7452_v9 = vmul.f32 %v13585_v0, %v13267_v17 }
 0x5af   :  { %v7550_v52 = vmax.f32 %v7518_v53, 0.0  ;;  %v7552_v18 = vmax.f32 %v7520_v39, 0.0  ;;  %v7554_v20 = vmax.f32 %v7522_v27, 0.0  ;;  %v7556_v7 = vmax.f32 %v7524_v42, 0.0 }
 0x5b0   :  { %v7454_v24 = vmul.f32 %v13585_v0, %v13277_v3  ;;  %v7526_v37 = vadd.f32 %v13595_v16, %v7452_v9  ;;  %v7587_v28 = vpack.c.bf16 %v7561_v40, %v7559_v55  ;;  %v7531_v61 = vadd.f32 %v13578_v10, %v7457_v13 }
 0x5b1   :  { %v7582_v15 = vpack.c.bf16 %v7552_v18, %v7550_v52  ;;  %v7584_v21 = vpack.c.bf16 %v7556_v7, %v7554_v20  ;;  %v7533_v14 = vadd.f32 %v13578_v10, %v7459_v45  ;;  %v7461_v3 = vmul.f32 %v13565_v43, %v13369_v41 }
 0x5b2   :  { %v7528_v25 = vadd.f32 %v13595_v16, %v7454_v24  ;;  %v7558_v12 = vmax.f32 %v7526_v37, 0.0  ;;  %v7563_v54 = vmax.f32 %v7531_v61, 0.0  ;;  %v7463_v36 = vmul.f32 %v13565_v43, %v13382_v8 }
 0x5b3   :  { %7791 = vmatmul.mubr.bf16.vlgmr.msra.gmra.mxu1 %v7582_v15  ;;  %v7565_v17 = vmax.f32 %v7533_v14, 0.0  ;;  %v7456_v47 = vmul.f32 %v13585_v0, %v13287_v5  ;;  %v7458_v63 = vmul.f32 %v13585_v0, %v13297_v59  ;;  %v7535_v23 = vadd.f32 %v13578_v10, %v7461_v3 }
 0x5b4   :  { %8912 = vmatprep.mubr.msk.bf16.mxu1 %vm7126_vm12, %v7585_v44  ;;  %v7560_v11 = vmax.f32 %v7528_v25, 0.0  ;;  %v7537_v62 = vadd.f32 %v13578_v10, %v7463_v36  ;;  %v7465_v59 = vmul.f32 %v13565_v43, %v13395_v2  ;;  %v7467_v58 = vmul.f32 %v13565_v43, %v13408_v22 }
 0x5b5   :  { %v7530_v57 = vadd.f32 %v13595_v16, %v7456_v47  ;;  %v7532_v53 = vadd.f32 %v13595_v16, %v7458_v63  ;;  %v7589_v39 = vpack.c.bf16 %v7565_v17, %v7563_v54  ;;  %v7567_v32 = vmax.f32 %v7535_v23, 0.0  ;;  %v7632_v23 = vpop.permute.xlu0 %7631 }
 0x5b6   :  { %v7586_v33 = vpack.c.bf16 %v7560_v11, %v7558_v12  ;;  %v7569_v5 = vmax.f32 %v7537_v62, 0.0  ;;  %v7460_v52 = vmul.f32 %v13585_v0, %v13311_v38  ;;  %v7462_v18 = vmul.f32 %v13585_v0, %v13323_v19 }
 0x5b7   :  { %v7562_v41 = vmax.f32 %v7530_v57, 0.0  ;;  %v7564_v8 = vmax.f32 %v7532_v53, 0.0  ;;  %v7539_v42 = vadd.f32 %v13578_v10, %v7465_v59  ;;  %v7541_v44 = vadd.f32 %v13578_v10, %v7467_v58 }
 0x5b8   :  { %v7534_v46 = vadd.f32 %v13595_v16, %v7460_v52  ;;  %v7536_v15 = vadd.f32 %v13595_v16, %v7462_v18  ;;  %v7591_v27 = vpack.c.bf16 %v7569_v5, %v7567_v32  ;;  %v7469_v19 = vmul.f32 %v13565_v43, %v13417_v30 }
 0x5b9   :  { %v7588_v60 = vpack.c.bf16 %v7564_v8, %v7562_v41  ;;  %v7571_v48 = vmax.f32 %v7539_v42, 0.0  ;;  %v7573_v38 = vmax.f32 %v7541_v44, 0.0  ;;  %v7471_v4 = vmul.f32 %v13565_v43, %v13426_v6 }
 0x5ba   :  { %v7566_v2 = vmax.f32 %v7534_v46, 0.0  ;;  %v7568_v22 = vmax.f32 %v7536_v15, 0.0  ;;  %v7464_v20 = vmul.f32 %v13585_v0, %v13337_v31  ;;  %v7466_v7 = vmul.f32 %v13585_v0, %v13350_v51 }
 0x5bb   :  { %7799 = vmatmul.mubr.bf16.gmra.mxu1 %v7584_v21  ;;  %v7593_v45 = vpack.c.bf16 %v7573_v38, %v7571_v48  ;;  %v7543_v9 = vadd.f32 %v13578_v10, %v7469_v19  ;;  %v7545_v24 = vadd.f32 %v13578_v10, %v7471_v4  ;;  %v7473_v51 = vmul.f32 %v13565_v43, %v13433_v34 }
 0x5bc   :  { %8913 = vmatprep.mubr.msk.bf16.mxu1 %vm7126_vm12, %v7587_v28  ;;  %v7590_v55 = vpack.c.bf16 %v7568_v22, %v7566_v2  ;;  %v7538_v40 = vadd.f32 %v13595_v16, %v7464_v20  ;;  %v7540_v13 = vadd.f32 %v13595_v16, %v7466_v7  ;;  %v7475_v37 = vmul.f32 %v13565_v43, %v13440_v50 }
 0x5bd   :  { %v7575_v21 = vmax.f32 %v7543_v9, 0.0  ;;  %v7577_v31 = vmax.f32 %v7545_v24, 0.0  ;;  %v7468_v25 = vmul.f32 %v13585_v0, %v13363_v1  ;;  %v7470_v28 = vmul.f32 %v13585_v0, %v13376_v56 }
 0x5be   :  { %v7570_v30 = vmax.f32 %v7538_v40, 0.0  ;;  %v7572_v6 = vmax.f32 %v7540_v13, 0.0  ;;  %v7547_v54 = vadd.f32 %v13578_v10, %v7473_v51  ;;  %v7549_v17 = vadd.f32 %v13578_v10, %v7475_v37 }
 0x5bf   :  { %v7542_v14 = vadd.f32 %v13595_v16, %v7468_v25  ;;  %v7544_v12 = vadd.f32 %v13595_v16, %v7470_v28  ;;  %v7595_v11 = vpack.c.bf16 %v7577_v31, %v7575_v21  ;;  %v7472_v56 = vmul.f32 %v13585_v0, %v13389_v35 }
 0x5c0   :  { %v7592_v61 = vpack.c.bf16 %v7572_v6, %v7570_v30  ;;  %v7579_v43 = vmax.f32 %v7547_v54, 0.0  ;;  %v7581_v1 = vmax.f32 %v7549_v17, 0.0  ;;  %v7474_v3 = vmul.f32 %v13585_v0, %v13402_v26 }
 0x5c1   :  { %v7574_v34 = vmax.f32 %v7542_v14, 0.0  ;;  %v7576_v50 = vmax.f32 %v7544_v12, 0.0  ;;  %v7546_v47 = vadd.f32 %v13595_v16, %v7472_v56 }
 0x5c2   :  { %v7548_v63 = vadd.f32 %v13595_v16, %v7474_v3  ;;  %v7638_v16 = vpop.permute.xlu0 %7637 }
 0x5c3   :  { %7807 = vmatmul.mubr.bf16.gmra.mxu1 %v7586_v33  ;;  %v7594_v36 = vpack.c.bf16 %v7576_v50, %v7574_v34  ;;  %v7597_v33 = vpack.c.bf16 %v7581_v1, %v7579_v43  ;;  %v7578_v10 = vmax.f32 %v7546_v47, 0.0 }
 0x5c4   :  { %8914 = vmatprep.mubr.msk.bf16.mxu1 %vm7126_vm12, %v7589_v39  ;;  %v7580_v57 = vmax.f32 %v7548_v63, 0.0  ;;  %v7629_v39 = vpop.permute.xlu1 %7628 }
 0x5c5   :  { %v7649_v35 = vsel %vm7186_vm13, %v13547_v49, %v7629_v39 }
 0x5c6   :  { %v7596_v53 = vpack.c.bf16 %v7580_v57, %v7578_v10  ;;  %v7650_v26 = vsel %vm7231_vm3, %v7649_v35, %v7632_v23  ;;  %v7644_v5 = vpop.permute.xlu0 %7643 }
 0x5c8   :  { %v7635_v0 = vpop.permute.xlu1 %7634 }
 0x5c9   :  { %v7651_v62 = vsel %vm7221_vm14, %v7650_v26, %v7635_v0 }
 0x5ca   :  { %v7653_v41 = vsel %vm7652_vm5, %v7651_v62, %v7638_v16 }
 0x5cb   :  { %7815 = vmatmul.mubr.bf16.gmra.mxu1 %v7588_v60 }
 0x5cc   :  { %8915 = vmatprep.mubr.msk.bf16.mxu1 %vm7126_vm12, %v7591_v27  ;;  %v7641_v8 = vpop.permute.xlu1 %7640 }
 0x5cd   :  { %v7654_v32 = vsel %vm7233_vm4, %v7653_v41, %v7641_v8 }
 0x5ce   :  { %v7655_v59 = vsel %vm7223_vm15, %v7654_v32, %v7644_v5 }
 0x5d0   :  { %v7647_v58 = vpop.permute.xlu1 %7646 }
 0x5d1   :  { %v7657_v52 = vsel %vm7656_vm6, %v7655_v59, %v7647_v58 }
 0x5d2   :  { %v13696_v49 = vrot.slane %v7657_v52, %v13233_v29 }
 0x5d3   :  { %7823 = vmatmul.mubr.bf16.gmra.mxu1 %v7590_v55 }
 0x5d4   :  { %8916 = vmatprep.mubr.msk.bf16.mxu1 %vm7126_vm12, %v7593_v45 }
 0x5db   :  { %7831 = vmatmul.mubr.bf16.gmra.mxu1 %v7592_v61 }
 0x5dc   :  { %8917 = vmatprep.mubr.msk.bf16.mxu1 %vm7126_vm12, %v7595_v11 }
 0x5e3   :  { %7839 = vmatmul.mubr.bf16.gmra.mxu1 %v7594_v36 }
 0x5e4   :  { %8918 = vmatprep.mubr.msk.bf16.mxu1 %vm7126_vm12, %v7597_v33 }
 0x5eb   :  { %7847 = vmatmul.mubr.bf16.gmra.mxu1 %v7596_v53 }
 0x673   :  { %v7792_v18 = vpop.f32.mrf.mxu1 }
 0x674   :  { %v7793_v60 = vadd.f32 %v7792_v18, %v13696_v49 }
 0x675   :  { %v7794_v46 = vpop.f32.mrf.mxu1 }
 0x676   :  { %7855 = vst.msk [vmem:[%s13784_s6] sm:$0xff] %vm7126_vm12, %v7793_v60 }
 0x677   :  { %v7795_v15 = vpop.f32.mrf.mxu1 }
 0x678   :  { %v7796_v27 = vadd.f32 %v7795_v15, %v13696_v49 }
 0x679   :  { %v7797_v42 = vpop.f32.mrf.mxu1 }
 0x67a   :  { %7856 = vst.msk [vmem:[%s13784_s6 + $0x8] sm:$0xff] %vm7126_vm12, %v7796_v27 }
 0x67b   :  { %v7800_v29 = vpop.f32.mrf.mxu1 }
 0x67c   :  { %v7801_v44 = vadd.f32 %v7800_v29, %v13696_v49 }
 0x67d   :  { %v7802_v2 = vpop.f32.mrf.mxu1 }
 0x67e   :  { %7857 = vst.msk [vmem:[%s13784_s6 + $0x10] sm:$0xff] %vm7126_vm12, %v7801_v44 }
 0x67f   :  { %v7803_v22 = vpop.f32.mrf.mxu1 }
 0x680   :  { %v7804_v48 = vadd.f32 %v7803_v22, %v13696_v49 }
 0x681   :  { %v7805_v38 = vpop.f32.mrf.mxu1 }
 0x682   :  { %7858 = vst.msk [vmem:[%s13784_s6 + $0x18] sm:$0xff] %vm7126_vm12, %v7804_v48 }
 0x683   :  { %v7808_v19 = vpop.f32.mrf.mxu1 }
 0x684   :  { %v7809_v4 = vadd.f32 %v7808_v19, %v13696_v49 }
 0x685   :  { %v7810_v20 = vpop.f32.mrf.mxu1 }
 0x686   :  { %7859 = vst.msk [vmem:[%s13784_s6 + $0x20] sm:$0xff] %vm7126_vm12, %v7809_v4 }
 0x687   :  { %v7811_v7 = vpop.f32.mrf.mxu1 }
 0x688   :  { %v7812_v55 = vadd.f32 %v7811_v7, %v13696_v49 }
 0x689   :  { %v7813_v40 = vpop.f32.mrf.mxu1 }
 0x68a   :  { %7860 = vst.msk [vmem:[%s13784_s6 + $0x28] sm:$0xff] %vm7126_vm12, %v7812_v55 }
 0x68b   :  { %v7816_v13 = vpop.f32.mrf.mxu1 }
 0x68c   :  { %v7817_v45 = vadd.f32 %v7816_v13, %v13696_v49 }
 0x68d   :  { %v7818_v9 = vpop.f32.mrf.mxu1 }
 0x68e   :  { %7861 = vst.msk [vmem:[%s13784_s6 + $0x30] sm:$0xff] %vm7126_vm12, %v7817_v45 }
 0x68f   :  { %v7819_v24 = vpop.f32.mrf.mxu1 }
 0x690   :  { %v7820_v30 = vadd.f32 %v7819_v24, %v13696_v49 }
 0x691   :  { %v7821_v6 = vpop.f32.mrf.mxu1 }
 0x692   :  { %7862 = vst.msk [vmem:[%s13784_s6 + $0x38] sm:$0xff] %vm7126_vm12, %v7820_v30 }
 0x693   :  { %v7824_v21 = vpop.f32.mrf.mxu1 }
 0x694   :  { %v7825_v31 = vadd.f32 %v7824_v21, %v13696_v49 }
 0x695   :  { %v7826_v51 = vpop.f32.mrf.mxu1 }
 0x696   :  { %7863 = vst.msk [vmem:[%s13784_s6 + $0x40] sm:$0xff] %vm7126_vm12, %v7825_v31 }
 0x697   :  { %v7827_v37 = vpop.f32.mrf.mxu1 }
 0x698   :  { %v7828_v25 = vadd.f32 %v7827_v37, %v13696_v49 }
 0x699   :  { %v7829_v28 = vpop.f32.mrf.mxu1 }
 0x69a   :  { %7864 = vst.msk [vmem:[%s13784_s6 + $0x48] sm:$0xff] %vm7126_vm12, %v7828_v25 }
 0x69b   :  { %v7832_v61 = vpop.f32.mrf.mxu1 }
 0x69c   :  { %v7833_v14 = vadd.f32 %v7832_v61, %v13696_v49 }
 0x69d   :  { %v7834_v12 = vpop.f32.mrf.mxu1 }
 0x69e   :  { %7865 = vst.msk [vmem:[%s13784_s6 + $0x50] sm:$0xff] %vm7126_vm12, %v7833_v14 }
 0x69f   :  { %v7835_v11 = vpop.f32.mrf.mxu1 }
 0x6a0   :  { %v7836_v54 = vadd.f32 %v7835_v11, %v13696_v49 }
 0x6a1   :  { %v7837_v17 = vpop.f32.mrf.mxu1 }
 0x6a2   :  { %7866 = vst.msk [vmem:[%s13784_s6 + $0x58] sm:$0xff] %vm7126_vm12, %v7836_v54 }
 0x6a3   :  { %v7840_v34 = vpop.f32.mrf.mxu1 }
 0x6a4   :  { %v7841_v50 = vadd.f32 %v7840_v34, %v13696_v49 }
 0x6a5   :  { %v7842_v43 = vpop.f32.mrf.mxu1 }
 0x6a6   :  { %7867 = vst.msk [vmem:[%s13784_s6 + $0x60] sm:$0xff] %vm7126_vm12, %v7841_v50 }
 0x6a7   :  { %v7843_v1 = vpop.f32.mrf.mxu1 }
 0x6a8   :  { %v7844_v56 = vadd.f32 %v7843_v1, %v13696_v49 }
 0x6a9   :  { %v7845_v3 = vpop.f32.mrf.mxu1 }
 0x6aa   :  { %7868 = vst.msk [vmem:[%s13784_s6 + $0x68] sm:$0xff] %vm7126_vm12, %v7844_v56 }
 0x6ab   :  { %v7848_v36 = vpop.f32.mrf.mxu1 }
 0x6ac   :  { %v7849_v47 = vadd.f32 %v7848_v36, %v13696_v49 }
 0x6ad   :  { %v7850_v63 = vpop.f32.mrf.mxu1 }
 0x6ae   :  { %7869 = vst.msk [vmem:[%s13784_s6 + $0x70] sm:$0xff] %vm7126_vm12, %v7849_v47 }
 0x6af   :  { %v7851_v33 = vpop.f32.mrf.mxu1 }
 0x6b0   :  { %v7852_v10 = vadd.f32 %v7851_v33, %v13696_v49 }
 0x6b1   :  { %v7853_v57 = vpop.f32.mrf.mxu1 }
 0x6b2   :  { %7870 = vst.msk [vmem:[%s13784_s6 + $0x78] sm:$0xff] %vm7126_vm12, %v7852_v10 }

</bundles_post_ra>
